<compile_context>
chip_gen: v6e
topology: v6e:2x2x1
jax: 0.10.0
libtpu: 0.0.40
codegen_flags: <defaults>
</compile_context>

<pallas_src>
import numpy as np
import jax
import jax.numpy as jnp
from jax.experimental import pallas as pl
from jax.experimental.pallas import tpu as pltpu

BATCH = 2
IN_DIM, H1, H2, H3 = 128, 256, 512, 3136
C0, C1, C2 = 16, 8, 3            # channels after unflatten / conv1 / conv2
L0, L1, L2 = 196, 199, 1000      # lengths  after unflatten / conv1 / conv2
K1, K2, STRIDE2 = 4, 10, 5
PH = STRIDE2                     # 5 output phases of the stride-5 deconv
LP2 = L2 // PH                   # 200 output positions per phase
LPAD = 256                       # lane-aligned per-channel width after unflatten
H3P = C0 * LPAD                  # 4096: padded width of the third linear layer


def cnn_decoder_kernel(x_ref, w1_ref, b1_ref, w2_ref, b2_ref, w3_ref, b3_ref,
                       cw1_ref, cb1_ref, cw2_ref, cb2_ref, o_ref):
    f32 = jnp.float32
    bm = x_ref.shape[0]                                   # batch tile size

    # -------- linear decoder (whole batch tile as M): 128 -> 256 -> 512 -> 4096
    # bf16 weights streamed from HBM, f32 MXU accumulation; double ReLU == ReLU.
    h = jnp.dot(x_ref[...].astype(jnp.bfloat16), w1_ref[...],
                preferred_element_type=f32) + b1_ref[...]
    h = jnp.maximum(h, 0.0)
    h = jnp.dot(h.astype(jnp.bfloat16), w2_ref[...],
                preferred_element_type=f32) + b2_ref[...]
    h = jnp.maximum(h, 0.0)
    h = jnp.dot(h.astype(jnp.bfloat16), w3_ref[...],
                preferred_element_type=f32) + b3_ref[...]
    h = jnp.maximum(h, 0.0)            # (bm, 4096); per-channel cols >=196 are 0

    cw1 = cw1_ref[...]                 # (K1*C1, C0) = (32, 16)
    cb1 = cb1_ref[...]                 # (C1, 1)
    cw2 = cw2_ref[...]                 # (K2*C2, C1) = (30, 8)
    cb2 = cb2_ref[...]                 # (C2, 1)

    def shift_right(x, k):             # static lane shift with zero fill
        if k == 0:
            return x
        return jnp.concatenate(
            [jnp.zeros((x.shape[0], k), x.dtype), x[:, :x.shape[1] - k]], axis=1)

    for b in range(bm):                # unrolled per-sample conv stage
        # ---- Unflatten(-1,(16,-1)) -> channels-first (16, 256), lane-aligned --
        ld = jnp.concatenate(
            [h[b:b + 1, c * LPAD:(c + 1) * LPAD] for c in range(C0)], axis=0)

        # ---- ConvTranspose1d(16 -> 8, kernel=4, stride=1) + ReLU --------------
        # rows of cw1 are (tap k, out-channel co); padded cols stay zero.
        t1 = jnp.dot(cw1, ld, preferred_element_type=f32)       # (32, 256)
        acc1 = t1[0:C1, :]
        for k in range(1, K1):
            acc1 = acc1 + shift_right(t1[k * C1:(k + 1) * C1, :], k)
        out1 = jnp.maximum(acc1[:, :L1] + cb1, 0.0)             # (8, 199)

        # ---- ConvTranspose1d(8 -> 3, kernel=10, stride=5): phase decomposition
        # out2[co, 5i+r] = t2[r*C2+co, i] + t2[(r+5)*C2+co, i-1]
        t2 = jnp.dot(cw2, out1, preferred_element_type=f32)     # (30, 199)
        zcol = jnp.zeros((K2 * C2, 1), f32)
        t2a = jnp.concatenate([t2, zcol], axis=1)               # (30, 200): col i
        t2b = jnp.concatenate([zcol, t2], axis=1)               # (30, 200): col i-1
        for r in range(PH):
            o_ref[b, r] = (t2a[r * C2:(r + 1) * C2, :]
                           + t2b[(r + PH) * C2:(r + PH + 1) * C2, :]
                           + cb2)                               # (3, 200) phase r


def prepare_params(W1, b1, W2, b2, W3, b3, cw1, cb1, cw2, cb2):
    """One-time host-side prep: bf16 cast, lane-aligned W3/b3 padding, conv
    weights reshaped to (tap*cout, cin)."""
    W3p = jnp.pad(W3.reshape(H2, C0, L0),
                  ((0, 0), (0, 0), (0, LPAD - L0))).reshape(H2, H3P)
    b3p = jnp.pad(b3.reshape(C0, L0), ((0, 0), (0, LPAD - L0))).reshape(1, H3P)
    return (
        W1.astype(jnp.bfloat16), b1.reshape(1, H1).astype(jnp.float32),
        W2.astype(jnp.bfloat16), b2.reshape(1, H2).astype(jnp.float32),
        W3p.astype(jnp.bfloat16), b3p.astype(jnp.float32),
        jnp.transpose(cw1, (2, 1, 0)).reshape(K1 * C1, C0).astype(jnp.float32),
        cb1.reshape(C1, 1).astype(jnp.float32),
        jnp.transpose(cw2, (2, 1, 0)).reshape(K2 * C2, C1).astype(jnp.float32),
        cb2.reshape(C2, 1).astype(jnp.float32),
    )


@jax.jit
def cnn_decoder_forward(x, prepped):
    (w1b, b1r, w2b, b2r, w3p, b3p, cw1a, cb1r, cw2a, cb2r) = prepped
    B = x.shape[0]
    if B <= 8:
        BM, Bp = B, B              # whole batch in a single grid step
    else:
        BM = 8                     # sublane-aligned batch tile for larger B
        Bp = ((B + BM - 1) // BM) * BM
    xp = x if Bp == B else jnp.pad(x, ((0, Bp - B), (0, 0)))
    ntiles = Bp // BM

    def const(shape):
        return pl.BlockSpec(shape, lambda i: (0,) * len(shape))

    in_specs = [
        pl.BlockSpec((BM, IN_DIM), lambda i: (i, 0)),  # batch tile of inputs
        const((IN_DIM, H1)), const((1, H1)),           # W1 (bf16), b1
        const((H1, H2)), const((1, H2)),               # W2 (bf16), b2
        const((H2, H3P)), const((1, H3P)),             # W3 padded (bf16), b3 padded
        const((K1 * C1, C0)), const((C1, 1)),          # conv1 weights, bias
        const((K2 * C2, C1)), const((C2, 1)),          # conv2 weights, bias
    ]
    out_specs = pl.BlockSpec((BM, PH, C2, LP2), lambda i: (i, 0, 0, 0))

    out_ph = pl.pallas_call(
        cnn_decoder_kernel,
        out_shape=jax.ShapeDtypeStruct((Bp, PH, C2, LP2), jnp.float32),
        grid=(ntiles,),
        in_specs=in_specs,
        out_specs=out_specs,
        compiler_params=pltpu.CompilerParams(
            dimension_semantics=("parallel",) if ntiles > 1 else ("arbitrary",),
            vmem_limit_bytes=32 << 20),
    )(xp, w1b, b1r, w2b, b2r, w3p, b3p, cw1a, cb1r, cw2a, cb2r)

    # out_ph[b, r, co, i] == out[b, co, 5*i + r] -> tiny XLA layout plumbing.
    out = out_ph.transpose(0, 2, 3, 1).reshape(Bp, C2, L2)
    return out[:B] if Bp != B else out


# ----------------------------- pure-JAX reference ---------------------------

def ref_forward(x, params):
    (W1, b1, W2, b2, W3, b3, cw1, cb1, cw2, cb2) = params
    hp = jax.lax.Precision.HIGHEST
    h = jax.nn.relu(jnp.dot(x, W1, precision=hp) + b1)
    h = jax.nn.relu(jnp.dot(h, W2, precision=hp) + b2)
    h = jax.nn.relu(jnp.dot(h, W3, precision=hp) + b3)
    ld = h.reshape(x.shape[0], C0, L0)
    out1 = jnp.zeros((x.shape[0], C1, L1), jnp.float32)
    for k in range(K1):
        contrib = jnp.einsum('bci,co->boi', ld, cw1[:, :, k], precision=hp)
        out1 = out1.at[:, :, k:k + L0].add(contrib)
    out1 = jax.nn.relu(out1 + cb1[None, :, None])
    out2 = jnp.zeros((x.shape[0], C2, L2), jnp.float32)
    for k in range(K2):
        contrib = jnp.einsum('bci,co->boi', out1, cw2[:, :, k], precision=hp)
        out2 = out2.at[:, :, k:k + STRIDE2 * (L1 - 1) + 1:STRIDE2].add(contrib)
    return out2 + cb2[None, :, None]


# ----------------------------- main ------------------------------------------

if __name__ == "__main__":
    key = jax.random.PRNGKey(0)
    keys = jax.random.split(key, 11)
    sc = 0.05
    x = jax.random.normal(keys[0], (BATCH, IN_DIM), jnp.float32)

    W1 = jax.random.normal(keys[1], (IN_DIM, H1), jnp.float32) * sc
    b1 = jax.random.normal(keys[2], (H1,), jnp.float32) * sc
    W2 = jax.random.normal(keys[3], (H1, H2), jnp.float32) * sc
    b2 = jax.random.normal(keys[4], (H2,), jnp.float32) * sc
    W3 = jax.random.normal(keys[5], (H2, H3), jnp.float32) * sc
    b3 = jax.random.normal(keys[6], (H3,), jnp.float32) * sc
    cw1 = jax.random.normal(keys[7], (C0, C1, K1), jnp.float32) * sc   # (in, out, k)
    cb1 = jax.random.normal(keys[8], (C1,), jnp.float32) * sc
    cw2 = jax.random.normal(keys[9], (C1, C2, K2), jnp.float32) * sc   # (in, out, k)
    cb2 = jax.random.normal(keys[10], (C2,), jnp.float32) * sc

    params = (W1, b1, W2, b2, W3, b3, cw1, cb1, cw2, cb2)
    prepped = prepare_params(*params)

    out = jax.block_until_ready(cnn_decoder_forward(x, prepped))
    assert out.shape == (BATCH, C2, L2) and out.dtype == jnp.float32

    ref = jax.block_until_ready(ref_forward(x, params))
    if not np.allclose(np.asarray(out), np.asarray(ref), rtol=1e-2, atol=1e-2):
        max_err = float(np.max(np.abs(np.asarray(out) - np.asarray(ref))))
        raise AssertionError(
            f"Pallas output does not match reference (max abs err {max_err:.3e})")

    print("KERNEL_OK")
</pallas_src>

<mosaic_0001>
module attributes {stable_mosaic.version = 11 : i64} {
  func.func @cnn_decoder_kernel(%arg0: i32, %arg1: memref<2x128xf32, #tpu.memory_space<vmem>>, %arg2: memref<128x256xbf16, #tpu.memory_space<vmem>>, %arg3: memref<1x256xf32, #tpu.memory_space<vmem>>, %arg4: memref<256x512xbf16, #tpu.memory_space<vmem>>, %arg5: memref<1x512xf32, #tpu.memory_space<vmem>>, %arg6: memref<512x4096xbf16, #tpu.memory_space<vmem>>, %arg7: memref<1x4096xf32, #tpu.memory_space<vmem>>, %arg8: memref<32x16xf32, #tpu.memory_space<vmem>>, %arg9: memref<8x1xf32, #tpu.memory_space<vmem>>, %arg10: memref<30x8xf32, #tpu.memory_space<vmem>>, %arg11: memref<3x1xf32, #tpu.memory_space<vmem>>, %arg12: memref<2x5x3x200xf32, #tpu.memory_space<vmem>>) attributes {dimension_semantics = [#tpu.dimension_semantics<arbitrary>], iteration_bounds = array<i64: 1>, scalar_prefetch = 0 : i64, scratch_operands = 0 : i64, tpu.core_type = #tpu.core_type<tc>, window_params = [{transform_indices = @transform_0, window_bounds = array<i64: 2, 128>}, {pipeline_mode = #tpu.pipeline_mode<synchronous>, transform_indices = @transform_1, window_bounds = array<i64: 128, 256>}, {pipeline_mode = #tpu.pipeline_mode<synchronous>, transform_indices = @transform_2, window_bounds = array<i64: 1, 256>}, {pipeline_mode = #tpu.pipeline_mode<synchronous>, transform_indices = @transform_3, window_bounds = array<i64: 256, 512>}, {pipeline_mode = #tpu.pipeline_mode<synchronous>, transform_indices = @transform_4, window_bounds = array<i64: 1, 512>}, {pipeline_mode = #tpu.pipeline_mode<synchronous>, transform_indices = @transform_5, window_bounds = array<i64: 512, 4096>}, {pipeline_mode = #tpu.pipeline_mode<synchronous>, transform_indices = @transform_6, window_bounds = array<i64: 1, 4096>}, {pipeline_mode = #tpu.pipeline_mode<synchronous>, transform_indices = @transform_7, window_bounds = array<i64: 32, 16>}, {pipeline_mode = #tpu.pipeline_mode<synchronous>, transform_indices = @transform_8, window_bounds = array<i64: 8, 1>}, {pipeline_mode = #tpu.pipeline_mode<synchronous>, transform_indices = @transform_9, window_bounds = array<i64: 30, 8>}, {pipeline_mode = #tpu.pipeline_mode<synchronous>, transform_indices = @transform_10, window_bounds = array<i64: 3, 1>}, {transform_indices = @transform_11, window_bounds = array<i64: 2, 5, 3, 200>}]} {
    %c0 = arith.constant 0 : index
    %c0_0 = arith.constant 0 : index
    %0 = vector.load %arg1[%c0, %c0_0] : memref<2x128xf32, #tpu.memory_space<vmem>>, vector<2x128xf32>
    %1 = arith.truncf %0 : vector<2x128xf32> to vector<2x128xbf16>
    %c0_1 = arith.constant 0 : index
    %c0_2 = arith.constant 0 : index
    %2 = vector.load %arg2[%c0_1, %c0_2] : memref<128x256xbf16, #tpu.memory_space<vmem>>, vector<128x256xbf16>
    %cst = arith.constant dense<0.000000e+00> : vector<2x256xf32>
    %3 = tpu.matmul %1, %2, %cst {dimension_numbers = #tpu.dot_dimension_numbers<[1], [0], [0], [1], [0, 0, 1, 1], [], []>} : vector<2x128xbf16>, vector<128x256xbf16>, vector<2x256xf32> -> vector<2x256xf32>
    %c0_3 = arith.constant 0 : index
    %c0_4 = arith.constant 0 : index
    %4 = vector.load %arg3[%c0_3, %c0_4] : memref<1x256xf32, #tpu.memory_space<vmem>>, vector<1x256xf32>
    %5 = vector.broadcast %4 : vector<1x256xf32> to vector<2x256xf32>
    %6 = arith.addf %3, %5 : vector<2x256xf32>
    %cst_5 = arith.constant 0.000000e+00 : f32
    %7 = vector.broadcast %cst_5 : f32 to vector<2x256xf32>
    %8 = arith.maximumf %6, %7 : vector<2x256xf32>
    %9 = arith.truncf %8 : vector<2x256xf32> to vector<2x256xbf16>
    %c0_6 = arith.constant 0 : index
    %c0_7 = arith.constant 0 : index
    %10 = vector.load %arg4[%c0_6, %c0_7] : memref<256x512xbf16, #tpu.memory_space<vmem>>, vector<256x512xbf16>
    %cst_8 = arith.constant dense<0.000000e+00> : vector<2x512xf32>
    %11 = tpu.matmul %9, %10, %cst_8 {dimension_numbers = #tpu.dot_dimension_numbers<[1], [0], [0], [1], [0, 0, 1, 1], [], []>} : vector<2x256xbf16>, vector<256x512xbf16>, vector<2x512xf32> -> vector<2x512xf32>
    %c0_9 = arith.constant 0 : index
    %c0_10 = arith.constant 0 : index
    %12 = vector.load %arg5[%c0_9, %c0_10] : memref<1x512xf32, #tpu.memory_space<vmem>>, vector<1x512xf32>
    %13 = vector.broadcast %12 : vector<1x512xf32> to vector<2x512xf32>
    %14 = arith.addf %11, %13 : vector<2x512xf32>
    %cst_11 = arith.constant 0.000000e+00 : f32
    %15 = vector.broadcast %cst_11 : f32 to vector<2x512xf32>
    %16 = arith.maximumf %14, %15 : vector<2x512xf32>
    %17 = arith.truncf %16 : vector<2x512xf32> to vector<2x512xbf16>
    %c0_12 = arith.constant 0 : index
    %c0_13 = arith.constant 0 : index
    %18 = vector.load %arg6[%c0_12, %c0_13] : memref<512x4096xbf16, #tpu.memory_space<vmem>>, vector<512x4096xbf16>
    %cst_14 = arith.constant dense<0.000000e+00> : vector<2x4096xf32>
    %19 = tpu.matmul %17, %18, %cst_14 {dimension_numbers = #tpu.dot_dimension_numbers<[1], [0], [0], [1], [0, 0, 1, 1], [], []>} : vector<2x512xbf16>, vector<512x4096xbf16>, vector<2x4096xf32> -> vector<2x4096xf32>
    %c0_15 = arith.constant 0 : index
    %c0_16 = arith.constant 0 : index
    %20 = vector.load %arg7[%c0_15, %c0_16] : memref<1x4096xf32, #tpu.memory_space<vmem>>, vector<1x4096xf32>
    %21 = vector.broadcast %20 : vector<1x4096xf32> to vector<2x4096xf32>
    %22 = arith.addf %19, %21 : vector<2x4096xf32>
    %cst_17 = arith.constant 0.000000e+00 : f32
    %23 = vector.broadcast %cst_17 : f32 to vector<2x4096xf32>
    %24 = arith.maximumf %22, %23 : vector<2x4096xf32>
    %c0_18 = arith.constant 0 : index
    %c0_19 = arith.constant 0 : index
    %25 = vector.load %arg8[%c0_18, %c0_19] : memref<32x16xf32, #tpu.memory_space<vmem>>, vector<32x16xf32>
    %c0_20 = arith.constant 0 : index
    %c0_21 = arith.constant 0 : index
    %26 = vector.load %arg9[%c0_20, %c0_21] : memref<8x1xf32, #tpu.memory_space<vmem>>, vector<8x1xf32>
    %c0_22 = arith.constant 0 : index
    %c0_23 = arith.constant 0 : index
    %27 = vector.load %arg10[%c0_22, %c0_23] : memref<30x8xf32, #tpu.memory_space<vmem>>, vector<30x8xf32>
    %c0_24 = arith.constant 0 : index
    %c0_25 = arith.constant 0 : index
    %28 = vector.load %arg11[%c0_24, %c0_25] : memref<3x1xf32, #tpu.memory_space<vmem>>, vector<3x1xf32>
    %29 = vector.extract_strided_slice %24 {offsets = [0, 0], sizes = [1, 256], strides = [1, 1]} : vector<2x4096xf32> to vector<1x256xf32>
    %30 = vector.extract_strided_slice %24 {offsets = [0, 256], sizes = [1, 256], strides = [1, 1]} : vector<2x4096xf32> to vector<1x256xf32>
    %31 = vector.extract_strided_slice %24 {offsets = [0, 512], sizes = [1, 256], strides = [1, 1]} : vector<2x4096xf32> to vector<1x256xf32>
    %32 = vector.extract_strided_slice %24 {offsets = [0, 768], sizes = [1, 256], strides = [1, 1]} : vector<2x4096xf32> to vector<1x256xf32>
    %33 = vector.extract_strided_slice %24 {offsets = [0, 1024], sizes = [1, 256], strides = [1, 1]} : vector<2x4096xf32> to vector<1x256xf32>
    %34 = vector.extract_strided_slice %24 {offsets = [0, 1280], sizes = [1, 256], strides = [1, 1]} : vector<2x4096xf32> to vector<1x256xf32>
    %35 = vector.extract_strided_slice %24 {offsets = [0, 1536], sizes = [1, 256], strides = [1, 1]} : vector<2x4096xf32> to vector<1x256xf32>
    %36 = vector.extract_strided_slice %24 {offsets = [0, 1792], sizes = [1, 256], strides = [1, 1]} : vector<2x4096xf32> to vector<1x256xf32>
    %37 = vector.extract_strided_slice %24 {offsets = [0, 2048], sizes = [1, 256], strides = [1, 1]} : vector<2x4096xf32> to vector<1x256xf32>
    %38 = vector.extract_strided_slice %24 {offsets = [0, 2304], sizes = [1, 256], strides = [1, 1]} : vector<2x4096xf32> to vector<1x256xf32>
    %39 = vector.extract_strided_slice %24 {offsets = [0, 2560], sizes = [1, 256], strides = [1, 1]} : vector<2x4096xf32> to vector<1x256xf32>
    %40 = vector.extract_strided_slice %24 {offsets = [0, 2816], sizes = [1, 256], strides = [1, 1]} : vector<2x4096xf32> to vector<1x256xf32>
    %41 = vector.extract_strided_slice %24 {offsets = [0, 3072], sizes = [1, 256], strides = [1, 1]} : vector<2x4096xf32> to vector<1x256xf32>
    %42 = vector.extract_strided_slice %24 {offsets = [0, 3328], sizes = [1, 256], strides = [1, 1]} : vector<2x4096xf32> to vector<1x256xf32>
    %43 = vector.extract_strided_slice %24 {offsets = [0, 3584], sizes = [1, 256], strides = [1, 1]} : vector<2x4096xf32> to vector<1x256xf32>
    %44 = vector.extract_strided_slice %24 {offsets = [0, 3840], sizes = [1, 256], strides = [1, 1]} : vector<2x4096xf32> to vector<1x256xf32>
    %45 = tpu.concatenate %29, %30, %31, %32, %33, %34, %35, %36, %37, %38, %39, %40, %41, %42, %43, %44 in 0 : vector<1x256xf32>, vector<1x256xf32>, vector<1x256xf32>, vector<1x256xf32>, vector<1x256xf32>, vector<1x256xf32>, vector<1x256xf32>, vector<1x256xf32>, vector<1x256xf32>, vector<1x256xf32>, vector<1x256xf32>, vector<1x256xf32>, vector<1x256xf32>, vector<1x256xf32>, vector<1x256xf32>, vector<1x256xf32> -> vector<16x256xf32>
    %cst_26 = arith.constant dense<0.000000e+00> : vector<32x256xf32>
    %46 = tpu.matmul %25, %45, %cst_26 {dimension_numbers = #tpu.dot_dimension_numbers<[1], [0], [0], [1], [0, 0, 1, 1], [], []>} : vector<32x16xf32>, vector<16x256xf32>, vector<32x256xf32> -> vector<32x256xf32>
    %47 = vector.extract_strided_slice %46 {offsets = [0, 0], sizes = [8, 256], strides = [1, 1]} : vector<32x256xf32> to vector<8x256xf32>
    %48 = vector.extract_strided_slice %46 {offsets = [8, 0], sizes = [8, 256], strides = [1, 1]} : vector<32x256xf32> to vector<8x256xf32>
    %cst_27 = arith.constant 0.000000e+00 : f32
    %49 = vector.broadcast %cst_27 : f32 to vector<8x1xf32>
    %50 = vector.extract_strided_slice %48 {offsets = [0, 0], sizes = [8, 255], strides = [1, 1]} : vector<8x256xf32> to vector<8x255xf32>
    %51 = tpu.concatenate %49, %50 in 1 : vector<8x1xf32>, vector<8x255xf32> -> vector<8x256xf32>
    %52 = arith.addf %47, %51 : vector<8x256xf32>
    %53 = vector.extract_strided_slice %46 {offsets = [16, 0], sizes = [8, 256], strides = [1, 1]} : vector<32x256xf32> to vector<8x256xf32>
    %cst_28 = arith.constant 0.000000e+00 : f32
    %54 = vector.broadcast %cst_28 : f32 to vector<8x2xf32>
    %55 = vector.extract_strided_slice %53 {offsets = [0, 0], sizes = [8, 254], strides = [1, 1]} : vector<8x256xf32> to vector<8x254xf32>
    %56 = tpu.concatenate %54, %55 in 1 : vector<8x2xf32>, vector<8x254xf32> -> vector<8x256xf32>
    %57 = arith.addf %52, %56 : vector<8x256xf32>
    %58 = vector.extract_strided_slice %46 {offsets = [24, 0], sizes = [8, 256], strides = [1, 1]} : vector<32x256xf32> to vector<8x256xf32>
    %cst_29 = arith.constant 0.000000e+00 : f32
    %59 = vector.broadcast %cst_29 : f32 to vector<8x3xf32>
    %60 = vector.extract_strided_slice %58 {offsets = [0, 0], sizes = [8, 253], strides = [1, 1]} : vector<8x256xf32> to vector<8x253xf32>
    %61 = tpu.concatenate %59, %60 in 1 : vector<8x3xf32>, vector<8x253xf32> -> vector<8x256xf32>
    %62 = arith.addf %57, %61 : vector<8x256xf32>
    %63 = vector.extract_strided_slice %62 {offsets = [0, 0], sizes = [8, 199], strides = [1, 1]} : vector<8x256xf32> to vector<8x199xf32>
    %64 = vector.broadcast %26 : vector<8x1xf32> to vector<8x199xf32>
    %65 = arith.addf %63, %64 : vector<8x199xf32>
    %cst_30 = arith.constant 0.000000e+00 : f32
    %66 = vector.broadcast %cst_30 : f32 to vector<8x199xf32>
    %67 = arith.maximumf %65, %66 : vector<8x199xf32>
    %cst_31 = arith.constant dense<0.000000e+00> : vector<30x199xf32>
    %68 = tpu.matmul %27, %67, %cst_31 {dimension_numbers = #tpu.dot_dimension_numbers<[1], [0], [0], [1], [0, 0, 1, 1], [], []>} : vector<30x8xf32>, vector<8x199xf32>, vector<30x199xf32> -> vector<30x199xf32>
    %cst_32 = arith.constant 0.000000e+00 : f32
    %69 = vector.broadcast %cst_32 : f32 to vector<30x1xf32>
    %70 = tpu.concatenate %68, %69 in 1 : vector<30x199xf32>, vector<30x1xf32> -> vector<30x200xf32>
    %71 = tpu.concatenate %69, %68 in 1 : vector<30x1xf32>, vector<30x199xf32> -> vector<30x200xf32>
    %72 = vector.extract_strided_slice %70 {offsets = [0, 0], sizes = [3, 200], strides = [1, 1]} : vector<30x200xf32> to vector<3x200xf32>
    %73 = vector.extract_strided_slice %71 {offsets = [15, 0], sizes = [3, 200], strides = [1, 1]} : vector<30x200xf32> to vector<3x200xf32>
    %74 = arith.addf %72, %73 : vector<3x200xf32>
    %75 = vector.broadcast %28 : vector<3x1xf32> to vector<3x200xf32>
    %76 = arith.addf %74, %75 : vector<3x200xf32>
    %c0_33 = arith.constant 0 : index
    %c0_34 = arith.constant 0 : index
    %c0_35 = arith.constant 0 : index
    %c0_36 = arith.constant 0 : index
    %77 = vector.load %arg12[%c0_33, %c0_34, %c0_35, %c0_36] : memref<2x5x3x200xf32, #tpu.memory_space<vmem>>, vector<1x1x3x200xf32>
    %78 = vector.shape_cast %77 : vector<1x1x3x200xf32> to vector<3x200xf32>
    %79 = vector.shape_cast %76 : vector<3x200xf32> to vector<1x1x3x200xf32>
    tpu.vector_store %arg12[%c0_33, %c0_34, %c0_35, %c0_36], %79 {strides = array<i32>} : memref<2x5x3x200xf32, #tpu.memory_space<vmem>>, vector<1x1x3x200xf32>,
    %80 = vector.extract_strided_slice %70 {offsets = [3, 0], sizes = [3, 200], strides = [1, 1]} : vector<30x200xf32> to vector<3x200xf32>
    %81 = vector.extract_strided_slice %71 {offsets = [18, 0], sizes = [3, 200], strides = [1, 1]} : vector<30x200xf32> to vector<3x200xf32>
    %82 = arith.addf %80, %81 : vector<3x200xf32>
    %83 = vector.broadcast %28 : vector<3x1xf32> to vector<3x200xf32>
    %84 = arith.addf %82, %83 : vector<3x200xf32>
    %c0_37 = arith.constant 0 : index
    %c1 = arith.constant 1 : index
    %c0_38 = arith.constant 0 : index
    %c0_39 = arith.constant 0 : index
    %85 = vector.load %arg12[%c0_37, %c1, %c0_38, %c0_39] : memref<2x5x3x200xf32, #tpu.memory_space<vmem>>, vector<1x1x3x200xf32>
    %86 = vector.shape_cast %85 : vector<1x1x3x200xf32> to vector<3x200xf32>
    %87 = vector.shape_cast %84 : vector<3x200xf32> to vector<1x1x3x200xf32>
    tpu.vector_store %arg12[%c0_37, %c1, %c0_38, %c0_39], %87 {strides = array<i32>} : memref<2x5x3x200xf32, #tpu.memory_space<vmem>>, vector<1x1x3x200xf32>,
    %88 = vector.extract_strided_slice %70 {offsets = [6, 0], sizes = [3, 200], strides = [1, 1]} : vector<30x200xf32> to vector<3x200xf32>
    %89 = vector.extract_strided_slice %71 {offsets = [21, 0], sizes = [3, 200], strides = [1, 1]} : vector<30x200xf32> to vector<3x200xf32>
    %90 = arith.addf %88, %89 : vector<3x200xf32>
    %91 = vector.broadcast %28 : vector<3x1xf32> to vector<3x200xf32>
    %92 = arith.addf %90, %91 : vector<3x200xf32>
    %c0_40 = arith.constant 0 : index
    %c2 = arith.constant 2 : index
    %c0_41 = arith.constant 0 : index
    %c0_42 = arith.constant 0 : index
    %93 = vector.load %arg12[%c0_40, %c2, %c0_41, %c0_42] : memref<2x5x3x200xf32, #tpu.memory_space<vmem>>, vector<1x1x3x200xf32>
    %94 = vector.shape_cast %93 : vector<1x1x3x200xf32> to vector<3x200xf32>
    %95 = vector.shape_cast %92 : vector<3x200xf32> to vector<1x1x3x200xf32>
    tpu.vector_store %arg12[%c0_40, %c2, %c0_41, %c0_42], %95 {strides = array<i32>} : memref<2x5x3x200xf32, #tpu.memory_space<vmem>>, vector<1x1x3x200xf32>,
    %96 = vector.extract_strided_slice %70 {offsets = [9, 0], sizes = [3, 200], strides = [1, 1]} : vector<30x200xf32> to vector<3x200xf32>
    %97 = vector.extract_strided_slice %71 {offsets = [24, 0], sizes = [3, 200], strides = [1, 1]} : vector<30x200xf32> to vector<3x200xf32>
    %98 = arith.addf %96, %97 : vector<3x200xf32>
    %99 = vector.broadcast %28 : vector<3x1xf32> to vector<3x200xf32>
    %100 = arith.addf %98, %99 : vector<3x200xf32>
    %c0_43 = arith.constant 0 : index
    %c3 = arith.constant 3 : index
    %c0_44 = arith.constant 0 : index
    %c0_45 = arith.constant 0 : index
    %101 = vector.load %arg12[%c0_43, %c3, %c0_44, %c0_45] : memref<2x5x3x200xf32, #tpu.memory_space<vmem>>, vector<1x1x3x200xf32>
    %102 = vector.shape_cast %101 : vector<1x1x3x200xf32> to vector<3x200xf32>
    %103 = vector.shape_cast %100 : vector<3x200xf32> to vector<1x1x3x200xf32>
    tpu.vector_store %arg12[%c0_43, %c3, %c0_44, %c0_45], %103 {strides = array<i32>} : memref<2x5x3x200xf32, #tpu.memory_space<vmem>>, vector<1x1x3x200xf32>,
    %104 = vector.extract_strided_slice %70 {offsets = [12, 0], sizes = [3, 200], strides = [1, 1]} : vector<30x200xf32> to vector<3x200xf32>
    %105 = vector.extract_strided_slice %71 {offsets = [27, 0], sizes = [3, 200], strides = [1, 1]} : vector<30x200xf32> to vector<3x200xf32>
    %106 = arith.addf %104, %105 : vector<3x200xf32>
    %107 = vector.broadcast %28 : vector<3x1xf32> to vector<3x200xf32>
    %108 = arith.addf %106, %107 : vector<3x200xf32>
    %c0_46 = arith.constant 0 : index
    %c4 = arith.constant 4 : index
    %c0_47 = arith.constant 0 : index
    %c0_48 = arith.constant 0 : index
    %109 = vector.load %arg12[%c0_46, %c4, %c0_47, %c0_48] : memref<2x5x3x200xf32, #tpu.memory_space<vmem>>, vector<1x1x3x200xf32>
    %110 = vector.shape_cast %109 : vector<1x1x3x200xf32> to vector<3x200xf32>
    %111 = vector.shape_cast %108 : vector<3x200xf32> to vector<1x1x3x200xf32>
    tpu.vector_store %arg12[%c0_46, %c4, %c0_47, %c0_48], %111 {strides = array<i32>} : memref<2x5x3x200xf32, #tpu.memory_space<vmem>>, vector<1x1x3x200xf32>,
    %112 = vector.extract_strided_slice %24 {offsets = [1, 0], sizes = [1, 256], strides = [1, 1]} : vector<2x4096xf32> to vector<1x256xf32>
    %113 = vector.extract_strided_slice %24 {offsets = [1, 256], sizes = [1, 256], strides = [1, 1]} : vector<2x4096xf32> to vector<1x256xf32>
    %114 = vector.extract_strided_slice %24 {offsets = [1, 512], sizes = [1, 256], strides = [1, 1]} : vector<2x4096xf32> to vector<1x256xf32>
    %115 = vector.extract_strided_slice %24 {offsets = [1, 768], sizes = [1, 256], strides = [1, 1]} : vector<2x4096xf32> to vector<1x256xf32>
    %116 = vector.extract_strided_slice %24 {offsets = [1, 1024], sizes = [1, 256], strides = [1, 1]} : vector<2x4096xf32> to vector<1x256xf32>
    %117 = vector.extract_strided_slice %24 {offsets = [1, 1280], sizes = [1, 256], strides = [1, 1]} : vector<2x4096xf32> to vector<1x256xf32>
    %118 = vector.extract_strided_slice %24 {offsets = [1, 1536], sizes = [1, 256], strides = [1, 1]} : vector<2x4096xf32> to vector<1x256xf32>
    %119 = vector.extract_strided_slice %24 {offsets = [1, 1792], sizes = [1, 256], strides = [1, 1]} : vector<2x4096xf32> to vector<1x256xf32>
    %120 = vector.extract_strided_slice %24 {offsets = [1, 2048], sizes = [1, 256], strides = [1, 1]} : vector<2x4096xf32> to vector<1x256xf32>
    %121 = vector.extract_strided_slice %24 {offsets = [1, 2304], sizes = [1, 256], strides = [1, 1]} : vector<2x4096xf32> to vector<1x256xf32>
    %122 = vector.extract_strided_slice %24 {offsets = [1, 2560], sizes = [1, 256], strides = [1, 1]} : vector<2x4096xf32> to vector<1x256xf32>
    %123 = vector.extract_strided_slice %24 {offsets = [1, 2816], sizes = [1, 256], strides = [1, 1]} : vector<2x4096xf32> to vector<1x256xf32>
    %124 = vector.extract_strided_slice %24 {offsets = [1, 3072], sizes = [1, 256], strides = [1, 1]} : vector<2x4096xf32> to vector<1x256xf32>
    %125 = vector.extract_strided_slice %24 {offsets = [1, 3328], sizes = [1, 256], strides = [1, 1]} : vector<2x4096xf32> to vector<1x256xf32>
    %126 = vector.extract_strided_slice %24 {offsets = [1, 3584], sizes = [1, 256], strides = [1, 1]} : vector<2x4096xf32> to vector<1x256xf32>
    %127 = vector.extract_strided_slice %24 {offsets = [1, 3840], sizes = [1, 256], strides = [1, 1]} : vector<2x4096xf32> to vector<1x256xf32>
    %128 = tpu.concatenate %112, %113, %114, %115, %116, %117, %118, %119, %120, %121, %122, %123, %124, %125, %126, %127 in 0 : vector<1x256xf32>, vector<1x256xf32>, vector<1x256xf32>, vector<1x256xf32>, vector<1x256xf32>, vector<1x256xf32>, vector<1x256xf32>, vector<1x256xf32>, vector<1x256xf32>, vector<1x256xf32>, vector<1x256xf32>, vector<1x256xf32>, vector<1x256xf32>, vector<1x256xf32>, vector<1x256xf32>, vector<1x256xf32> -> vector<16x256xf32>
    %cst_49 = arith.constant dense<0.000000e+00> : vector<32x256xf32>
    %129 = tpu.matmul %25, %128, %cst_49 {dimension_numbers = #tpu.dot_dimension_numbers<[1], [0], [0], [1], [0, 0, 1, 1], [], []>} : vector<32x16xf32>, vector<16x256xf32>, vector<32x256xf32> -> vector<32x256xf32>
    %130 = vector.extract_strided_slice %129 {offsets = [0, 0], sizes = [8, 256], strides = [1, 1]} : vector<32x256xf32> to vector<8x256xf32>
    %131 = vector.extract_strided_slice %129 {offsets = [8, 0], sizes = [8, 256], strides = [1, 1]} : vector<32x256xf32> to vector<8x256xf32>
    %cst_50 = arith.constant 0.000000e+00 : f32
    %132 = vector.broadcast %cst_50 : f32 to vector<8x1xf32>
    %133 = vector.extract_strided_slice %131 {offsets = [0, 0], sizes = [8, 255], strides = [1, 1]} : vector<8x256xf32> to vector<8x255xf32>
    %134 = tpu.concatenate %132, %133 in 1 : vector<8x1xf32>, vector<8x255xf32> -> vector<8x256xf32>
    %135 = arith.addf %130, %134 : vector<8x256xf32>
    %136 = vector.extract_strided_slice %129 {offsets = [16, 0], sizes = [8, 256], strides = [1, 1]} : vector<32x256xf32> to vector<8x256xf32>
    %cst_51 = arith.constant 0.000000e+00 : f32
    %137 = vector.broadcast %cst_51 : f32 to vector<8x2xf32>
    %138 = vector.extract_strided_slice %136 {offsets = [0, 0], sizes = [8, 254], strides = [1, 1]} : vector<8x256xf32> to vector<8x254xf32>
    %139 = tpu.concatenate %137, %138 in 1 : vector<8x2xf32>, vector<8x254xf32> -> vector<8x256xf32>
    %140 = arith.addf %135, %139 : vector<8x256xf32>
    %141 = vector.extract_strided_slice %129 {offsets = [24, 0], sizes = [8, 256], strides = [1, 1]} : vector<32x256xf32> to vector<8x256xf32>
    %cst_52 = arith.constant 0.000000e+00 : f32
    %142 = vector.broadcast %cst_52 : f32 to vector<8x3xf32>
    %143 = vector.extract_strided_slice %141 {offsets = [0, 0], sizes = [8, 253], strides = [1, 1]} : vector<8x256xf32> to vector<8x253xf32>
    %144 = tpu.concatenate %142, %143 in 1 : vector<8x3xf32>, vector<8x253xf32> -> vector<8x256xf32>
    %145 = arith.addf %140, %144 : vector<8x256xf32>
    %146 = vector.extract_strided_slice %145 {offsets = [0, 0], sizes = [8, 199], strides = [1, 1]} : vector<8x256xf32> to vector<8x199xf32>
    %147 = vector.broadcast %26 : vector<8x1xf32> to vector<8x199xf32>
    %148 = arith.addf %146, %147 : vector<8x199xf32>
    %cst_53 = arith.constant 0.000000e+00 : f32
    %149 = vector.broadcast %cst_53 : f32 to vector<8x199xf32>
    %150 = arith.maximumf %148, %149 : vector<8x199xf32>
    %cst_54 = arith.constant dense<0.000000e+00> : vector<30x199xf32>
    %151 = tpu.matmul %27, %150, %cst_54 {dimension_numbers = #tpu.dot_dimension_numbers<[1], [0], [0], [1], [0, 0, 1, 1], [], []>} : vector<30x8xf32>, vector<8x199xf32>, vector<30x199xf32> -> vector<30x199xf32>
    %cst_55 = arith.constant 0.000000e+00 : f32
    %152 = vector.broadcast %cst_55 : f32 to vector<30x1xf32>
    %153 = tpu.concatenate %151, %152 in 1 : vector<30x199xf32>, vector<30x1xf32> -> vector<30x200xf32>
    %154 = tpu.concatenate %152, %151 in 1 : vector<30x1xf32>, vector<30x199xf32> -> vector<30x200xf32>
    %155 = vector.extract_strided_slice %153 {offsets = [0, 0], sizes = [3, 200], strides = [1, 1]} : vector<30x200xf32> to vector<3x200xf32>
    %156 = vector.extract_strided_slice %154 {offsets = [15, 0], sizes = [3, 200], strides = [1, 1]} : vector<30x200xf32> to vector<3x200xf32>
    %157 = arith.addf %155, %156 : vector<3x200xf32>
    %158 = vector.broadcast %28 : vector<3x1xf32> to vector<3x200xf32>
    %159 = arith.addf %157, %158 : vector<3x200xf32>
    %c1_56 = arith.constant 1 : index
    %c0_57 = arith.constant 0 : index
    %c0_58 = arith.constant 0 : index
    %c0_59 = arith.constant 0 : index
    %160 = vector.load %arg12[%c1_56, %c0_57, %c0_58, %c0_59] : memref<2x5x3x200xf32, #tpu.memory_space<vmem>>, vector<1x1x3x200xf32>
    %161 = vector.shape_cast %160 : vector<1x1x3x200xf32> to vector<3x200xf32>
    %162 = vector.shape_cast %159 : vector<3x200xf32> to vector<1x1x3x200xf32>
    tpu.vector_store %arg12[%c1_56, %c0_57, %c0_58, %c0_59], %162 {strides = array<i32>} : memref<2x5x3x200xf32, #tpu.memory_space<vmem>>, vector<1x1x3x200xf32>,
    %163 = vector.extract_strided_slice %153 {offsets = [3, 0], sizes = [3, 200], strides = [1, 1]} : vector<30x200xf32> to vector<3x200xf32>
    %164 = vector.extract_strided_slice %154 {offsets = [18, 0], sizes = [3, 200], strides = [1, 1]} : vector<30x200xf32> to vector<3x200xf32>
    %165 = arith.addf %163, %164 : vector<3x200xf32>
    %166 = vector.broadcast %28 : vector<3x1xf32> to vector<3x200xf32>
    %167 = arith.addf %165, %166 : vector<3x200xf32>
    %c1_60 = arith.constant 1 : index
    %c1_61 = arith.constant 1 : index
    %c0_62 = arith.constant 0 : index
    %c0_63 = arith.constant 0 : index
    %168 = vector.load %arg12[%c1_60, %c1_61, %c0_62, %c0_63] : memref<2x5x3x200xf32, #tpu.memory_space<vmem>>, vector<1x1x3x200xf32>
    %169 = vector.shape_cast %168 : vector<1x1x3x200xf32> to vector<3x200xf32>
    %170 = vector.shape_cast %167 : vector<3x200xf32> to vector<1x1x3x200xf32>
    tpu.vector_store %arg12[%c1_60, %c1_61, %c0_62, %c0_63], %170 {strides = array<i32>} : memref<2x5x3x200xf32, #tpu.memory_space<vmem>>, vector<1x1x3x200xf32>,
    %171 = vector.extract_strided_slice %153 {offsets = [6, 0], sizes = [3, 200], strides = [1, 1]} : vector<30x200xf32> to vector<3x200xf32>
    %172 = vector.extract_strided_slice %154 {offsets = [21, 0], sizes = [3, 200], strides = [1, 1]} : vector<30x200xf32> to vector<3x200xf32>
    %173 = arith.addf %171, %172 : vector<3x200xf32>
    %174 = vector.broadcast %28 : vector<3x1xf32> to vector<3x200xf32>
    %175 = arith.addf %173, %174 : vector<3x200xf32>
    %c1_64 = arith.constant 1 : index
    %c2_65 = arith.constant 2 : index
    %c0_66 = arith.constant 0 : index
    %c0_67 = arith.constant 0 : index
    %176 = vector.load %arg12[%c1_64, %c2_65, %c0_66, %c0_67] : memref<2x5x3x200xf32, #tpu.memory_space<vmem>>, vector<1x1x3x200xf32>
    %177 = vector.shape_cast %176 : vector<1x1x3x200xf32> to vector<3x200xf32>
    %178 = vector.shape_cast %175 : vector<3x200xf32> to vector<1x1x3x200xf32>
    tpu.vector_store %arg12[%c1_64, %c2_65, %c0_66, %c0_67], %178 {strides = array<i32>} : memref<2x5x3x200xf32, #tpu.memory_space<vmem>>, vector<1x1x3x200xf32>,
    %179 = vector.extract_strided_slice %153 {offsets = [9, 0], sizes = [3, 200], strides = [1, 1]} : vector<30x200xf32> to vector<3x200xf32>
    %180 = vector.extract_strided_slice %154 {offsets = [24, 0], sizes = [3, 200], strides = [1, 1]} : vector<30x200xf32> to vector<3x200xf32>
    %181 = arith.addf %179, %180 : vector<3x200xf32>
    %182 = vector.broadcast %28 : vector<3x1xf32> to vector<3x200xf32>
    %183 = arith.addf %181, %182 : vector<3x200xf32>
    %c1_68 = arith.constant 1 : index
    %c3_69 = arith.constant 3 : index
    %c0_70 = arith.constant 0 : index
    %c0_71 = arith.constant 0 : index
    %184 = vector.load %arg12[%c1_68, %c3_69, %c0_70, %c0_71] : memref<2x5x3x200xf32, #tpu.memory_space<vmem>>, vector<1x1x3x200xf32>
    %185 = vector.shape_cast %184 : vector<1x1x3x200xf32> to vector<3x200xf32>
    %186 = vector.shape_cast %183 : vector<3x200xf32> to vector<1x1x3x200xf32>
    tpu.vector_store %arg12[%c1_68, %c3_69, %c0_70, %c0_71], %186 {strides = array<i32>} : memref<2x5x3x200xf32, #tpu.memory_space<vmem>>, vector<1x1x3x200xf32>,
    %187 = vector.extract_strided_slice %153 {offsets = [12, 0], sizes = [3, 200], strides = [1, 1]} : vector<30x200xf32> to vector<3x200xf32>
    %188 = vector.extract_strided_slice %154 {offsets = [27, 0], sizes = [3, 200], strides = [1, 1]} : vector<30x200xf32> to vector<3x200xf32>
    %189 = arith.addf %187, %188 : vector<3x200xf32>
    %190 = vector.broadcast %28 : vector<3x1xf32> to vector<3x200xf32>
    %191 = arith.addf %189, %190 : vector<3x200xf32>
    %c1_72 = arith.constant 1 : index
    %c4_73 = arith.constant 4 : index
    %c0_74 = arith.constant 0 : index
    %c0_75 = arith.constant 0 : index
    %192 = vector.load %arg12[%c1_72, %c4_73, %c0_74, %c0_75] : memref<2x5x3x200xf32, #tpu.memory_space<vmem>>, vector<1x1x3x200xf32>
    %193 = vector.shape_cast %192 : vector<1x1x3x200xf32> to vector<3x200xf32>
    %194 = vector.shape_cast %191 : vector<3x200xf32> to vector<1x1x3x200xf32>
    tpu.vector_store %arg12[%c1_72, %c4_73, %c0_74, %c0_75], %194 {strides = array<i32>} : memref<2x5x3x200xf32, #tpu.memory_space<vmem>>, vector<1x1x3x200xf32>,
    return
  }
  func.func @transform_0(%arg0: i32) -> (i32, i32) {
    %c0_i32 = arith.constant 0 : i32
    %c0_i32_0 = arith.constant 0 : i32
    return %arg0, %c0_i32 : i32, i32
  }
  func.func @transform_1(%arg0: i32) -> (i32, i32) {
    %c0_i32 = arith.constant 0 : i32
    %c0_i32_0 = arith.constant 0 : i32
    %c0_i32_1 = arith.constant 0 : i32
    return %c0_i32, %c0_i32_0 : i32, i32
  }
  func.func @transform_2(%arg0: i32) -> (i32, i32) {
    %c0_i32 = arith.constant 0 : i32
    %c0_i32_0 = arith.constant 0 : i32
    %c0_i32_1 = arith.constant 0 : i32
    return %c0_i32, %c0_i32_0 : i32, i32
  }
  func.func @transform_3(%arg0: i32) -> (i32, i32) {
    %c0_i32 = arith.constant 0 : i32
    %c0_i32_0 = arith.constant 0 : i32
    %c0_i32_1 = arith.constant 0 : i32
    return %c0_i32, %c0_i32_0 : i32, i32
  }
  func.func @transform_4(%arg0: i32) -> (i32, i32) {
    %c0_i32 = arith.constant 0 : i32
    %c0_i32_0 = arith.constant 0 : i32
    %c0_i32_1 = arith.constant 0 : i32
    return %c0_i32, %c0_i32_0 : i32, i32
  }
  func.func @transform_5(%arg0: i32) -> (i32, i32) {
    %c0_i32 = arith.constant 0 : i32
    %c0_i32_0 = arith.constant 0 : i32
    %c0_i32_1 = arith.constant 0 : i32
    return %c0_i32, %c0_i32_0 : i32, i32
  }
  func.func @transform_6(%arg0: i32) -> (i32, i32) {
    %c0_i32 = arith.constant 0 : i32
    %c0_i32_0 = arith.constant 0 : i32
    %c0_i32_1 = arith.constant 0 : i32
    return %c0_i32, %c0_i32_0 : i32, i32
  }
  func.func @transform_7(%arg0: i32) -> (i32, i32) {
    %c0_i32 = arith.constant 0 : i32
    %c0_i32_0 = arith.constant 0 : i32
    %c0_i32_1 = arith.constant 0 : i32
    return %c0_i32, %c0_i32_0 : i32, i32
  }
  func.func @transform_8(%arg0: i32) -> (i32, i32) {
    %c0_i32 = arith.constant 0 : i32
    %c0_i32_0 = arith.constant 0 : i32
    %c0_i32_1 = arith.constant 0 : i32
    return %c0_i32, %c0_i32_0 : i32, i32
  }
  func.func @transform_9(%arg0: i32) -> (i32, i32) {
    %c0_i32 = arith.constant 0 : i32
    %c0_i32_0 = arith.constant 0 : i32
    %c0_i32_1 = arith.constant 0 : i32
    return %c0_i32, %c0_i32_0 : i32, i32
  }
  func.func @transform_10(%arg0: i32) -> (i32, i32) {
    %c0_i32 = arith.constant 0 : i32
    %c0_i32_0 = arith.constant 0 : i32
    %c0_i32_1 = arith.constant 0 : i32
    return %c0_i32, %c0_i32_0 : i32, i32
  }
  func.func @transform_11(%arg0: i32) -> (i32, i32, i32, i32) {
    %c0_i32 = arith.constant 0 : i32
    %c0_i32_0 = arith.constant 0 : i32
    %c0_i32_1 = arith.constant 0 : i32
    %c0_i32_2 = arith.constant 0 : i32
    return %arg0, %c0_i32, %c0_i32_0, %c0_i32_1 : i32, i32, i32, i32
  }
}

</mosaic_0001>

<bundles_post_ra>
// kernel: cnn_decoder_forward.1
= control target key start
LH: loop header
LB: loop body
LE: loop exit
PB: predicated region body
PF: predicated region fallthrough
CT: control target
= control target key end

     0   :  { %16 = vsyncpa [#allocation3], 0  ;;  %s11494_s0 = inlined_call_operand.hbm [shape: f32[2,128], index: 0, kind: input, shape index: {}]   ;;  %s11495_s1 = inlined_call_operand.hbm [shape: bf16[128,256], index: 1, kind: input, shape index: {}]   ;;  %s11496_s2 = inlined_call_operand.hbm [shape: f32[1,256], index: 2, kind: input, shape index: {}]   ;;  %s11497_s3 = inlined_call_operand.hbm [shape: bf16[256,512], index: 3, kind: input, shape index: {}]   ;;  %s11498_s4 = inlined_call_operand.hbm [shape: f32[1,512], index: 4, kind: input, shape index: {}]   ;;  %s11499_s5 = inlined_call_operand.hbm [shape: bf16[512,4096], index: 5, kind: input, shape index: {}]   ;;  %s11500_s6 = inlined_call_operand.hbm [shape: f32[1,4096], index: 6, kind: input, shape index: {}]   ;;  %s11501_s7 = inlined_call_operand.vmem [shape: f32[32,16], index: 7, kind: input, shape index: {}]   ;;  %s11502_s8 = inlined_call_operand.vmem [shape: f32[8,1], index: 8, kind: input, shape index: {}]   ;;  %s11503_s9 = inlined_call_operand.vmem [shape: f32[30,8], index: 9, kind: input, shape index: {}]   ;;  %s11504_s10 = inlined_call_operand.vmem [shape: f32[3,1], index: 10, kind: input, shape index: {}]   ;;  %s11505_s11 = inlined_call_operand.vmem [shape: f32[2,5,3,200], index: 11, kind: output, shape index: {}]  }
   0x1   :  { %17 = vsyncpa [#allocation5], 0 }
   0x2   :  { %18 = vsyncpa [#allocation8], 0 }
   0x3   :  { %19 = vsyncpa [#allocation11], 0  ;;  %s10791_s17 = smov [#allocation4]  }
   0x4   :  { %s35_s18 = sshll.u32 %s10791_s17, 4  ;;  %s36_s18 = int_to_ptr.vmem [resolvable:$true] %s35_s18 }
   0x5   :  { %s10651_s19 = scalar_lea.vmem %s36_s18, 2048  ;;  %p10656_p1 = scmp.lt.s32.totalorder %s36_s18, %s36_s18 }
   0x6   :  { %p10652_p0 = scmp.ne.s32.totalorder %s36_s18, %s10651_s19  ;;  %p10657_p2 = scmp.lt.s32.totalorder %s10651_s19, %s10651_s19 }
   0x8   :  { %p10658_p3 = por %p10657_p2, %p10656_p1 }
   0xa   :  { %p10659_p4 = pnand %p10658_p3, %p10652_p0 }
   0xc   :  { %10662 = shalt.err (!%p10659_p4)
}
   0xd   :  { %s10792_s20 = smov 128   ;;  %s10793_s21 = smov 8  }
   0xe   :  { %41 = dma.hbm_to_vmem [thread:$0]  %s11495_s1, 2048, %s36_s18, [#allocation5], %s10792_s20, %s10792_s20, %s10793_s21  }
   0xf   :  { %s10794_s24 = smov [#allocation7]  }
  0x10   :  { %s57_s25 = sshll.u32 %s10794_s24, 4  ;;  %s58_s25 = int_to_ptr.vmem [resolvable:$true] %s57_s25 }
  0x11   :  { %s10671_s26 = scalar_lea.vmem %s58_s25, 8192  ;;  %p10676_p6 = scmp.lt.s32.totalorder %s58_s25, %s58_s25 }
  0x12   :  { %p10672_p5 = scmp.ne.s32.totalorder %s58_s25, %s10671_s26  ;;  %p10677_p7 = scmp.lt.s32.totalorder %s10671_s26, %s10671_s26 }
  0x14   :  { %p10678_p8 = por %p10677_p7, %p10676_p6 }
  0x16   :  { %p10679_p9 = pnand %p10678_p8, %p10672_p5 }
  0x18   :  { %10682 = shalt.err (!%p10679_p9)
}
  0x19   :  { %s10795_s27 = smov 256   ;;  %s10796_s28 = smov 16  }
  0x1a   :  { %63 = dma.hbm_to_vmem [thread:$0]  %s11497_s3, 8192, %s58_s25, [#allocation8], %s10795_s27, %s10795_s27, %s10796_s28  }
  0x1b   :  { %s10797_s12 = smov [#allocation10]   ;;  %s10798_s1 = smov [#allocation2]  }
  0x1c   :  { %s79_s13 = sshll.u32 %s10797_s12, 4  ;;  %s26_s14 = sshll.u32 %s10798_s1, 4  ;;  %s80_s13 = int_to_ptr.vmem [resolvable:$true] %s79_s13  ;;  %s27_s14 = int_to_ptr.vmem [resolvable:$true] %s26_s14 }
  0x1d   :  { %s10691_s15 = scalar_lea.vmem %s80_s13, 131072  ;;  %p10696_p11 = scmp.lt.s32.totalorder %s80_s13, %s80_s13 }
  0x1e   :  { %p10692_p10 = scmp.ne.s32.totalorder %s80_s13, %s10691_s15  ;;  %p10697_p12 = scmp.lt.s32.totalorder %s10691_s15, %s10691_s15 }
  0x20   :  { %p10698_p13 = por %p10697_p12, %p10696_p11 }
  0x22   :  { %p10699_p0 = pnand %p10698_p13, %p10692_p10 }
  0x24   :  { %10702 = shalt.err (!%p10699_p0)
}
  0x25   :  { %s10799_s16 = smov 2048   ;;  %s10711_s3 = scalar_lea.vmem %s27_s14, 32 }
  0x26   :  { %85 = dma.hbm_to_vmem [thread:$0]  %s11499_s5, 131072, %s80_s13, [#allocation11], %s10799_s16, %s10799_s16, %s10792_s20  }
  0x27   :  { %p10712_p1 = scmp.ne.s32.totalorder %s27_s14, %s10711_s3  ;;  %p10716_p2 = scmp.lt.s32.totalorder %s27_s14, %s27_s14 }
  0x28   :  { %p10717_p3 = scmp.lt.s32.totalorder %s10711_s3, %s10711_s3 }
  0x2a   :  { %p10718_p4 = por %p10717_p3, %p10716_p2 }
  0x2c   :  { %p10719_p5 = pnand %p10718_p4, %p10712_p1 }
  0x2e   :  { %10722 = shalt.err (!%p10719_p5)
}
  0x2f   :  { %29 = dma.hbm_to_vmem [thread:$0]  %s11494_s0, 32, %s27_s14, [#allocation3]  }
  0x30   :  { %s10800_s22 = smov [#allocation6]   ;;  %s10801_s24 = smov [#allocation9]  }
  0x31   :  { %s48_s23 = sshll.u32 %s10800_s22, 4  ;;  %s70_s25 = sshll.u32 %s10801_s24, 4  ;;  %s49_s23 = int_to_ptr.vmem [resolvable:$true] %s48_s23  ;;  %s71_s25 = int_to_ptr.vmem [resolvable:$true] %s70_s25 }
  0x32   :  { %s10731_s26 = scalar_lea.vmem %s49_s23, 32  ;;  %p10736_p7 = scmp.lt.s32.totalorder %s49_s23, %s49_s23 }
  0x33   :  { %p10732_p6 = scmp.ne.s32.totalorder %s49_s23, %s10731_s26  ;;  %p10737_p8 = scmp.lt.s32.totalorder %s10731_s26, %s10731_s26 }
  0x35   :  { %p10738_p9 = por %p10737_p8, %p10736_p7 }
  0x37   :  { %p10739_p10 = pnand %p10738_p9, %p10732_p6 }
  0x39   :  { %10742 = shalt.err (!%p10739_p10)
}
  0x3a   :  { %51 = dma.hbm_to_vmem [thread:$0]  %s11496_s2, 32, %s49_s23, [#allocation5]  }
  0x3b   :  { %s10751_s27 = scalar_lea.vmem %s71_s25, 64  ;;  %p10756_p12 = scmp.lt.s32.totalorder %s71_s25, %s71_s25 }
  0x3c   :  { %p10752_p11 = scmp.ne.s32.totalorder %s71_s25, %s10751_s27  ;;  %p10757_p13 = scmp.lt.s32.totalorder %s10751_s27, %s10751_s27 }
  0x3e   :  { %p10758_p0 = por %p10757_p13, %p10756_p12 }
  0x40   :  { %p10759_p1 = pnand %p10758_p0, %p10752_p11 }
  0x42   :  { %10762 = shalt.err (!%p10759_p1)
}
  0x43   :  { %73 = dma.hbm_to_vmem [thread:$0]  %s11498_s4, 64, %s71_s25, [#allocation8]  }
  0x44   :  { %s10802_s29 = smov [#allocation12]  }
  0x45   :  { %s92_s30 = sshll.u32 %s10802_s29, 4  ;;  %s93_s30 = int_to_ptr.vmem [resolvable:$true] %s92_s30 }
  0x46   :  { %s10771_s12 = scalar_lea.vmem %s93_s30, 512  ;;  %p10776_p3 = scmp.lt.s32.totalorder %s93_s30, %s93_s30 }
  0x47   :  { %p10772_p2 = scmp.ne.s32.totalorder %s93_s30, %s10771_s12  ;;  %p10777_p4 = scmp.lt.s32.totalorder %s10771_s12, %s10771_s12 }
  0x49   :  { %p10778_p5 = por %p10777_p4, %p10776_p3 }
  0x4b   :  { %p10779_p6 = pnand %p10778_p5, %p10772_p2 }
  0x4d   :  { %10782 = shalt.err (!%p10779_p6)
}
  0x4e   :  { %95 = dma.hbm_to_vmem [thread:$0]  %s11500_s6, 512, %s93_s30, [#allocation11]  }
  0x4f   :  { %10783 = dma.done.wait [#allocation3], 32  }
  0x50   :  { %10784 = vsyncadd [#allocation3], 4294967264 }
  0x51   :  { %10785 = dma.done.wait [#allocation5], 2080  }
  0x52   :  { %10786 = vsyncadd [#allocation5], 4294965216 }
  0x53   :  { %10787 = dma.done.wait [#allocation8], 8256  }
  0x54   :  { %10788 = vsyncadd [#allocation8], 4294959040 }
  0x55   :  { %10789 = dma.done.wait [#allocation11], 131584  }
  0x56   :  { %10790 = vsyncadd [#allocation11], 4294835712  ;;  %v10803_v0 = vmov 0   ;;  %v10520_v1 = vld [vmem:[#allocation4 + $0x74] ss:$8 sps:$4 sm:$0xff]   ;;  %vm8527_vm0 = vcmask 1040384  }
  0x57   :  { %268 = vmatprep.mubr.bf16.mxu0 %v10803_v0  ;;  %10519 = vset.pattern.permute.xlu0 %v10803_v0  ;;  %v10522_v2 = vld [vmem:[#allocation4 + $0x70] ss:$8 sps:$4 sm:$0xff]   ;;  %v10523_v3 = vld [vmem:[#allocation4 + $0x64] ss:$8 sps:$4 sm:$0xff]   ;;  %v10525_v4 = vld [vmem:[#allocation4 + $0x60] ss:$8 sps:$4 sm:$0xff]  }
  0x58   :  { %236 = vmatprep.subr.bf16.mxu0 %v10520_v1  ;;  %v10526_v5 = vld [vmem:[#allocation4 + $0x54] ss:$8 sps:$4 sm:$0xff]   ;;  %v10528_v6 = vld [vmem:[#allocation4 + $0x50] ss:$8 sps:$4 sm:$0xff]   ;;  %v10529_v7 = vld [vmem:[#allocation4 + $0x44] ss:$8 sps:$4 sm:$0xff]  }
  0x59   :  { %237 = vmatpush1.bf16.msra.mxu0 %v10522_v2  ;;  %v10531_v8 = vld [vmem:[#allocation4 + $0x40] ss:$8 sps:$4 sm:$0xff]   ;;  %v10532_v10 = vld [vmem:[#allocation4 + $0x34] ss:$8 sps:$4 sm:$0xff]   ;;  %v10534_v13 = vld [vmem:[#allocation4 + $0x30] ss:$8 sps:$4 sm:$0xff]  }
  0x5a   :  { %238 = vmatprep.subr.bf16.mxu0 %v10523_v3  ;;  %v10544_v9 = vld [vmem:[#allocation7 + $0xe4] ss:$16 sps:$4 sm:$0xff]   ;;  %v10549_v11 = vld [vmem:[#allocation7 + $0xe0] ss:$16 sps:$4 sm:$0xff]   ;;  %v126_v26 = vld [vmem:[#allocation2] sm:$0x3] }
  0x5b   :  { %687 = vmatprep.subr.bf16.mxu1 %v10544_v9  ;;  %v10550_v12 = vld [vmem:[#allocation7 + $0xc4] ss:$16 sps:$4 sm:$0xff]   ;;  %v10555_v15 = vld [vmem:[#allocation7 + $0xc0] ss:$16 sps:$4 sm:$0xff]   ;;  %v10548_v27 = vld [vmem:[#allocation7 + $0xec] ss:$16 sps:$4 sm:$0xff]   ;;  %v127_v30 = vpack.c.bf16 %v126_v26, %v126_v26 }
  0x5c   :  { %v10535_v14 = vld [vmem:[#allocation4 + $0x24] ss:$8 sps:$4 sm:$0xff]   ;;  %688 = vmatpush1.bf16.msra.mxu1 %v10549_v11  ;;  %v10537_v17 = vld [vmem:[#allocation4 + $0x20] ss:$8 sps:$4 sm:$0xff]   ;;  %v10538_v18 = vld [vmem:[#allocation4 + $0x14] ss:$8 sps:$4 sm:$0xff]  }
  0x5d   :  { %239 = vmatpush1.bf16.msra.mxu0 %v10525_v4  ;;  %689 = vmatprep.subr.bf16.mxu1 %v10550_v12  ;;  %v10556_v16 = vld [vmem:[#allocation7 + $0xa4] ss:$16 sps:$4 sm:$0xff]   ;;  %v10561_v19 = vld [vmem:[#allocation7 + $0xa0] ss:$16 sps:$4 sm:$0xff]   ;;  %v10546_v31 = vld [vmem:[#allocation7 + $0xe8] ss:$16 sps:$4 sm:$0xff]  }
  0x5e   :  { %240 = vmatprep.subr.bf16.mxu0 %v10526_v5  ;;  %v10562_v20 = vld [vmem:[#allocation7 + $0x84] ss:$16 sps:$4 sm:$0xff]   ;;  %v10567_v23 = vld [vmem:[#allocation7 + $0x80] ss:$16 sps:$4 sm:$0xff]   ;;  %v10554_v32 = vld [vmem:[#allocation7 + $0xcc] ss:$16 sps:$4 sm:$0xff]  }
  0x5f   :  { %v10540_v21 = vld [vmem:[#allocation4 + $0x10] ss:$8 sps:$4 sm:$0xff]   ;;  %v10541_v22 = vld [vmem:[#allocation4 + $0x4] ss:$8 sps:$4 sm:$0xff]   ;;  %v10543_v25 = vld [vmem:[#allocation4] ss:$8 sps:$4 sm:$0xff]  }
  0x60   :  { %690 = vmatpush1.bf16.msra.mxu1 %v10555_v15  ;;  %v10568_v24 = vld [vmem:[#allocation7 + $0x64] ss:$16 sps:$4 sm:$0xff]   ;;  %v10573_v28 = vld [vmem:[#allocation7 + $0x60] ss:$16 sps:$4 sm:$0xff]   ;;  %v10552_v35 = vld [vmem:[#allocation7 + $0xc8] ss:$16 sps:$4 sm:$0xff]  }
  0x61   :  { %241 = vmatpush1.bf16.msra.mxu0 %v10528_v6  ;;  %691 = vmatprep.subr.bf16.mxu1 %v10556_v16  ;;  %v10574_v29 = vld [vmem:[#allocation7 + $0x44] ss:$16 sps:$4 sm:$0xff]   ;;  %v10579_v33 = vld [vmem:[#allocation7 + $0x40] ss:$16 sps:$4 sm:$0xff]   ;;  %v10560_v36 = vld [vmem:[#allocation7 + $0xac] ss:$16 sps:$4 sm:$0xff]  }
  0x62   :  { %242 = vmatprep.subr.bf16.mxu0 %v10529_v7  ;;  %v10580_v34 = vld [vmem:[#allocation7 + $0x24] ss:$16 sps:$4 sm:$0xff]   ;;  %v10585_v37 = vld [vmem:[#allocation7 + $0x20] ss:$16 sps:$4 sm:$0xff]   ;;  %v10558_v39 = vld [vmem:[#allocation7 + $0xa8] ss:$16 sps:$4 sm:$0xff]  }
  0x63   :  { %v10586_v38 = vld [vmem:[#allocation7 + $0x4] ss:$16 sps:$4 sm:$0xff]   ;;  %v10566_v40 = vld [vmem:[#allocation7 + $0x8c] ss:$16 sps:$4 sm:$0xff]   ;;  %v10591_v41 = vld [vmem:[#allocation7] ss:$16 sps:$4 sm:$0xff]  }
  0x64   :  { %692 = vmatpush1.bf16.msra.mxu1 %v10561_v19  ;;  %v10592_v42 = vld [vmem:[#allocation7 + $0x1e4] ss:$16 sps:$4 sm:$0xff]   ;;  %v10564_v43 = vld [vmem:[#allocation7 + $0x88] ss:$16 sps:$4 sm:$0xff]   ;;  %v10572_v44 = vld [vmem:[#allocation7 + $0x6c] ss:$16 sps:$4 sm:$0xff]  }
  0x65   :  { %243 = vmatpush1.bf16.msra.mxu0 %v10531_v8  ;;  %693 = vmatprep.subr.bf16.mxu1 %v10562_v20  ;;  %v10597_v45 = vld [vmem:[#allocation7 + $0x1e0] ss:$16 sps:$4 sm:$0xff]   ;;  %v10598_v46 = vld [vmem:[#allocation7 + $0x1c4] ss:$16 sps:$4 sm:$0xff]   ;;  %v10570_v47 = vld [vmem:[#allocation7 + $0x68] ss:$16 sps:$4 sm:$0xff]  }
  0x66   :  { %244 = vmatprep.subr.bf16.mxu0 %v10532_v10  ;;  %v10603_v48 = vld [vmem:[#allocation7 + $0x1c0] ss:$16 sps:$4 sm:$0xff]   ;;  %v10578_v49 = vld [vmem:[#allocation7 + $0x4c] ss:$16 sps:$4 sm:$0xff]   ;;  %v10604_v50 = vld [vmem:[#allocation7 + $0x1a4] ss:$16 sps:$4 sm:$0xff]  }
  0x67   :  { %v10576_v51 = vld [vmem:[#allocation7 + $0x48] ss:$16 sps:$4 sm:$0xff]   ;;  %v10609_v52 = vld [vmem:[#allocation7 + $0x1a0] ss:$16 sps:$4 sm:$0xff]   ;;  %v10584_v53 = vld [vmem:[#allocation7 + $0x2c] ss:$16 sps:$4 sm:$0xff]  }
  0x68   :  { %694 = vmatpush1.bf16.msra.mxu1 %v10567_v23  ;;  %v10610_v54 = vld [vmem:[#allocation7 + $0x184] ss:$16 sps:$4 sm:$0xff]   ;;  %v10582_v55 = vld [vmem:[#allocation7 + $0x28] ss:$16 sps:$4 sm:$0xff]   ;;  %v10615_v56 = vld [vmem:[#allocation7 + $0x180] ss:$16 sps:$4 sm:$0xff]  }
  0x69   :  { %245 = vmatpush1.bf16.msra.mxu0 %v10534_v13  ;;  %695 = vmatprep.subr.bf16.mxu1 %v10568_v24  ;;  %v10590_v57 = vld [vmem:[#allocation7 + $0xc] ss:$16 sps:$4 sm:$0xff]   ;;  %v10616_v58 = vld [vmem:[#allocation7 + $0x164] ss:$16 sps:$4 sm:$0xff]   ;;  %v10588_v59 = vld [vmem:[#allocation7 + $0x8] ss:$16 sps:$4 sm:$0xff]  }
  0x6a   :  { %246 = vmatprep.subr.bf16.mxu0 %v10535_v14  ;;  %v10621_v60 = vld [vmem:[#allocation7 + $0x160] ss:$16 sps:$4 sm:$0xff]   ;;  %v10596_v61 = vld [vmem:[#allocation7 + $0x1ec] ss:$16 sps:$4 sm:$0xff]   ;;  %v10622_v62 = vld [vmem:[#allocation7 + $0x144] ss:$16 sps:$4 sm:$0xff]  }
  0x6b   :  { %v10594_v63 = vld [vmem:[#allocation7 + $0x1e8] ss:$16 sps:$4 sm:$0xff]   ;;  %v10627_v0 = vld [vmem:[#allocation7 + $0x140] ss:$16 sps:$4 sm:$0xff]   ;;  %v10602_v1 = vld [vmem:[#allocation7 + $0x1cc] ss:$16 sps:$4 sm:$0xff]  }
  0x6c   :  { %696 = vmatpush1.bf16.msra.mxu1 %v10573_v28  ;;  %v10600_v2 = vld [vmem:[#allocation7 + $0x1c8] ss:$16 sps:$4 sm:$0xff]   ;;  %v10608_v3 = vld [vmem:[#allocation7 + $0x1ac] ss:$16 sps:$4 sm:$0xff]   ;;  %v10628_v11 = vld [vmem:[#allocation7 + $0x124] ss:$16 sps:$4 sm:$0xff]  }
  0x6d   :  { %247 = vmatpush1.bf16.msra.mxu0 %v10537_v17  ;;  %697 = vmatprep.subr.bf16.mxu1 %v10574_v29  ;;  %v10606_v4 = vld [vmem:[#allocation7 + $0x1a8] ss:$16 sps:$4 sm:$0xff]   ;;  %v10614_v5 = vld [vmem:[#allocation7 + $0x18c] ss:$16 sps:$4 sm:$0xff]   ;;  %v10633_v14 = vld [vmem:[#allocation7 + $0x120] ss:$16 sps:$4 sm:$0xff]  }
  0x6e   :  { %248 = vmatprep.subr.bf16.mxu0 %v10538_v18  ;;  %v10612_v6 = vld [vmem:[#allocation7 + $0x188] ss:$16 sps:$4 sm:$0xff]   ;;  %v10620_v7 = vld [vmem:[#allocation7 + $0x16c] ss:$16 sps:$4 sm:$0xff]   ;;  %v10634_v15 = vld [vmem:[#allocation7 + $0x104] ss:$16 sps:$4 sm:$0xff]  }
  0x6f   :  { %v10618_v8 = vld [vmem:[#allocation7 + $0x168] ss:$16 sps:$4 sm:$0xff]   ;;  %v10626_v9 = vld [vmem:[#allocation7 + $0x14c] ss:$16 sps:$4 sm:$0xff]   ;;  %v10639_v18 = vld [vmem:[#allocation7 + $0x100] ss:$16 sps:$4 sm:$0xff]  }
  0x70   :  { %698 = vmatpush1.bf16.msra.mxu1 %v10579_v33  ;;  %v10624_v10 = vld [vmem:[#allocation7 + $0x148] ss:$16 sps:$4 sm:$0xff]   ;;  %v10632_v12 = vld [vmem:[#allocation7 + $0x12c] ss:$16 sps:$4 sm:$0xff]   ;;  %vm8530_vm1 = vcmask 1041408   ;;  %vm8533_vm2 = vcmask 1042432  }
  0x71   :  { %249 = vmatpush1.bf16.msra.mxu0 %v10540_v21  ;;  %699 = vmatprep.subr.bf16.mxu1 %v10580_v34  ;;  %v10630_v13 = vld [vmem:[#allocation7 + $0x128] ss:$16 sps:$4 sm:$0xff]   ;;  %v10638_v16 = vld [vmem:[#allocation7 + $0x10c] ss:$16 sps:$4 sm:$0xff]   ;;  %vm8536_vm3 = vcmask 1043456   ;;  %vm8539_vm4 = vcmask 1044480  }
  0x72   :  { %250 = vmatprep.subr.bf16.mxu0 %v10541_v22  ;;  %v10636_v17 = vld [vmem:[#allocation7 + $0x108] ss:$16 sps:$4 sm:$0xff]   ;;  %vm8542_vm5 = vcmask 1045504   ;;  %vm8545_vm6 = vcmask 1046528   ;;  %vm8562_vm7 = vcmask 130048   ;;  %s10805_s3 = smov 1  }
  0x73   :  { %v1001_v19 = vld [vmem:[#allocation10 + $0x700] sm:$0xff]  ;;  %s10807_s22 = smov 3   ;;  %vm8670_vm8 = vcmask 7168   ;;  %vm8683_vm9 = vcmask 15360   ;;  %vm8696_vm10 = vcmask 23552   ;;  %vm8712_vm11 = vcmask 64512  }
  0x74   :  { %700 = vmatpush1.bf16.msra.mxu1 %v10585_v37  ;;  %v1017_v20 = vld [vmem:[#allocation10 + $0x780] sm:$0xff]  ;;  %vm8814_vm12 = vcmask 580608   ;;  %vm8867_vm13 = vcmask 587780   ;;  %vm8882_vm14 = vcmask 1044484  }
  0x75   :  { %251 = vmatpush1.bf16.msra.mxu0 %v10543_v25  ;;  %701 = vmatprep.subr.bf16.mxu1 %v10586_v38  ;;  %v1513_v21 = vld [vmem:[#allocation10 + $0x1700] sm:$0xff]  ;;  %v9671_v22 = vcombine.low %v1001_v19, %v1017_v20  ;;  %v9672_v23 = vcombine.high %v1001_v19, %v1017_v20  ;;  %vm11391_vm15 = vmor %vm8867_vm13, %vm8533_vm2 }
  0x76   :  { %728 = vmatprep.subr.bf16.mxu0 %v10548_v27  ;;  %v1529_v24 = vld [vmem:[#allocation10 + $0x1780] sm:$0xff]  ;;  %v146_v27 = vlaneseq }
  0x77   :  { %v10183_v25 = vcombine.low %v1513_v21, %v1529_v24  ;;  %v10184_v26 = vcombine.high %v1513_v21, %v1529_v24  ;;  %v825_v19 = vld [vmem:[#allocation10 + $0x180] sm:$0xff] }
  0x78   :  { %269 = vmatmul.mubr.bf16.vlgmr.msra.gmra.mxu0 %v127_v30  ;;  %702 = vmatpush1.bf16.msra.mxu1 %v10591_v41  ;;  %v10892_v28 = vshrl.u32 %v146_v27, 7  ;;  %v144_v30 = vld [vmem:[#allocation6] sm:$0x3]  ;;  %v1321_v20 = vld [vmem:[#allocation10 + $0x1100] sm:$0xff] }
  0x79   :  { %729 = vmatpush1.bf16.msra.mxu0 %v10546_v31  ;;  %703 = vmatprep.subr.bf16.mxu1 %v10592_v42  ;;  %v985_v42 = vld [vmem:[#allocation10 + $0x680] sm:$0xff] }
  0x7a   :  { %730 = vmatprep.subr.bf16.mxu0 %v10554_v32  ;;  %v10895_v29 = vsub.s32 0, %v10892_v28  ;;  %v10898_v31 = vsub.s32 1, %v10892_v28  ;;  %v1337_v21 = vld [vmem:[#allocation10 + $0x1180] sm:$0xff] }
  0x7b   :  { %v793_v27 = vld [vmem:[#allocation10 + $0x80] sm:$0xff] }
  0x7c   :  { %704 = vmatpush2.bf16.msra.mxu1 %v10597_v45  ;;  %v149_v32 = vrot.slane %v144_v30, %v10895_v29  ;;  %v153_v33 = vrot.slane %v144_v30, %v10898_v31  ;;  %v1289_v30 = vld [vmem:[#allocation10 + $0x1000] sm:$0xff] }
  0x7d   :  { %731 = vmatpush1.bf16.msra.mxu0 %v10552_v35  ;;  %705 = vmatprep.subr.bf16.mxu1 %v10598_v46 }
  0x7e   :  { %732 = vmatprep.subr.bf16.mxu0 %v10560_v36 }
  0x80   :  { %706 = vmatpush2.bf16.msra.mxu1 %v10603_v48 }
  0x81   :  { %733 = vmatpush1.bf16.msra.mxu0 %v10558_v39  ;;  %707 = vmatprep.subr.bf16.mxu1 %v10604_v50  ;;  %v937_v50 = vld [vmem:[#allocation10 + $0x500] sm:$0xff] }
  0x82   :  { %734 = vmatprep.subr.bf16.mxu0 %v10566_v40  ;;  %v969_v40 = vld [vmem:[#allocation10 + $0x600] sm:$0xff] }
  0x83   :  { %v9640_v48 = vcombine.high %v969_v40, %v985_v42 }
  0x84   :  { %708 = vmatpush2.bf16.msra.mxu1 %v10609_v52  ;;  %v1449_v52 = vld [vmem:[#allocation10 + $0x1500] sm:$0xff] }
  0x85   :  { %735 = vmatpush1.bf16.msra.mxu0 %v10564_v43  ;;  %709 = vmatprep.subr.bf16.mxu1 %v10610_v54  ;;  %v1481_v43 = vld [vmem:[#allocation10 + $0x1600] sm:$0xff]  ;;  %v9639_v54 = vcombine.low %v969_v40, %v985_v42 }
  0x86   :  { %736 = vmatprep.subr.bf16.mxu0 %v10572_v44  ;;  %v1497_v44 = vld [vmem:[#allocation10 + $0x1680] sm:$0xff] }
  0x87   :  { %v1785_v40 = vld [vmem:[#allocation10 + $0x1f80] sm:$0xff] }
  0x88   :  { %710 = vmatpush2.bf16.msra.mxu1 %v10615_v56 }
  0x89   :  { %737 = vmatpush1.bf16.msra.mxu0 %v10570_v47  ;;  %711 = vmatprep.subr.bf16.mxu1 %v10616_v58  ;;  %v905_v58 = vld [vmem:[#allocation10 + $0x400] sm:$0xff] }
  0x8a   :  { %738 = vmatprep.subr.bf16.mxu0 %v10578_v49  ;;  %v10152_v49 = vcombine.high %v1481_v43, %v1497_v44 }
  0x8c   :  { %712 = vmatpush2.bf16.msra.mxu1 %v10621_v60  ;;  %v1417_v60 = vld [vmem:[#allocation10 + $0x1400] sm:$0xff] }
  0x8d   :  { %739 = vmatpush1.bf16.msra.mxu0 %v10576_v51  ;;  %713 = vmatprep.subr.bf16.mxu1 %v10622_v62  ;;  %v953_v51 = vld [vmem:[#allocation10 + $0x580] sm:$0xff] }
  0x8e   :  { %740 = vmatprep.subr.bf16.mxu0 %v10584_v53  ;;  %v1465_v53 = vld [vmem:[#allocation10 + $0x1580] sm:$0xff]  ;;  %v9608_v56 = vcombine.high %v937_v50, %v953_v51  ;;  %v9607_v62 = vcombine.low %v937_v50, %v953_v51 }
  0x90   :  { %714 = vmatpush2.bf16.msra.mxu1 %v10627_v0 }
  0x91   :  { %741 = vmatpush1.bf16.msra.mxu0 %v10582_v55  ;;  %715 = vmatprep.subr.bf16.mxu1 %v10628_v11  ;;  %v10151_v55 = vcombine.low %v1481_v43, %v1497_v44  ;;  %v857_v11 = vld [vmem:[#allocation10 + $0x280] sm:$0xff] }
  0x92   :  { %742 = vmatprep.subr.bf16.mxu0 %v10590_v57  ;;  %v10120_v57 = vcombine.high %v1449_v52, %v1465_v53 }
  0x94   :  { %716 = vmatpush2.bf16.msra.mxu1 %v10633_v14 }
  0x95   :  { %743 = vmatpush1.bf16.msra.mxu0 %v10588_v59  ;;  %717 = vmatprep.subr.bf16.mxu1 %v10634_v15  ;;  %v921_v59 = vld [vmem:[#allocation10 + $0x480] sm:$0xff] }
  0x96   :  { %744 = vmatprep.subr.bf16.mxu0 %v10596_v61  ;;  %v1433_v61 = vld [vmem:[#allocation10 + $0x1480] sm:$0xff]  ;;  %v9576_v0 = vcombine.high %v905_v58, %v921_v59 }
  0x98   :  { %718 = vmatpush2.bf16.msra.mxu1 %v10639_v18  ;;  %v809_v18 = vld [vmem:[#allocation10 + $0x100] sm:$0xff] }
  0x99   :  { %745 = vmatpush2.bf16.msra.mxu0 %v10594_v63  ;;  %7089 = vmatprep.subr.bf16.mxu1 %v9672_v23  ;;  %v10119_v63 = vcombine.low %v1449_v52, %v1465_v53  ;;  %v9480_v24 = vcombine.high %v809_v18, %v825_v19  ;;  %v1193_v53 = vld [vmem:[#allocation10 + $0xd00] sm:$0xff] }
  0x9a   :  { %746 = vmatprep.subr.bf16.mxu0 %v10602_v1  ;;  %v10088_v1 = vcombine.high %v1417_v60, %v1433_v61 }
  0x9d   :  { %747 = vmatpush2.bf16.msra.mxu0 %v10600_v2  ;;  %v873_v2 = vld [vmem:[#allocation10 + $0x300] sm:$0xff] }
  0x9e   :  { %748 = vmatprep.subr.bf16.mxu0 %v10608_v3  ;;  %v889_v3 = vld [vmem:[#allocation10 + $0x380] sm:$0xff] }
  0x9f   :  { %v9543_v14 = vcombine.low %v873_v2, %v889_v3 }
  0xa1   :  { %749 = vmatpush2.bf16.msra.mxu0 %v10606_v4  ;;  %v1385_v4 = vld [vmem:[#allocation10 + $0x1300] sm:$0xff] }
  0xa2   :  { %750 = vmatprep.subr.bf16.mxu0 %v10614_v5  ;;  %v1401_v5 = vld [vmem:[#allocation10 + $0x1380] sm:$0xff] }
  0xa3   :  { %v10055_v15 = vcombine.low %v1385_v4, %v1401_v5 }
  0xa5   :  { %751 = vmatpush2.bf16.msra.mxu0 %v10612_v6  ;;  %v9575_v6 = vcombine.low %v905_v58, %v921_v59 }
  0xa6   :  { %752 = vmatprep.subr.bf16.mxu0 %v10620_v7  ;;  %v10087_v7 = vcombine.low %v1417_v60, %v1433_v61  ;;  %v1161_v61 = vld [vmem:[#allocation10 + $0xc00] sm:$0xff] }
  0xa9   :  { %753 = vmatpush2.bf16.msra.mxu0 %v10618_v8  ;;  %v9544_v8 = vcombine.high %v873_v2, %v889_v3 }
  0xaa   :  { %754 = vmatprep.subr.bf16.mxu0 %v10626_v9  ;;  %v10056_v9 = vcombine.high %v1385_v4, %v1401_v5  ;;  %v1129_v5 = vld [vmem:[#allocation10 + $0xb00] sm:$0xff] }
  0xad   :  { %755 = vmatpush2.bf16.msra.mxu0 %v10624_v10  ;;  %v841_v10 = vld [vmem:[#allocation10 + $0x200] sm:$0xff] }
  0xae   :  { %756 = vmatprep.subr.bf16.mxu0 %v10632_v12  ;;  %v1353_v12 = vld [vmem:[#allocation10 + $0x1200] sm:$0xff] }
  0xb1   :  { %757 = vmatpush2.bf16.msra.mxu0 %v10630_v13  ;;  %v1369_v13 = vld [vmem:[#allocation10 + $0x1280] sm:$0xff] }
  0xb2   :  { %758 = vmatprep.subr.bf16.mxu0 %v10638_v16  ;;  %v9512_v16 = vcombine.high %v841_v10, %v857_v11  ;;  %v10023_v23 = vcombine.low %v1353_v12, %v1369_v13 }
  0xb5   :  { %759 = vmatpush2.bf16.msra.mxu0 %v10636_v17  ;;  %v10024_v17 = vcombine.high %v1353_v12, %v1369_v13  ;;  %v1097_v13 = vld [vmem:[#allocation10 + $0xa00] sm:$0xff] }
  0xb6   :  { %7130 = vmatprep.subr.bf16.mxu0 %v10184_v26  ;;  %v777_v26 = vld [vmem:[#allocation10] sm:$0xff] }
 0x138   :  { %v270_v34 = vpop.f32.mrf.mxu0 }
 0x139   :  { %v271_v35 = vadd.f32 %v270_v34, %v149_v32  ;;  %v1305_v32 = vld [vmem:[#allocation10 + $0x1080] sm:$0xff]  ;;  %v9991_v34 = vcombine.low %v1321_v20, %v1337_v21 }
 0x13a   :  { %v272_v36 = vpop.f32.mrf.mxu0  ;;  %v9959_v42 = vcombine.low %v1289_v30, %v1305_v32 }
 0x13b   :  { %v273_v37 = vadd.f32 %v272_v36, %v153_v33  ;;  %v277_v38 = vmax.f32 %v271_v35, 0.0  ;;  %v9479_v33 = vcombine.low %v809_v18, %v825_v19  ;;  %v9448_v35 = vcombine.high %v777_v26, %v793_v27 }
 0x13c   :  { %v274_v39 = vpop.f32.mrf.mxu0  ;;  %v9960_v36 = vcombine.high %v1289_v30, %v1305_v32 }
 0x13d   :  { %v278_v41 = vmax.f32 %v273_v37, 0.0  ;;  %v279_v47 = vpack.c.bf16 %v277_v38, %v277_v38  ;;  %v1257_v37 = vld [vmem:[#allocation10 + $0xf00] sm:$0xff] }
 0x13e   :  { %v275_v45 = vpop.f32.mrf.mxu0  ;;  %v1273_v38 = vld [vmem:[#allocation10 + $0xf80] sm:$0xff] }
 0x13f   :  { %v280_v46 = vpack.c.bf16 %v278_v41, %v278_v41  ;;  %v1769_v39 = vld [vmem:[#allocation10 + $0x1f00] sm:$0xff]  ;;  %v9447_v41 = vcombine.low %v777_v26, %v793_v27  ;;  %v9928_v43 = vcombine.high %v1257_v37, %v1273_v38 }
 0x140   :  { %v10440_v44 = vcombine.high %v1769_v39, %v1785_v40  ;;  %v1225_v45 = vld [vmem:[#allocation10 + $0xe00] sm:$0xff]  ;;  %v10439_v50 = vcombine.low %v1769_v39, %v1785_v40 }
 0x141   :  { %719 = vmatprep.mubr.bf16.mxu1 %v280_v46  ;;  %760 = vmatprep.mubr.bf16.mxu0 %v280_v46  ;;  %v1241_v46 = vld [vmem:[#allocation10 + $0xe80] sm:$0xff] }
 0x142   :  { %720 = vmatmul.mubr.bf16.vlgmr.msra.gmra.mxu1 %v279_v47  ;;  %761 = vmatmul.mubr.bf16.vlgmr.msra.gmra.mxu0 %v279_v47  ;;  %v1737_v47 = vld [vmem:[#allocation10 + $0x1e00] sm:$0xff]  ;;  %v9896_v51 = vcombine.high %v1225_v45, %v1241_v46 }
 0x143   :  { %7090 = vmatpush1.bf16.msra.mxu1 %v9671_v22  ;;  %7131 = vmatpush1.bf16.msra.mxu0 %v10183_v25  ;;  %v9511_v22 = vcombine.low %v841_v10, %v857_v11  ;;  %v9992_v25 = vcombine.high %v1321_v20, %v1337_v21  ;;  %v1593_v27 = vld [vmem:[#allocation10 + $0x1980] sm:$0xff] }
 0x144   :  { %7091 = vmatprep.subr.bf16.mxu1 %v9640_v48  ;;  %7132 = vmatprep.subr.bf16.mxu0 %v10152_v49  ;;  %v1753_v48 = vld [vmem:[#allocation10 + $0x1e80] sm:$0xff]  ;;  %v9927_v49 = vcombine.low %v1257_v37, %v1273_v38 }
 0x145   :  { %v10408_v52 = vcombine.high %v1737_v47, %v1753_v48  ;;  %v10407_v58 = vcombine.low %v1737_v47, %v1753_v48  ;;  %v1561_v38 = vld [vmem:[#allocation10 + $0x1880] sm:$0xff] }
 0x147   :  { %7092 = vmatpush1.bf16.msra.mxu1 %v9639_v54  ;;  %7133 = vmatpush1.bf16.msra.mxu0 %v10151_v55  ;;  %v1209_v54 = vld [vmem:[#allocation10 + $0xd80] sm:$0xff] }
 0x148   :  { %7093 = vmatprep.subr.bf16.mxu1 %v9608_v56  ;;  %7134 = vmatprep.subr.bf16.mxu0 %v10120_v57  ;;  %v1705_v55 = vld [vmem:[#allocation10 + $0x1d00] sm:$0xff]  ;;  %v9895_v57 = vcombine.low %v1225_v45, %v1241_v46  ;;  %v9864_v59 = vcombine.high %v1193_v53, %v1209_v54  ;;  %v1530_v46 = vld [vmem:[#allocation10 + $0x1788] sm:$0xff] }
 0x149   :  { %v1721_v56 = vld [vmem:[#allocation10 + $0x1d80] sm:$0xff] }
 0x14a   :  { %v10376_v60 = vcombine.high %v1705_v55, %v1721_v56  ;;  %v10375_v2 = vcombine.low %v1705_v55, %v1721_v56 }
 0x14b   :  { %7094 = vmatpush1.bf16.msra.mxu1 %v9607_v62  ;;  %7135 = vmatpush1.bf16.msra.mxu0 %v10119_v63  ;;  %v1177_v62 = vld [vmem:[#allocation10 + $0xc80] sm:$0xff] }
 0x14c   :  { %7095 = vmatprep.subr.bf16.mxu1 %v9576_v0  ;;  %7136 = vmatprep.subr.bf16.mxu0 %v10088_v1  ;;  %v1673_v63 = vld [vmem:[#allocation10 + $0x1c00] sm:$0xff]  ;;  %v9863_v1 = vcombine.low %v1193_v53, %v1209_v54  ;;  %v9832_v3 = vcombine.high %v1161_v61, %v1177_v62 }
 0x14d   :  { %v1689_v0 = vld [vmem:[#allocation10 + $0x1c80] sm:$0xff] }
 0x14e   :  { %v10344_v4 = vcombine.high %v1673_v63, %v1689_v0  ;;  %v10343_v10 = vcombine.low %v1673_v63, %v1689_v0 }
 0x14f   :  { %7096 = vmatpush1.bf16.msra.mxu1 %v9575_v6  ;;  %7137 = vmatpush1.bf16.msra.mxu0 %v10087_v7  ;;  %v1145_v6 = vld [vmem:[#allocation10 + $0xb80] sm:$0xff] }
 0x150   :  { %7097 = vmatprep.subr.bf16.mxu1 %v9544_v8  ;;  %7138 = vmatprep.subr.bf16.mxu0 %v10056_v9  ;;  %v1641_v7 = vld [vmem:[#allocation10 + $0x1b00] sm:$0xff]  ;;  %v9831_v9 = vcombine.low %v1161_v61, %v1177_v62  ;;  %v9800_v11 = vcombine.high %v1129_v5, %v1145_v6 }
 0x151   :  { %v1657_v8 = vld [vmem:[#allocation10 + $0x1b80] sm:$0xff] }
 0x152   :  { %v10312_v12 = vcombine.high %v1641_v7, %v1657_v8  ;;  %v10311_v18 = vcombine.low %v1641_v7, %v1657_v8  ;;  %v970_v7 = vld [vmem:[#allocation10 + $0x608] sm:$0xff] }
 0x153   :  { %7098 = vmatpush1.bf16.msra.mxu1 %v9543_v14  ;;  %7139 = vmatpush1.bf16.msra.mxu0 %v10055_v15  ;;  %v1113_v14 = vld [vmem:[#allocation10 + $0xa80] sm:$0xff] }
 0x154   :  { %7099 = vmatprep.subr.bf16.mxu1 %v9512_v16  ;;  %7140 = vmatprep.subr.bf16.mxu0 %v10024_v17  ;;  %v1609_v15 = vld [vmem:[#allocation10 + $0x1a00] sm:$0xff]  ;;  %v9799_v17 = vcombine.low %v1129_v5, %v1145_v6  ;;  %v9768_v19 = vcombine.high %v1097_v13, %v1113_v14  ;;  %v9767_v21 = vcombine.low %v1097_v13, %v1113_v14 }
 0x155   :  { %v1625_v16 = vld [vmem:[#allocation10 + $0x1a80] sm:$0xff] }
 0x156   :  { %v10280_v20 = vcombine.high %v1609_v15, %v1625_v16 }
 0x157   :  { %7100 = vmatpush1.bf16.msra.mxu1 %v9511_v22  ;;  %7141 = vmatpush1.bf16.msra.mxu0 %v10023_v23  ;;  %v10279_v22 = vcombine.low %v1609_v15, %v1625_v16  ;;  %v1065_v23 = vld [vmem:[#allocation10 + $0x900] sm:$0xff] }
 0x158   :  { %7101 = vmatprep.subr.bf16.mxu1 %v9480_v24  ;;  %7142 = vmatprep.subr.bf16.mxu0 %v9992_v25  ;;  %v1081_v24 = vld [vmem:[#allocation10 + $0x980] sm:$0xff] }
 0x159   :  { %v1577_v25 = vld [vmem:[#allocation10 + $0x1900] sm:$0xff]  ;;  %v9736_v26 = vcombine.high %v1065_v23, %v1081_v24  ;;  %v9735_v30 = vcombine.low %v1065_v23, %v1081_v24 }
 0x15a   :  { %v10247_v32 = vcombine.low %v1577_v25, %v1593_v27 }
 0x15b   :  { %7102 = vmatpush1.bf16.msra.mxu1 %v9479_v33  ;;  %7143 = vmatpush1.bf16.msra.mxu0 %v9991_v34  ;;  %v10248_v33 = vcombine.high %v1577_v25, %v1593_v27  ;;  %v1033_v34 = vld [vmem:[#allocation10 + $0x800] sm:$0xff]  ;;  %v906_v27 = vld [vmem:[#allocation10 + $0x408] sm:$0xff] }
 0x15c   :  { %7103 = vmatprep.subr.bf16.mxu1 %v9448_v35  ;;  %7144 = vmatprep.subr.bf16.mxu0 %v9960_v36  ;;  %v1049_v35 = vld [vmem:[#allocation10 + $0x880] sm:$0xff] }
 0x15d   :  { %v1545_v36 = vld [vmem:[#allocation10 + $0x1800] sm:$0xff]  ;;  %v9704_v37 = vcombine.high %v1033_v34, %v1049_v35  ;;  %v9703_v39 = vcombine.low %v1033_v34, %v1049_v35 }
 0x15e   :  { %v10215_v40 = vcombine.low %v1545_v36, %v1561_v38 }
 0x15f   :  { %7104 = vmatpush1.bf16.msra.mxu1 %v9447_v41  ;;  %7145 = vmatpush1.bf16.msra.mxu0 %v9959_v42  ;;  %v10216_v41 = vcombine.high %v1545_v36, %v1561_v38  ;;  %v1002_v42 = vld [vmem:[#allocation10 + $0x708] sm:$0xff] }
 0x160   :  { %7105 = vmatprep.subr.bf16.mxu1 %v9928_v43  ;;  %7146 = vmatprep.subr.bf16.mxu0 %v10440_v44  ;;  %v1018_v43 = vld [vmem:[#allocation10 + $0x788] sm:$0xff] }
 0x161   :  { %v1514_v44 = vld [vmem:[#allocation10 + $0x1708] sm:$0xff]  ;;  %v9674_v45 = vcombine.high %v1002_v42, %v1018_v43  ;;  %v9673_v47 = vcombine.low %v1002_v42, %v1018_v43 }
 0x162   :  { %v10185_v48 = vcombine.low %v1514_v44, %v1530_v46  ;;  %v874_v38 = vld [vmem:[#allocation10 + $0x308] sm:$0xff] }
 0x163   :  { %7106 = vmatpush2.bf16.msra.mxu1 %v9927_v49  ;;  %7147 = vmatpush2.bf16.msra.mxu0 %v10439_v50  ;;  %v10186_v49 = vcombine.high %v1514_v44, %v1530_v46  ;;  %v10903_v50 = vsub.s32 2, %v10892_v28  ;;  %v842_v46 = vld [vmem:[#allocation10 + $0x208] sm:$0xff] }
 0x164   :  { %7107 = vmatprep.subr.bf16.mxu1 %v9896_v51  ;;  %7148 = vmatprep.subr.bf16.mxu0 %v10408_v52  ;;  %v345_v51 = vld [vmem:[#allocation9] sm:$0xf]  ;;  %v10906_v52 = vsub.s32 3, %v10892_v28 }
 0x165   :  { %v350_v53 = vrot.slane %v345_v51, %v10895_v29  ;;  %v358_v54 = vrot.slane %v345_v51, %v10903_v50  ;;  %v354_v55 = vrot.slane %v345_v51, %v10898_v31 }
 0x166   :  { %v362_v56 = vrot.slane %v345_v51, %v10906_v52 }
 0x167   :  { %7108 = vmatpush2.bf16.msra.mxu1 %v9895_v57  ;;  %7149 = vmatpush2.bf16.msra.mxu0 %v10407_v58 }
 0x168   :  { %7109 = vmatprep.subr.bf16.mxu1 %v9864_v59  ;;  %7150 = vmatprep.subr.bf16.mxu0 %v10376_v60 }
 0x16b   :  { %7110 = vmatpush2.bf16.msra.mxu1 %v9863_v1  ;;  %7151 = vmatpush2.bf16.msra.mxu0 %v10375_v2 }
 0x16c   :  { %7111 = vmatprep.subr.bf16.mxu1 %v9832_v3  ;;  %7152 = vmatprep.subr.bf16.mxu0 %v10344_v4 }
 0x16f   :  { %7112 = vmatpush2.bf16.msra.mxu1 %v9831_v9  ;;  %7153 = vmatpush2.bf16.msra.mxu0 %v10343_v10  ;;  %v986_v10 = vld [vmem:[#allocation10 + $0x688] sm:$0xff] }
 0x170   :  { %7113 = vmatprep.subr.bf16.mxu1 %v9800_v11  ;;  %7154 = vmatprep.subr.bf16.mxu0 %v10312_v12  ;;  %v1482_v11 = vld [vmem:[#allocation10 + $0x1608] sm:$0xff]  ;;  %v9641_v23 = vcombine.low %v970_v7, %v986_v10 }
 0x171   :  { %v1498_v12 = vld [vmem:[#allocation10 + $0x1688] sm:$0xff] }
 0x172   :  { %v10153_v24 = vcombine.low %v1482_v11, %v1498_v12 }
 0x173   :  { %7114 = vmatpush2.bf16.msra.mxu1 %v9799_v17  ;;  %7155 = vmatpush2.bf16.msra.mxu0 %v10311_v18  ;;  %v938_v17 = vld [vmem:[#allocation10 + $0x508] sm:$0xff]  ;;  %v9642_v18 = vcombine.high %v970_v7, %v986_v10 }
 0x174   :  { %7115 = vmatprep.subr.bf16.mxu1 %v9768_v19  ;;  %7156 = vmatprep.subr.bf16.mxu0 %v10280_v20  ;;  %v10154_v19 = vcombine.high %v1482_v11, %v1498_v12  ;;  %v954_v20 = vld [vmem:[#allocation10 + $0x588] sm:$0xff] }
 0x175   :  { %v9610_v25 = vcombine.high %v938_v17, %v954_v20  ;;  %v9609_v34 = vcombine.low %v938_v17, %v954_v20  ;;  %v1770_v10 = vld [vmem:[#allocation10 + $0x1f08] sm:$0xff] }
 0x176   :  { %v1786_v11 = vld [vmem:[#allocation10 + $0x1f88] sm:$0xff] }
 0x177   :  { %7116 = vmatpush2.bf16.msra.mxu1 %v9767_v21  ;;  %7157 = vmatpush2.bf16.msra.mxu0 %v10279_v22  ;;  %v1450_v21 = vld [vmem:[#allocation10 + $0x1508] sm:$0xff] }
 0x178   :  { %7117 = vmatprep.subr.bf16.mxu1 %v9736_v26  ;;  %7158 = vmatprep.subr.bf16.mxu0 %v10248_v33  ;;  %v1466_v22 = vld [vmem:[#allocation10 + $0x1588] sm:$0xff] }
 0x179   :  { %v10122_v26 = vcombine.high %v1450_v21, %v1466_v22  ;;  %v1434_v33 = vld [vmem:[#allocation10 + $0x1488] sm:$0xff]  ;;  %v10121_v35 = vcombine.low %v1450_v21, %v1466_v22 }
 0x17a   :  { %v1226_v20 = vld [vmem:[#allocation10 + $0xe08] sm:$0xff] }
 0x17b   :  { %7118 = vmatpush2.bf16.msra.mxu1 %v9735_v30  ;;  %7159 = vmatpush2.bf16.msra.mxu0 %v10247_v32  ;;  %v922_v30 = vld [vmem:[#allocation10 + $0x488] sm:$0xff] }
 0x17c   :  { %7119 = vmatprep.subr.bf16.mxu1 %v9704_v37  ;;  %7160 = vmatprep.subr.bf16.mxu0 %v10216_v41  ;;  %v1418_v32 = vld [vmem:[#allocation10 + $0x1408] sm:$0xff]  ;;  %v9578_v36 = vcombine.high %v906_v27, %v922_v30  ;;  %v9577_v42 = vcombine.low %v906_v27, %v922_v30 }
 0x17d   :  { %v10090_v37 = vcombine.high %v1418_v32, %v1434_v33  ;;  %v1402_v41 = vld [vmem:[#allocation10 + $0x1388] sm:$0xff]  ;;  %v10089_v43 = vcombine.low %v1418_v32, %v1434_v33 }
 0x17e   :  { %v1242_v21 = vld [vmem:[#allocation10 + $0xe88] sm:$0xff] }
 0x17f   :  { %7120 = vmatpush2.bf16.msra.mxu1 %v9703_v39  ;;  %7161 = vmatpush2.bf16.msra.mxu0 %v10215_v40  ;;  %v890_v39 = vld [vmem:[#allocation10 + $0x388] sm:$0xff] }
 0x180   :  { %7171 = vmatprep.subr.bf16.mxu1 %v9674_v45  ;;  %7212 = vmatprep.subr.bf16.mxu0 %v10186_v49  ;;  %v1386_v40 = vld [vmem:[#allocation10 + $0x1308] sm:$0xff]  ;;  %v9546_v44 = vcombine.high %v874_v38, %v890_v39  ;;  %v9545_v51 = vcombine.low %v874_v38, %v890_v39 }
 0x181   :  { %v10058_v45 = vcombine.high %v1386_v40, %v1402_v41  ;;  %v1370_v49 = vld [vmem:[#allocation10 + $0x1288] sm:$0xff] }
 0x182   :  { %v1738_v22 = vld [vmem:[#allocation10 + $0x1e08] sm:$0xff] }
 0x183   :  { %v1194_v30 = vld [vmem:[#allocation10 + $0xd08] sm:$0xff] }
 0x184   :  { %v1210_v32 = vld [vmem:[#allocation10 + $0xd88] sm:$0xff] }
 0x185   :  { %v1706_v33 = vld [vmem:[#allocation10 + $0x1d08] sm:$0xff] }
 0x186   :  { %v1162_v39 = vld [vmem:[#allocation10 + $0xc08] sm:$0xff] }
 0x202   :  { %v721_v57 = vpop.f32.mrf.mxu1  ;;  %v762_v58 = vpop.f32.mrf.mxu0 }
 0x203   :  { %v722_v59 = vadd.f32 %v721_v57, %v350_v53  ;;  %v763_v60 = vadd.f32 %v762_v58, %v358_v54  ;;  %v10057_v53 = vcombine.low %v1386_v40, %v1402_v41  ;;  %v826_v57 = vld [vmem:[#allocation10 + $0x188] sm:$0xff] }
 0x204   :  { %v723_v61 = vpop.f32.mrf.mxu1  ;;  %v764_v62 = vpop.f32.mrf.mxu0  ;;  %v1322_v58 = vld [vmem:[#allocation10 + $0x1108] sm:$0xff] }
 0x205   :  { %v724_v63 = vadd.f32 %v723_v61, %v354_v55  ;;  %v765_v0 = vadd.f32 %v764_v62, %v362_v56  ;;  %v769_v1 = vmax.f32 %v722_v59, 0.0  ;;  %v771_v2 = vmax.f32 %v763_v60, 0.0  ;;  %v810_v56 = vld [vmem:[#allocation10 + $0x108] sm:$0xff] }
 0x206   :  { %v725_v3 = vpop.f32.mrf.mxu1  ;;  %v766_v4 = vpop.f32.mrf.mxu0  ;;  %v1338_v59 = vld [vmem:[#allocation10 + $0x1188] sm:$0xff]  ;;  %v9482_v62 = vcombine.high %v810_v56, %v826_v57 }
 0x207   :  { %v770_v5 = vmax.f32 %v724_v63, 0.0  ;;  %v772_v6 = vmax.f32 %v765_v0, 0.0  ;;  %v10916_v15 = vpack.c.bf16 %v769_v1, %v769_v1  ;;  %v10918_v16 = vpack.c.bf16 %v771_v2, %v771_v2  ;;  %v778_v0 = vld [vmem:[#allocation10 + $0x8] sm:$0xff] }
 0x208   :  { %v726_v8 = vpop.f32.mrf.mxu1  ;;  %v767_v9 = vpop.f32.mrf.mxu0  ;;  %v9994_v63 = vcombine.high %v1322_v58, %v1338_v59  ;;  %v794_v1 = vld [vmem:[#allocation10 + $0x88] sm:$0xff]  ;;  %v9481_v4 = vcombine.low %v810_v56, %v826_v57 }
 0x209   :  { %v10912_v13 = vpack.c.bf16 %v770_v5, %v770_v5  ;;  %v10914_v14 = vpack.c.bf16 %v772_v6, %v772_v6  ;;  %v1290_v2 = vld [vmem:[#allocation10 + $0x1008] sm:$0xff]  ;;  %v9993_v5 = vcombine.low %v1322_v58, %v1338_v59  ;;  %v9450_v6 = vcombine.high %v778_v0, %v794_v1 }
 0x20a   :  { %v1306_v3 = vld [vmem:[#allocation10 + $0x1088] sm:$0xff]  ;;  %v9449_v12 = vcombine.low %v778_v0, %v794_v1 }
 0x20b   :  { %7121 = vmatprep.mubr.bf16.mxu1 %v10912_v13  ;;  %7162 = vmatprep.mubr.bf16.mxu0 %v10914_v14  ;;  %v9962_v7 = vcombine.high %v1290_v2, %v1306_v3  ;;  %v1258_v8 = vld [vmem:[#allocation10 + $0xf08] sm:$0xff]  ;;  %v9961_v17 = vcombine.low %v1290_v2, %v1306_v3 }
 0x20c   :  { %7122 = vmatmul.mubr.bf16.vlgmr.msra.gmra.mxu1 %v10916_v15  ;;  %7163 = vmatmul.mubr.bf16.vlgmr.msra.gmra.mxu0 %v10918_v16  ;;  %v1274_v9 = vld [vmem:[#allocation10 + $0xf88] sm:$0xff] }
 0x20d   :  { %7172 = vmatpush1.bf16.msra.mxu1 %v9673_v47  ;;  %7213 = vmatpush1.bf16.msra.mxu0 %v10185_v48  ;;  %v858_v47 = vld [vmem:[#allocation10 + $0x288] sm:$0xff] }
 0x20e   :  { %7203 = vmatprep.mubr.bf16.mxu1 %v10912_v13  ;;  %7244 = vmatprep.mubr.bf16.mxu0 %v10914_v14  ;;  %v1354_v48 = vld [vmem:[#allocation10 + $0x1208] sm:$0xff]  ;;  %v9514_v54 = vcombine.high %v842_v46, %v858_v47  ;;  %v9513_v60 = vcombine.low %v842_v46, %v858_v47 }
 0x20f   :  { %7173 = vmatprep.subr.bf16.mxu1 %v9642_v18  ;;  %7214 = vmatprep.subr.bf16.mxu0 %v10154_v19  ;;  %v10026_v55 = vcombine.high %v1354_v48, %v1370_v49  ;;  %v10025_v61 = vcombine.low %v1354_v48, %v1370_v49  ;;  %v9930_v18 = vcombine.high %v1258_v8, %v1274_v9  ;;  %v1178_v40 = vld [vmem:[#allocation10 + $0xc88] sm:$0xff] }
 0x210   :  { %v10442_v19 = vcombine.high %v1770_v10, %v1786_v11  ;;  %v1674_v41 = vld [vmem:[#allocation10 + $0x1c08] sm:$0xff] }
 0x211   :  { %7174 = vmatpush1.bf16.msra.mxu1 %v9641_v23  ;;  %7215 = vmatpush1.bf16.msra.mxu0 %v10153_v24  ;;  %v1754_v23 = vld [vmem:[#allocation10 + $0x1e88] sm:$0xff]  ;;  %v9929_v24 = vcombine.low %v1258_v8, %v1274_v9 }
 0x212   :  { %7175 = vmatprep.subr.bf16.mxu1 %v9610_v25  ;;  %7216 = vmatprep.subr.bf16.mxu0 %v10122_v26  ;;  %v10441_v25 = vcombine.low %v1770_v10, %v1786_v11  ;;  %v9898_v26 = vcombine.high %v1226_v20, %v1242_v21  ;;  %v10410_v27 = vcombine.high %v1738_v22, %v1754_v23  ;;  %v1130_v47 = vld [vmem:[#allocation10 + $0xb08] sm:$0xff] }
 0x213   :  { %v1146_v48 = vld [vmem:[#allocation10 + $0xb88] sm:$0xff] }
 0x214   :  { %v1642_v49 = vld [vmem:[#allocation10 + $0x1b08] sm:$0xff] }
 0x215   :  { %7176 = vmatpush1.bf16.msra.mxu1 %v9609_v34  ;;  %7217 = vmatpush1.bf16.msra.mxu0 %v10121_v35  ;;  %v1722_v34 = vld [vmem:[#allocation10 + $0x1d88] sm:$0xff]  ;;  %v9897_v35 = vcombine.low %v1226_v20, %v1242_v21  ;;  %v1003_v21 = vld [vmem:[#allocation10 + $0x710] sm:$0xff] }
 0x216   :  { %7177 = vmatprep.subr.bf16.mxu1 %v9578_v36  ;;  %7218 = vmatprep.subr.bf16.mxu0 %v10090_v37  ;;  %v10409_v36 = vcombine.low %v1738_v22, %v1754_v23  ;;  %v9866_v37 = vcombine.high %v1194_v30, %v1210_v32  ;;  %v10378_v38 = vcombine.high %v1706_v33, %v1722_v34  ;;  %v1098_v57 = vld [vmem:[#allocation10 + $0xa08] sm:$0xff]  ;;  %v1019_v22 = vld [vmem:[#allocation10 + $0x790] sm:$0xff] }
 0x217   :  { %v1114_v58 = vld [vmem:[#allocation10 + $0xa88] sm:$0xff]  ;;  %v1515_v23 = vld [vmem:[#allocation10 + $0x1710] sm:$0xff] }
 0x218   :  { %v1610_v59 = vld [vmem:[#allocation10 + $0x1a08] sm:$0xff] }
 0x219   :  { %7178 = vmatpush1.bf16.msra.mxu1 %v9577_v42  ;;  %7219 = vmatpush1.bf16.msra.mxu0 %v10089_v43  ;;  %v1690_v42 = vld [vmem:[#allocation10 + $0x1c88] sm:$0xff]  ;;  %v9865_v43 = vcombine.low %v1194_v30, %v1210_v32  ;;  %v971_v32 = vld [vmem:[#allocation10 + $0x610] sm:$0xff] }
 0x21a   :  { %7179 = vmatprep.subr.bf16.mxu1 %v9546_v44  ;;  %7220 = vmatprep.subr.bf16.mxu0 %v10058_v45  ;;  %v10377_v44 = vcombine.low %v1706_v33, %v1722_v34  ;;  %v9834_v45 = vcombine.high %v1162_v39, %v1178_v40  ;;  %v10346_v46 = vcombine.high %v1674_v41, %v1690_v42  ;;  %v1066_v1 = vld [vmem:[#allocation10 + $0x908] sm:$0xff]  ;;  %v987_v33 = vld [vmem:[#allocation10 + $0x690] sm:$0xff] }
 0x21b   :  { %v1082_v2 = vld [vmem:[#allocation10 + $0x988] sm:$0xff]  ;;  %v1483_v34 = vld [vmem:[#allocation10 + $0x1610] sm:$0xff] }
 0x21c   :  { %v1578_v3 = vld [vmem:[#allocation10 + $0x1908] sm:$0xff] }
 0x21d   :  { %7180 = vmatpush1.bf16.msra.mxu1 %v9545_v51  ;;  %7221 = vmatpush1.bf16.msra.mxu0 %v10057_v53  ;;  %v1658_v51 = vld [vmem:[#allocation10 + $0x1b88] sm:$0xff]  ;;  %v9833_v53 = vcombine.low %v1162_v39, %v1178_v40  ;;  %v939_v40 = vld [vmem:[#allocation10 + $0x510] sm:$0xff] }
 0x21e   :  { %7181 = vmatprep.subr.bf16.mxu1 %v9514_v54  ;;  %7222 = vmatprep.subr.bf16.mxu0 %v10026_v55  ;;  %v10345_v54 = vcombine.low %v1674_v41, %v1690_v42  ;;  %v9802_v55 = vcombine.high %v1130_v47, %v1146_v48  ;;  %v10314_v56 = vcombine.high %v1642_v49, %v1658_v51  ;;  %v1034_v9 = vld [vmem:[#allocation10 + $0x808] sm:$0xff]  ;;  %v955_v41 = vld [vmem:[#allocation10 + $0x590] sm:$0xff] }
 0x21f   :  { %v1050_v10 = vld [vmem:[#allocation10 + $0x888] sm:$0xff]  ;;  %v1451_v42 = vld [vmem:[#allocation10 + $0x1510] sm:$0xff] }
 0x220   :  { %v1546_v11 = vld [vmem:[#allocation10 + $0x1808] sm:$0xff] }
 0x221   :  { %7182 = vmatpush1.bf16.msra.mxu1 %v9513_v60  ;;  %7223 = vmatpush1.bf16.msra.mxu0 %v10025_v61  ;;  %v1626_v60 = vld [vmem:[#allocation10 + $0x1a88] sm:$0xff]  ;;  %v9801_v61 = vcombine.low %v1130_v47, %v1146_v48  ;;  %v907_v48 = vld [vmem:[#allocation10 + $0x410] sm:$0xff] }
 0x222   :  { %7183 = vmatprep.subr.bf16.mxu1 %v9482_v62  ;;  %7224 = vmatprep.subr.bf16.mxu0 %v9994_v63  ;;  %v10313_v62 = vcombine.low %v1642_v49, %v1658_v51  ;;  %v9770_v63 = vcombine.high %v1098_v57, %v1114_v58  ;;  %v10282_v0 = vcombine.high %v1610_v59, %v1626_v60  ;;  %v923_v49 = vld [vmem:[#allocation10 + $0x490] sm:$0xff] }
 0x223   :  { %v1419_v51 = vld [vmem:[#allocation10 + $0x1410] sm:$0xff] }
 0x225   :  { %7184 = vmatpush1.bf16.msra.mxu1 %v9481_v4  ;;  %7225 = vmatpush1.bf16.msra.mxu0 %v9993_v5  ;;  %v1594_v4 = vld [vmem:[#allocation10 + $0x1988] sm:$0xff]  ;;  %v9769_v5 = vcombine.low %v1098_v57, %v1114_v58  ;;  %v875_v58 = vld [vmem:[#allocation10 + $0x310] sm:$0xff] }
 0x226   :  { %7185 = vmatprep.subr.bf16.mxu1 %v9450_v6  ;;  %7226 = vmatprep.subr.bf16.mxu0 %v9962_v7  ;;  %v10281_v6 = vcombine.low %v1610_v59, %v1626_v60  ;;  %v9738_v7 = vcombine.high %v1066_v1, %v1082_v2  ;;  %v10250_v8 = vcombine.high %v1578_v3, %v1594_v4  ;;  %v891_v59 = vld [vmem:[#allocation10 + $0x390] sm:$0xff] }
 0x227   :  { %v1387_v60 = vld [vmem:[#allocation10 + $0x1310] sm:$0xff] }
 0x229   :  { %7186 = vmatpush1.bf16.msra.mxu1 %v9449_v12  ;;  %7227 = vmatpush1.bf16.msra.mxu0 %v9961_v17  ;;  %v1562_v12 = vld [vmem:[#allocation10 + $0x1888] sm:$0xff]  ;;  %v9737_v17 = vcombine.low %v1066_v1, %v1082_v2  ;;  %v843_v2 = vld [vmem:[#allocation10 + $0x210] sm:$0xff] }
 0x22a   :  { %7187 = vmatprep.subr.bf16.mxu1 %v9930_v18  ;;  %7228 = vmatprep.subr.bf16.mxu0 %v10442_v19  ;;  %v10249_v18 = vcombine.low %v1578_v3, %v1594_v4  ;;  %v9706_v19 = vcombine.high %v1034_v9, %v1050_v10  ;;  %v10218_v20 = vcombine.high %v1546_v11, %v1562_v12  ;;  %v859_v3 = vld [vmem:[#allocation10 + $0x290] sm:$0xff] }
 0x22b   :  { %v1355_v4 = vld [vmem:[#allocation10 + $0x1210] sm:$0xff] }
 0x22d   :  { %7188 = vmatpush2.bf16.msra.mxu1 %v9929_v24  ;;  %7229 = vmatpush2.bf16.msra.mxu0 %v10441_v25  ;;  %v1531_v24 = vld [vmem:[#allocation10 + $0x1790] sm:$0xff]  ;;  %v9705_v25 = vcombine.low %v1034_v9, %v1050_v10 }
 0x22e   :  { %7189 = vmatprep.subr.bf16.mxu1 %v9898_v26  ;;  %7230 = vmatprep.subr.bf16.mxu0 %v10410_v27  ;;  %v10217_v26 = vcombine.low %v1546_v11, %v1562_v12  ;;  %v9676_v27 = vcombine.high %v1003_v21, %v1019_v22  ;;  %v10188_v30 = vcombine.high %v1515_v23, %v1531_v24  ;;  %v811_v10 = vld [vmem:[#allocation10 + $0x110] sm:$0xff] }
 0x22f   :  { %v827_v11 = vld [vmem:[#allocation10 + $0x190] sm:$0xff] }
 0x230   :  { %v1323_v12 = vld [vmem:[#allocation10 + $0x1110] sm:$0xff] }
 0x231   :  { %7190 = vmatpush2.bf16.msra.mxu1 %v9897_v35  ;;  %7231 = vmatpush2.bf16.msra.mxu0 %v10409_v36  ;;  %v1499_v35 = vld [vmem:[#allocation10 + $0x1690] sm:$0xff]  ;;  %v9675_v36 = vcombine.low %v1003_v21, %v1019_v22 }
 0x232   :  { %7191 = vmatprep.subr.bf16.mxu1 %v9866_v37  ;;  %7232 = vmatprep.subr.bf16.mxu0 %v10378_v38  ;;  %v10187_v37 = vcombine.low %v1515_v23, %v1531_v24  ;;  %v9644_v38 = vcombine.high %v971_v32, %v987_v33  ;;  %v10156_v39 = vcombine.high %v1483_v34, %v1499_v35  ;;  %v779_v22 = vld [vmem:[#allocation10 + $0x10] sm:$0xff] }
 0x233   :  { %v795_v23 = vld [vmem:[#allocation10 + $0x90] sm:$0xff] }
 0x234   :  { %v1291_v24 = vld [vmem:[#allocation10 + $0x1010] sm:$0xff] }
 0x235   :  { %7192 = vmatpush2.bf16.msra.mxu1 %v9865_v43  ;;  %7233 = vmatpush2.bf16.msra.mxu0 %v10377_v44  ;;  %v1467_v43 = vld [vmem:[#allocation10 + $0x1590] sm:$0xff]  ;;  %v9643_v44 = vcombine.low %v971_v32, %v987_v33 }
 0x236   :  { %7193 = vmatprep.subr.bf16.mxu1 %v9834_v45  ;;  %7234 = vmatprep.subr.bf16.mxu0 %v10346_v46  ;;  %v10155_v45 = vcombine.low %v1483_v34, %v1499_v35  ;;  %v9612_v46 = vcombine.high %v939_v40, %v955_v41  ;;  %v10124_v47 = vcombine.high %v1451_v42, %v1467_v43  ;;  %v1259_v33 = vld [vmem:[#allocation10 + $0xf10] sm:$0xff] }
 0x237   :  { %v1275_v34 = vld [vmem:[#allocation10 + $0xf90] sm:$0xff] }
 0x238   :  { %v1771_v35 = vld [vmem:[#allocation10 + $0x1f10] sm:$0xff] }
 0x239   :  { %7194 = vmatpush2.bf16.msra.mxu1 %v9833_v53  ;;  %7235 = vmatpush2.bf16.msra.mxu0 %v10345_v54  ;;  %v1435_v53 = vld [vmem:[#allocation10 + $0x1490] sm:$0xff]  ;;  %v9611_v54 = vcombine.low %v939_v40, %v955_v41 }
 0x23a   :  { %7195 = vmatprep.subr.bf16.mxu1 %v9802_v55  ;;  %7236 = vmatprep.subr.bf16.mxu0 %v10314_v56  ;;  %v10123_v55 = vcombine.low %v1451_v42, %v1467_v43  ;;  %v9580_v56 = vcombine.high %v907_v48, %v923_v49  ;;  %v10092_v57 = vcombine.high %v1419_v51, %v1435_v53  ;;  %v1227_v41 = vld [vmem:[#allocation10 + $0xe10] sm:$0xff] }
 0x23b   :  { %v1243_v42 = vld [vmem:[#allocation10 + $0xe90] sm:$0xff] }
 0x23c   :  { %v1739_v43 = vld [vmem:[#allocation10 + $0x1e10] sm:$0xff] }
 0x23d   :  { %7196 = vmatpush2.bf16.msra.mxu1 %v9801_v61  ;;  %7237 = vmatpush2.bf16.msra.mxu0 %v10313_v62  ;;  %v1403_v61 = vld [vmem:[#allocation10 + $0x1390] sm:$0xff]  ;;  %v9579_v62 = vcombine.low %v907_v48, %v923_v49 }
 0x23e   :  { %7197 = vmatprep.subr.bf16.mxu1 %v9770_v63  ;;  %7238 = vmatprep.subr.bf16.mxu0 %v10282_v0  ;;  %v10091_v63 = vcombine.low %v1419_v51, %v1435_v53  ;;  %v9548_v0 = vcombine.high %v875_v58, %v891_v59  ;;  %v10060_v1 = vcombine.high %v1387_v60, %v1403_v61  ;;  %v1195_v49 = vld [vmem:[#allocation10 + $0xd10] sm:$0xff] }
 0x23f   :  { %v1211_v51 = vld [vmem:[#allocation10 + $0xd90] sm:$0xff] }
 0x240   :  { %v1707_v53 = vld [vmem:[#allocation10 + $0x1d10] sm:$0xff] }
 0x241   :  { %7198 = vmatpush2.bf16.msra.mxu1 %v9769_v5  ;;  %7239 = vmatpush2.bf16.msra.mxu0 %v10281_v6  ;;  %v1371_v5 = vld [vmem:[#allocation10 + $0x1290] sm:$0xff]  ;;  %v9547_v6 = vcombine.low %v875_v58, %v891_v59 }
 0x242   :  { %7199 = vmatprep.subr.bf16.mxu1 %v9738_v7  ;;  %7240 = vmatprep.subr.bf16.mxu0 %v10250_v8  ;;  %v10059_v7 = vcombine.low %v1387_v60, %v1403_v61  ;;  %v9516_v8 = vcombine.high %v843_v2, %v859_v3  ;;  %v10028_v9 = vcombine.high %v1355_v4, %v1371_v5  ;;  %v1163_v59 = vld [vmem:[#allocation10 + $0xc10] sm:$0xff] }
 0x243   :  { %v1179_v60 = vld [vmem:[#allocation10 + $0xc90] sm:$0xff] }
 0x244   :  { %v1675_v61 = vld [vmem:[#allocation10 + $0x1c10] sm:$0xff] }
 0x245   :  { %7200 = vmatpush2.bf16.msra.mxu1 %v9737_v17  ;;  %7241 = vmatpush2.bf16.msra.mxu0 %v10249_v18  ;;  %v1339_v17 = vld [vmem:[#allocation10 + $0x1190] sm:$0xff]  ;;  %v9515_v18 = vcombine.low %v843_v2, %v859_v3 }
 0x246   :  { %7201 = vmatprep.subr.bf16.mxu1 %v9706_v19  ;;  %7242 = vmatprep.subr.bf16.mxu0 %v10218_v20  ;;  %v10027_v19 = vcombine.low %v1355_v4, %v1371_v5  ;;  %v9484_v20 = vcombine.high %v811_v10, %v827_v11  ;;  %v9996_v21 = vcombine.high %v1323_v12, %v1339_v17  ;;  %v1131_v3 = vld [vmem:[#allocation10 + $0xb10] sm:$0xff] }
 0x247   :  { %v1147_v4 = vld [vmem:[#allocation10 + $0xb90] sm:$0xff] }
 0x248   :  { %v1643_v5 = vld [vmem:[#allocation10 + $0x1b10] sm:$0xff] }
 0x249   :  { %7202 = vmatpush2.bf16.msra.mxu1 %v9705_v25  ;;  %7243 = vmatpush2.bf16.msra.mxu0 %v10217_v26  ;;  %v1307_v25 = vld [vmem:[#allocation10 + $0x1090] sm:$0xff]  ;;  %v9483_v26 = vcombine.low %v811_v10, %v827_v11 }
 0x24a   :  { %7253 = vmatprep.subr.bf16.mxu1 %v9676_v27  ;;  %7294 = vmatprep.subr.bf16.mxu0 %v10188_v30  ;;  %v9995_v27 = vcombine.low %v1323_v12, %v1339_v17  ;;  %v9452_v30 = vcombine.high %v779_v22, %v795_v23  ;;  %v9964_v32 = vcombine.high %v1291_v24, %v1307_v25  ;;  %v1099_v11 = vld [vmem:[#allocation10 + $0xa10] sm:$0xff] }
 0x24b   :  { %v1115_v12 = vld [vmem:[#allocation10 + $0xa90] sm:$0xff] }
 0x24c   :  { %7204 = vmatmul.mubr.bf16.vlgmr.msra.gmra.mxu1 %v10916_v15  ;;  %7245 = vmatmul.mubr.bf16.vlgmr.msra.gmra.mxu0 %v10918_v16  ;;  %v1611_v17 = vld [vmem:[#allocation10 + $0x1a10] sm:$0xff] }
 0x24d   :  { %7254 = vmatpush1.bf16.msra.mxu1 %v9675_v36  ;;  %7285 = vmatprep.mubr.bf16.mxu1 %v10912_v13  ;;  %v1787_v36 = vld [vmem:[#allocation10 + $0x1f90] sm:$0xff] }
 0x24e   :  { %7295 = vmatpush1.bf16.msra.mxu0 %v10187_v37  ;;  %7326 = vmatprep.mubr.bf16.mxu0 %v10914_v14  ;;  %v9451_v37 = vcombine.low %v779_v22, %v795_v23  ;;  %v10444_v40 = vcombine.high %v1771_v35, %v1787_v36  ;;  %v1067_v23 = vld [vmem:[#allocation10 + $0x910] sm:$0xff] }
 0x24f   :  { %7255 = vmatprep.subr.bf16.mxu1 %v9644_v38  ;;  %7296 = vmatprep.subr.bf16.mxu0 %v10156_v39  ;;  %v9963_v38 = vcombine.low %v1291_v24, %v1307_v25  ;;  %v9932_v39 = vcombine.high %v1259_v33, %v1275_v34  ;;  %v1083_v24 = vld [vmem:[#allocation10 + $0x990] sm:$0xff] }
 0x250   :  { %v1579_v25 = vld [vmem:[#allocation10 + $0x1910] sm:$0xff] }
 0x251   :  { %7256 = vmatpush1.bf16.msra.mxu1 %v9643_v44  ;;  %v1755_v44 = vld [vmem:[#allocation10 + $0x1e90] sm:$0xff] }
 0x252   :  { %7297 = vmatpush1.bf16.msra.mxu0 %v10155_v45  ;;  %7257 = vmatprep.subr.bf16.mxu1 %v9612_v46  ;;  %v9931_v45 = vcombine.low %v1259_v33, %v1275_v34  ;;  %v10443_v46 = vcombine.low %v1771_v35, %v1787_v36  ;;  %v10412_v48 = vcombine.high %v1739_v43, %v1755_v44  ;;  %v1035_v34 = vld [vmem:[#allocation10 + $0x810] sm:$0xff] }
 0x253   :  { %7298 = vmatprep.subr.bf16.mxu0 %v10124_v47  ;;  %v9900_v47 = vcombine.high %v1227_v41, %v1243_v42  ;;  %v1051_v35 = vld [vmem:[#allocation10 + $0x890] sm:$0xff] }
 0x254   :  { %v1547_v36 = vld [vmem:[#allocation10 + $0x1810] sm:$0xff] }
 0x255   :  { %7258 = vmatpush1.bf16.msra.mxu1 %v9611_v54  ;;  %v1723_v54 = vld [vmem:[#allocation10 + $0x1d90] sm:$0xff] }
 0x256   :  { %7299 = vmatpush1.bf16.msra.mxu0 %v10123_v55  ;;  %7259 = vmatprep.subr.bf16.mxu1 %v9580_v56  ;;  %v9899_v55 = vcombine.low %v1227_v41, %v1243_v42  ;;  %v10411_v56 = vcombine.low %v1739_v43, %v1755_v44  ;;  %v10380_v58 = vcombine.high %v1707_v53, %v1723_v54  ;;  %v1004_v42 = vld [vmem:[#allocation10 + $0x718] sm:$0xff] }
 0x257   :  { %7300 = vmatprep.subr.bf16.mxu0 %v10092_v57  ;;  %v9868_v57 = vcombine.high %v1195_v49, %v1211_v51  ;;  %v1020_v43 = vld [vmem:[#allocation10 + $0x798] sm:$0xff] }
 0x258   :  { %v1516_v44 = vld [vmem:[#allocation10 + $0x1718] sm:$0xff] }
 0x259   :  { %7260 = vmatpush1.bf16.msra.mxu1 %v9579_v62  ;;  %v1691_v62 = vld [vmem:[#allocation10 + $0x1c90] sm:$0xff] }
 0x25a   :  { %7301 = vmatpush1.bf16.msra.mxu0 %v10091_v63  ;;  %7261 = vmatprep.subr.bf16.mxu1 %v9548_v0  ;;  %v9867_v63 = vcombine.low %v1195_v49, %v1211_v51  ;;  %v10379_v0 = vcombine.low %v1707_v53, %v1723_v54  ;;  %v10348_v2 = vcombine.high %v1675_v61, %v1691_v62  ;;  %v972_v51 = vld [vmem:[#allocation10 + $0x618] sm:$0xff] }
 0x25b   :  { %7302 = vmatprep.subr.bf16.mxu0 %v10060_v1  ;;  %v9836_v1 = vcombine.high %v1163_v59, %v1179_v60  ;;  %v988_v53 = vld [vmem:[#allocation10 + $0x698] sm:$0xff]  ;;  %v9677_v54 = vcombine.low %v1004_v42, %v1020_v43 }
 0x25d   :  { %7262 = vmatpush1.bf16.msra.mxu1 %v9547_v6  ;;  %v1659_v6 = vld [vmem:[#allocation10 + $0x1b90] sm:$0xff] }
 0x25e   :  { %7303 = vmatpush1.bf16.msra.mxu0 %v10059_v7  ;;  %7263 = vmatprep.subr.bf16.mxu1 %v9516_v8  ;;  %v9835_v7 = vcombine.low %v1163_v59, %v1179_v60  ;;  %v10347_v8 = vcombine.low %v1675_v61, %v1691_v62  ;;  %v10316_v10 = vcombine.high %v1643_v5, %v1659_v6  ;;  %v940_v59 = vld [vmem:[#allocation10 + $0x518] sm:$0xff] }
 0x25f   :  { %7304 = vmatprep.subr.bf16.mxu0 %v10028_v9  ;;  %v9804_v9 = vcombine.high %v1131_v3, %v1147_v4  ;;  %v956_v60 = vld [vmem:[#allocation10 + $0x598] sm:$0xff] }
 0x260   :  { %v1452_v62 = vld [vmem:[#allocation10 + $0x1518] sm:$0xff] }
 0x261   :  { %7264 = vmatpush1.bf16.msra.mxu1 %v9515_v18  ;;  %v1627_v18 = vld [vmem:[#allocation10 + $0x1a90] sm:$0xff] }
 0x262   :  { %7305 = vmatpush1.bf16.msra.mxu0 %v10027_v19  ;;  %7265 = vmatprep.subr.bf16.mxu1 %v9484_v20  ;;  %v9803_v19 = vcombine.low %v1131_v3, %v1147_v4  ;;  %v10315_v20 = vcombine.low %v1643_v5, %v1659_v6  ;;  %v10284_v22 = vcombine.high %v1611_v17, %v1627_v18  ;;  %v908_v4 = vld [vmem:[#allocation10 + $0x418] sm:$0xff] }
 0x263   :  { %7306 = vmatprep.subr.bf16.mxu0 %v9996_v21  ;;  %v9772_v21 = vcombine.high %v1099_v11, %v1115_v12  ;;  %v924_v5 = vld [vmem:[#allocation10 + $0x498] sm:$0xff] }
 0x264   :  { %v1420_v6 = vld [vmem:[#allocation10 + $0x1418] sm:$0xff] }
 0x265   :  { %7266 = vmatpush1.bf16.msra.mxu1 %v9483_v26  ;;  %v1595_v26 = vld [vmem:[#allocation10 + $0x1990] sm:$0xff] }
 0x266   :  { %7307 = vmatpush1.bf16.msra.mxu0 %v9995_v27  ;;  %7267 = vmatprep.subr.bf16.mxu1 %v9452_v30  ;;  %v9771_v27 = vcombine.low %v1099_v11, %v1115_v12  ;;  %v10283_v30 = vcombine.low %v1611_v17, %v1627_v18  ;;  %v10252_v33 = vcombine.high %v1579_v25, %v1595_v26  ;;  %v876_v12 = vld [vmem:[#allocation10 + $0x318] sm:$0xff] }
 0x267   :  { %7308 = vmatprep.subr.bf16.mxu0 %v9964_v32  ;;  %v9740_v32 = vcombine.high %v1067_v23, %v1083_v24  ;;  %v892_v17 = vld [vmem:[#allocation10 + $0x398] sm:$0xff] }
 0x268   :  { %v1388_v18 = vld [vmem:[#allocation10 + $0x1318] sm:$0xff] }
 0x269   :  { %7268 = vmatpush1.bf16.msra.mxu1 %v9451_v37  ;;  %v1563_v37 = vld [vmem:[#allocation10 + $0x1890] sm:$0xff] }
 0x26a   :  { %7309 = vmatpush1.bf16.msra.mxu0 %v9963_v38  ;;  %7269 = vmatprep.subr.bf16.mxu1 %v9932_v39  ;;  %v9739_v38 = vcombine.low %v1067_v23, %v1083_v24  ;;  %v10251_v39 = vcombine.low %v1579_v25, %v1595_v26  ;;  %v10220_v41 = vcombine.high %v1547_v36, %v1563_v37  ;;  %v844_v24 = vld [vmem:[#allocation10 + $0x218] sm:$0xff] }
 0x26b   :  { %7310 = vmatprep.subr.bf16.mxu0 %v10444_v40  ;;  %v9708_v40 = vcombine.high %v1035_v34, %v1051_v35  ;;  %v860_v25 = vld [vmem:[#allocation10 + $0x298] sm:$0xff] }
 0x26c   :  { %v1356_v26 = vld [vmem:[#allocation10 + $0x1218] sm:$0xff] }
 0x26d   :  { %7270 = vmatpush2.bf16.msra.mxu1 %v9931_v45  ;;  %v1532_v45 = vld [vmem:[#allocation10 + $0x1798] sm:$0xff] }
 0x26e   :  { %7311 = vmatpush2.bf16.msra.mxu0 %v10443_v46  ;;  %7271 = vmatprep.subr.bf16.mxu1 %v9900_v47  ;;  %v9707_v46 = vcombine.low %v1035_v34, %v1051_v35  ;;  %v10219_v47 = vcombine.low %v1547_v36, %v1563_v37  ;;  %v10190_v49 = vcombine.high %v1516_v44, %v1532_v45  ;;  %v812_v35 = vld [vmem:[#allocation10 + $0x118] sm:$0xff] }
 0x26f   :  { %7312 = vmatprep.subr.bf16.mxu0 %v10412_v48  ;;  %v9678_v48 = vcombine.high %v1004_v42, %v1020_v43  ;;  %v828_v36 = vld [vmem:[#allocation10 + $0x198] sm:$0xff] }
 0x270   :  { %v1324_v37 = vld [vmem:[#allocation10 + $0x1118] sm:$0xff] }
 0x271   :  { %7272 = vmatpush2.bf16.msra.mxu1 %v9899_v55  ;;  %v1484_v55 = vld [vmem:[#allocation10 + $0x1618] sm:$0xff] }
 0x272   :  { %7313 = vmatpush2.bf16.msra.mxu0 %v10411_v56  ;;  %7273 = vmatprep.subr.bf16.mxu1 %v9868_v57  ;;  %v1500_v56 = vld [vmem:[#allocation10 + $0x1698] sm:$0xff]  ;;  %v10189_v57 = vcombine.low %v1516_v44, %v1532_v45 }
 0x273   :  { %7314 = vmatprep.subr.bf16.mxu0 %v10380_v58  ;;  %v9646_v58 = vcombine.high %v972_v51, %v988_v53  ;;  %v10158_v61 = vcombine.high %v1484_v55, %v1500_v56  ;;  %v780_v43 = vld [vmem:[#allocation10 + $0x18] sm:$0xff] }
 0x274   :  { %v796_v44 = vld [vmem:[#allocation10 + $0x98] sm:$0xff] }
 0x275   :  { %7274 = vmatpush2.bf16.msra.mxu1 %v9867_v63  ;;  %v1468_v63 = vld [vmem:[#allocation10 + $0x1598] sm:$0xff] }
 0x276   :  { %7315 = vmatpush2.bf16.msra.mxu0 %v10379_v0  ;;  %7275 = vmatprep.subr.bf16.mxu1 %v9836_v1  ;;  %v9645_v0 = vcombine.low %v972_v51, %v988_v53  ;;  %v10157_v1 = vcombine.low %v1484_v55, %v1500_v56  ;;  %v10126_v3 = vcombine.high %v1452_v62, %v1468_v63  ;;  %v1292_v45 = vld [vmem:[#allocation10 + $0x1018] sm:$0xff] }
 0x277   :  { %7316 = vmatprep.subr.bf16.mxu0 %v10348_v2  ;;  %v9614_v2 = vcombine.high %v940_v59, %v956_v60  ;;  %v1260_v53 = vld [vmem:[#allocation10 + $0xf18] sm:$0xff] }
 0x278   :  { %v1772_v55 = vld [vmem:[#allocation10 + $0x1f18] sm:$0xff] }
 0x279   :  { %7276 = vmatpush2.bf16.msra.mxu1 %v9835_v7  ;;  %v1436_v7 = vld [vmem:[#allocation10 + $0x1498] sm:$0xff] }
 0x27a   :  { %7317 = vmatpush2.bf16.msra.mxu0 %v10347_v8  ;;  %7277 = vmatprep.subr.bf16.mxu1 %v9804_v9  ;;  %v9613_v8 = vcombine.low %v940_v59, %v956_v60  ;;  %v10125_v9 = vcombine.low %v1452_v62, %v1468_v63  ;;  %v10094_v11 = vcombine.high %v1420_v6, %v1436_v7  ;;  %v1788_v56 = vld [vmem:[#allocation10 + $0x1f98] sm:$0xff] }
 0x27b   :  { %7318 = vmatprep.subr.bf16.mxu0 %v10316_v10  ;;  %v9582_v10 = vcombine.high %v908_v4, %v924_v5  ;;  %v10446_v60 = vcombine.high %v1772_v55, %v1788_v56  ;;  %v1244_v62 = vld [vmem:[#allocation10 + $0xe98] sm:$0xff] }
 0x27c   :  { %v1740_v63 = vld [vmem:[#allocation10 + $0x1e18] sm:$0xff] }
 0x27d   :  { %7278 = vmatpush2.bf16.msra.mxu1 %v9803_v19  ;;  %v1404_v19 = vld [vmem:[#allocation10 + $0x1398] sm:$0xff] }
 0x27e   :  { %7319 = vmatpush2.bf16.msra.mxu0 %v10315_v20  ;;  %7279 = vmatprep.subr.bf16.mxu1 %v9772_v21  ;;  %v9581_v20 = vcombine.low %v908_v4, %v924_v5  ;;  %v10093_v21 = vcombine.low %v1420_v6, %v1436_v7  ;;  %v10062_v23 = vcombine.high %v1388_v18, %v1404_v19  ;;  %v1196_v5 = vld [vmem:[#allocation10 + $0xd18] sm:$0xff] }
 0x27f   :  { %7320 = vmatprep.subr.bf16.mxu0 %v10284_v22  ;;  %v9550_v22 = vcombine.high %v876_v12, %v892_v17  ;;  %v1212_v6 = vld [vmem:[#allocation10 + $0xd98] sm:$0xff] }
 0x280   :  { %v1708_v7 = vld [vmem:[#allocation10 + $0x1d18] sm:$0xff] }
 0x281   :  { %7280 = vmatpush2.bf16.msra.mxu1 %v9771_v27  ;;  %v1372_v27 = vld [vmem:[#allocation10 + $0x1298] sm:$0xff] }
 0x282   :  { %7321 = vmatpush2.bf16.msra.mxu0 %v10283_v30  ;;  %7281 = vmatprep.subr.bf16.mxu1 %v9740_v32  ;;  %v9549_v30 = vcombine.low %v876_v12, %v892_v17  ;;  %v10061_v32 = vcombine.low %v1388_v18, %v1404_v19  ;;  %v10030_v34 = vcombine.high %v1356_v26, %v1372_v27  ;;  %v1164_v17 = vld [vmem:[#allocation10 + $0xc18] sm:$0xff] }
 0x283   :  { %7322 = vmatprep.subr.bf16.mxu0 %v10252_v33  ;;  %v9518_v33 = vcombine.high %v844_v24, %v860_v25  ;;  %v1180_v18 = vld [vmem:[#allocation10 + $0xc98] sm:$0xff] }
 0x284   :  { %v1676_v19 = vld [vmem:[#allocation10 + $0x1c18] sm:$0xff] }
 0x285   :  { %7282 = vmatpush2.bf16.msra.mxu1 %v9739_v38  ;;  %v1340_v38 = vld [vmem:[#allocation10 + $0x1198] sm:$0xff] }
 0x286   :  { %7323 = vmatpush2.bf16.msra.mxu0 %v10251_v39  ;;  %7283 = vmatprep.subr.bf16.mxu1 %v9708_v40  ;;  %v9517_v39 = vcombine.low %v844_v24, %v860_v25  ;;  %v10029_v40 = vcombine.low %v1356_v26, %v1372_v27  ;;  %v9998_v42 = vcombine.high %v1324_v37, %v1340_v38  ;;  %v1132_v25 = vld [vmem:[#allocation10 + $0xb18] sm:$0xff] }
 0x287   :  { %7324 = vmatprep.subr.bf16.mxu0 %v10220_v41  ;;  %v9486_v41 = vcombine.high %v812_v35, %v828_v36  ;;  %v1148_v26 = vld [vmem:[#allocation10 + $0xb98] sm:$0xff] }
 0x288   :  { %v1644_v27 = vld [vmem:[#allocation10 + $0x1b18] sm:$0xff] }
 0x289   :  { %7284 = vmatpush2.bf16.msra.mxu1 %v9707_v46  ;;  %v1308_v46 = vld [vmem:[#allocation10 + $0x1098] sm:$0xff] }
 0x28a   :  { %7325 = vmatpush2.bf16.msra.mxu0 %v10219_v47  ;;  %7335 = vmatprep.subr.bf16.mxu1 %v9678_v48  ;;  %v9485_v47 = vcombine.low %v812_v35, %v828_v36  ;;  %v9997_v48 = vcombine.low %v1324_v37, %v1340_v38  ;;  %v9966_v51 = vcombine.high %v1292_v45, %v1308_v46  ;;  %v1100_v36 = vld [vmem:[#allocation10 + $0xa18] sm:$0xff] }
 0x28b   :  { %7376 = vmatprep.subr.bf16.mxu0 %v10190_v49  ;;  %v9454_v49 = vcombine.high %v780_v43, %v796_v44  ;;  %v1116_v37 = vld [vmem:[#allocation10 + $0xa98] sm:$0xff] }
 0x28c   :  { %7286 = vmatmul.mubr.bf16.vlgmr.msra.gmra.mxu1 %v10916_v15  ;;  %v1612_v38 = vld [vmem:[#allocation10 + $0x1a18] sm:$0xff] }
 0x28d   :  { %7327 = vmatmul.mubr.bf16.vlgmr.msra.gmra.mxu0 %v10918_v16  ;;  %7336 = vmatpush1.bf16.msra.mxu1 %v9677_v54  ;;  %v1276_v54 = vld [vmem:[#allocation10 + $0xf98] sm:$0xff] }
 0x28e   :  { %7367 = vmatprep.mubr.bf16.mxu1 %v10912_v13  ;;  %7377 = vmatpush1.bf16.msra.mxu0 %v10189_v57  ;;  %v9453_v57 = vcombine.low %v780_v43, %v796_v44  ;;  %v9934_v59 = vcombine.high %v1260_v53, %v1276_v54  ;;  %v1068_v44 = vld [vmem:[#allocation10 + $0x918] sm:$0xff] }
 0x28f   :  { %7408 = vmatprep.mubr.bf16.mxu0 %v10914_v14  ;;  %7337 = vmatprep.subr.bf16.mxu1 %v9646_v58  ;;  %v9965_v58 = vcombine.low %v1292_v45, %v1308_v46  ;;  %v1084_v45 = vld [vmem:[#allocation10 + $0x998] sm:$0xff] }
 0x290   :  { %7378 = vmatprep.subr.bf16.mxu0 %v10158_v61  ;;  %v1228_v61 = vld [vmem:[#allocation10 + $0xe18] sm:$0xff] }
 0x291   :  { %7338 = vmatpush1.bf16.msra.mxu1 %v9645_v0  ;;  %v1756_v0 = vld [vmem:[#allocation10 + $0x1e98] sm:$0xff] }
 0x292   :  { %7379 = vmatpush1.bf16.msra.mxu0 %v10157_v1  ;;  %7339 = vmatprep.subr.bf16.mxu1 %v9614_v2  ;;  %v9933_v1 = vcombine.low %v1260_v53, %v1276_v54  ;;  %v10445_v2 = vcombine.low %v1772_v55, %v1788_v56  ;;  %v10414_v4 = vcombine.high %v1740_v63, %v1756_v0  ;;  %v1580_v46 = vld [vmem:[#allocation10 + $0x1918] sm:$0xff] }
 0x293   :  { %7380 = vmatprep.subr.bf16.mxu0 %v10126_v3  ;;  %v9902_v3 = vcombine.high %v1228_v61, %v1244_v62  ;;  %v1036_v54 = vld [vmem:[#allocation10 + $0x818] sm:$0xff] }
 0x294   :  { %v1052_v55 = vld [vmem:[#allocation10 + $0x898] sm:$0xff] }
 0x295   :  { %7340 = vmatpush1.bf16.msra.mxu1 %v9613_v8  ;;  %v1724_v8 = vld [vmem:[#allocation10 + $0x1d98] sm:$0xff] }
 0x296   :  { %7381 = vmatpush1.bf16.msra.mxu0 %v10125_v9  ;;  %7341 = vmatprep.subr.bf16.mxu1 %v9582_v10  ;;  %v9901_v9 = vcombine.low %v1228_v61, %v1244_v62  ;;  %v10413_v10 = vcombine.low %v1740_v63, %v1756_v0  ;;  %v10382_v12 = vcombine.high %v1708_v7, %v1724_v8  ;;  %v1548_v56 = vld [vmem:[#allocation10 + $0x1818] sm:$0xff]  ;;  %v1005_v62 = vld [vmem:[#allocation10 + $0x720] sm:$0xff] }
 0x297   :  { %7382 = vmatprep.subr.bf16.mxu0 %v10094_v11  ;;  %v9870_v11 = vcombine.high %v1196_v5, %v1212_v6  ;;  %v1021_v63 = vld [vmem:[#allocation10 + $0x7a0] sm:$0xff] }
 0x298   :  { %v1517_v0 = vld [vmem:[#allocation10 + $0x1720] sm:$0xff] }
 0x299   :  { %7342 = vmatpush1.bf16.msra.mxu1 %v9581_v20  ;;  %v1692_v20 = vld [vmem:[#allocation10 + $0x1c98] sm:$0xff] }
 0x29a   :  { %7383 = vmatpush1.bf16.msra.mxu0 %v10093_v21  ;;  %7343 = vmatprep.subr.bf16.mxu1 %v9550_v22  ;;  %v9869_v21 = vcombine.low %v1196_v5, %v1212_v6  ;;  %v10381_v22 = vcombine.low %v1708_v7, %v1724_v8  ;;  %v10350_v24 = vcombine.high %v1676_v19, %v1692_v20  ;;  %v10934_v5 = vld [vmem:[#allocation12] sm:$0xff] }
 0x29b   :  { %7384 = vmatprep.subr.bf16.mxu0 %v10062_v23  ;;  %v9838_v23 = vcombine.high %v1164_v17, %v1180_v18  ;;  %v973_v7 = vld [vmem:[#allocation10 + $0x620] sm:$0xff] }
 0x29c   :  { %v989_v8 = vld [vmem:[#allocation10 + $0x6a0] sm:$0xff] }
 0x29d   :  { %7344 = vmatpush1.bf16.msra.mxu1 %v9549_v30  ;;  %v1660_v30 = vld [vmem:[#allocation10 + $0x1b98] sm:$0xff] }
 0x29e   :  { %7385 = vmatpush1.bf16.msra.mxu0 %v10061_v32  ;;  %7345 = vmatprep.subr.bf16.mxu1 %v9518_v33  ;;  %v9837_v32 = vcombine.low %v1164_v17, %v1180_v18  ;;  %v10349_v33 = vcombine.low %v1676_v19, %v1692_v20  ;;  %v10318_v35 = vcombine.high %v1644_v27, %v1660_v30  ;;  %v941_v20 = vld [vmem:[#allocation10 + $0x520] sm:$0xff] }
 0x29f   :  { %7386 = vmatprep.subr.bf16.mxu0 %v10030_v34  ;;  %v9806_v34 = vcombine.high %v1132_v25, %v1148_v26  ;;  %v1816_v18 = vrot.slane %v10934_v5, %v10898_v31  ;;  %v9648_v19 = vcombine.high %v973_v7, %v989_v8 }
 0x2a1   :  { %7346 = vmatpush1.bf16.msra.mxu1 %v9517_v39  ;;  %v1628_v39 = vld [vmem:[#allocation10 + $0x1a98] sm:$0xff] }
 0x2a2   :  { %7387 = vmatpush1.bf16.msra.mxu0 %v10029_v40  ;;  %7347 = vmatprep.subr.bf16.mxu1 %v9486_v41  ;;  %v9805_v40 = vcombine.low %v1132_v25, %v1148_v26  ;;  %v10317_v41 = vcombine.low %v1644_v27, %v1660_v30  ;;  %v10286_v43 = vcombine.high %v1612_v38, %v1628_v39  ;;  %v1453_v25 = vld [vmem:[#allocation10 + $0x1520] sm:$0xff] }
 0x2a3   :  { %7388 = vmatprep.subr.bf16.mxu0 %v9998_v42  ;;  %v9774_v42 = vcombine.high %v1100_v36, %v1116_v37  ;;  %v1469_v26 = vld [vmem:[#allocation10 + $0x15a0] sm:$0xff]  ;;  %v9647_v30 = vcombine.low %v973_v7, %v989_v8 }
 0x2a4   :  { %v813_v7 = vld [vmem:[#allocation10 + $0x120] sm:$0xff] }
 0x2a5   :  { %7348 = vmatpush1.bf16.msra.mxu1 %v9485_v47  ;;  %v1596_v47 = vld [vmem:[#allocation10 + $0x1998] sm:$0xff]  ;;  %v829_v8 = vld [vmem:[#allocation10 + $0x1a0] sm:$0xff] }
 0x2a6   :  { %7389 = vmatpush1.bf16.msra.mxu0 %v9997_v48  ;;  %7349 = vmatprep.subr.bf16.mxu1 %v9454_v49  ;;  %v9773_v48 = vcombine.low %v1100_v36, %v1116_v37  ;;  %v10285_v49 = vcombine.low %v1612_v38, %v1628_v39  ;;  %v10254_v53 = vcombine.high %v1580_v46, %v1596_v47  ;;  %v909_v39 = vld [vmem:[#allocation10 + $0x420] sm:$0xff] }
 0x2a7   :  { %7390 = vmatprep.subr.bf16.mxu0 %v9966_v51  ;;  %v9742_v51 = vcombine.high %v1068_v44, %v1084_v45  ;;  %v10128_v38 = vcombine.high %v1453_v25, %v1469_v26 }
 0x2a9   :  { %7350 = vmatpush1.bf16.msra.mxu1 %v9453_v57  ;;  %v1564_v57 = vld [vmem:[#allocation10 + $0x1898] sm:$0xff] }
 0x2aa   :  { %7391 = vmatpush1.bf16.msra.mxu0 %v9965_v58  ;;  %7351 = vmatprep.subr.bf16.mxu1 %v9934_v59  ;;  %v9741_v58 = vcombine.low %v1068_v44, %v1084_v45  ;;  %v10253_v59 = vcombine.low %v1580_v46, %v1596_v47  ;;  %v10222_v61 = vcombine.high %v1548_v56, %v1564_v57  ;;  %v1437_v44 = vld [vmem:[#allocation10 + $0x14a0] sm:$0xff] }
 0x2ab   :  { %7392 = vmatprep.subr.bf16.mxu0 %v10446_v60  ;;  %v9710_v60 = vcombine.high %v1036_v54, %v1052_v55 }
 0x2ad   :  { %7352 = vmatpush2.bf16.msra.mxu1 %v9933_v1  ;;  %v1533_v1 = vld [vmem:[#allocation10 + $0x17a0] sm:$0xff] }
 0x2ae   :  { %7393 = vmatpush2.bf16.msra.mxu0 %v10445_v2  ;;  %7353 = vmatprep.subr.bf16.mxu1 %v9902_v3  ;;  %v9709_v2 = vcombine.low %v1036_v54, %v1052_v55  ;;  %v10221_v3 = vcombine.low %v1548_v56, %v1564_v57  ;;  %v10192_v6 = vcombine.high %v1517_v0, %v1533_v1  ;;  %v877_v54 = vld [vmem:[#allocation10 + $0x320] sm:$0xff] }
 0x2af   :  { %7394 = vmatprep.subr.bf16.mxu0 %v10414_v4  ;;  %v9680_v4 = vcombine.high %v1005_v62, %v1021_v63  ;;  %v10191_v17 = vcombine.low %v1517_v0, %v1533_v1  ;;  %v893_v55 = vld [vmem:[#allocation10 + $0x3a0] sm:$0xff] }
 0x2b0   :  { %v1389_v56 = vld [vmem:[#allocation10 + $0x1320] sm:$0xff] }
 0x2b1   :  { %7354 = vmatpush2.bf16.msra.mxu1 %v9901_v9  ;;  %v9679_v9 = vcombine.low %v1005_v62, %v1021_v63  ;;  %v1405_v57 = vld [vmem:[#allocation10 + $0x13a0] sm:$0xff] }
 0x2b2   :  { %7395 = vmatpush2.bf16.msra.mxu0 %v10413_v10  ;;  %7355 = vmatprep.subr.bf16.mxu1 %v9870_v11  ;;  %v1812_v10 = vrot.slane %v10934_v5, %v10895_v29  ;;  %v1485_v11 = vld [vmem:[#allocation10 + $0x1620] sm:$0xff] }
 0x2b3   :  { %7396 = vmatprep.subr.bf16.mxu0 %v10382_v12  ;;  %v1501_v12 = vld [vmem:[#allocation10 + $0x16a0] sm:$0xff] }
 0x2b4   :  { %v845_v62 = vld [vmem:[#allocation10 + $0x220] sm:$0xff] }
 0x2b5   :  { %7356 = vmatpush2.bf16.msra.mxu1 %v9869_v21  ;;  %v957_v21 = vld [vmem:[#allocation10 + $0x5a0] sm:$0xff] }
 0x2b6   :  { %7397 = vmatpush2.bf16.msra.mxu0 %v10381_v22  ;;  %7357 = vmatprep.subr.bf16.mxu1 %v9838_v23  ;;  %v9615_v46 = vcombine.low %v941_v20, %v957_v21  ;;  %v861_v63 = vld [vmem:[#allocation10 + $0x2a0] sm:$0xff] }
 0x2b7   :  { %7398 = vmatprep.subr.bf16.mxu0 %v10350_v24  ;;  %v10160_v24 = vcombine.high %v1485_v11, %v1501_v12  ;;  %v1357_v0 = vld [vmem:[#allocation10 + $0x1220] sm:$0xff] }
 0x2b8   :  { %v1373_v1 = vld [vmem:[#allocation10 + $0x12a0] sm:$0xff] }
 0x2b9   :  { %7358 = vmatpush2.bf16.msra.mxu1 %v9837_v32 }
 0x2ba   :  { %7399 = vmatpush2.bf16.msra.mxu0 %v10349_v33  ;;  %7359 = vmatprep.subr.bf16.mxu1 %v9806_v34  ;;  %v10159_v34 = vcombine.low %v1485_v11, %v1501_v12  ;;  %v9519_v11 = vcombine.low %v845_v62, %v861_v63  ;;  %v10031_v12 = vcombine.low %v1357_v0, %v1373_v1 }
 0x2bb   :  { %7400 = vmatprep.subr.bf16.mxu0 %v10318_v35  ;;  %v9616_v35 = vcombine.high %v941_v20, %v957_v21  ;;  %v797_v20 = vld [vmem:[#allocation10 + $0xa0] sm:$0xff] }
 0x2bc   :  { %v1293_v21 = vld [vmem:[#allocation10 + $0x1020] sm:$0xff] }
 0x2bd   :  { %7360 = vmatpush2.bf16.msra.mxu1 %v9805_v40  ;;  %v925_v40 = vld [vmem:[#allocation10 + $0x4a0] sm:$0xff] }
 0x2be   :  { %7401 = vmatpush2.bf16.msra.mxu0 %v10317_v41  ;;  %7361 = vmatprep.subr.bf16.mxu1 %v9774_v42 }
 0x2bf   :  { %7402 = vmatprep.subr.bf16.mxu0 %v10286_v43  ;;  %v1421_v43 = vld [vmem:[#allocation10 + $0x1420] sm:$0xff] }
 0x2c1   :  { %7362 = vmatpush2.bf16.msra.mxu1 %v9773_v48 }
 0x2c2   :  { %7403 = vmatpush2.bf16.msra.mxu0 %v10285_v49  ;;  %7363 = vmatprep.subr.bf16.mxu1 %v9742_v51  ;;  %v10127_v49 = vcombine.low %v1453_v25, %v1469_v26  ;;  %v9584_v51 = vcombine.high %v909_v39, %v925_v40 }
 0x2c3   :  { %7404 = vmatprep.subr.bf16.mxu0 %v10254_v53  ;;  %v10096_v53 = vcombine.high %v1421_v43, %v1437_v44 }
 0x2c5   :  { %7364 = vmatpush2.bf16.msra.mxu1 %v9741_v58  ;;  %v9583_v58 = vcombine.low %v909_v39, %v925_v40  ;;  %v1229_v39 = vld [vmem:[#allocation10 + $0xe20] sm:$0xff] }
 0x2c6   :  { %7405 = vmatpush2.bf16.msra.mxu0 %v10253_v59  ;;  %7365 = vmatprep.subr.bf16.mxu1 %v9710_v60  ;;  %v10095_v59 = vcombine.low %v1421_v43, %v1437_v44  ;;  %v9552_v60 = vcombine.high %v877_v54, %v893_v55  ;;  %v1245_v40 = vld [vmem:[#allocation10 + $0xea0] sm:$0xff] }
 0x2c7   :  { %7406 = vmatprep.subr.bf16.mxu0 %v10222_v61  ;;  %v10064_v61 = vcombine.high %v1389_v56, %v1405_v57 }
 0x2c9   :  { %7366 = vmatpush2.bf16.msra.mxu1 %v9709_v2  ;;  %v9551_v2 = vcombine.low %v877_v54, %v893_v55  ;;  %v9903_v54 = vcombine.low %v1229_v39, %v1245_v40 }
 0x2ca   :  { %7407 = vmatpush2.bf16.msra.mxu0 %v10221_v3  ;;  %7417 = vmatprep.subr.bf16.mxu1 %v9680_v4  ;;  %v10063_v3 = vcombine.low %v1389_v56, %v1405_v57  ;;  %v9520_v4 = vcombine.high %v845_v62, %v861_v63 }
 0x2cb   :  { %7458 = vmatprep.subr.bf16.mxu0 %v10192_v6  ;;  %v10032_v6 = vcombine.high %v1357_v0, %v1373_v1 }
 0x2cc   :  { %7368 = vmatmul.mubr.bf16.vlgmr.msra.gmra.mxu1 %v10916_v15  ;;  %v7123_v22 = vpop.f32.mrf.mxu1  ;;  %v7164_v23 = vpop.f32.mrf.mxu0 }
 0x2cd   :  { %7409 = vmatmul.mubr.bf16.vlgmr.msra.gmra.mxu0 %v10918_v16  ;;  %v7124_v27 = vadd.f32 %v7123_v22, %v1812_v10  ;;  %7418 = vmatpush1.bf16.msra.mxu1 %v9679_v9  ;;  %v1325_v9 = vld [vmem:[#allocation10 + $0x1120] sm:$0xff] }
 0x2ce   :  { %7449 = vmatprep.mubr.bf16.mxu1 %v10912_v13  ;;  %7459 = vmatpush1.bf16.msra.mxu0 %v10191_v17  ;;  %v7125_v32 = vpop.f32.mrf.mxu1  ;;  %v7166_v33 = vpop.f32.mrf.mxu0  ;;  %v1341_v10 = vld [vmem:[#allocation10 + $0x11a0] sm:$0xff]  ;;  %v9488_v17 = vcombine.high %v813_v7, %v829_v8 }
 0x2cf   :  { %v10943_v36 = vadd.f32 %v7164_v23, %v7124_v27  ;;  %7490 = vmatprep.mubr.bf16.mxu0 %v10914_v14  ;;  %v7126_v37 = vadd.f32 %v7125_v32, %v1816_v18  ;;  %7419 = vmatprep.subr.bf16.mxu1 %v9648_v19  ;;  %v10000_v18 = vcombine.high %v1325_v9, %v1341_v10  ;;  %v781_v19 = vld [vmem:[#allocation10 + $0x20] sm:$0xff] }
 0x2d0   :  { %7460 = vmatprep.subr.bf16.mxu0 %v10160_v24  ;;  %v7127_v41 = vpop.f32.mrf.mxu1  ;;  %v7168_v42 = vpop.f32.mrf.mxu0  ;;  %v1309_v22 = vld [vmem:[#allocation10 + $0x10a0] sm:$0xff]  ;;  %v9487_v23 = vcombine.low %v813_v7, %v829_v8  ;;  %v9999_v24 = vcombine.low %v1325_v9, %v1341_v10  ;;  %v9456_v25 = vcombine.high %v781_v19, %v797_v20 }
 0x2d1   :  { %v10946_v45 = vadd.f32 %v7166_v33, %v7126_v37  ;;  %7420 = vmatpush1.bf16.msra.mxu1 %v9647_v30  ;;  %v9968_v26 = vcombine.high %v1293_v21, %v1309_v22  ;;  %v1261_v27 = vld [vmem:[#allocation10 + $0xf20] sm:$0xff] }
 0x2d2   :  { %7461 = vmatpush1.bf16.msra.mxu0 %v10159_v34  ;;  %v7128_v47 = vpop.f32.mrf.mxu1  ;;  %v7169_v48 = vpop.f32.mrf.mxu0  ;;  %7421 = vmatprep.subr.bf16.mxu1 %v9616_v35  ;;  %v1277_v30 = vld [vmem:[#allocation10 + $0xfa0] sm:$0xff]  ;;  %v9455_v34 = vcombine.low %v781_v19, %v797_v20  ;;  %v9967_v35 = vcombine.low %v1293_v21, %v1309_v22 }
 0x2d3   :  { %7462 = vmatprep.subr.bf16.mxu0 %v10128_v38  ;;  %v1773_v32 = vld [vmem:[#allocation10 + $0x1f20] sm:$0xff]  ;;  %v9936_v37 = vcombine.high %v1261_v27, %v1277_v30  ;;  %v9935_v43 = vcombine.low %v1261_v27, %v1277_v30 }
 0x2d4   :  { %v1789_v33 = vld [vmem:[#allocation10 + $0x1fa0] sm:$0xff] }
 0x2d5   :  { %7422 = vmatpush1.bf16.msra.mxu1 %v9615_v46  ;;  %v10448_v38 = vcombine.high %v1773_v32, %v1789_v33  ;;  %v1741_v41 = vld [vmem:[#allocation10 + $0x1e20] sm:$0xff]  ;;  %v10447_v44 = vcombine.low %v1773_v32, %v1789_v33  ;;  %v9904_v46 = vcombine.high %v1229_v39, %v1245_v40 }
 0x2d6   :  { %7463 = vmatpush1.bf16.msra.mxu0 %v10127_v49  ;;  %7423 = vmatprep.subr.bf16.mxu1 %v9584_v51  ;;  %v1757_v42 = vld [vmem:[#allocation10 + $0x1ea0] sm:$0xff] }
 0x2d7   :  { %7464 = vmatprep.subr.bf16.mxu0 %v10096_v53  ;;  %v10416_v47 = vcombine.high %v1741_v41, %v1757_v42  ;;  %v1197_v48 = vld [vmem:[#allocation10 + $0xd20] sm:$0xff]  ;;  %v10415_v55 = vcombine.low %v1741_v41, %v1757_v42 }
 0x2d8   :  { %v1213_v49 = vld [vmem:[#allocation10 + $0xda0] sm:$0xff] }
 0x2d9   :  { %7424 = vmatpush1.bf16.msra.mxu1 %v9583_v58  ;;  %v1709_v51 = vld [vmem:[#allocation10 + $0x1d20] sm:$0xff]  ;;  %v9872_v56 = vcombine.high %v1197_v48, %v1213_v49  ;;  %v9871_v62 = vcombine.low %v1197_v48, %v1213_v49 }
 0x2da   :  { %7465 = vmatpush1.bf16.msra.mxu0 %v10095_v59  ;;  %7425 = vmatprep.subr.bf16.mxu1 %v9552_v60  ;;  %v1725_v53 = vld [vmem:[#allocation10 + $0x1da0] sm:$0xff] }
 0x2db   :  { %7466 = vmatprep.subr.bf16.mxu0 %v10064_v61  ;;  %v10384_v57 = vcombine.high %v1709_v51, %v1725_v53  ;;  %v1165_v58 = vld [vmem:[#allocation10 + $0xc20] sm:$0xff]  ;;  %v10383_v63 = vcombine.low %v1709_v51, %v1725_v53 }
 0x2dc   :  { %v1181_v59 = vld [vmem:[#allocation10 + $0xca0] sm:$0xff] }
 0x2dd   :  { %7426 = vmatpush1.bf16.msra.mxu1 %v9551_v2  ;;  %v1677_v60 = vld [vmem:[#allocation10 + $0x1c20] sm:$0xff]  ;;  %v9840_v0 = vcombine.high %v1165_v58, %v1181_v59  ;;  %v9839_v7 = vcombine.low %v1165_v58, %v1181_v59  ;;  %v1486_v58 = vld [vmem:[#allocation10 + $0x1628] sm:$0xff] }
 0x2de   :  { %7467 = vmatpush1.bf16.msra.mxu0 %v10063_v3  ;;  %7427 = vmatprep.subr.bf16.mxu1 %v9520_v4  ;;  %v1693_v61 = vld [vmem:[#allocation10 + $0x1ca0] sm:$0xff]  ;;  %v1502_v59 = vld [vmem:[#allocation10 + $0x16a8] sm:$0xff] }
 0x2df   :  { %7468 = vmatprep.subr.bf16.mxu0 %v10032_v6  ;;  %v10352_v1 = vcombine.high %v1677_v60, %v1693_v61  ;;  %v1133_v2 = vld [vmem:[#allocation10 + $0xb20] sm:$0xff]  ;;  %v10351_v8 = vcombine.low %v1677_v60, %v1693_v61  ;;  %v1824_v61 = vrot.slane %v10934_v5, %v10906_v52 }
 0x2e0   :  { %v1149_v3 = vld [vmem:[#allocation10 + $0xba0] sm:$0xff] }
 0x2e1   :  { %7428 = vmatpush1.bf16.msra.mxu1 %v9519_v11  ;;  %v1645_v4 = vld [vmem:[#allocation10 + $0x1b20] sm:$0xff]  ;;  %v9808_v9 = vcombine.high %v1133_v2, %v1149_v3  ;;  %v9807_v19 = vcombine.low %v1133_v2, %v1149_v3  ;;  %v10162_v3 = vcombine.high %v1486_v58, %v1502_v59 }
 0x2e2   :  { %7469 = vmatpush1.bf16.msra.mxu0 %v10031_v12  ;;  %7429 = vmatprep.subr.bf16.mxu1 %v9488_v17  ;;  %v1661_v6 = vld [vmem:[#allocation10 + $0x1ba0] sm:$0xff] }
 0x2e3   :  { %7470 = vmatprep.subr.bf16.mxu0 %v10000_v18  ;;  %v10320_v10 = vcombine.high %v1645_v4, %v1661_v6  ;;  %v1101_v11 = vld [vmem:[#allocation10 + $0xa20] sm:$0xff]  ;;  %v10319_v20 = vcombine.low %v1645_v4, %v1661_v6  ;;  %v1454_v4 = vld [vmem:[#allocation10 + $0x1528] sm:$0xff] }
 0x2e4   :  { %v1117_v12 = vld [vmem:[#allocation10 + $0xaa0] sm:$0xff]  ;;  %v1470_v6 = vld [vmem:[#allocation10 + $0x15a8] sm:$0xff] }
 0x2e5   :  { %7430 = vmatpush1.bf16.msra.mxu1 %v9487_v23  ;;  %v1613_v17 = vld [vmem:[#allocation10 + $0x1a20] sm:$0xff]  ;;  %v9776_v21 = vcombine.high %v1101_v11, %v1117_v12  ;;  %v9775_v27 = vcombine.low %v1101_v11, %v1117_v12  ;;  %v10161_v12 = vcombine.low %v1486_v58, %v1502_v59  ;;  %v846_v58 = vld [vmem:[#allocation10 + $0x228] sm:$0xff] }
 0x2e6   :  { %7471 = vmatpush1.bf16.msra.mxu0 %v9999_v24  ;;  %7431 = vmatprep.subr.bf16.mxu1 %v9456_v25  ;;  %v1629_v18 = vld [vmem:[#allocation10 + $0x1aa0] sm:$0xff]  ;;  %v862_v59 = vld [vmem:[#allocation10 + $0x2a8] sm:$0xff] }
 0x2e7   :  { %7472 = vmatprep.subr.bf16.mxu0 %v9968_v26  ;;  %v10288_v22 = vcombine.high %v1613_v17, %v1629_v18  ;;  %v1069_v23 = vld [vmem:[#allocation10 + $0x920] sm:$0xff]  ;;  %v10287_v30 = vcombine.low %v1613_v17, %v1629_v18  ;;  %v910_v18 = vld [vmem:[#allocation10 + $0x428] sm:$0xff] }
 0x2e8   :  { %v1085_v24 = vld [vmem:[#allocation10 + $0x9a0] sm:$0xff] }
 0x2e9   :  { %7432 = vmatpush1.bf16.msra.mxu1 %v9455_v34  ;;  %v1581_v25 = vld [vmem:[#allocation10 + $0x1920] sm:$0xff]  ;;  %v9744_v32 = vcombine.high %v1069_v23, %v1085_v24  ;;  %v9743_v39 = vcombine.low %v1069_v23, %v1085_v24  ;;  %v1422_v23 = vld [vmem:[#allocation10 + $0x1428] sm:$0xff] }
 0x2ea   :  { %7473 = vmatpush1.bf16.msra.mxu0 %v9967_v35  ;;  %7433 = vmatprep.subr.bf16.mxu1 %v9936_v37  ;;  %v1597_v26 = vld [vmem:[#allocation10 + $0x19a0] sm:$0xff]  ;;  %v1438_v24 = vld [vmem:[#allocation10 + $0x14a8] sm:$0xff] }
 0x2eb   :  { %7474 = vmatprep.subr.bf16.mxu0 %v10448_v38  ;;  %v10256_v33 = vcombine.high %v1581_v25, %v1597_v26  ;;  %v1037_v34 = vld [vmem:[#allocation10 + $0x820] sm:$0xff]  ;;  %v10255_v40 = vcombine.low %v1581_v25, %v1597_v26 }
 0x2ec   :  { %v1053_v35 = vld [vmem:[#allocation10 + $0x8a0] sm:$0xff] }
 0x2ed   :  { %7434 = vmatpush2.bf16.msra.mxu1 %v9935_v43  ;;  %v1549_v37 = vld [vmem:[#allocation10 + $0x1820] sm:$0xff]  ;;  %v9712_v41 = vcombine.high %v1037_v34, %v1053_v35  ;;  %v1006_v43 = vld [vmem:[#allocation10 + $0x728] sm:$0xff]  ;;  %v9711_v48 = vcombine.low %v1037_v34, %v1053_v35  ;;  %v10129_v35 = vcombine.low %v1454_v4, %v1470_v6 }
 0x2ee   :  { %7475 = vmatpush2.bf16.msra.mxu0 %v10447_v44  ;;  %7435 = vmatprep.subr.bf16.mxu1 %v9904_v46  ;;  %v1565_v38 = vld [vmem:[#allocation10 + $0x18a0] sm:$0xff]  ;;  %v1022_v44 = vld [vmem:[#allocation10 + $0x7a8] sm:$0xff] }
 0x2ef   :  { %7476 = vmatprep.subr.bf16.mxu0 %v10416_v47  ;;  %v10224_v42 = vcombine.high %v1549_v37, %v1565_v38  ;;  %v1518_v46 = vld [vmem:[#allocation10 + $0x1728] sm:$0xff]  ;;  %v10223_v49 = vcombine.low %v1549_v37, %v1565_v38  ;;  %v9682_v51 = vcombine.high %v1006_v43, %v1022_v44  ;;  %v10098_v38 = vcombine.high %v1422_v23, %v1438_v24 }
 0x2f0   :  { %v1534_v47 = vld [vmem:[#allocation10 + $0x17a8] sm:$0xff] }
 0x2f1   :  { %7436 = vmatpush2.bf16.msra.mxu1 %v9903_v54  ;;  %v10194_v53 = vcombine.high %v1518_v46, %v1534_v47  ;;  %v974_v54 = vld [vmem:[#allocation10 + $0x628] sm:$0xff]  ;;  %v10193_v60 = vcombine.low %v1518_v46, %v1534_v47 }
 0x2f2   :  { %7477 = vmatpush2.bf16.msra.mxu0 %v10415_v55  ;;  %7437 = vmatprep.subr.bf16.mxu1 %v9872_v56  ;;  %v990_v55 = vld [vmem:[#allocation10 + $0x6a8] sm:$0xff]  ;;  %v1820_v56 = vrot.slane %v10934_v5, %v10903_v50 }
 0x2f3   :  { %7478 = vmatprep.subr.bf16.mxu0 %v10384_v57  ;;  %v9681_v57 = vcombine.low %v1006_v43, %v1022_v44  ;;  %v878_v43 = vld [vmem:[#allocation10 + $0x328] sm:$0xff] }
 0x2f4   :  { %v894_v44 = vld [vmem:[#allocation10 + $0x3a8] sm:$0xff] }
 0x2f5   :  { %7438 = vmatpush2.bf16.msra.mxu1 %v9871_v62  ;;  %v9650_v62 = vcombine.high %v974_v54, %v990_v55  ;;  %v1390_v46 = vld [vmem:[#allocation10 + $0x1328] sm:$0xff] }
 0x2f6   :  { %7479 = vmatpush2.bf16.msra.mxu0 %v10383_v63  ;;  %7439 = vmatprep.subr.bf16.mxu1 %v9840_v0  ;;  %v942_v63 = vld [vmem:[#allocation10 + $0x528] sm:$0xff] }
 0x2f7   :  { %7480 = vmatprep.subr.bf16.mxu0 %v10352_v1  ;;  %v958_v0 = vld [vmem:[#allocation10 + $0x5a8] sm:$0xff] }
 0x2f8   :  { %v9618_v17 = vcombine.high %v942_v63, %v958_v0  ;;  %v1406_v47 = vld [vmem:[#allocation10 + $0x13a8] sm:$0xff] }
 0x2f9   :  { %7440 = vmatpush2.bf16.msra.mxu1 %v9839_v7  ;;  %v8401_v7 = vmax.f32 %v10943_v36, 0.0  ;;  %v10130_v36 = vcombine.high %v1454_v4, %v1470_v6  ;;  %v1326_v4 = vld [vmem:[#allocation10 + $0x1128] sm:$0xff] }
 0x2fa   :  { %7481 = vmatpush2.bf16.msra.mxu0 %v10351_v8  ;;  %7441 = vmatprep.subr.bf16.mxu1 %v9808_v9  ;;  %v9649_v9 = vcombine.low %v974_v54, %v990_v55  ;;  %v10097_v54 = vcombine.low %v1422_v23, %v1438_v24  ;;  %v9554_v55 = vcombine.high %v878_v43, %v894_v44  ;;  %v1342_v6 = vld [vmem:[#allocation10 + $0x11a8] sm:$0xff] }
 0x2fb   :  { %7482 = vmatprep.subr.bf16.mxu0 %v10320_v10  ;;  %v1278_v23 = vld [vmem:[#allocation10 + $0xfa8] sm:$0xff] }
 0x2fc   :  { %v1774_v24 = vld [vmem:[#allocation10 + $0x1f28] sm:$0xff] }
 0x2fd   :  { %7442 = vmatpush2.bf16.msra.mxu1 %v9807_v19  ;;  %v8402_v19 = vmax.f32 %v10946_v45, 0.0 }
 0x2fe   :  { %7483 = vmatpush2.bf16.msra.mxu0 %v10319_v20  ;;  %7443 = vmatprep.subr.bf16.mxu1 %v9776_v21 }
 0x2ff   :  { %7484 = vmatprep.subr.bf16.mxu0 %v10288_v22  ;;  %v926_v22 = vld [vmem:[#allocation10 + $0x4a8] sm:$0xff] }
 0x300   :  { %v9586_v37 = vcombine.high %v910_v18, %v926_v22 }
 0x301   :  { %7444 = vmatpush2.bf16.msra.mxu1 %v9775_v27  ;;  %v8945_v27 = vrot.slane %v8401_v7, 1 }
 0x302   :  { %7485 = vmatpush2.bf16.msra.mxu0 %v10287_v30  ;;  %7445 = vmatprep.subr.bf16.mxu1 %v9744_v32 }
 0x303   :  { %7486 = vmatprep.subr.bf16.mxu0 %v10256_v33  ;;  %v9617_v33 = vcombine.low %v942_v63, %v958_v0  ;;  %v10065_v63 = vcombine.low %v1390_v46, %v1406_v47  ;;  %v9522_v0 = vcombine.high %v846_v58, %v862_v59 }
 0x305   :  { %7446 = vmatpush2.bf16.msra.mxu1 %v9743_v39  ;;  %v8946_v39 = vrot.slane %v8402_v19, 1 }
 0x306   :  { %7487 = vmatpush2.bf16.msra.mxu0 %v10255_v40  ;;  %7447 = vmatprep.subr.bf16.mxu1 %v9712_v41 }
 0x307   :  { %7488 = vmatprep.subr.bf16.mxu0 %v10224_v42 }
 0x309   :  { %7448 = vmatpush2.bf16.msra.mxu1 %v9711_v48 }
 0x30a   :  { %7489 = vmatpush2.bf16.msra.mxu0 %v10223_v49  ;;  %7499 = vmatprep.subr.bf16.mxu1 %v9682_v51 }
 0x30b   :  { %7540 = vmatprep.subr.bf16.mxu0 %v10194_v53  ;;  %v9585_v53 = vcombine.low %v910_v18, %v926_v22  ;;  %v1310_v18 = vld [vmem:[#allocation10 + $0x10a8] sm:$0xff] }
 0x30c   :  { %v7205_v1 = vpop.f32.mrf.mxu1  ;;  %v7246_v2 = vpop.f32.mrf.mxu0  ;;  %7450 = vmatmul.mubr.bf16.vlgmr.msra.gmra.mxu1 %v10916_v15  ;;  %v1262_v22 = vld [vmem:[#allocation10 + $0xf28] sm:$0xff] }
 0x30d   :  { %v7206_v8 = vadd.f32 %v7205_v1, %v1820_v56  ;;  %7491 = vmatmul.mubr.bf16.vlgmr.msra.gmra.mxu0 %v10918_v16  ;;  %7500 = vmatpush1.bf16.msra.mxu1 %v9681_v57  ;;  %v10066_v57 = vcombine.high %v1390_v46, %v1406_v47  ;;  %v1726_v46 = vld [vmem:[#allocation10 + $0x1da8] sm:$0xff] }
 0x30e   :  { %7531 = vmatprep.mubr.bf16.mxu1 %v10912_v13  ;;  %7541 = vmatpush1.bf16.msra.mxu0 %v10193_v60  ;;  %v7207_v10 = vpop.f32.mrf.mxu1  ;;  %v7248_v11 = vpop.f32.mrf.mxu0  ;;  %v1358_v60 = vld [vmem:[#allocation10 + $0x1228] sm:$0xff] }
 0x30f   :  { %v7247_v20 = vadd.f32 %v7246_v2, %v7206_v8  ;;  %7572 = vmatprep.mubr.bf16.mxu0 %v10914_v14  ;;  %v7208_v21 = vadd.f32 %v7207_v10, %v1824_v61  ;;  %7501 = vmatprep.subr.bf16.mxu1 %v9650_v62  ;;  %v1374_v61 = vld [vmem:[#allocation10 + $0x12a8] sm:$0xff]  ;;  %v9553_v62 = vcombine.low %v878_v43, %v894_v44 }
 0x310   :  { %v7209_v25 = vpop.f32.mrf.mxu1  ;;  %v7250_v26 = vpop.f32.mrf.mxu0  ;;  %7542 = vmatprep.subr.bf16.mxu0 %v10162_v3  ;;  %v10034_v1 = vcombine.high %v1358_v60, %v1374_v61  ;;  %v814_v2 = vld [vmem:[#allocation10 + $0x128] sm:$0xff]  ;;  %v10033_v8 = vcombine.low %v1358_v60, %v1374_v61  ;;  %v10002_v10 = vcombine.high %v1326_v4, %v1342_v6 }
 0x311   :  { %v8403_v30 = vmax.f32 %v7247_v20, 0.0  ;;  %v7249_v32 = vadd.f32 %v7248_v11, %v7208_v21  ;;  %7502 = vmatpush1.bf16.msra.mxu1 %v9649_v9  ;;  %v830_v3 = vld [vmem:[#allocation10 + $0x1a8] sm:$0xff]  ;;  %v10001_v20 = vcombine.low %v1326_v4, %v1342_v6 }
 0x312   :  { %7543 = vmatpush1.bf16.msra.mxu0 %v10161_v12  ;;  %v7210_v45 = vpop.f32.mrf.mxu1  ;;  %v7251_v34 = vpop.f32.mrf.mxu0  ;;  %7503 = vmatprep.subr.bf16.mxu1 %v9618_v17  ;;  %v9490_v9 = vcombine.high %v814_v2, %v830_v3  ;;  %v782_v11 = vld [vmem:[#allocation10 + $0x28] sm:$0xff] }
 0x313   :  { %v8445_v40 = vrot.slane %v8403_v30, 7  ;;  %v10959_v41 = vsel %vm8527_vm0, %v8945_v27, %v8403_v30  ;;  %v8404_v42 = vmax.f32 %v7249_v32, 0.0  ;;  %7544 = vmatprep.subr.bf16.mxu0 %v10130_v36  ;;  %v798_v12 = vld [vmem:[#allocation10 + $0xa8] sm:$0xff]  ;;  %v9938_v30 = vcombine.high %v1262_v22, %v1278_v23 }
 0x314   :  { %v1294_v17 = vld [vmem:[#allocation10 + $0x1028] sm:$0xff]  ;;  %v9458_v21 = vcombine.high %v782_v11, %v798_v12  ;;  %v9457_v26 = vcombine.low %v782_v11, %v798_v12 }
 0x315   :  { %v10962_v48 = vsel %vm8527_vm0, %v8401_v7, %v8445_v40  ;;  %v8446_v49 = vrot.slane %v8404_v42, 7  ;;  %v10965_v51 = vsel %vm8527_vm0, %v8946_v39, %v8404_v42  ;;  %7504 = vmatpush1.bf16.msra.mxu1 %v9617_v33  ;;  %v9521_v7 = vcombine.low %v846_v58, %v862_v59  ;;  %v1790_v25 = vld [vmem:[#allocation10 + $0x1fa8] sm:$0xff] }
 0x316   :  { %7545 = vmatpush1.bf16.msra.mxu0 %v10129_v35  ;;  %7505 = vmatprep.subr.bf16.mxu1 %v9586_v37  ;;  %v9970_v36 = vcombine.high %v1294_v17, %v1310_v18  ;;  %v9969_v27 = vcombine.low %v1294_v17, %v1310_v18  ;;  %v10450_v32 = vcombine.high %v1774_v24, %v1790_v25  ;;  %v1230_v33 = vld [vmem:[#allocation10 + $0xe28] sm:$0xff] }
 0x317   :  { %v10968_v56 = vsel %vm8527_vm0, %v8402_v19, %v8446_v49  ;;  %7546 = vmatprep.subr.bf16.mxu0 %v10098_v38  ;;  %v9489_v19 = vcombine.low %v814_v2, %v830_v3  ;;  %v1246_v45 = vld [vmem:[#allocation10 + $0xea8] sm:$0xff]  ;;  %v9937_v37 = vcombine.low %v1262_v22, %v1278_v23  ;;  %v10449_v38 = vcombine.low %v1774_v24, %v1790_v25 }
 0x318   :  { %v1742_v34 = vld [vmem:[#allocation10 + $0x1e28] sm:$0xff]  ;;  %v9906_v39 = vcombine.high %v1230_v33, %v1246_v45  ;;  %v9905_v47 = vcombine.low %v1230_v33, %v1246_v45 }
 0x319   :  { %7506 = vmatpush1.bf16.msra.mxu1 %v9585_v53  ;;  %v1758_v35 = vld [vmem:[#allocation10 + $0x1ea8] sm:$0xff] }
 0x31a   :  { %7547 = vmatpush1.bf16.msra.mxu0 %v10097_v54  ;;  %7507 = vmatprep.subr.bf16.mxu1 %v9554_v55  ;;  %v10418_v40 = vcombine.high %v1742_v34, %v1758_v35  ;;  %v1198_v42 = vld [vmem:[#allocation10 + $0xd28] sm:$0xff]  ;;  %v10417_v49 = vcombine.low %v1742_v34, %v1758_v35 }
 0x31b   :  { %7548 = vmatprep.subr.bf16.mxu0 %v10066_v57  ;;  %v1214_v43 = vld [vmem:[#allocation10 + $0xda8] sm:$0xff] }
 0x31c   :  { %v1710_v44 = vld [vmem:[#allocation10 + $0x1d28] sm:$0xff]  ;;  %v9874_v53 = vcombine.high %v1198_v42, %v1214_v43  ;;  %v9873_v60 = vcombine.low %v1198_v42, %v1214_v43  ;;  %v1519_v42 = vld [vmem:[#allocation10 + $0x1730] sm:$0xff] }
 0x31d   :  { %7508 = vmatpush1.bf16.msra.mxu1 %v9553_v62  ;;  %v10386_v54 = vcombine.high %v1710_v44, %v1726_v46  ;;  %v1166_v55 = vld [vmem:[#allocation10 + $0xc28] sm:$0xff]  ;;  %v10385_v61 = vcombine.low %v1710_v44, %v1726_v46  ;;  %v1535_v43 = vld [vmem:[#allocation10 + $0x17b0] sm:$0xff]  ;;  %v10971_v46 = vsub.s32 4, %v10892_v28 }
 0x31e   :  { %7549 = vmatpush1.bf16.msra.mxu0 %v10065_v63  ;;  %7509 = vmatprep.subr.bf16.mxu1 %v9522_v0  ;;  %v1182_v57 = vld [vmem:[#allocation10 + $0xca8] sm:$0xff] }
 0x31f   :  { %7550 = vmatprep.subr.bf16.mxu0 %v10034_v1  ;;  %v1678_v58 = vld [vmem:[#allocation10 + $0x1c28] sm:$0xff]  ;;  %v9842_v62 = vcombine.high %v1166_v55, %v1182_v57  ;;  %v9841_v4 = vcombine.low %v1166_v55, %v1182_v57  ;;  %v975_v55 = vld [vmem:[#allocation10 + $0x630] sm:$0xff] }
 0x320   :  { %v1694_v59 = vld [vmem:[#allocation10 + $0x1ca8] sm:$0xff]  ;;  %v991_v57 = vld [vmem:[#allocation10 + $0x6b0] sm:$0xff] }
 0x321   :  { %7510 = vmatpush1.bf16.msra.mxu1 %v9521_v7  ;;  %v10354_v63 = vcombine.high %v1678_v58, %v1694_v59  ;;  %v1134_v0 = vld [vmem:[#allocation10 + $0xb28] sm:$0xff]  ;;  %v10353_v6 = vcombine.low %v1678_v58, %v1694_v59  ;;  %v1828_v58 = vrot.slane %v10934_v5, %v10971_v46 }
 0x322   :  { %7551 = vmatpush1.bf16.msra.mxu0 %v10033_v8  ;;  %7511 = vmatprep.subr.bf16.mxu1 %v9490_v9  ;;  %v1150_v1 = vld [vmem:[#allocation10 + $0xba8] sm:$0xff] }
 0x323   :  { %7552 = vmatprep.subr.bf16.mxu0 %v10002_v10  ;;  %v1646_v2 = vld [vmem:[#allocation10 + $0x1b28] sm:$0xff]  ;;  %v9810_v7 = vcombine.high %v1134_v0, %v1150_v1  ;;  %v9809_v17 = vcombine.low %v1134_v0, %v1150_v1  ;;  %v9652_v0 = vcombine.high %v975_v55, %v991_v57  ;;  %v943_v1 = vld [vmem:[#allocation10 + $0x530] sm:$0xff] }
 0x324   :  { %v1662_v3 = vld [vmem:[#allocation10 + $0x1ba8] sm:$0xff] }
 0x325   :  { %7512 = vmatpush1.bf16.msra.mxu1 %v9489_v19  ;;  %v10322_v8 = vcombine.high %v1646_v2, %v1662_v3  ;;  %v1102_v9 = vld [vmem:[#allocation10 + $0xa28] sm:$0xff]  ;;  %v10321_v18 = vcombine.low %v1646_v2, %v1662_v3  ;;  %v959_v2 = vld [vmem:[#allocation10 + $0x5b0] sm:$0xff] }
 0x326   :  { %7553 = vmatpush1.bf16.msra.mxu0 %v10001_v20  ;;  %7513 = vmatprep.subr.bf16.mxu1 %v9458_v21  ;;  %v1118_v10 = vld [vmem:[#allocation10 + $0xaa8] sm:$0xff] }
 0x327   :  { %7554 = vmatprep.subr.bf16.mxu0 %v9970_v36  ;;  %v1614_v11 = vld [vmem:[#allocation10 + $0x1a28] sm:$0xff]  ;;  %v9778_v19 = vcombine.high %v1102_v9, %v1118_v10  ;;  %v9777_v24 = vcombine.low %v1102_v9, %v1118_v10  ;;  %v9651_v10 = vcombine.low %v975_v55, %v991_v57 }
 0x328   :  { %v1630_v12 = vld [vmem:[#allocation10 + $0x1aa8] sm:$0xff] }
 0x329   :  { %7514 = vmatpush1.bf16.msra.mxu1 %v9457_v26  ;;  %v10290_v20 = vcombine.high %v1614_v11, %v1630_v12  ;;  %v1070_v21 = vld [vmem:[#allocation10 + $0x928] sm:$0xff]  ;;  %v10289_v25 = vcombine.low %v1614_v11, %v1630_v12  ;;  %v9620_v12 = vcombine.high %v943_v1, %v959_v2 }
 0x32a   :  { %7555 = vmatpush1.bf16.msra.mxu0 %v9969_v27  ;;  %7515 = vmatprep.subr.bf16.mxu1 %v9938_v30  ;;  %v1086_v36 = vld [vmem:[#allocation10 + $0x9a8] sm:$0xff] }
 0x32b   :  { %7556 = vmatprep.subr.bf16.mxu0 %v10450_v32  ;;  %v1582_v22 = vld [vmem:[#allocation10 + $0x1928] sm:$0xff]  ;;  %v9746_v26 = vcombine.high %v1070_v21, %v1086_v36  ;;  %v9745_v34 = vcombine.low %v1070_v21, %v1086_v36  ;;  %v911_v21 = vld [vmem:[#allocation10 + $0x430] sm:$0xff] }
 0x32c   :  { %v1598_v23 = vld [vmem:[#allocation10 + $0x19a8] sm:$0xff]  ;;  %v927_v36 = vld [vmem:[#allocation10 + $0x4b0] sm:$0xff] }
 0x32d   :  { %7516 = vmatpush2.bf16.msra.mxu1 %v9937_v37  ;;  %v10258_v27 = vcombine.high %v1582_v22, %v1598_v23  ;;  %v1038_v30 = vld [vmem:[#allocation10 + $0x828] sm:$0xff]  ;;  %v10257_v35 = vcombine.low %v1582_v22, %v1598_v23  ;;  %v1423_v23 = vld [vmem:[#allocation10 + $0x1430] sm:$0xff] }
 0x32e   :  { %7557 = vmatpush2.bf16.msra.mxu0 %v10449_v38  ;;  %7517 = vmatprep.subr.bf16.mxu1 %v9906_v39  ;;  %v1054_v32 = vld [vmem:[#allocation10 + $0x8a8] sm:$0xff]  ;;  %v1007_v39 = vld [vmem:[#allocation10 + $0x730] sm:$0xff] }
 0x32f   :  { %7558 = vmatprep.subr.bf16.mxu0 %v10418_v40  ;;  %v1550_v33 = vld [vmem:[#allocation10 + $0x1828] sm:$0xff]  ;;  %v9714_v37 = vcombine.high %v1038_v30, %v1054_v32  ;;  %v1023_v40 = vld [vmem:[#allocation10 + $0x7b0] sm:$0xff]  ;;  %v9713_v44 = vcombine.low %v1038_v30, %v1054_v32  ;;  %v9619_v30 = vcombine.low %v943_v1, %v959_v2 }
 0x330   :  { %v1566_v45 = vld [vmem:[#allocation10 + $0x18a8] sm:$0xff]  ;;  %v9683_v59 = vcombine.low %v1007_v39, %v1023_v40 }
 0x331   :  { %7518 = vmatpush2.bf16.msra.mxu1 %v9905_v47  ;;  %v10226_v38 = vcombine.high %v1550_v33, %v1566_v45  ;;  %v10225_v47 = vcombine.low %v1550_v33, %v1566_v45  ;;  %v9588_v45 = vcombine.high %v911_v21, %v927_v36 }
 0x332   :  { %7559 = vmatpush2.bf16.msra.mxu0 %v10417_v49  ;;  %7519 = vmatprep.subr.bf16.mxu1 %v9874_v53  ;;  %v9684_v49 = vcombine.high %v1007_v39, %v1023_v40  ;;  %v10196_v53 = vcombine.high %v1519_v42, %v1535_v43  ;;  %v879_v40 = vld [vmem:[#allocation10 + $0x330] sm:$0xff] }
 0x333   :  { %7560 = vmatprep.subr.bf16.mxu0 %v10386_v54  ;;  %v10974_v54 = vsub.s32 5, %v10892_v28 }
 0x335   :  { %7520 = vmatpush2.bf16.msra.mxu1 %v9873_v60  ;;  %v1487_v60 = vld [vmem:[#allocation10 + $0x1630] sm:$0xff] }
 0x336   :  { %7561 = vmatpush2.bf16.msra.mxu0 %v10385_v61  ;;  %7521 = vmatprep.subr.bf16.mxu1 %v9842_v62  ;;  %v1503_v61 = vld [vmem:[#allocation10 + $0x16b0] sm:$0xff]  ;;  %v10195_v62 = vcombine.low %v1519_v42, %v1535_v43  ;;  %v9587_v43 = vcombine.low %v911_v21, %v927_v36 }
 0x337   :  { %7562 = vmatprep.subr.bf16.mxu0 %v10354_v63  ;;  %v1832_v63 = vrot.slane %v10934_v5, %v10974_v54  ;;  %v10163_v5 = vcombine.low %v1487_v60, %v1503_v61  ;;  %v895_v42 = vld [vmem:[#allocation10 + $0x3b0] sm:$0xff] }
 0x338   :  { %v9555_v1 = vcombine.low %v879_v40, %v895_v42 }
 0x339   :  { %7522 = vmatpush2.bf16.msra.mxu1 %v9841_v4  ;;  %v10164_v4 = vcombine.high %v1487_v60, %v1503_v61 }
 0x33a   :  { %7563 = vmatpush2.bf16.msra.mxu0 %v10353_v6  ;;  %7523 = vmatprep.subr.bf16.mxu1 %v9810_v7  ;;  %v1455_v6 = vld [vmem:[#allocation10 + $0x1530] sm:$0xff] }
 0x33b   :  { %7564 = vmatprep.subr.bf16.mxu0 %v10322_v8  ;;  %v1471_v7 = vld [vmem:[#allocation10 + $0x15b0] sm:$0xff] }
 0x33c   :  { %v10131_v33 = vcombine.low %v1455_v6, %v1471_v7 }
 0x33d   :  { %7524 = vmatpush2.bf16.msra.mxu1 %v9809_v17 }
 0x33e   :  { %7565 = vmatpush2.bf16.msra.mxu0 %v10321_v18  ;;  %7525 = vmatprep.subr.bf16.mxu1 %v9778_v19 }
 0x33f   :  { %7566 = vmatprep.subr.bf16.mxu0 %v10290_v20  ;;  %v10132_v20 = vcombine.high %v1455_v6, %v1471_v7  ;;  %v831_v6 = vld [vmem:[#allocation10 + $0x1b0] sm:$0xff] }
 0x340   :  { %v1327_v7 = vld [vmem:[#allocation10 + $0x1130] sm:$0xff] }
 0x341   :  { %7526 = vmatpush2.bf16.msra.mxu1 %v9777_v24  ;;  %v1439_v24 = vld [vmem:[#allocation10 + $0x14b0] sm:$0xff] }
 0x342   :  { %7567 = vmatpush2.bf16.msra.mxu0 %v10289_v25  ;;  %7527 = vmatprep.subr.bf16.mxu1 %v9746_v26  ;;  %v10100_v39 = vcombine.high %v1423_v23, %v1439_v24 }
 0x343   :  { %7568 = vmatprep.subr.bf16.mxu0 %v10258_v27 }
 0x345   :  { %7528 = vmatpush2.bf16.msra.mxu1 %v9745_v34 }
 0x346   :  { %7569 = vmatpush2.bf16.msra.mxu0 %v10257_v35  ;;  %7529 = vmatprep.subr.bf16.mxu1 %v9714_v37 }
 0x347   :  { %7570 = vmatprep.subr.bf16.mxu0 %v10226_v38 }
 0x349   :  { %7530 = vmatpush2.bf16.msra.mxu1 %v9713_v44  ;;  %v1391_v44 = vld [vmem:[#allocation10 + $0x1330] sm:$0xff] }
 0x34a   :  { %7571 = vmatpush2.bf16.msra.mxu0 %v10225_v47  ;;  %7581 = vmatprep.subr.bf16.mxu1 %v9684_v49  ;;  %v1407_v47 = vld [vmem:[#allocation10 + $0x13b0] sm:$0xff] }
 0x34b   :  { %7622 = vmatprep.subr.bf16.mxu0 %v10196_v53  ;;  %v10067_v2 = vcombine.low %v1391_v44, %v1407_v47 }
 0x34c   :  { %v7287_v3 = vpop.f32.mrf.mxu1  ;;  %7532 = vmatmul.mubr.bf16.vlgmr.msra.gmra.mxu1 %v10916_v15 }
 0x34d   :  { %v7288_v8 = vadd.f32 %v7287_v3, %v1828_v58  ;;  %v7328_v9 = vpop.f32.mrf.mxu0  ;;  %7573 = vmatmul.mubr.bf16.vlgmr.msra.gmra.mxu0 %v10918_v16  ;;  %7582 = vmatpush1.bf16.msra.mxu1 %v9683_v59  ;;  %v10099_v58 = vcombine.low %v1423_v23, %v1439_v24  ;;  %v9556_v59 = vcombine.high %v879_v40, %v895_v42  ;;  %v1279_v23 = vld [vmem:[#allocation10 + $0xfb0] sm:$0xff] }
 0x34e   :  { %7613 = vmatprep.mubr.bf16.mxu1 %v10912_v13  ;;  %7623 = vmatpush1.bf16.msra.mxu0 %v10195_v62  ;;  %v7289_v11 = vpop.f32.mrf.mxu1  ;;  %v847_v62 = vld [vmem:[#allocation10 + $0x230] sm:$0xff] }
 0x34f   :  { %v7329_v17 = vadd.f32 %v7328_v9, %v7288_v8  ;;  %7654 = vmatprep.mubr.bf16.mxu0 %v10914_v14  ;;  %v7290_v18 = vadd.f32 %v7289_v11, %v1832_v63  ;;  %v7330_v19 = vpop.f32.mrf.mxu0  ;;  %7583 = vmatprep.subr.bf16.mxu1 %v9652_v0  ;;  %v1359_v63 = vld [vmem:[#allocation10 + $0x1230] sm:$0xff] }
 0x350   :  { %v7291_v22 = vpop.f32.mrf.mxu1  ;;  %7624 = vmatprep.subr.bf16.mxu0 %v10164_v4  ;;  %v1375_v0 = vld [vmem:[#allocation10 + $0x12b0] sm:$0xff] }
 0x351   :  { %v8405_v25 = vmax.f32 %v7329_v17, 0.0  ;;  %v7331_v26 = vadd.f32 %v7330_v19, %v7290_v18  ;;  %v7332_v27 = vpop.f32.mrf.mxu0  ;;  %7584 = vmatpush1.bf16.msra.mxu1 %v9651_v10  ;;  %v10036_v4 = vcombine.high %v1359_v63, %v1375_v0  ;;  %v1343_v8 = vld [vmem:[#allocation10 + $0x11b0] sm:$0xff]  ;;  %v10035_v9 = vcombine.low %v1359_v63, %v1375_v0 }
 0x352   :  { %7625 = vmatpush1.bf16.msra.mxu0 %v10163_v5  ;;  %v7292_v32 = vpop.f32.mrf.mxu1  ;;  %7585 = vmatprep.subr.bf16.mxu1 %v9620_v12  ;;  %v10004_v11 = vcombine.high %v1327_v7, %v1343_v8  ;;  %v783_v5 = vld [vmem:[#allocation10 + $0x30] sm:$0xff] }
 0x353   :  { %v8451_v34 = vrot.slane %v8405_v25, 6  ;;  %v8949_v35 = vrot.slane %v8405_v25, 7  ;;  %v8406_v37 = vmax.f32 %v7331_v26, 0.0  ;;  %v7333_v38 = vpop.f32.mrf.mxu0  ;;  %7626 = vmatprep.subr.bf16.mxu0 %v10132_v20  ;;  %v799_v12 = vld [vmem:[#allocation10 + $0xb0] sm:$0xff]  ;;  %v10003_v20 = vcombine.low %v1327_v7, %v1343_v8 }
 0x354   :  { %v1295_v17 = vld [vmem:[#allocation10 + $0x1030] sm:$0xff]  ;;  %v9460_v21 = vcombine.high %v783_v5, %v799_v12  ;;  %v9459_v26 = vcombine.low %v783_v5, %v799_v12 }
 0x355   :  { %v10986_v49 = vsel %vm8530_vm1, %v10962_v48, %v8451_v34  ;;  %v10990_v53 = vsel %vm8530_vm1, %v10959_v41, %v8949_v35  ;;  %v8452_v55 = vrot.slane %v8406_v37, 6  ;;  %v8950_v57 = vrot.slane %v8406_v37, 7  ;;  %7586 = vmatpush1.bf16.msra.mxu1 %v9619_v30  ;;  %v863_v41 = vld [vmem:[#allocation10 + $0x2b0] sm:$0xff] }
 0x356   :  { %7627 = vmatpush1.bf16.msra.mxu0 %v10131_v33  ;;  %7587 = vmatprep.subr.bf16.mxu1 %v9588_v45  ;;  %v10068_v48 = vcombine.high %v1391_v44, %v1407_v47  ;;  %v9524_v3 = vcombine.high %v847_v62, %v863_v41  ;;  %v1311_v18 = vld [vmem:[#allocation10 + $0x10b0] sm:$0xff] }
 0x357   :  { %v10994_v60 = vsel %vm8530_vm1, %v10968_v56, %v8452_v55  ;;  %v10998_v61 = vsel %vm8530_vm1, %v10965_v51, %v8950_v57  ;;  %7628 = vmatprep.subr.bf16.mxu0 %v10100_v39  ;;  %v815_v56 = vld [vmem:[#allocation10 + $0x130] sm:$0xff]  ;;  %v9523_v51 = vcombine.low %v847_v62, %v863_v41  ;;  %v9972_v36 = vcombine.high %v1295_v17, %v1311_v18 }
 0x358   :  { %v9492_v10 = vcombine.high %v815_v56, %v831_v6  ;;  %v9491_v19 = vcombine.low %v815_v56, %v831_v6  ;;  %v1263_v22 = vld [vmem:[#allocation10 + $0xf30] sm:$0xff]  ;;  %v9971_v27 = vcombine.low %v1295_v17, %v1311_v18 }
 0x359   :  { %7588 = vmatpush1.bf16.msra.mxu1 %v9587_v43  ;;  %v1775_v24 = vld [vmem:[#allocation10 + $0x1f30] sm:$0xff]  ;;  %v9940_v30 = vcombine.high %v1263_v22, %v1279_v23  ;;  %v9939_v37 = vcombine.low %v1263_v22, %v1279_v23 }
 0x35a   :  { %7629 = vmatpush1.bf16.msra.mxu0 %v10099_v58  ;;  %7589 = vmatprep.subr.bf16.mxu1 %v9556_v59  ;;  %v1791_v25 = vld [vmem:[#allocation10 + $0x1fb0] sm:$0xff] }
 0x35b   :  { %7630 = vmatprep.subr.bf16.mxu0 %v10068_v48  ;;  %v10452_v32 = vcombine.high %v1775_v24, %v1791_v25  ;;  %v1231_v33 = vld [vmem:[#allocation10 + $0xe30] sm:$0xff]  ;;  %v10451_v38 = vcombine.low %v1775_v24, %v1791_v25 }
 0x35c   :  { %v1247_v45 = vld [vmem:[#allocation10 + $0xeb0] sm:$0xff] }
 0x35d   :  { %7590 = vmatpush1.bf16.msra.mxu1 %v9555_v1  ;;  %v1743_v34 = vld [vmem:[#allocation10 + $0x1e30] sm:$0xff]  ;;  %v9908_v39 = vcombine.high %v1231_v33, %v1247_v45  ;;  %v9907_v55 = vcombine.low %v1231_v33, %v1247_v45 }
 0x35e   :  { %7631 = vmatpush1.bf16.msra.mxu0 %v10067_v2  ;;  %7591 = vmatprep.subr.bf16.mxu1 %v9524_v3  ;;  %v1759_v35 = vld [vmem:[#allocation10 + $0x1eb0] sm:$0xff] }
 0x35f   :  { %7632 = vmatprep.subr.bf16.mxu0 %v10036_v4  ;;  %v10420_v40 = vcombine.high %v1743_v34, %v1759_v35  ;;  %v1199_v42 = vld [vmem:[#allocation10 + $0xd30] sm:$0xff]  ;;  %v10419_v57 = vcombine.low %v1743_v34, %v1759_v35 }
 0x360   :  { %v1215_v43 = vld [vmem:[#allocation10 + $0xdb0] sm:$0xff] }
 0x361   :  { %7592 = vmatpush1.bf16.msra.mxu1 %v9523_v51  ;;  %v1711_v44 = vld [vmem:[#allocation10 + $0x1d30] sm:$0xff]  ;;  %v9876_v58 = vcombine.high %v1199_v42, %v1215_v43  ;;  %v9875_v0 = vcombine.low %v1199_v42, %v1215_v43  ;;  %v1024_v42 = vld [vmem:[#allocation10 + $0x7b8] sm:$0xff] }
 0x362   :  { %7633 = vmatpush1.bf16.msra.mxu0 %v10035_v9  ;;  %7593 = vmatprep.subr.bf16.mxu1 %v9492_v10  ;;  %v1727_v47 = vld [vmem:[#allocation10 + $0x1db0] sm:$0xff]  ;;  %v1520_v43 = vld [vmem:[#allocation10 + $0x1738] sm:$0xff] }
 0x363   :  { %7634 = vmatprep.subr.bf16.mxu0 %v10004_v11  ;;  %v10388_v59 = vcombine.high %v1711_v44, %v1727_v47  ;;  %v1167_v48 = vld [vmem:[#allocation10 + $0xc30] sm:$0xff]  ;;  %v10387_v1 = vcombine.low %v1711_v44, %v1727_v47  ;;  %v1536_v44 = vld [vmem:[#allocation10 + $0x17b8] sm:$0xff] }
 0x364   :  { %v1183_v62 = vld [vmem:[#allocation10 + $0xcb0] sm:$0xff] }
 0x365   :  { %7594 = vmatpush1.bf16.msra.mxu1 %v9491_v19  ;;  %v1679_v41 = vld [vmem:[#allocation10 + $0x1c30] sm:$0xff]  ;;  %v9844_v2 = vcombine.high %v1167_v48, %v1183_v62  ;;  %v9843_v8 = vcombine.low %v1167_v48, %v1183_v62  ;;  %v11004_v48 = vsub.s32 7, %v10892_v28  ;;  %v976_v62 = vld [vmem:[#allocation10 + $0x638] sm:$0xff] }
 0x366   :  { %7635 = vmatpush1.bf16.msra.mxu0 %v10003_v20  ;;  %7595 = vmatprep.subr.bf16.mxu1 %v9460_v21  ;;  %v1695_v63 = vld [vmem:[#allocation10 + $0x1cb0] sm:$0xff] }
 0x367   :  { %7636 = vmatprep.subr.bf16.mxu0 %v9972_v36  ;;  %v10356_v3 = vcombine.high %v1679_v41, %v1695_v63  ;;  %v1135_v4 = vld [vmem:[#allocation10 + $0xb30] sm:$0xff]  ;;  %v10355_v51 = vcombine.low %v1679_v41, %v1695_v63  ;;  %v992_v41 = vld [vmem:[#allocation10 + $0x6b8] sm:$0xff]  ;;  %v10640_v63 = vld [vmem:[#allocation12] sm:$0xff] }
 0x368   :  { %v1151_v56 = vld [vmem:[#allocation10 + $0xbb0] sm:$0xff] }
 0x369   :  { %7596 = vmatpush1.bf16.msra.mxu1 %v9459_v26  ;;  %v1647_v6 = vld [vmem:[#allocation10 + $0x1b30] sm:$0xff]  ;;  %v9812_v9 = vcombine.high %v1135_v4, %v1151_v56  ;;  %v9811_v18 = vcombine.low %v1135_v4, %v1151_v56  ;;  %v10197_v4 = vcombine.low %v1520_v43, %v1536_v44  ;;  %v1840_v56 = vrot.slane %v10640_v63, %v11004_v48 }
 0x36a   :  { %7637 = vmatpush1.bf16.msra.mxu0 %v9971_v27  ;;  %7597 = vmatprep.subr.bf16.mxu1 %v9940_v30  ;;  %v1663_v7 = vld [vmem:[#allocation10 + $0x1bb0] sm:$0xff] }
 0x36b   :  { %7638 = vmatprep.subr.bf16.mxu0 %v10452_v32  ;;  %v10324_v10 = vcombine.high %v1647_v6, %v1663_v7  ;;  %v1103_v11 = vld [vmem:[#allocation10 + $0xa30] sm:$0xff]  ;;  %v10323_v19 = vcombine.low %v1647_v6, %v1663_v7  ;;  %v9654_v6 = vcombine.high %v976_v62, %v992_v41  ;;  %v944_v7 = vld [vmem:[#allocation10 + $0x538] sm:$0xff] }
 0x36c   :  { %v1119_v5 = vld [vmem:[#allocation10 + $0xab0] sm:$0xff] }
 0x36d   :  { %7598 = vmatpush2.bf16.msra.mxu1 %v9939_v37  ;;  %v1615_v12 = vld [vmem:[#allocation10 + $0x1a30] sm:$0xff]  ;;  %v9780_v20 = vcombine.high %v1103_v11, %v1119_v5  ;;  %v9779_v25 = vcombine.low %v1103_v11, %v1119_v5 }
 0x36e   :  { %7639 = vmatpush2.bf16.msra.mxu0 %v10451_v38  ;;  %7599 = vmatprep.subr.bf16.mxu1 %v9908_v39  ;;  %v1631_v17 = vld [vmem:[#allocation10 + $0x1ab0] sm:$0xff] }
 0x36f   :  { %7640 = vmatprep.subr.bf16.mxu0 %v10420_v40  ;;  %v10292_v21 = vcombine.high %v1615_v12, %v1631_v17  ;;  %v1071_v36 = vld [vmem:[#allocation10 + $0x930] sm:$0xff]  ;;  %v10291_v26 = vcombine.low %v1615_v12, %v1631_v17  ;;  %v1008_v40 = vld [vmem:[#allocation10 + $0x738] sm:$0xff]  ;;  %v9653_v12 = vcombine.low %v976_v62, %v992_v41 }
 0x370   :  { %v1087_v22 = vld [vmem:[#allocation10 + $0x9b0] sm:$0xff] }
 0x371   :  { %7600 = vmatpush2.bf16.msra.mxu1 %v9907_v55  ;;  %v1583_v23 = vld [vmem:[#allocation10 + $0x1930] sm:$0xff]  ;;  %v9748_v27 = vcombine.high %v1071_v36, %v1087_v22  ;;  %v9747_v35 = vcombine.low %v1071_v36, %v1087_v22  ;;  %v11001_v55 = vsub.s32 6, %v10892_v28 }
 0x372   :  { %7641 = vmatpush2.bf16.msra.mxu0 %v10419_v57  ;;  %7601 = vmatprep.subr.bf16.mxu1 %v9876_v58  ;;  %v1599_v24 = vld [vmem:[#allocation10 + $0x19b0] sm:$0xff]  ;;  %v9686_v58 = vcombine.high %v1008_v40, %v1024_v42 }
 0x373   :  { %7642 = vmatprep.subr.bf16.mxu0 %v10388_v59  ;;  %v10260_v30 = vcombine.high %v1583_v23, %v1599_v24  ;;  %v1039_v32 = vld [vmem:[#allocation10 + $0x830] sm:$0xff]  ;;  %v10259_v37 = vcombine.low %v1583_v23, %v1599_v24  ;;  %v10198_v59 = vcombine.high %v1520_v43, %v1536_v44  ;;  %v912_v23 = vld [vmem:[#allocation10 + $0x438] sm:$0xff] }
 0x374   :  { %v1055_v33 = vld [vmem:[#allocation10 + $0x8b0] sm:$0xff]  ;;  %v928_v24 = vld [vmem:[#allocation10 + $0x4b8] sm:$0xff] }
 0x375   :  { %7602 = vmatpush2.bf16.msra.mxu1 %v9875_v0  ;;  %v1551_v45 = vld [vmem:[#allocation10 + $0x1830] sm:$0xff]  ;;  %v9716_v38 = vcombine.high %v1039_v32, %v1055_v33  ;;  %v9715_v47 = vcombine.low %v1039_v32, %v1055_v33  ;;  %v1836_v0 = vrot.slane %v10640_v63, %v11001_v55  ;;  %v880_v44 = vld [vmem:[#allocation10 + $0x338] sm:$0xff] }
 0x376   :  { %7643 = vmatpush2.bf16.msra.mxu0 %v10387_v1  ;;  %7603 = vmatprep.subr.bf16.mxu1 %v9844_v2  ;;  %v1567_v34 = vld [vmem:[#allocation10 + $0x18b0] sm:$0xff]  ;;  %v9685_v1 = vcombine.low %v1008_v40, %v1024_v42  ;;  %v1488_v2 = vld [vmem:[#allocation10 + $0x1638] sm:$0xff] }
 0x377   :  { %7644 = vmatprep.subr.bf16.mxu0 %v10356_v3  ;;  %v10228_v39 = vcombine.high %v1551_v45, %v1567_v34  ;;  %v10227_v57 = vcombine.low %v1551_v45, %v1567_v34  ;;  %v1504_v3 = vld [vmem:[#allocation10 + $0x16b8] sm:$0xff] }
 0x379   :  { %7604 = vmatpush2.bf16.msra.mxu1 %v9843_v8  ;;  %v960_v8 = vld [vmem:[#allocation10 + $0x5b8] sm:$0xff] }
 0x37a   :  { %7645 = vmatpush2.bf16.msra.mxu0 %v10355_v51  ;;  %7605 = vmatprep.subr.bf16.mxu1 %v9812_v9  ;;  %v10166_v51 = vcombine.high %v1488_v2, %v1504_v3  ;;  %v1456_v9 = vld [vmem:[#allocation10 + $0x1538] sm:$0xff]  ;;  %v9621_v45 = vcombine.low %v944_v7, %v960_v8 }
 0x37b   :  { %7646 = vmatprep.subr.bf16.mxu0 %v10324_v10  ;;  %v1472_v10 = vld [vmem:[#allocation10 + $0x15b8] sm:$0xff] }
 0x37c   :  { %v10134_v22 = vcombine.high %v1456_v9, %v1472_v10 }
 0x37d   :  { %7606 = vmatpush2.bf16.msra.mxu1 %v9811_v18  ;;  %v10165_v18 = vcombine.low %v1488_v2, %v1504_v3 }
 0x37e   :  { %7647 = vmatpush2.bf16.msra.mxu0 %v10323_v19  ;;  %7607 = vmatprep.subr.bf16.mxu1 %v9780_v20  ;;  %v9622_v19 = vcombine.high %v944_v7, %v960_v8  ;;  %v1376_v7 = vld [vmem:[#allocation10 + $0x12b8] sm:$0xff] }
 0x37f   :  { %7648 = vmatprep.subr.bf16.mxu0 %v10292_v21 }
 0x381   :  { %7608 = vmatpush2.bf16.msra.mxu1 %v9779_v25 }
 0x382   :  { %7649 = vmatpush2.bf16.msra.mxu0 %v10291_v26  ;;  %7609 = vmatprep.subr.bf16.mxu1 %v9748_v27  ;;  %v1424_v26 = vld [vmem:[#allocation10 + $0x1438] sm:$0xff] }
 0x383   :  { %7650 = vmatprep.subr.bf16.mxu0 %v10260_v30  ;;  %v1440_v27 = vld [vmem:[#allocation10 + $0x14b8] sm:$0xff] }
 0x384   :  { %v10102_v43 = vcombine.high %v1424_v26, %v1440_v27 }
 0x385   :  { %7610 = vmatpush2.bf16.msra.mxu1 %v9747_v35  ;;  %v10133_v35 = vcombine.low %v1456_v9, %v1472_v10  ;;  %v832_v10 = vld [vmem:[#allocation10 + $0x1b8] sm:$0xff] }
 0x386   :  { %7651 = vmatpush2.bf16.msra.mxu0 %v10259_v37  ;;  %7611 = vmatprep.subr.bf16.mxu1 %v9716_v38  ;;  %v9590_v37 = vcombine.high %v912_v23, %v928_v24 }
 0x387   :  { %7652 = vmatprep.subr.bf16.mxu0 %v10228_v39 }
 0x389   :  { %7612 = vmatpush2.bf16.msra.mxu1 %v9715_v47  ;;  %v896_v47 = vld [vmem:[#allocation10 + $0x3b8] sm:$0xff] }
 0x38a   :  { %7653 = vmatpush2.bf16.msra.mxu0 %v10227_v57  ;;  %7663 = vmatprep.subr.bf16.mxu1 %v9686_v58  ;;  %v9589_v57 = vcombine.low %v912_v23, %v928_v24  ;;  %v1392_v58 = vld [vmem:[#allocation10 + $0x1338] sm:$0xff]  ;;  %v9558_v2 = vcombine.high %v880_v44, %v896_v47  ;;  %v9557_v8 = vcombine.low %v880_v44, %v896_v47 }
 0x38b   :  { %7704 = vmatprep.subr.bf16.mxu0 %v10198_v59  ;;  %v1408_v59 = vld [vmem:[#allocation10 + $0x13b8] sm:$0xff] }
 0x38c   :  { %v7369_v28 = vpop.f32.mrf.mxu1  ;;  %7614 = vmatmul.mubr.bf16.vlgmr.msra.gmra.mxu1 %v10916_v15 }
 0x38d   :  { %v7370_v11 = vadd.f32 %v7369_v28, %v1836_v0  ;;  %v7410_v5 = vpop.f32.mrf.mxu0  ;;  %7655 = vmatmul.mubr.bf16.vlgmr.msra.gmra.mxu0 %v10918_v16  ;;  %7664 = vmatpush1.bf16.msra.mxu1 %v9685_v1  ;;  %v10101_v1 = vcombine.low %v1424_v26, %v1440_v27  ;;  %v10069_v28 = vcombine.low %v1392_v58, %v1408_v59  ;;  %v1264_v26 = vld [vmem:[#allocation10 + $0xf38] sm:$0xff] }
 0x38e   :  { %7695 = vmatprep.mubr.bf16.mxu1 %v10912_v13  ;;  %7705 = vmatpush1.bf16.msra.mxu0 %v10197_v4  ;;  %v7371_v17 = vpop.f32.mrf.mxu1  ;;  %v1280_v27 = vld [vmem:[#allocation10 + $0xfb8] sm:$0xff] }
 0x38f   :  { %v7411_v20 = vadd.f32 %v7410_v5, %v7370_v11  ;;  %7736 = vmatprep.mubr.bf16.mxu0 %v10914_v14  ;;  %v7372_v21 = vadd.f32 %v7371_v17, %v1840_v56  ;;  %v7412_v36 = vpop.f32.mrf.mxu0  ;;  %7665 = vmatprep.subr.bf16.mxu1 %v9654_v6  ;;  %v848_v56 = vld [vmem:[#allocation10 + $0x238] sm:$0xff] }
 0x390   :  { %v7373_v25 = vpop.f32.mrf.mxu1  ;;  %7706 = vmatprep.subr.bf16.mxu0 %v10166_v51  ;;  %v1360_v6 = vld [vmem:[#allocation10 + $0x1238] sm:$0xff] }
 0x391   :  { %v8407_v30 = vmax.f32 %v7411_v20, 0.0  ;;  %v7413_v32 = vadd.f32 %v7412_v36, %v7372_v21  ;;  %v7414_v33 = vpop.f32.mrf.mxu0  ;;  %7666 = vmatpush1.bf16.msra.mxu1 %v9653_v12  ;;  %v10038_v9 = vcombine.high %v1360_v6, %v1376_v7  ;;  %v1328_v11 = vld [vmem:[#allocation10 + $0x1138] sm:$0xff]  ;;  %v10037_v12 = vcombine.low %v1360_v6, %v1376_v7 }
 0x392   :  { %7707 = vmatpush1.bf16.msra.mxu0 %v10165_v18  ;;  %v7374_v34 = vpop.f32.mrf.mxu1  ;;  %7667 = vmatprep.subr.bf16.mxu1 %v9622_v19  ;;  %v1344_v5 = vld [vmem:[#allocation10 + $0x11b8] sm:$0xff] }
 0x393   :  { %v8457_v38 = vrot.slane %v8407_v30, 5  ;;  %v8953_v39 = vrot.slane %v8407_v30, 6  ;;  %v8408_v40 = vmax.f32 %v7413_v32, 0.0  ;;  %v7415_v42 = vpop.f32.mrf.mxu0  ;;  %7708 = vmatprep.subr.bf16.mxu0 %v10134_v22  ;;  %v10006_v18 = vcombine.high %v1328_v11, %v1344_v5  ;;  %v784_v19 = vld [vmem:[#allocation10 + $0x38] sm:$0xff] }
 0x394   :  { %v800_v20 = vld [vmem:[#allocation10 + $0xb8] sm:$0xff]  ;;  %v10005_v23 = vcombine.low %v1328_v11, %v1344_v5  ;;  %v9942_v34 = vcombine.high %v1264_v26, %v1280_v27  ;;  %v9941_v42 = vcombine.low %v1264_v26, %v1280_v27 }
 0x395   :  { %v11014_v62 = vsel %vm8533_vm2, %v10986_v49, %v8457_v38  ;;  %v11018_v41 = vsel %vm8533_vm2, %v10990_v53, %v8953_v39  ;;  %v8458_v63 = vrot.slane %v8408_v40, 5  ;;  %v8954_v0 = vrot.slane %v8408_v40, 6  ;;  %7668 = vmatpush1.bf16.msra.mxu1 %v9621_v45  ;;  %v864_v53 = vld [vmem:[#allocation10 + $0x2b8] sm:$0xff] }
 0x396   :  { %7709 = vmatpush1.bf16.msra.mxu0 %v10133_v35  ;;  %7669 = vmatprep.subr.bf16.mxu1 %v9590_v37  ;;  %v10070_v49 = vcombine.high %v1392_v58, %v1408_v59  ;;  %v9526_v51 = vcombine.high %v848_v56, %v864_v53  ;;  %v1296_v21 = vld [vmem:[#allocation10 + $0x1038] sm:$0xff]  ;;  %v9462_v24 = vcombine.high %v784_v19, %v800_v20 }
 0x397   :  { %v11022_v3 = vsel %vm8533_vm2, %v10994_v60, %v8458_v63  ;;  %v11026_v4 = vsel %vm8533_vm2, %v10998_v61, %v8954_v0  ;;  %7710 = vmatprep.subr.bf16.mxu0 %v10102_v43  ;;  %v816_v60 = vld [vmem:[#allocation10 + $0x138] sm:$0xff]  ;;  %v9525_v61 = vcombine.low %v848_v56, %v864_v53  ;;  %v9461_v33 = vcombine.low %v784_v19, %v800_v20 }
 0x398   :  { %v9494_v17 = vcombine.high %v816_v60, %v832_v10  ;;  %v1312_v36 = vld [vmem:[#allocation10 + $0x10b8] sm:$0xff]  ;;  %v9493_v22 = vcombine.low %v816_v60, %v832_v10 }
 0x399   :  { %7670 = vmatpush1.bf16.msra.mxu1 %v9589_v57  ;;  %v9974_v25 = vcombine.high %v1296_v21, %v1312_v36  ;;  %v1776_v30 = vld [vmem:[#allocation10 + $0x1f38] sm:$0xff]  ;;  %v9973_v45 = vcombine.low %v1296_v21, %v1312_v36 }
 0x39a   :  { %7711 = vmatpush1.bf16.msra.mxu0 %v10101_v1  ;;  %7671 = vmatprep.subr.bf16.mxu1 %v9558_v2  ;;  %v1792_v32 = vld [vmem:[#allocation10 + $0x1fb8] sm:$0xff] }
 0x39b   :  { %7712 = vmatprep.subr.bf16.mxu0 %v10070_v49  ;;  %v10454_v35 = vcombine.high %v1776_v30, %v1792_v32  ;;  %v1232_v37 = vld [vmem:[#allocation10 + $0xe38] sm:$0xff]  ;;  %v10453_v43 = vcombine.low %v1776_v30, %v1792_v32 }
 0x39c   :  { %v1248_v38 = vld [vmem:[#allocation10 + $0xeb8] sm:$0xff] }
 0x39d   :  { %7672 = vmatpush1.bf16.msra.mxu1 %v9557_v8  ;;  %v1744_v39 = vld [vmem:[#allocation10 + $0x1e38] sm:$0xff]  ;;  %v9910_v44 = vcombine.high %v1232_v37, %v1248_v38  ;;  %v9909_v0 = vcombine.low %v1232_v37, %v1248_v38 }
 0x39e   :  { %7713 = vmatpush1.bf16.msra.mxu0 %v10069_v28  ;;  %7673 = vmatprep.subr.bf16.mxu1 %v9526_v51  ;;  %v1760_v40 = vld [vmem:[#allocation10 + $0x1eb8] sm:$0xff] }
 0x39f   :  { %7714 = vmatprep.subr.bf16.mxu0 %v10038_v9  ;;  %v10422_v47 = vcombine.high %v1744_v39, %v1760_v40  ;;  %v1200_v57 = vld [vmem:[#allocation10 + $0xd38] sm:$0xff]  ;;  %v10421_v1 = vcombine.low %v1744_v39, %v1760_v40 }
 0x3a0   :  { %v1216_v58 = vld [vmem:[#allocation10 + $0xdb8] sm:$0xff] }
 0x3a1   :  { %7674 = vmatpush1.bf16.msra.mxu1 %v9525_v61  ;;  %v1712_v59 = vld [vmem:[#allocation10 + $0x1d38] sm:$0xff]  ;;  %v9878_v2 = vcombine.high %v1200_v57, %v1216_v58  ;;  %v9877_v8 = vcombine.low %v1200_v57, %v1216_v58  ;;  %v1009_v57 = vld [vmem:[#allocation10 + $0x740] sm:$0xff] }
 0x3a2   :  { %7715 = vmatpush1.bf16.msra.mxu0 %v10037_v12  ;;  %7675 = vmatprep.subr.bf16.mxu1 %v9494_v17  ;;  %v1728_v63 = vld [vmem:[#allocation10 + $0x1db8] sm:$0xff]  ;;  %v1025_v58 = vld [vmem:[#allocation10 + $0x7c0] sm:$0xff] }
 0x3a3   :  { %7716 = vmatprep.subr.bf16.mxu0 %v10006_v18  ;;  %v10390_v49 = vcombine.high %v1712_v59, %v1728_v63  ;;  %v1168_v56 = vld [vmem:[#allocation10 + $0xc38] sm:$0xff]  ;;  %v10389_v28 = vcombine.low %v1712_v59, %v1728_v63  ;;  %v1521_v59 = vld [vmem:[#allocation10 + $0x1740] sm:$0xff] }
 0x3a4   :  { %v1184_v53 = vld [vmem:[#allocation10 + $0xcb8] sm:$0xff]  ;;  %v1537_v63 = vld [vmem:[#allocation10 + $0x17c0] sm:$0xff] }
 0x3a5   :  { %7676 = vmatpush1.bf16.msra.mxu1 %v9493_v22  ;;  %v1680_v6 = vld [vmem:[#allocation10 + $0x1c38] sm:$0xff]  ;;  %v9846_v51 = vcombine.high %v1168_v56, %v1184_v53  ;;  %v9845_v61 = vcombine.low %v1168_v56, %v1184_v53  ;;  %v10200_v56 = vcombine.high %v1521_v59, %v1537_v63  ;;  %v977_v53 = vld [vmem:[#allocation10 + $0x640] sm:$0xff] }
 0x3a6   :  { %7717 = vmatpush1.bf16.msra.mxu0 %v10005_v23  ;;  %7677 = vmatprep.subr.bf16.mxu1 %v9462_v24  ;;  %v1696_v7 = vld [vmem:[#allocation10 + $0x1cb8] sm:$0xff] }
 0x3a7   :  { %7718 = vmatprep.subr.bf16.mxu0 %v9974_v25  ;;  %v10358_v9 = vcombine.high %v1680_v6, %v1696_v7  ;;  %v1136_v60 = vld [vmem:[#allocation10 + $0xb38] sm:$0xff]  ;;  %v10357_v12 = vcombine.low %v1680_v6, %v1696_v7  ;;  %v993_v6 = vld [vmem:[#allocation10 + $0x6c0] sm:$0xff] }
 0x3a8   :  { %v1152_v10 = vld [vmem:[#allocation10 + $0xbb8] sm:$0xff] }
 0x3a9   :  { %7678 = vmatpush1.bf16.msra.mxu1 %v9461_v33  ;;  %v1648_v11 = vld [vmem:[#allocation10 + $0x1b38] sm:$0xff]  ;;  %v9814_v17 = vcombine.high %v1136_v60, %v1152_v10  ;;  %v9813_v22 = vcombine.low %v1136_v60, %v1152_v10  ;;  %v9656_v10 = vcombine.high %v977_v53, %v993_v6 }
 0x3aa   :  { %7719 = vmatpush1.bf16.msra.mxu0 %v9973_v45  ;;  %7679 = vmatprep.subr.bf16.mxu1 %v9942_v34  ;;  %v1664_v5 = vld [vmem:[#allocation10 + $0x1bb8] sm:$0xff] }
 0x3ab   :  { %7720 = vmatprep.subr.bf16.mxu0 %v10454_v35  ;;  %v10326_v18 = vcombine.high %v1648_v11, %v1664_v5  ;;  %v1104_v19 = vld [vmem:[#allocation10 + $0xa38] sm:$0xff]  ;;  %v10325_v23 = vcombine.low %v1648_v11, %v1664_v5  ;;  %v945_v11 = vld [vmem:[#allocation10 + $0x540] sm:$0xff] }
 0x3ac   :  { %v1120_v20 = vld [vmem:[#allocation10 + $0xab8] sm:$0xff]  ;;  %v961_v5 = vld [vmem:[#allocation10 + $0x5c0] sm:$0xff] }
 0x3ad   :  { %7680 = vmatpush2.bf16.msra.mxu1 %v9941_v42  ;;  %v1616_v21 = vld [vmem:[#allocation10 + $0x1a38] sm:$0xff]  ;;  %v9782_v24 = vcombine.high %v1104_v19, %v1120_v20  ;;  %v9781_v33 = vcombine.low %v1104_v19, %v1120_v20 }
 0x3ae   :  { %7721 = vmatpush2.bf16.msra.mxu0 %v10453_v43  ;;  %7681 = vmatprep.subr.bf16.mxu1 %v9910_v44  ;;  %v1632_v36 = vld [vmem:[#allocation10 + $0x1ab8] sm:$0xff] }
 0x3af   :  { %7722 = vmatprep.subr.bf16.mxu0 %v10422_v47  ;;  %v10294_v25 = vcombine.high %v1616_v21, %v1632_v36  ;;  %v1072_v26 = vld [vmem:[#allocation10 + $0x938] sm:$0xff]  ;;  %v10293_v45 = vcombine.low %v1616_v21, %v1632_v36  ;;  %v9655_v21 = vcombine.low %v977_v53, %v993_v6 }
 0x3b0   :  { %v1088_v27 = vld [vmem:[#allocation10 + $0x9b8] sm:$0xff] }
 0x3b1   :  { %7682 = vmatpush2.bf16.msra.mxu1 %v9909_v0  ;;  %v1584_v30 = vld [vmem:[#allocation10 + $0x1938] sm:$0xff]  ;;  %v9750_v34 = vcombine.high %v1072_v26, %v1088_v27  ;;  %v9749_v42 = vcombine.low %v1072_v26, %v1088_v27 }
 0x3b2   :  { %7723 = vmatpush2.bf16.msra.mxu0 %v10421_v1  ;;  %7683 = vmatprep.subr.bf16.mxu1 %v9878_v2  ;;  %v1600_v32 = vld [vmem:[#allocation10 + $0x19b8] sm:$0xff]  ;;  %v11028_v2 = vld [vmem:[#allocation12 + $0x8] sm:$0xff] }
 0x3b3   :  { %7724 = vmatprep.subr.bf16.mxu0 %v10390_v49  ;;  %v10262_v35 = vcombine.high %v1584_v30, %v1600_v32  ;;  %v1040_v37 = vld [vmem:[#allocation10 + $0x838] sm:$0xff]  ;;  %v10261_v43 = vcombine.low %v1584_v30, %v1600_v32  ;;  %v9688_v49 = vcombine.high %v1009_v57, %v1025_v58  ;;  %v1844_v7 = vrot.slane %v11028_v2, %v10895_v29  ;;  %v913_v30 = vld [vmem:[#allocation10 + $0x440] sm:$0xff] }
 0x3b4   :  { %v1056_v38 = vld [vmem:[#allocation10 + $0x8b8] sm:$0xff]  ;;  %v1848_v60 = vrot.slane %v11028_v2, %v10898_v31  ;;  %v929_v32 = vld [vmem:[#allocation10 + $0x4c0] sm:$0xff] }
 0x3b5   :  { %7684 = vmatpush2.bf16.msra.mxu1 %v9877_v8  ;;  %v1552_v39 = vld [vmem:[#allocation10 + $0x1838] sm:$0xff]  ;;  %v9718_v44 = vcombine.high %v1040_v37, %v1056_v38  ;;  %v9717_v0 = vcombine.low %v1040_v37, %v1056_v38  ;;  %v9687_v8 = vcombine.low %v1009_v57, %v1025_v58 }
 0x3b6   :  { %7725 = vmatpush2.bf16.msra.mxu0 %v10389_v28  ;;  %7685 = vmatprep.subr.bf16.mxu1 %v9846_v51  ;;  %v1568_v40 = vld [vmem:[#allocation10 + $0x18b8] sm:$0xff]  ;;  %v1489_v28 = vld [vmem:[#allocation10 + $0x1640] sm:$0xff] }
 0x3b7   :  { %7726 = vmatprep.subr.bf16.mxu0 %v10358_v9  ;;  %v10230_v47 = vcombine.high %v1552_v39, %v1568_v40  ;;  %v10229_v1 = vcombine.low %v1552_v39, %v1568_v40  ;;  %v1505_v51 = vld [vmem:[#allocation10 + $0x16c0] sm:$0xff]  ;;  %v10199_v9 = vcombine.low %v1521_v59, %v1537_v63  ;;  %v9623_v39 = vcombine.low %v945_v11, %v961_v5 }
 0x3b8   :  { %v881_v63 = vld [vmem:[#allocation10 + $0x340] sm:$0xff] }
 0x3b9   :  { %7686 = vmatpush2.bf16.msra.mxu1 %v9845_v61 }
 0x3ba   :  { %7727 = vmatpush2.bf16.msra.mxu0 %v10357_v12  ;;  %7687 = vmatprep.subr.bf16.mxu1 %v9814_v17  ;;  %v10168_v12 = vcombine.high %v1489_v28, %v1505_v51  ;;  %v1457_v17 = vld [vmem:[#allocation10 + $0x1540] sm:$0xff] }
 0x3bb   :  { %7728 = vmatprep.subr.bf16.mxu0 %v10326_v18  ;;  %v1473_v18 = vld [vmem:[#allocation10 + $0x15c0] sm:$0xff] }
 0x3bc   :  { %v10136_v27 = vcombine.high %v1457_v17, %v1473_v18 }
 0x3bd   :  { %7688 = vmatpush2.bf16.msra.mxu1 %v9813_v22  ;;  %v10167_v22 = vcombine.low %v1489_v28, %v1505_v51 }
 0x3be   :  { %7729 = vmatpush2.bf16.msra.mxu0 %v10325_v23  ;;  %7689 = vmatprep.subr.bf16.mxu1 %v9782_v24  ;;  %v9624_v23 = vcombine.high %v945_v11, %v961_v5  ;;  %v1361_v11 = vld [vmem:[#allocation10 + $0x1240] sm:$0xff] }
 0x3bf   :  { %7730 = vmatprep.subr.bf16.mxu0 %v10294_v25  ;;  %v1377_v5 = vld [vmem:[#allocation10 + $0x12c0] sm:$0xff] }
 0x3c1   :  { %7690 = vmatpush2.bf16.msra.mxu1 %v9781_v33 }
 0x3c2   :  { %7731 = vmatpush2.bf16.msra.mxu0 %v10293_v45  ;;  %7691 = vmatprep.subr.bf16.mxu1 %v9750_v34  ;;  %v1425_v45 = vld [vmem:[#allocation10 + $0x1440] sm:$0xff] }
 0x3c3   :  { %7732 = vmatprep.subr.bf16.mxu0 %v10262_v35  ;;  %v1441_v34 = vld [vmem:[#allocation10 + $0x14c0] sm:$0xff] }
 0x3c4   :  { %v10104_v59 = vcombine.high %v1425_v45, %v1441_v34  ;;  %v10103_v28 = vcombine.low %v1425_v45, %v1441_v34  ;;  %v1265_v34 = vld [vmem:[#allocation10 + $0xf40] sm:$0xff] }
 0x3c5   :  { %7692 = vmatpush2.bf16.msra.mxu1 %v9749_v42  ;;  %v10135_v42 = vcombine.low %v1457_v17, %v1473_v18  ;;  %v10040_v18 = vcombine.high %v1361_v11, %v1377_v5 }
 0x3c6   :  { %7733 = vmatpush2.bf16.msra.mxu0 %v10261_v43  ;;  %7693 = vmatprep.subr.bf16.mxu1 %v9718_v44  ;;  %v9592_v43 = vcombine.high %v913_v30, %v929_v32 }
 0x3c7   :  { %7734 = vmatprep.subr.bf16.mxu0 %v10230_v47 }
 0x3c9   :  { %7694 = vmatpush2.bf16.msra.mxu1 %v9717_v0  ;;  %v897_v0 = vld [vmem:[#allocation10 + $0x3c0] sm:$0xff] }
 0x3ca   :  { %7735 = vmatpush2.bf16.msra.mxu0 %v10229_v1  ;;  %7745 = vmatprep.subr.bf16.mxu1 %v9688_v49  ;;  %v9591_v1 = vcombine.low %v913_v30, %v929_v32  ;;  %v1393_v49 = vld [vmem:[#allocation10 + $0x1340] sm:$0xff]  ;;  %v9560_v51 = vcombine.high %v881_v63, %v897_v0 }
 0x3cb   :  { %7786 = vmatprep.subr.bf16.mxu0 %v10200_v56  ;;  %v1409_v56 = vld [vmem:[#allocation10 + $0x13c0] sm:$0xff] }
 0x3cc   :  { %v7451_v61 = vpop.f32.mrf.mxu1  ;;  %7696 = vmatmul.mubr.bf16.vlgmr.msra.gmra.mxu1 %v10916_v15 }
 0x3cd   :  { %v7452_v19 = vadd.f32 %v7451_v61, %v1844_v7  ;;  %v7492_v20 = vpop.f32.mrf.mxu0  ;;  %7737 = vmatmul.mubr.bf16.vlgmr.msra.gmra.mxu0 %v10918_v16  ;;  %7746 = vmatpush1.bf16.msra.mxu1 %v9687_v8  ;;  %v9559_v61 = vcombine.low %v881_v63, %v897_v0 }
 0x3ce   :  { %7777 = vmatprep.mubr.bf16.mxu1 %v10912_v13  ;;  %7787 = vmatpush1.bf16.msra.mxu0 %v10199_v9  ;;  %v7453_v36 = vpop.f32.mrf.mxu1 }
 0x3cf   :  { %v7493_v24 = vadd.f32 %v7492_v20, %v7452_v19  ;;  %7818 = vmatprep.mubr.bf16.mxu0 %v10914_v14  ;;  %v7454_v25 = vadd.f32 %v7453_v36, %v1848_v60  ;;  %v7494_v26 = vpop.f32.mrf.mxu0  ;;  %7747 = vmatprep.subr.bf16.mxu1 %v9656_v10  ;;  %v849_v10 = vld [vmem:[#allocation10 + $0x240] sm:$0xff]  ;;  %v10039_v36 = vcombine.low %v1361_v11, %v1377_v5 }
 0x3d0   :  { %v7455_v33 = vpop.f32.mrf.mxu1  ;;  %7788 = vmatprep.subr.bf16.mxu0 %v10168_v12  ;;  %v10071_v12 = vcombine.low %v1393_v49, %v1409_v56  ;;  %v833_v19 = vld [vmem:[#allocation10 + $0x1c0] sm:$0xff] }
 0x3d1   :  { %v8409_v35 = vmax.f32 %v7493_v24, 0.0  ;;  %v7495_v37 = vadd.f32 %v7494_v26, %v7454_v25  ;;  %v7496_v38 = vpop.f32.mrf.mxu0  ;;  %7748 = vmatpush1.bf16.msra.mxu1 %v9655_v21  ;;  %v1329_v20 = vld [vmem:[#allocation10 + $0x1140] sm:$0xff] }
 0x3d2   :  { %7789 = vmatpush1.bf16.msra.mxu0 %v10167_v22  ;;  %v7456_v40 = vpop.f32.mrf.mxu1  ;;  %7749 = vmatprep.subr.bf16.mxu1 %v9624_v23  ;;  %v1345_v21 = vld [vmem:[#allocation10 + $0x11c0] sm:$0xff] }
 0x3d3   :  { %v8463_v44 = vrot.slane %v8409_v35, 4  ;;  %v8957_v47 = vrot.slane %v8409_v35, 5  ;;  %v8410_v57 = vmax.f32 %v7495_v37, 0.0  ;;  %v7497_v58 = vpop.f32.mrf.mxu0  ;;  %7790 = vmatprep.subr.bf16.mxu0 %v10136_v27  ;;  %v10008_v23 = vcombine.high %v1329_v20, %v1345_v21  ;;  %v785_v24 = vld [vmem:[#allocation10 + $0x40] sm:$0xff] }
 0x3d4   :  { %v801_v25 = vld [vmem:[#allocation10 + $0xc0] sm:$0xff]  ;;  %v10007_v32 = vcombine.low %v1329_v20, %v1345_v21 }
 0x3d5   :  { %v11040_v53 = vsel %vm8536_vm3, %v11014_v62, %v8463_v44  ;;  %v11044_v6 = vsel %vm8536_vm3, %v11018_v41, %v8957_v47  ;;  %v8464_v7 = vrot.slane %v8410_v57, 4  ;;  %v8958_v8 = vrot.slane %v8410_v57, 5  ;;  %7750 = vmatpush1.bf16.msra.mxu1 %v9623_v39  ;;  %v865_v41 = vld [vmem:[#allocation10 + $0x2c0] sm:$0xff] }
 0x3d6   :  { %7791 = vmatpush1.bf16.msra.mxu0 %v10135_v42  ;;  %7751 = vmatprep.subr.bf16.mxu1 %v9592_v43  ;;  %v10072_v62 = vcombine.high %v1393_v49, %v1409_v56  ;;  %v9528_v17 = vcombine.high %v849_v10, %v865_v41  ;;  %v1297_v26 = vld [vmem:[#allocation10 + $0x1040] sm:$0xff]  ;;  %v9464_v33 = vcombine.high %v785_v24, %v801_v25 }
 0x3d7   :  { %v11048_v9 = vsel %vm8536_vm3, %v11022_v3, %v8464_v7  ;;  %v11052_v60 = vsel %vm8536_vm3, %v11026_v4, %v8958_v8  ;;  %7792 = vmatprep.subr.bf16.mxu0 %v10104_v59  ;;  %v817_v3 = vld [vmem:[#allocation10 + $0x140] sm:$0xff]  ;;  %v9527_v4 = vcombine.low %v849_v10, %v865_v41  ;;  %v9463_v39 = vcombine.low %v785_v24, %v801_v25 }
 0x3d8   :  { %v9496_v22 = vcombine.high %v817_v3, %v833_v19  ;;  %v1313_v27 = vld [vmem:[#allocation10 + $0x10c0] sm:$0xff]  ;;  %v9495_v30 = vcombine.low %v817_v3, %v833_v19 }
 0x3d9   :  { %7752 = vmatpush1.bf16.msra.mxu1 %v9591_v1  ;;  %v9976_v45 = vcombine.high %v1297_v26, %v1313_v27  ;;  %v1281_v35 = vld [vmem:[#allocation10 + $0xfc0] sm:$0xff]  ;;  %v9975_v40 = vcombine.low %v1297_v26, %v1313_v27 }
 0x3da   :  { %7793 = vmatpush1.bf16.msra.mxu0 %v10103_v28  ;;  %7753 = vmatprep.subr.bf16.mxu1 %v9560_v51  ;;  %v1777_v37 = vld [vmem:[#allocation10 + $0x1f40] sm:$0xff]  ;;  %v9944_v42 = vcombine.high %v1265_v34, %v1281_v35  ;;  %v9943_v59 = vcombine.low %v1265_v34, %v1281_v35 }
 0x3db   :  { %7794 = vmatprep.subr.bf16.mxu0 %v10072_v62  ;;  %v1793_v38 = vld [vmem:[#allocation10 + $0x1fc0] sm:$0xff] }
 0x3dc   :  { %v10456_v43 = vcombine.high %v1777_v37, %v1793_v38  ;;  %v1233_v44 = vld [vmem:[#allocation10 + $0xe40] sm:$0xff]  ;;  %v10455_v63 = vcombine.low %v1777_v37, %v1793_v38 }
 0x3dd   :  { %7754 = vmatpush1.bf16.msra.mxu1 %v9559_v61  ;;  %v1249_v47 = vld [vmem:[#allocation10 + $0xec0] sm:$0xff] }
 0x3de   :  { %7795 = vmatpush1.bf16.msra.mxu0 %v10071_v12  ;;  %7755 = vmatprep.subr.bf16.mxu1 %v9528_v17  ;;  %v1745_v57 = vld [vmem:[#allocation10 + $0x1e40] sm:$0xff]  ;;  %v9912_v0 = vcombine.high %v1233_v44, %v1249_v47  ;;  %v9911_v28 = vcombine.low %v1233_v44, %v1249_v47 }
 0x3df   :  { %7796 = vmatprep.subr.bf16.mxu0 %v10040_v18  ;;  %v1761_v58 = vld [vmem:[#allocation10 + $0x1ec0] sm:$0xff] }
 0x3e0   :  { %v10424_v1 = vcombine.high %v1745_v57, %v1761_v58  ;;  %v1201_v49 = vld [vmem:[#allocation10 + $0xd40] sm:$0xff]  ;;  %v10423_v51 = vcombine.low %v1745_v57, %v1761_v58 }
 0x3e1   :  { %7756 = vmatpush1.bf16.msra.mxu1 %v9527_v4  ;;  %v1217_v56 = vld [vmem:[#allocation10 + $0xdc0] sm:$0xff] }
 0x3e2   :  { %7797 = vmatpush1.bf16.msra.mxu0 %v10039_v36  ;;  %7757 = vmatprep.subr.bf16.mxu1 %v9496_v22  ;;  %v1713_v7 = vld [vmem:[#allocation10 + $0x1d40] sm:$0xff]  ;;  %v9880_v62 = vcombine.high %v1201_v49, %v1217_v56  ;;  %v9879_v12 = vcombine.low %v1201_v49, %v1217_v56  ;;  %v1010_v56 = vld [vmem:[#allocation10 + $0x748] sm:$0xff] }
 0x3e3   :  { %7798 = vmatprep.subr.bf16.mxu0 %v10008_v23  ;;  %v1729_v8 = vld [vmem:[#allocation10 + $0x1dc0] sm:$0xff] }
 0x3e4   :  { %v10392_v10 = vcombine.high %v1713_v7, %v1729_v8  ;;  %v1169_v41 = vld [vmem:[#allocation10 + $0xc40] sm:$0xff]  ;;  %v10391_v17 = vcombine.low %v1713_v7, %v1729_v8  ;;  %v1026_v7 = vld [vmem:[#allocation10 + $0x7c8] sm:$0xff] }
 0x3e5   :  { %7758 = vmatpush1.bf16.msra.mxu1 %v9495_v30  ;;  %v1185_v11 = vld [vmem:[#allocation10 + $0xcc0] sm:$0xff]  ;;  %v1522_v8 = vld [vmem:[#allocation10 + $0x1748] sm:$0xff] }
 0x3e6   :  { %7799 = vmatpush1.bf16.msra.mxu0 %v10007_v32  ;;  %7759 = vmatprep.subr.bf16.mxu1 %v9464_v33  ;;  %v1681_v5 = vld [vmem:[#allocation10 + $0x1c40] sm:$0xff]  ;;  %v9848_v18 = vcombine.high %v1169_v41, %v1185_v11  ;;  %v9847_v36 = vcombine.low %v1169_v41, %v1185_v11  ;;  %v978_v11 = vld [vmem:[#allocation10 + $0x648] sm:$0xff] }
 0x3e7   :  { %7800 = vmatprep.subr.bf16.mxu0 %v9976_v45  ;;  %v1697_v61 = vld [vmem:[#allocation10 + $0x1cc0] sm:$0xff] }
 0x3e8   :  { %v10360_v3 = vcombine.high %v1681_v5, %v1697_v61  ;;  %v1137_v19 = vld [vmem:[#allocation10 + $0xb40] sm:$0xff]  ;;  %v10359_v22 = vcombine.low %v1681_v5, %v1697_v61  ;;  %v994_v5 = vld [vmem:[#allocation10 + $0x6c8] sm:$0xff]  ;;  %v1852_v61 = vrot.slane %v11028_v2, %v10903_v50 }
 0x3e9   :  { %7760 = vmatpush1.bf16.msra.mxu1 %v9463_v39  ;;  %v1153_v20 = vld [vmem:[#allocation10 + $0xbc0] sm:$0xff] }
 0x3ea   :  { %7801 = vmatpush1.bf16.msra.mxu0 %v9975_v40  ;;  %7761 = vmatprep.subr.bf16.mxu1 %v9944_v42  ;;  %v1649_v21 = vld [vmem:[#allocation10 + $0x1b40] sm:$0xff]  ;;  %v9816_v23 = vcombine.high %v1137_v19, %v1153_v20  ;;  %v9815_v32 = vcombine.low %v1137_v19, %v1153_v20  ;;  %v1856_v19 = vrot.slane %v11028_v2, %v10906_v52 }
 0x3eb   :  { %7802 = vmatprep.subr.bf16.mxu0 %v10456_v43  ;;  %v1665_v4 = vld [vmem:[#allocation10 + $0x1bc0] sm:$0xff]  ;;  %v9658_v20 = vcombine.high %v978_v11, %v994_v5 }
 0x3ec   :  { %v10328_v24 = vcombine.high %v1649_v21, %v1665_v4  ;;  %v1105_v25 = vld [vmem:[#allocation10 + $0xa40] sm:$0xff]  ;;  %v10327_v33 = vcombine.low %v1649_v21, %v1665_v4  ;;  %v946_v21 = vld [vmem:[#allocation10 + $0x548] sm:$0xff] }
 0x3ed   :  { %7762 = vmatpush2.bf16.msra.mxu1 %v9943_v59  ;;  %v1121_v26 = vld [vmem:[#allocation10 + $0xac0] sm:$0xff]  ;;  %v962_v4 = vld [vmem:[#allocation10 + $0x5c8] sm:$0xff] }
 0x3ee   :  { %7803 = vmatpush2.bf16.msra.mxu0 %v10455_v63  ;;  %7763 = vmatprep.subr.bf16.mxu1 %v9912_v0  ;;  %v1617_v27 = vld [vmem:[#allocation10 + $0x1a40] sm:$0xff]  ;;  %v9784_v45 = vcombine.high %v1105_v25, %v1121_v26  ;;  %v9783_v40 = vcombine.low %v1105_v25, %v1121_v26 }
 0x3ef   :  { %7804 = vmatprep.subr.bf16.mxu0 %v10424_v1  ;;  %v1633_v30 = vld [vmem:[#allocation10 + $0x1ac0] sm:$0xff] }
 0x3f0   :  { %v10296_v34 = vcombine.high %v1617_v27, %v1633_v30  ;;  %v1073_v35 = vld [vmem:[#allocation10 + $0x940] sm:$0xff]  ;;  %v10295_v42 = vcombine.low %v1617_v27, %v1633_v30  ;;  %v9657_v27 = vcombine.low %v978_v11, %v994_v5 }
 0x3f1   :  { %7764 = vmatpush2.bf16.msra.mxu1 %v9911_v28  ;;  %v1089_v37 = vld [vmem:[#allocation10 + $0x9c0] sm:$0xff]  ;;  %v1538_v28 = vld [vmem:[#allocation10 + $0x17c8] sm:$0xff] }
 0x3f2   :  { %7805 = vmatpush2.bf16.msra.mxu0 %v10423_v51  ;;  %7765 = vmatprep.subr.bf16.mxu1 %v9880_v62  ;;  %v1585_v38 = vld [vmem:[#allocation10 + $0x1940] sm:$0xff]  ;;  %v9752_v43 = vcombine.high %v1073_v35, %v1089_v37  ;;  %v9751_v63 = vcombine.low %v1073_v35, %v1089_v37  ;;  %v10202_v41 = vcombine.high %v1522_v8, %v1538_v28 }
 0x3f3   :  { %7806 = vmatprep.subr.bf16.mxu0 %v10392_v10  ;;  %v1601_v39 = vld [vmem:[#allocation10 + $0x19c0] sm:$0xff]  ;;  %v9690_v10 = vcombine.high %v1010_v56, %v1026_v7 }
 0x3f4   :  { %v10264_v44 = vcombine.high %v1585_v38, %v1601_v39  ;;  %v1041_v47 = vld [vmem:[#allocation10 + $0x840] sm:$0xff]  ;;  %v10263_v0 = vcombine.low %v1585_v38, %v1601_v39  ;;  %v914_v38 = vld [vmem:[#allocation10 + $0x448] sm:$0xff] }
 0x3f5   :  { %7766 = vmatpush2.bf16.msra.mxu1 %v9879_v12  ;;  %v1057_v57 = vld [vmem:[#allocation10 + $0x8c0] sm:$0xff]  ;;  %v9689_v12 = vcombine.low %v1010_v56, %v1026_v7  ;;  %v930_v39 = vld [vmem:[#allocation10 + $0x4c8] sm:$0xff] }
 0x3f6   :  { %7807 = vmatpush2.bf16.msra.mxu0 %v10391_v17  ;;  %7767 = vmatprep.subr.bf16.mxu1 %v9848_v18  ;;  %v1553_v58 = vld [vmem:[#allocation10 + $0x1840] sm:$0xff]  ;;  %v9720_v1 = vcombine.high %v1041_v47, %v1057_v57  ;;  %v9719_v51 = vcombine.low %v1041_v47, %v1057_v57  ;;  %v1490_v17 = vld [vmem:[#allocation10 + $0x1648] sm:$0xff] }
 0x3f7   :  { %7808 = vmatprep.subr.bf16.mxu0 %v10360_v3  ;;  %v1569_v59 = vld [vmem:[#allocation10 + $0x18c0] sm:$0xff]  ;;  %v1506_v18 = vld [vmem:[#allocation10 + $0x16c8] sm:$0xff]  ;;  %v10201_v3 = vcombine.low %v1522_v8, %v1538_v28 }
 0x3f8   :  { %v10232_v49 = vcombine.high %v1553_v58, %v1569_v59  ;;  %v10231_v62 = vcombine.low %v1553_v58, %v1569_v59  ;;  %v9625_v58 = vcombine.low %v946_v21, %v962_v4  ;;  %v882_v28 = vld [vmem:[#allocation10 + $0x348] sm:$0xff] }
 0x3f9   :  { %7768 = vmatpush2.bf16.msra.mxu1 %v9847_v36 }
 0x3fa   :  { %7809 = vmatpush2.bf16.msra.mxu0 %v10359_v22  ;;  %7769 = vmatprep.subr.bf16.mxu1 %v9816_v23  ;;  %v10170_v22 = vcombine.high %v1490_v17, %v1506_v18  ;;  %v1458_v23 = vld [vmem:[#allocation10 + $0x1548] sm:$0xff] }
 0x3fb   :  { %7810 = vmatprep.subr.bf16.mxu0 %v10328_v24  ;;  %v1474_v24 = vld [vmem:[#allocation10 + $0x15c8] sm:$0xff] }
 0x3fc   :  { %v10138_v37 = vcombine.high %v1458_v23, %v1474_v24 }
 0x3fd   :  { %7770 = vmatpush2.bf16.msra.mxu1 %v9815_v32  ;;  %v10169_v32 = vcombine.low %v1490_v17, %v1506_v18 }
 0x3fe   :  { %7811 = vmatpush2.bf16.msra.mxu0 %v10327_v33  ;;  %7771 = vmatprep.subr.bf16.mxu1 %v9784_v45  ;;  %v9626_v33 = vcombine.high %v946_v21, %v962_v4  ;;  %v1378_v4 = vld [vmem:[#allocation10 + $0x12c8] sm:$0xff] }
 0x3ff   :  { %7812 = vmatprep.subr.bf16.mxu0 %v10296_v34 }
 0x401   :  { %7772 = vmatpush2.bf16.msra.mxu1 %v9783_v40 }
 0x402   :  { %7813 = vmatpush2.bf16.msra.mxu0 %v10295_v42  ;;  %7773 = vmatprep.subr.bf16.mxu1 %v9752_v43  ;;  %v1426_v42 = vld [vmem:[#allocation10 + $0x1448] sm:$0xff] }
 0x403   :  { %7814 = vmatprep.subr.bf16.mxu0 %v10264_v44  ;;  %v1442_v43 = vld [vmem:[#allocation10 + $0x14c8] sm:$0xff] }
 0x404   :  { %v10106_v8 = vcombine.high %v1426_v42, %v1442_v43  ;;  %v10105_v17 = vcombine.low %v1426_v42, %v1442_v43  ;;  %v1266_v43 = vld [vmem:[#allocation10 + $0xf48] sm:$0xff] }
 0x405   :  { %7774 = vmatpush2.bf16.msra.mxu1 %v9751_v63  ;;  %v10137_v63 = vcombine.low %v1458_v23, %v1474_v24 }
 0x406   :  { %7815 = vmatpush2.bf16.msra.mxu0 %v10263_v0  ;;  %7775 = vmatprep.subr.bf16.mxu1 %v9720_v1  ;;  %v9594_v0 = vcombine.high %v914_v38, %v930_v39 }
 0x407   :  { %7816 = vmatprep.subr.bf16.mxu0 %v10232_v49 }
 0x409   :  { %7776 = vmatpush2.bf16.msra.mxu1 %v9719_v51  ;;  %v898_v51 = vld [vmem:[#allocation10 + $0x3c8] sm:$0xff] }
 0x40a   :  { %7817 = vmatpush2.bf16.msra.mxu0 %v10231_v62  ;;  %7827 = vmatprep.subr.bf16.mxu1 %v9690_v10  ;;  %v9593_v62 = vcombine.low %v914_v38, %v930_v39  ;;  %v1394_v10 = vld [vmem:[#allocation10 + $0x1348] sm:$0xff]  ;;  %v9562_v18 = vcombine.high %v882_v28, %v898_v51 }
 0x40b   :  { %7868 = vmatprep.subr.bf16.mxu0 %v10202_v41  ;;  %v1410_v41 = vld [vmem:[#allocation10 + $0x13c8] sm:$0xff] }
 0x40c   :  { %v7533_v36 = vpop.f32.mrf.mxu1  ;;  %7778 = vmatmul.mubr.bf16.vlgmr.msra.gmra.mxu1 %v10916_v15 }
 0x40d   :  { %v7534_v25 = vadd.f32 %v7533_v36, %v1852_v61  ;;  %v7574_v26 = vpop.f32.mrf.mxu0  ;;  %7819 = vmatmul.mubr.bf16.vlgmr.msra.gmra.mxu0 %v10918_v16  ;;  %7828 = vmatpush1.bf16.msra.mxu1 %v9689_v12  ;;  %v9561_v36 = vcombine.low %v882_v28, %v898_v51 }
 0x40e   :  { %7859 = vmatprep.mubr.bf16.mxu1 %v10912_v13  ;;  %7869 = vmatpush1.bf16.msra.mxu0 %v10201_v3  ;;  %v7535_v30 = vpop.f32.mrf.mxu1  ;;  %v10074_v3 = vcombine.high %v1394_v10, %v1410_v41 }
 0x40f   :  { %v7575_v45 = vadd.f32 %v7574_v26, %v7534_v25  ;;  %7900 = vmatprep.mubr.bf16.mxu0 %v10914_v14  ;;  %v7536_v34 = vadd.f32 %v7535_v30, %v1856_v19  ;;  %v7576_v35 = vpop.f32.mrf.mxu0  ;;  %7829 = vmatprep.subr.bf16.mxu1 %v9658_v20  ;;  %v850_v19 = vld [vmem:[#allocation10 + $0x248] sm:$0xff] }
 0x410   :  { %v7537_v40 = vpop.f32.mrf.mxu1  ;;  %7870 = vmatprep.subr.bf16.mxu0 %v10170_v22  ;;  %v866_v20 = vld [vmem:[#allocation10 + $0x2c8] sm:$0xff]  ;;  %v10073_v22 = vcombine.low %v1394_v10, %v1410_v41 }
 0x411   :  { %v8411_v44 = vmax.f32 %v7575_v45, 0.0  ;;  %v7577_v47 = vadd.f32 %v7576_v35, %v7536_v34  ;;  %v7578_v57 = vpop.f32.mrf.mxu0  ;;  %7830 = vmatpush1.bf16.msra.mxu1 %v9657_v27  ;;  %v9530_v23 = vcombine.high %v850_v19, %v866_v20  ;;  %v818_v25 = vld [vmem:[#allocation10 + $0x148] sm:$0xff] }
 0x412   :  { %7871 = vmatpush1.bf16.msra.mxu0 %v10169_v32  ;;  %v7538_v59 = vpop.f32.mrf.mxu1  ;;  %7831 = vmatprep.subr.bf16.mxu1 %v9626_v33  ;;  %v834_v26 = vld [vmem:[#allocation10 + $0x1c8] sm:$0xff] }
 0x413   :  { %v8469_v1 = vrot.slane %v8411_v44, 3  ;;  %v8961_v49 = vrot.slane %v8411_v44, 4  ;;  %v8412_v56 = vmax.f32 %v7577_v47, 0.0  ;;  %v7579_v7 = vpop.f32.mrf.mxu0  ;;  %7872 = vmatprep.subr.bf16.mxu0 %v10138_v37  ;;  %v1330_v27 = vld [vmem:[#allocation10 + $0x1148] sm:$0xff]  ;;  %v9498_v32 = vcombine.high %v818_v25, %v834_v26 }
 0x414   :  { %v1346_v30 = vld [vmem:[#allocation10 + $0x11c8] sm:$0xff]  ;;  %v9497_v38 = vcombine.low %v818_v25, %v834_v26 }
 0x415   :  { %v11064_v11 = vsel %vm8539_vm4, %v11040_v53, %v8469_v1  ;;  %v11068_v5 = vsel %vm8539_vm4, %v11044_v6, %v8961_v49  ;;  %v8470_v61 = vrot.slane %v8412_v56, 3  ;;  %v8962_v12 = vrot.slane %v8412_v56, 4  ;;  %7832 = vmatpush1.bf16.msra.mxu1 %v9625_v58  ;;  %v1362_v6 = vld [vmem:[#allocation10 + $0x1248] sm:$0xff] }
 0x416   :  { %7873 = vmatpush1.bf16.msra.mxu0 %v10137_v63  ;;  %7833 = vmatprep.subr.bf16.mxu1 %v9594_v0  ;;  %v10042_v24 = vcombine.high %v1362_v6, %v1378_v4  ;;  %v10010_v33 = vcombine.high %v1330_v27, %v1346_v30  ;;  %v786_v45 = vld [vmem:[#allocation10 + $0x48] sm:$0xff]  ;;  %v10009_v39 = vcombine.low %v1330_v27, %v1346_v30 }
 0x417   :  { %7874 = vmatprep.subr.bf16.mxu0 %v10106_v8  ;;  %v11072_v21 = vsel %vm8539_vm4, %v11048_v9, %v8470_v61  ;;  %v11076_v53 = vsel %vm8539_vm4, %v11052_v60, %v8962_v12  ;;  %v9529_v9 = vcombine.low %v850_v19, %v866_v20  ;;  %v10041_v60 = vcombine.low %v1362_v6, %v1378_v4  ;;  %v802_v34 = vld [vmem:[#allocation10 + $0xc8] sm:$0xff] }
 0x418   :  { %v1298_v35 = vld [vmem:[#allocation10 + $0x1048] sm:$0xff]  ;;  %v9466_v40 = vcombine.high %v786_v45, %v802_v34  ;;  %v9465_v58 = vcombine.low %v786_v45, %v802_v34 }
 0x419   :  { %7834 = vmatpush1.bf16.msra.mxu1 %v9593_v62  ;;  %v1314_v37 = vld [vmem:[#allocation10 + $0x10c8] sm:$0xff] }
 0x41a   :  { %7875 = vmatpush1.bf16.msra.mxu0 %v10105_v17  ;;  %7835 = vmatprep.subr.bf16.mxu1 %v9562_v18  ;;  %v9978_v42 = vcombine.high %v1298_v35, %v1314_v37  ;;  %v1282_v44 = vld [vmem:[#allocation10 + $0xfc8] sm:$0xff]  ;;  %v9977_v59 = vcombine.low %v1298_v35, %v1314_v37 }
 0x41b   :  { %7876 = vmatprep.subr.bf16.mxu0 %v10074_v3  ;;  %v1778_v47 = vld [vmem:[#allocation10 + $0x1f48] sm:$0xff]  ;;  %v9946_v63 = vcombine.high %v1266_v43, %v1282_v44  ;;  %v9945_v8 = vcombine.low %v1266_v43, %v1282_v44 }
 0x41c   :  { %v1794_v57 = vld [vmem:[#allocation10 + $0x1fc8] sm:$0xff] }
 0x41d   :  { %7836 = vmatpush1.bf16.msra.mxu1 %v9561_v36  ;;  %v10458_v0 = vcombine.high %v1778_v47, %v1794_v57  ;;  %v1234_v1 = vld [vmem:[#allocation10 + $0xe48] sm:$0xff]  ;;  %v10457_v28 = vcombine.low %v1778_v47, %v1794_v57 }
 0x41e   :  { %7877 = vmatpush1.bf16.msra.mxu0 %v10073_v22  ;;  %7837 = vmatprep.subr.bf16.mxu1 %v9530_v23  ;;  %v1250_v49 = vld [vmem:[#allocation10 + $0xec8] sm:$0xff] }
 0x41f   :  { %7878 = vmatprep.subr.bf16.mxu0 %v10042_v24  ;;  %v1746_v56 = vld [vmem:[#allocation10 + $0x1e48] sm:$0xff]  ;;  %v9914_v51 = vcombine.high %v1234_v1, %v1250_v49  ;;  %v9913_v17 = vcombine.low %v1234_v1, %v1250_v49 }
 0x420   :  { %v1762_v7 = vld [vmem:[#allocation10 + $0x1ec8] sm:$0xff] }
 0x421   :  { %7838 = vmatpush1.bf16.msra.mxu1 %v9529_v9  ;;  %v10426_v62 = vcombine.high %v1746_v56, %v1762_v7  ;;  %v1202_v10 = vld [vmem:[#allocation10 + $0xd48] sm:$0xff]  ;;  %v10425_v18 = vcombine.low %v1746_v56, %v1762_v7 }
 0x422   :  { %7879 = vmatpush1.bf16.msra.mxu0 %v10041_v60  ;;  %7839 = vmatprep.subr.bf16.mxu1 %v9498_v32  ;;  %v1218_v41 = vld [vmem:[#allocation10 + $0xdc8] sm:$0xff] }
 0x423   :  { %7880 = vmatprep.subr.bf16.mxu0 %v10010_v33  ;;  %v1714_v61 = vld [vmem:[#allocation10 + $0x1d48] sm:$0xff]  ;;  %v9882_v3 = vcombine.high %v1202_v10, %v1218_v41  ;;  %v9881_v22 = vcombine.low %v1202_v10, %v1218_v41  ;;  %v1011_v41 = vld [vmem:[#allocation10 + $0x750] sm:$0xff] }
 0x424   :  { %v1730_v12 = vld [vmem:[#allocation10 + $0x1dc8] sm:$0xff] }
 0x425   :  { %7840 = vmatpush1.bf16.msra.mxu1 %v9497_v38  ;;  %v10394_v19 = vcombine.high %v1714_v61, %v1730_v12  ;;  %v1170_v20 = vld [vmem:[#allocation10 + $0xc48] sm:$0xff]  ;;  %v10393_v23 = vcombine.low %v1714_v61, %v1730_v12  ;;  %v1027_v61 = vld [vmem:[#allocation10 + $0x7d0] sm:$0xff] }
 0x426   :  { %7881 = vmatpush1.bf16.msra.mxu0 %v10009_v39  ;;  %7841 = vmatprep.subr.bf16.mxu1 %v9466_v40  ;;  %v1186_v6 = vld [vmem:[#allocation10 + $0xcc8] sm:$0xff]  ;;  %v1523_v12 = vld [vmem:[#allocation10 + $0x1750] sm:$0xff] }
 0x427   :  { %7882 = vmatprep.subr.bf16.mxu0 %v9978_v42  ;;  %v1682_v4 = vld [vmem:[#allocation10 + $0x1c48] sm:$0xff]  ;;  %v9850_v24 = vcombine.high %v1170_v20, %v1186_v6  ;;  %v9849_v60 = vcombine.low %v1170_v20, %v1186_v6  ;;  %v979_v6 = vld [vmem:[#allocation10 + $0x650] sm:$0xff] }
 0x428   :  { %v1698_v36 = vld [vmem:[#allocation10 + $0x1cc8] sm:$0xff] }
 0x429   :  { %7842 = vmatpush1.bf16.msra.mxu1 %v9465_v58  ;;  %v10362_v25 = vcombine.high %v1682_v4, %v1698_v36  ;;  %v1138_v26 = vld [vmem:[#allocation10 + $0xb48] sm:$0xff]  ;;  %v10361_v32 = vcombine.low %v1682_v4, %v1698_v36  ;;  %v995_v4 = vld [vmem:[#allocation10 + $0x6d0] sm:$0xff]  ;;  %v1860_v36 = vrot.slane %v11028_v2, %v10971_v46 }
 0x42a   :  { %7883 = vmatpush1.bf16.msra.mxu0 %v9977_v59  ;;  %7843 = vmatprep.subr.bf16.mxu1 %v9946_v63  ;;  %v1154_v27 = vld [vmem:[#allocation10 + $0xbc8] sm:$0xff] }
 0x42b   :  { %7884 = vmatprep.subr.bf16.mxu0 %v10458_v0  ;;  %v1650_v30 = vld [vmem:[#allocation10 + $0x1b48] sm:$0xff]  ;;  %v9818_v33 = vcombine.high %v1138_v26, %v1154_v27  ;;  %v9817_v39 = vcombine.low %v1138_v26, %v1154_v27  ;;  %v1864_v26 = vrot.slane %v11028_v2, %v10974_v54  ;;  %v9660_v27 = vcombine.high %v979_v6, %v995_v4 }
 0x42c   :  { %v1666_v9 = vld [vmem:[#allocation10 + $0x1bc8] sm:$0xff] }
 0x42d   :  { %7844 = vmatpush2.bf16.msra.mxu1 %v9945_v8  ;;  %v10330_v45 = vcombine.high %v1650_v30, %v1666_v9  ;;  %v1106_v34 = vld [vmem:[#allocation10 + $0xa48] sm:$0xff]  ;;  %v10329_v40 = vcombine.low %v1650_v30, %v1666_v9  ;;  %v947_v30 = vld [vmem:[#allocation10 + $0x550] sm:$0xff] }
 0x42e   :  { %7885 = vmatpush2.bf16.msra.mxu0 %v10457_v28  ;;  %7845 = vmatprep.subr.bf16.mxu1 %v9914_v51  ;;  %v1122_v35 = vld [vmem:[#allocation10 + $0xac8] sm:$0xff]  ;;  %v963_v9 = vld [vmem:[#allocation10 + $0x5d0] sm:$0xff] }
 0x42f   :  { %7886 = vmatprep.subr.bf16.mxu0 %v10426_v62  ;;  %v1618_v37 = vld [vmem:[#allocation10 + $0x1a48] sm:$0xff]  ;;  %v9786_v42 = vcombine.high %v1106_v34, %v1122_v35  ;;  %v9785_v59 = vcombine.low %v1106_v34, %v1122_v35 }
 0x430   :  { %v1634_v38 = vld [vmem:[#allocation10 + $0x1ac8] sm:$0xff] }
 0x431   :  { %7846 = vmatpush2.bf16.msra.mxu1 %v9913_v17  ;;  %v10298_v43 = vcombine.high %v1618_v37, %v1634_v38  ;;  %v1074_v44 = vld [vmem:[#allocation10 + $0x948] sm:$0xff]  ;;  %v10297_v63 = vcombine.low %v1618_v37, %v1634_v38  ;;  %v1539_v17 = vld [vmem:[#allocation10 + $0x17d0] sm:$0xff]  ;;  %v9659_v37 = vcombine.low %v979_v6, %v995_v4 }
 0x432   :  { %7887 = vmatpush2.bf16.msra.mxu0 %v10425_v18  ;;  %7847 = vmatprep.subr.bf16.mxu1 %v9882_v3  ;;  %v1090_v47 = vld [vmem:[#allocation10 + $0x9c8] sm:$0xff]  ;;  %v10204_v20 = vcombine.high %v1523_v12, %v1539_v17 }
 0x433   :  { %7888 = vmatprep.subr.bf16.mxu0 %v10394_v19  ;;  %v1586_v57 = vld [vmem:[#allocation10 + $0x1948] sm:$0xff]  ;;  %v9754_v0 = vcombine.high %v1074_v44, %v1090_v47  ;;  %v9753_v28 = vcombine.low %v1074_v44, %v1090_v47  ;;  %v9692_v19 = vcombine.high %v1011_v41, %v1027_v61  ;;  %v915_v47 = vld [vmem:[#allocation10 + $0x450] sm:$0xff] }
 0x434   :  { %v1602_v58 = vld [vmem:[#allocation10 + $0x19c8] sm:$0xff] }
 0x435   :  { %7848 = vmatpush2.bf16.msra.mxu1 %v9881_v22  ;;  %v10266_v1 = vcombine.high %v1586_v57, %v1602_v58  ;;  %v1042_v49 = vld [vmem:[#allocation10 + $0x848] sm:$0xff]  ;;  %v10265_v51 = vcombine.low %v1586_v57, %v1602_v58  ;;  %v9691_v22 = vcombine.low %v1011_v41, %v1027_v61  ;;  %v931_v57 = vld [vmem:[#allocation10 + $0x4d0] sm:$0xff] }
 0x436   :  { %7889 = vmatpush2.bf16.msra.mxu0 %v10393_v23  ;;  %7849 = vmatprep.subr.bf16.mxu1 %v9850_v24  ;;  %v1058_v56 = vld [vmem:[#allocation10 + $0x8c8] sm:$0xff]  ;;  %v1491_v23 = vld [vmem:[#allocation10 + $0x1650] sm:$0xff]  ;;  %v9595_v6 = vcombine.low %v915_v47, %v931_v57 }
 0x437   :  { %7890 = vmatprep.subr.bf16.mxu0 %v10362_v25  ;;  %v1554_v7 = vld [vmem:[#allocation10 + $0x1848] sm:$0xff]  ;;  %v9722_v62 = vcombine.high %v1042_v49, %v1058_v56  ;;  %v9721_v18 = vcombine.low %v1042_v49, %v1058_v56  ;;  %v1507_v24 = vld [vmem:[#allocation10 + $0x16d0] sm:$0xff]  ;;  %v10203_v25 = vcombine.low %v1523_v12, %v1539_v17  ;;  %v9627_v56 = vcombine.low %v947_v30, %v963_v9 }
 0x438   :  { %v1570_v8 = vld [vmem:[#allocation10 + $0x18c8] sm:$0xff]  ;;  %v10171_v2 = vcombine.low %v1491_v23, %v1507_v24  ;;  %v883_v12 = vld [vmem:[#allocation10 + $0x350] sm:$0xff] }
 0x439   :  { %7850 = vmatpush2.bf16.msra.mxu1 %v9849_v60  ;;  %v10234_v10 = vcombine.high %v1554_v7, %v1570_v8  ;;  %v10233_v3 = vcombine.low %v1554_v7, %v1570_v8  ;;  %v899_v17 = vld [vmem:[#allocation10 + $0x3d0] sm:$0xff] }
 0x43a   :  { %7891 = vmatpush2.bf16.msra.mxu0 %v10361_v32  ;;  %7851 = vmatprep.subr.bf16.mxu1 %v9818_v33  ;;  %v10172_v32 = vcombine.high %v1491_v23, %v1507_v24  ;;  %v1459_v33 = vld [vmem:[#allocation10 + $0x1550] sm:$0xff] }
 0x43b   :  { %7892 = vmatprep.subr.bf16.mxu0 %v10330_v45  ;;  %v1475_v45 = vld [vmem:[#allocation10 + $0x15d0] sm:$0xff] }
 0x43c   :  { %v10140_v44 = vcombine.high %v1459_v33, %v1475_v45  ;;  %v10139_v8 = vcombine.low %v1459_v33, %v1475_v45  ;;  %v819_v45 = vld [vmem:[#allocation10 + $0x150] sm:$0xff] }
 0x43d   :  { %7852 = vmatpush2.bf16.msra.mxu1 %v9817_v39  ;;  %v9628_v39 = vcombine.high %v947_v30, %v963_v9  ;;  %v1363_v9 = vld [vmem:[#allocation10 + $0x1250] sm:$0xff] }
 0x43e   :  { %7893 = vmatpush2.bf16.msra.mxu0 %v10329_v40  ;;  %7853 = vmatprep.subr.bf16.mxu1 %v9786_v42 }
 0x43f   :  { %7894 = vmatprep.subr.bf16.mxu0 %v10298_v43 }
 0x441   :  { %7854 = vmatpush2.bf16.msra.mxu1 %v9785_v59  ;;  %v1427_v59 = vld [vmem:[#allocation10 + $0x1450] sm:$0xff] }
 0x442   :  { %7895 = vmatpush2.bf16.msra.mxu0 %v10297_v63  ;;  %7855 = vmatprep.subr.bf16.mxu1 %v9754_v0  ;;  %v1443_v63 = vld [vmem:[#allocation10 + $0x14d0] sm:$0xff] }
 0x443   :  { %7896 = vmatprep.subr.bf16.mxu0 %v10266_v1  ;;  %v10108_v61 = vcombine.high %v1427_v59, %v1443_v63  ;;  %v10107_v4 = vcombine.low %v1427_v59, %v1443_v63  ;;  %v1267_v59 = vld [vmem:[#allocation10 + $0xf50] sm:$0xff] }
 0x444   :  { %v1283_v63 = vld [vmem:[#allocation10 + $0xfd0] sm:$0xff] }
 0x445   :  { %7856 = vmatpush2.bf16.msra.mxu1 %v9753_v28  ;;  %v9596_v28 = vcombine.high %v915_v47, %v931_v57 }
 0x446   :  { %7897 = vmatpush2.bf16.msra.mxu0 %v10265_v51  ;;  %7857 = vmatprep.subr.bf16.mxu1 %v9722_v62 }
 0x447   :  { %7898 = vmatprep.subr.bf16.mxu0 %v10234_v10 }
 0x449   :  { %7858 = vmatpush2.bf16.msra.mxu1 %v9721_v18  ;;  %v1395_v18 = vld [vmem:[#allocation10 + $0x1350] sm:$0xff] }
 0x44a   :  { %7899 = vmatpush2.bf16.msra.mxu0 %v10233_v3  ;;  %7909 = vmatprep.subr.bf16.mxu1 %v9692_v19  ;;  %v1411_v3 = vld [vmem:[#allocation10 + $0x13d0] sm:$0xff] }
 0x44b   :  { %7950 = vmatprep.subr.bf16.mxu0 %v10204_v20  ;;  %v10076_v24 = vcombine.high %v1395_v18, %v1411_v3 }
 0x44c   :  { %v7615_v60 = vpop.f32.mrf.mxu1  ;;  %7860 = vmatmul.mubr.bf16.vlgmr.msra.gmra.mxu1 %v10916_v15 }
 0x44d   :  { %v7616_v34 = vadd.f32 %v7615_v60, %v1860_v36  ;;  %v7656_v35 = vpop.f32.mrf.mxu0  ;;  %7901 = vmatmul.mubr.bf16.vlgmr.msra.gmra.mxu0 %v10918_v16  ;;  %7910 = vmatpush1.bf16.msra.mxu1 %v9691_v22  ;;  %v9564_v36 = vcombine.high %v883_v12, %v899_v17  ;;  %v1379_v60 = vld [vmem:[#allocation10 + $0x12d0] sm:$0xff] }
 0x44e   :  { %7941 = vmatprep.mubr.bf16.mxu1 %v10912_v13  ;;  %7951 = vmatpush1.bf16.msra.mxu0 %v10203_v25  ;;  %v7617_v38 = vpop.f32.mrf.mxu1  ;;  %v851_v25 = vld [vmem:[#allocation10 + $0x250] sm:$0xff]  ;;  %v10044_v33 = vcombine.high %v1363_v9, %v1379_v60 }
 0x44f   :  { %v7657_v40 = vadd.f32 %v7656_v35, %v7616_v34  ;;  %7982 = vmatprep.mubr.bf16.mxu0 %v10914_v14  ;;  %v7618_v42 = vadd.f32 %v7617_v38, %v1864_v26  ;;  %v7658_v43 = vpop.f32.mrf.mxu0  ;;  %7911 = vmatprep.subr.bf16.mxu1 %v9660_v27  ;;  %v867_v26 = vld [vmem:[#allocation10 + $0x2d0] sm:$0xff] }
 0x450   :  { %v7619_v58 = vpop.f32.mrf.mxu1  ;;  %7952 = vmatprep.subr.bf16.mxu0 %v10172_v32  ;;  %v9532_v32 = vcombine.high %v851_v25, %v867_v26  ;;  %v835_v34 = vld [vmem:[#allocation10 + $0x1d0] sm:$0xff] }
 0x451   :  { %v8413_v0 = vmax.f32 %v7657_v40, 0.0  ;;  %v7659_v1 = vadd.f32 %v7658_v43, %v7618_v42  ;;  %v7660_v49 = vpop.f32.mrf.mxu0  ;;  %7912 = vmatpush1.bf16.msra.mxu1 %v9659_v37  ;;  %v1331_v35 = vld [vmem:[#allocation10 + $0x1150] sm:$0xff]  ;;  %v9500_v38 = vcombine.high %v819_v45, %v835_v34 }
 0x452   :  { %7953 = vmatpush1.bf16.msra.mxu0 %v10171_v2  ;;  %v7620_v7 = vpop.f32.mrf.mxu1  ;;  %7913 = vmatprep.subr.bf16.mxu1 %v9628_v39  ;;  %v1347_v37 = vld [vmem:[#allocation10 + $0x11d0] sm:$0xff] }
 0x453   :  { %v8475_v51 = vrot.slane %v8413_v0, 2  ;;  %v8965_v62 = vrot.slane %v8413_v0, 3  ;;  %v8414_v10 = vmax.f32 %v7659_v1, 0.0  ;;  %v7661_v41 = vpop.f32.mrf.mxu0  ;;  %7954 = vmatprep.subr.bf16.mxu0 %v10140_v44  ;;  %v10012_v2 = vcombine.high %v1331_v35, %v1347_v37  ;;  %v787_v39 = vld [vmem:[#allocation10 + $0x50] sm:$0xff] }
 0x454   :  { %v803_v40 = vld [vmem:[#allocation10 + $0xd0] sm:$0xff]  ;;  %v9499_v44 = vcombine.low %v819_v45, %v835_v34  ;;  %v10011_v47 = vcombine.low %v1331_v35, %v1347_v37  ;;  %v9948_v7 = vcombine.high %v1267_v59, %v1283_v63  ;;  %v9947_v41 = vcombine.low %v1267_v59, %v1283_v63 }
 0x455   :  { %v8476_v19 = vrot.slane %v8414_v10, 2  ;;  %v8966_v20 = vrot.slane %v8414_v10, 3  ;;  %7914 = vmatpush1.bf16.msra.mxu1 %v9627_v56  ;;  %v11088_v22 = vsel %vm8542_vm5, %v11064_v11, %v8475_v51  ;;  %v11092_v23 = vsel %vm8542_vm5, %v11068_v5, %v8965_v62  ;;  %v1299_v42 = vld [vmem:[#allocation10 + $0x1050] sm:$0xff] }
 0x456   :  { %7955 = vmatpush1.bf16.msra.mxu0 %v10139_v8  ;;  %7915 = vmatprep.subr.bf16.mxu1 %v9596_v28  ;;  %v9563_v11 = vcombine.low %v883_v12, %v899_v17  ;;  %v10075_v5 = vcombine.low %v1395_v18, %v1411_v3  ;;  %v1315_v43 = vld [vmem:[#allocation10 + $0x10d0] sm:$0xff]  ;;  %v9468_v57 = vcombine.high %v787_v39, %v803_v40 }
 0x457   :  { %7956 = vmatprep.subr.bf16.mxu0 %v10108_v61  ;;  %v11096_v27 = vsel %vm8542_vm5, %v11072_v21, %v8476_v19  ;;  %v11100_v30 = vsel %vm8542_vm5, %v11076_v53, %v8966_v20  ;;  %v9531_v21 = vcombine.low %v851_v25, %v867_v26  ;;  %v10043_v53 = vcombine.low %v1363_v9, %v1379_v60  ;;  %v1779_v0 = vld [vmem:[#allocation10 + $0x1f50] sm:$0xff] }
 0x458   :  { %v9980_v58 = vcombine.high %v1299_v42, %v1315_v43  ;;  %v1795_v1 = vld [vmem:[#allocation10 + $0x1fd0] sm:$0xff]  ;;  %v9467_v49 = vcombine.low %v787_v39, %v803_v40  ;;  %v9979_v56 = vcombine.low %v1299_v42, %v1315_v43 }
 0x459   :  { %7916 = vmatpush1.bf16.msra.mxu1 %v9595_v6  ;;  %v10460_v8 = vcombine.high %v1779_v0, %v1795_v1  ;;  %v1235_v28 = vld [vmem:[#allocation10 + $0xe50] sm:$0xff]  ;;  %v10459_v61 = vcombine.low %v1779_v0, %v1795_v1 }
 0x45a   :  { %7957 = vmatpush1.bf16.msra.mxu0 %v10107_v4  ;;  %7917 = vmatprep.subr.bf16.mxu1 %v9564_v36  ;;  %v1251_v51 = vld [vmem:[#allocation10 + $0xed0] sm:$0xff] }
 0x45b   :  { %7958 = vmatprep.subr.bf16.mxu0 %v10076_v24  ;;  %v1747_v62 = vld [vmem:[#allocation10 + $0x1e50] sm:$0xff]  ;;  %v9916_v12 = vcombine.high %v1235_v28, %v1251_v51  ;;  %v9915_v6 = vcombine.low %v1235_v28, %v1251_v51 }
 0x45c   :  { %v1763_v10 = vld [vmem:[#allocation10 + $0x1ed0] sm:$0xff] }
 0x45d   :  { %7918 = vmatpush1.bf16.msra.mxu1 %v9563_v11  ;;  %v10428_v17 = vcombine.high %v1747_v62, %v1763_v10  ;;  %v1203_v18 = vld [vmem:[#allocation10 + $0xd50] sm:$0xff]  ;;  %v10427_v4 = vcombine.low %v1747_v62, %v1763_v10 }
 0x45e   :  { %7959 = vmatpush1.bf16.msra.mxu0 %v10075_v5  ;;  %7919 = vmatprep.subr.bf16.mxu1 %v9532_v32  ;;  %v1219_v3 = vld [vmem:[#allocation10 + $0xdd0] sm:$0xff] }
 0x45f   :  { %7960 = vmatprep.subr.bf16.mxu0 %v10044_v33  ;;  %v1715_v19 = vld [vmem:[#allocation10 + $0x1d50] sm:$0xff]  ;;  %v9884_v36 = vcombine.high %v1203_v18, %v1219_v3  ;;  %v9883_v11 = vcombine.low %v1203_v18, %v1219_v3  ;;  %v1012_v18 = vld [vmem:[#allocation10 + $0x758] sm:$0xff] }
 0x460   :  { %v1731_v20 = vld [vmem:[#allocation10 + $0x1dd0] sm:$0xff]  ;;  %v1028_v3 = vld [vmem:[#allocation10 + $0x7d8] sm:$0xff] }
 0x461   :  { %7920 = vmatpush1.bf16.msra.mxu1 %v9531_v21  ;;  %v10396_v24 = vcombine.high %v1715_v19, %v1731_v20  ;;  %v1171_v25 = vld [vmem:[#allocation10 + $0xc50] sm:$0xff]  ;;  %v10395_v5 = vcombine.low %v1715_v19, %v1731_v20  ;;  %v1524_v19 = vld [vmem:[#allocation10 + $0x1758] sm:$0xff] }
 0x462   :  { %7961 = vmatpush1.bf16.msra.mxu0 %v10043_v53  ;;  %7921 = vmatprep.subr.bf16.mxu1 %v9500_v38  ;;  %v1187_v26 = vld [vmem:[#allocation10 + $0xcd0] sm:$0xff]  ;;  %v1540_v20 = vld [vmem:[#allocation10 + $0x17d8] sm:$0xff] }
 0x463   :  { %7962 = vmatprep.subr.bf16.mxu0 %v10012_v2  ;;  %v1683_v9 = vld [vmem:[#allocation10 + $0x1c50] sm:$0xff]  ;;  %v9852_v32 = vcombine.high %v1171_v25, %v1187_v26  ;;  %v9851_v21 = vcombine.low %v1171_v25, %v1187_v26  ;;  %v980_v25 = vld [vmem:[#allocation10 + $0x658] sm:$0xff] }
 0x464   :  { %v1699_v60 = vld [vmem:[#allocation10 + $0x1cd0] sm:$0xff]  ;;  %v996_v26 = vld [vmem:[#allocation10 + $0x6d8] sm:$0xff] }
 0x465   :  { %7922 = vmatpush1.bf16.msra.mxu1 %v9499_v44  ;;  %v10364_v33 = vcombine.high %v1683_v9, %v1699_v60  ;;  %v1139_v45 = vld [vmem:[#allocation10 + $0xb50] sm:$0xff]  ;;  %v10363_v53 = vcombine.low %v1683_v9, %v1699_v60  ;;  %v10641_v9 = vld [vmem:[#allocation12 + $0x8] sm:$0xff] }
 0x466   :  { %7963 = vmatpush1.bf16.msra.mxu0 %v10011_v47  ;;  %7923 = vmatprep.subr.bf16.mxu1 %v9468_v57  ;;  %v1155_v34 = vld [vmem:[#allocation10 + $0xbd0] sm:$0xff]  ;;  %v1868_v60 = vrot.slane %v10641_v9, %v11001_v55 }
 0x467   :  { %7964 = vmatprep.subr.bf16.mxu0 %v9980_v58  ;;  %v1651_v35 = vld [vmem:[#allocation10 + $0x1b50] sm:$0xff]  ;;  %v9820_v38 = vcombine.high %v1139_v45, %v1155_v34  ;;  %v9819_v44 = vcombine.low %v1139_v45, %v1155_v34  ;;  %v1872_v45 = vrot.slane %v10641_v9, %v11004_v48  ;;  %v9662_v34 = vcombine.high %v980_v25, %v996_v26 }
 0x468   :  { %v1667_v37 = vld [vmem:[#allocation10 + $0x1bd0] sm:$0xff] }
 0x469   :  { %7924 = vmatpush1.bf16.msra.mxu1 %v9467_v49  ;;  %v10332_v2 = vcombine.high %v1651_v35, %v1667_v37  ;;  %v1107_v39 = vld [vmem:[#allocation10 + $0xa50] sm:$0xff]  ;;  %v10331_v47 = vcombine.low %v1651_v35, %v1667_v37  ;;  %v948_v35 = vld [vmem:[#allocation10 + $0x558] sm:$0xff] }
 0x46a   :  { %7965 = vmatpush1.bf16.msra.mxu0 %v9979_v56  ;;  %7925 = vmatprep.subr.bf16.mxu1 %v9948_v7  ;;  %v1123_v40 = vld [vmem:[#allocation10 + $0xad0] sm:$0xff]  ;;  %v964_v37 = vld [vmem:[#allocation10 + $0x5d8] sm:$0xff] }
 0x46b   :  { %7966 = vmatprep.subr.bf16.mxu0 %v10460_v8  ;;  %v1619_v42 = vld [vmem:[#allocation10 + $0x1a50] sm:$0xff]  ;;  %v9788_v57 = vcombine.high %v1107_v39, %v1123_v40  ;;  %v9787_v49 = vcombine.low %v1107_v39, %v1123_v40 }
 0x46c   :  { %v1635_v43 = vld [vmem:[#allocation10 + $0x1ad0] sm:$0xff] }
 0x46d   :  { %7926 = vmatpush2.bf16.msra.mxu1 %v9947_v41  ;;  %v10300_v58 = vcombine.high %v1619_v42, %v1635_v43  ;;  %v1075_v59 = vld [vmem:[#allocation10 + $0x950] sm:$0xff]  ;;  %v10299_v56 = vcombine.low %v1619_v42, %v1635_v43  ;;  %v9661_v42 = vcombine.low %v980_v25, %v996_v26 }
 0x46e   :  { %7967 = vmatpush2.bf16.msra.mxu0 %v10459_v61  ;;  %7927 = vmatprep.subr.bf16.mxu1 %v9916_v12  ;;  %v1091_v63 = vld [vmem:[#allocation10 + $0x9d0] sm:$0xff] }
 0x46f   :  { %7968 = vmatprep.subr.bf16.mxu0 %v10428_v17  ;;  %v1587_v0 = vld [vmem:[#allocation10 + $0x1950] sm:$0xff]  ;;  %v9756_v7 = vcombine.high %v1075_v59, %v1091_v63  ;;  %v9755_v41 = vcombine.low %v1075_v59, %v1091_v63 }
 0x470   :  { %v1603_v1 = vld [vmem:[#allocation10 + $0x19d0] sm:$0xff] }
 0x471   :  { %7928 = vmatpush2.bf16.msra.mxu1 %v9915_v6  ;;  %v10268_v8 = vcombine.high %v1587_v0, %v1603_v1  ;;  %v1043_v28 = vld [vmem:[#allocation10 + $0x850] sm:$0xff]  ;;  %v10267_v61 = vcombine.low %v1587_v0, %v1603_v1  ;;  %v916_v0 = vld [vmem:[#allocation10 + $0x458] sm:$0xff] }
 0x472   :  { %7969 = vmatpush2.bf16.msra.mxu0 %v10427_v4  ;;  %7929 = vmatprep.subr.bf16.mxu1 %v9884_v36  ;;  %v1059_v51 = vld [vmem:[#allocation10 + $0x8d0] sm:$0xff]  ;;  %v9694_v36 = vcombine.high %v1012_v18, %v1028_v3  ;;  %v932_v1 = vld [vmem:[#allocation10 + $0x4d8] sm:$0xff] }
 0x473   :  { %7970 = vmatprep.subr.bf16.mxu0 %v10396_v24  ;;  %v1555_v62 = vld [vmem:[#allocation10 + $0x1850] sm:$0xff]  ;;  %v9724_v12 = vcombine.high %v1043_v28, %v1059_v51  ;;  %v9723_v6 = vcombine.low %v1043_v28, %v1059_v51  ;;  %v10206_v24 = vcombine.high %v1524_v19, %v1540_v20  ;;  %v9597_v26 = vcombine.low %v916_v0, %v932_v1 }
 0x474   :  { %v1571_v10 = vld [vmem:[#allocation10 + $0x18d0] sm:$0xff] }
 0x475   :  { %7930 = vmatpush2.bf16.msra.mxu1 %v9883_v11  ;;  %v10236_v17 = vcombine.high %v1555_v62, %v1571_v10  ;;  %v10235_v4 = vcombine.low %v1555_v62, %v1571_v10  ;;  %v9693_v11 = vcombine.low %v1012_v18, %v1028_v3  ;;  %v9629_v62 = vcombine.low %v948_v35, %v964_v37 }
 0x476   :  { %7971 = vmatpush2.bf16.msra.mxu0 %v10395_v5  ;;  %7931 = vmatprep.subr.bf16.mxu1 %v9852_v32  ;;  %v1492_v5 = vld [vmem:[#allocation10 + $0x1658] sm:$0xff] }
 0x477   :  { %7972 = vmatprep.subr.bf16.mxu0 %v10364_v33  ;;  %v1508_v32 = vld [vmem:[#allocation10 + $0x16d8] sm:$0xff]  ;;  %v10205_v33 = vcombine.low %v1524_v19, %v1540_v20 }
 0x478   :  { %v884_v20 = vld [vmem:[#allocation10 + $0x358] sm:$0xff] }
 0x479   :  { %7932 = vmatpush2.bf16.msra.mxu1 %v9851_v21 }
 0x47a   :  { %7973 = vmatpush2.bf16.msra.mxu0 %v10363_v53  ;;  %7933 = vmatprep.subr.bf16.mxu1 %v9820_v38  ;;  %v10174_v53 = vcombine.high %v1492_v5, %v1508_v32  ;;  %v1460_v38 = vld [vmem:[#allocation10 + $0x1558] sm:$0xff] }
 0x47b   :  { %7974 = vmatprep.subr.bf16.mxu0 %v10332_v2  ;;  %v1476_v2 = vld [vmem:[#allocation10 + $0x15d8] sm:$0xff] }
 0x47c   :  { %v10142_v63 = vcombine.high %v1460_v38, %v1476_v2 }
 0x47d   :  { %7934 = vmatpush2.bf16.msra.mxu1 %v9819_v44  ;;  %v10173_v44 = vcombine.low %v1492_v5, %v1508_v32 }
 0x47e   :  { %7975 = vmatpush2.bf16.msra.mxu0 %v10331_v47  ;;  %7935 = vmatprep.subr.bf16.mxu1 %v9788_v57  ;;  %v9630_v47 = vcombine.high %v948_v35, %v964_v37  ;;  %v1364_v37 = vld [vmem:[#allocation10 + $0x1258] sm:$0xff] }
 0x47f   :  { %7976 = vmatprep.subr.bf16.mxu0 %v10300_v58 }
 0x481   :  { %7936 = vmatpush2.bf16.msra.mxu1 %v9787_v49 }
 0x482   :  { %7977 = vmatpush2.bf16.msra.mxu0 %v10299_v56  ;;  %7937 = vmatprep.subr.bf16.mxu1 %v9756_v7  ;;  %v1428_v56 = vld [vmem:[#allocation10 + $0x1458] sm:$0xff] }
 0x483   :  { %7978 = vmatprep.subr.bf16.mxu0 %v10268_v8  ;;  %v1444_v7 = vld [vmem:[#allocation10 + $0x14d8] sm:$0xff] }
 0x484   :  { %v10110_v19 = vcombine.high %v1428_v56, %v1444_v7  ;;  %v10109_v9 = vcombine.low %v1428_v56, %v1444_v7  ;;  %v1268_v56 = vld [vmem:[#allocation10 + $0xf58] sm:$0xff] }
 0x485   :  { %7938 = vmatpush2.bf16.msra.mxu1 %v9755_v41  ;;  %v10141_v41 = vcombine.low %v1460_v38, %v1476_v2  ;;  %v820_v2 = vld [vmem:[#allocation10 + $0x158] sm:$0xff] }
 0x486   :  { %7979 = vmatpush2.bf16.msra.mxu0 %v10267_v61  ;;  %7939 = vmatprep.subr.bf16.mxu1 %v9724_v12  ;;  %v9598_v61 = vcombine.high %v916_v0, %v932_v1  ;;  %v1284_v7 = vld [vmem:[#allocation10 + $0xfd8] sm:$0xff] }
 0x487   :  { %7980 = vmatprep.subr.bf16.mxu0 %v10236_v17 }
 0x489   :  { %7940 = vmatpush2.bf16.msra.mxu1 %v9723_v6  ;;  %v900_v6 = vld [vmem:[#allocation10 + $0x3d8] sm:$0xff] }
 0x48a   :  { %7981 = vmatpush2.bf16.msra.mxu0 %v10235_v4  ;;  %7991 = vmatprep.subr.bf16.mxu1 %v9694_v36  ;;  %v1396_v4 = vld [vmem:[#allocation10 + $0x1358] sm:$0xff] }
 0x48b   :  { %8032 = vmatprep.subr.bf16.mxu0 %v10206_v24  ;;  %v1412_v36 = vld [vmem:[#allocation10 + $0x13d8] sm:$0xff] }
 0x48c   :  { %v7697_v21 = vpop.f32.mrf.mxu1  ;;  %7942 = vmatmul.mubr.bf16.vlgmr.msra.gmra.mxu1 %v10916_v15  ;;  %v10078_v32 = vcombine.high %v1396_v4, %v1412_v36 }
 0x48d   :  { %v7698_v39 = vadd.f32 %v7697_v21, %v1868_v60  ;;  %v7738_v40 = vpop.f32.mrf.mxu0  ;;  %7983 = vmatmul.mubr.bf16.vlgmr.msra.gmra.mxu0 %v10918_v16  ;;  %7992 = vmatpush1.bf16.msra.mxu1 %v9693_v11  ;;  %v9566_v60 = vcombine.high %v884_v20, %v900_v6  ;;  %v1380_v21 = vld [vmem:[#allocation10 + $0x12d8] sm:$0xff] }
 0x48e   :  { %8023 = vmatprep.mubr.bf16.mxu1 %v10912_v13  ;;  %8033 = vmatpush1.bf16.msra.mxu0 %v10205_v33  ;;  %v7699_v43 = vpop.f32.mrf.mxu1  ;;  %v852_v33 = vld [vmem:[#allocation10 + $0x258] sm:$0xff]  ;;  %v10046_v38 = vcombine.high %v1364_v37, %v1380_v21 }
 0x48f   :  { %v7739_v57 = vadd.f32 %v7738_v40, %v7698_v39  ;;  %8064 = vmatprep.mubr.bf16.mxu0 %v10914_v14  ;;  %v7700_v58 = vadd.f32 %v7699_v43, %v1872_v45  ;;  %v7740_v59 = vpop.f32.mrf.mxu0  ;;  %7993 = vmatprep.subr.bf16.mxu1 %v9662_v34  ;;  %v868_v45 = vld [vmem:[#allocation10 + $0x2d8] sm:$0xff] }
 0x490   :  { %v7701_v49 = vpop.f32.mrf.mxu1  ;;  %8034 = vmatprep.subr.bf16.mxu0 %v10174_v53  ;;  %v9534_v53 = vcombine.high %v852_v33, %v868_v45  ;;  %v836_v39 = vld [vmem:[#allocation10 + $0x1d8] sm:$0xff] }
 0x491   :  { %v8415_v8 = vmax.f32 %v7739_v57, 0.0  ;;  %v7741_v28 = vadd.f32 %v7740_v59, %v7700_v58  ;;  %v7742_v51 = vpop.f32.mrf.mxu0  ;;  %7994 = vmatpush1.bf16.msra.mxu1 %v9661_v42  ;;  %v1332_v40 = vld [vmem:[#allocation10 + $0x1158] sm:$0xff]  ;;  %v9502_v43 = vcombine.high %v820_v2, %v836_v39 }
 0x492   :  { %8035 = vmatpush1.bf16.msra.mxu0 %v10173_v44  ;;  %v7702_v10 = vpop.f32.mrf.mxu1  ;;  %7995 = vmatprep.subr.bf16.mxu1 %v9630_v47  ;;  %v1348_v42 = vld [vmem:[#allocation10 + $0x11d8] sm:$0xff] }
 0x493   :  { %v8481_v12 = vrot.slane %v8415_v8, 1  ;;  %v8969_v17 = vrot.slane %v8415_v8, 2  ;;  %v8416_v18 = vmax.f32 %v7741_v28, 0.0  ;;  %v7743_v3 = vpop.f32.mrf.mxu0  ;;  %8036 = vmatprep.subr.bf16.mxu0 %v10142_v63  ;;  %v10014_v44 = vcombine.high %v1332_v40, %v1348_v42  ;;  %v788_v47 = vld [vmem:[#allocation10 + $0x58] sm:$0xff] }
 0x494   :  { %v804_v57 = vld [vmem:[#allocation10 + $0xd8] sm:$0xff]  ;;  %v9501_v63 = vcombine.low %v820_v2, %v836_v39  ;;  %v10013_v0 = vcombine.low %v1332_v40, %v1348_v42  ;;  %v9950_v10 = vcombine.high %v1268_v56, %v1284_v7  ;;  %v9949_v3 = vcombine.low %v1268_v56, %v1284_v7 }
 0x495   :  { %v8482_v24 = vrot.slane %v8416_v18, 1  ;;  %v8970_v25 = vrot.slane %v8416_v18, 2  ;;  %7996 = vmatpush1.bf16.msra.mxu1 %v9629_v62  ;;  %v11110_v11 = vsel %vm8545_vm6, %v11088_v22, %v8481_v12  ;;  %v11114_v5 = vsel %vm8545_vm6, %v11092_v23, %v8969_v17  ;;  %v1300_v58 = vld [vmem:[#allocation10 + $0x1058] sm:$0xff] }
 0x496   :  { %8037 = vmatpush1.bf16.msra.mxu0 %v10141_v41  ;;  %7997 = vmatprep.subr.bf16.mxu1 %v9598_v61  ;;  %v9565_v22 = vcombine.low %v884_v20, %v900_v6  ;;  %v10077_v23 = vcombine.low %v1396_v4, %v1412_v36  ;;  %v1316_v59 = vld [vmem:[#allocation10 + $0x10d8] sm:$0xff]  ;;  %v9470_v1 = vcombine.high %v788_v47, %v804_v57 }
 0x497   :  { %8038 = vmatprep.subr.bf16.mxu0 %v10110_v19  ;;  %v11118_v34 = vsel %vm8545_vm6, %v11096_v27, %v8482_v24  ;;  %v11122_v35 = vsel %vm8545_vm6, %v11100_v30, %v8970_v25  ;;  %v9533_v27 = vcombine.low %v852_v33, %v868_v45  ;;  %v10045_v30 = vcombine.low %v1364_v37, %v1380_v21  ;;  %v1780_v8 = vld [vmem:[#allocation10 + $0x1f58] sm:$0xff] }
 0x498   :  { %v9982_v49 = vcombine.high %v1300_v58, %v1316_v59  ;;  %v1796_v28 = vld [vmem:[#allocation10 + $0x1fd8] sm:$0xff]  ;;  %v9469_v51 = vcombine.low %v788_v47, %v804_v57  ;;  %v9981_v62 = vcombine.low %v1300_v58, %v1316_v59 }
 0x499   :  { %7998 = vmatpush1.bf16.msra.mxu1 %v9597_v26  ;;  %v10462_v41 = vcombine.high %v1780_v8, %v1796_v28  ;;  %v1236_v61 = vld [vmem:[#allocation10 + $0xe58] sm:$0xff]  ;;  %v10461_v19 = vcombine.low %v1780_v8, %v1796_v28 }
 0x49a   :  { %8039 = vmatpush1.bf16.msra.mxu0 %v10109_v9  ;;  %7999 = vmatprep.subr.bf16.mxu1 %v9566_v60  ;;  %v1252_v12 = vld [vmem:[#allocation10 + $0xed8] sm:$0xff] }
 0x49b   :  { %8040 = vmatprep.subr.bf16.mxu0 %v10078_v32  ;;  %v1748_v17 = vld [vmem:[#allocation10 + $0x1e58] sm:$0xff]  ;;  %v9918_v20 = vcombine.high %v1236_v61, %v1252_v12  ;;  %v9917_v26 = vcombine.low %v1236_v61, %v1252_v12 }
 0x49c   :  { %v1764_v18 = vld [vmem:[#allocation10 + $0x1ed8] sm:$0xff] }
 0x49d   :  { %8000 = vmatpush1.bf16.msra.mxu1 %v9565_v22  ;;  %v10430_v6 = vcombine.high %v1748_v17, %v1764_v18  ;;  %v1204_v4 = vld [vmem:[#allocation10 + $0xd58] sm:$0xff]  ;;  %v10429_v9 = vcombine.low %v1748_v17, %v1764_v18 }
 0x49e   :  { %8041 = vmatpush1.bf16.msra.mxu0 %v10077_v23  ;;  %8001 = vmatprep.subr.bf16.mxu1 %v9534_v53  ;;  %v1220_v36 = vld [vmem:[#allocation10 + $0xdd8] sm:$0xff] }
 0x49f   :  { %8042 = vmatprep.subr.bf16.mxu0 %v10046_v38  ;;  %v1716_v24 = vld [vmem:[#allocation10 + $0x1d58] sm:$0xff]  ;;  %v9886_v60 = vcombine.high %v1204_v4, %v1220_v36  ;;  %v9885_v22 = vcombine.low %v1204_v4, %v1220_v36  ;;  %v1013_v4 = vld [vmem:[#allocation10 + $0x760] sm:$0xff] }
 0x4a0   :  { %v1732_v25 = vld [vmem:[#allocation10 + $0x1dd8] sm:$0xff]  ;;  %v1029_v36 = vld [vmem:[#allocation10 + $0x7e0] sm:$0xff] }
 0x4a1   :  { %8002 = vmatpush1.bf16.msra.mxu1 %v9533_v27  ;;  %v10398_v32 = vcombine.high %v1716_v24, %v1732_v25  ;;  %v1172_v33 = vld [vmem:[#allocation10 + $0xc58] sm:$0xff]  ;;  %v10397_v23 = vcombine.low %v1716_v24, %v1732_v25  ;;  %v1525_v24 = vld [vmem:[#allocation10 + $0x1760] sm:$0xff] }
 0x4a2   :  { %8043 = vmatpush1.bf16.msra.mxu0 %v10045_v30  ;;  %8003 = vmatprep.subr.bf16.mxu1 %v9502_v43  ;;  %v1188_v45 = vld [vmem:[#allocation10 + $0xcd8] sm:$0xff]  ;;  %v1541_v25 = vld [vmem:[#allocation10 + $0x17e0] sm:$0xff] }
 0x4a3   :  { %8044 = vmatprep.subr.bf16.mxu0 %v10014_v44  ;;  %v1684_v37 = vld [vmem:[#allocation10 + $0x1c58] sm:$0xff]  ;;  %v9854_v53 = vcombine.high %v1172_v33, %v1188_v45  ;;  %v9853_v27 = vcombine.low %v1172_v33, %v1188_v45  ;;  %v10208_v33 = vcombine.high %v1525_v24, %v1541_v25  ;;  %v981_v45 = vld [vmem:[#allocation10 + $0x660] sm:$0xff] }
 0x4a4   :  { %v1700_v21 = vld [vmem:[#allocation10 + $0x1cd8] sm:$0xff] }
 0x4a5   :  { %8004 = vmatpush1.bf16.msra.mxu1 %v9501_v63  ;;  %v10366_v38 = vcombine.high %v1684_v37, %v1700_v21  ;;  %v1140_v2 = vld [vmem:[#allocation10 + $0xb58] sm:$0xff]  ;;  %v10365_v30 = vcombine.low %v1684_v37, %v1700_v21  ;;  %v997_v37 = vld [vmem:[#allocation10 + $0x6e0] sm:$0xff] }
 0x4a6   :  { %8045 = vmatpush1.bf16.msra.mxu0 %v10013_v0  ;;  %8005 = vmatprep.subr.bf16.mxu1 %v9470_v1  ;;  %v1156_v39 = vld [vmem:[#allocation10 + $0xbd8] sm:$0xff] }
 0x4a7   :  { %8046 = vmatprep.subr.bf16.mxu0 %v9982_v49  ;;  %v1652_v40 = vld [vmem:[#allocation10 + $0x1b58] sm:$0xff]  ;;  %v9822_v43 = vcombine.high %v1140_v2, %v1156_v39  ;;  %v9821_v63 = vcombine.low %v1140_v2, %v1156_v39  ;;  %v9664_v39 = vcombine.high %v981_v45, %v997_v37 }
 0x4a8   :  { %v1668_v42 = vld [vmem:[#allocation10 + $0x1bd8] sm:$0xff] }
 0x4a9   :  { %8006 = vmatpush1.bf16.msra.mxu1 %v9469_v51  ;;  %v10334_v44 = vcombine.high %v1652_v40, %v1668_v42  ;;  %v1108_v47 = vld [vmem:[#allocation10 + $0xa58] sm:$0xff]  ;;  %v10333_v0 = vcombine.low %v1652_v40, %v1668_v42  ;;  %v949_v40 = vld [vmem:[#allocation10 + $0x560] sm:$0xff] }
 0x4aa   :  { %8047 = vmatpush1.bf16.msra.mxu0 %v9981_v62  ;;  %8007 = vmatprep.subr.bf16.mxu1 %v9950_v10  ;;  %v1124_v57 = vld [vmem:[#allocation10 + $0xad8] sm:$0xff]  ;;  %v965_v42 = vld [vmem:[#allocation10 + $0x5e0] sm:$0xff] }
 0x4ab   :  { %8048 = vmatprep.subr.bf16.mxu0 %v10462_v41  ;;  %v1620_v58 = vld [vmem:[#allocation10 + $0x1a58] sm:$0xff]  ;;  %v9790_v1 = vcombine.high %v1108_v47, %v1124_v57  ;;  %v9789_v51 = vcombine.low %v1108_v47, %v1124_v57 }
 0x4ac   :  { %v1636_v59 = vld [vmem:[#allocation10 + $0x1ad8] sm:$0xff] }
 0x4ad   :  { %8008 = vmatpush2.bf16.msra.mxu1 %v9949_v3  ;;  %v10302_v49 = vcombine.high %v1620_v58, %v1636_v59  ;;  %v1076_v56 = vld [vmem:[#allocation10 + $0x958] sm:$0xff]  ;;  %v10301_v62 = vcombine.low %v1620_v58, %v1636_v59  ;;  %v9663_v58 = vcombine.low %v981_v45, %v997_v37  ;;  %v869_v45 = vld [vmem:[#allocation10 + $0x2e0] sm:$0xff] }
 0x4ae   :  { %8049 = vmatpush2.bf16.msra.mxu0 %v10461_v19  ;;  %8009 = vmatprep.subr.bf16.mxu1 %v9918_v20  ;;  %v1092_v7 = vld [vmem:[#allocation10 + $0x9d8] sm:$0xff]  ;;  %v1365_v37 = vld [vmem:[#allocation10 + $0x1260] sm:$0xff] }
 0x4af   :  { %8050 = vmatprep.subr.bf16.mxu0 %v10430_v6  ;;  %v1588_v8 = vld [vmem:[#allocation10 + $0x1958] sm:$0xff]  ;;  %v9758_v10 = vcombine.high %v1076_v56, %v1092_v7  ;;  %v9757_v3 = vcombine.low %v1076_v56, %v1092_v7 }
 0x4b0   :  { %v1604_v28 = vld [vmem:[#allocation10 + $0x19d8] sm:$0xff] }
 0x4b1   :  { %8010 = vmatpush2.bf16.msra.mxu1 %v9917_v26  ;;  %v10270_v41 = vcombine.high %v1588_v8, %v1604_v28  ;;  %v1044_v61 = vld [vmem:[#allocation10 + $0x858] sm:$0xff]  ;;  %v10269_v19 = vcombine.low %v1588_v8, %v1604_v28  ;;  %v917_v8 = vld [vmem:[#allocation10 + $0x460] sm:$0xff] }
 0x4b2   :  { %8051 = vmatpush2.bf16.msra.mxu0 %v10429_v9  ;;  %8011 = vmatprep.subr.bf16.mxu1 %v9886_v60  ;;  %v1060_v12 = vld [vmem:[#allocation10 + $0x8d8] sm:$0xff]  ;;  %v11124_v60 = vld [vmem:[#allocation12 + $0x10] sm:$0xff]  ;;  %v933_v28 = vld [vmem:[#allocation10 + $0x4e0] sm:$0xff] }
 0x4b3   :  { %8052 = vmatprep.subr.bf16.mxu0 %v10398_v32  ;;  %v1556_v17 = vld [vmem:[#allocation10 + $0x1858] sm:$0xff]  ;;  %v9726_v20 = vcombine.high %v1044_v61, %v1060_v12  ;;  %v9725_v26 = vcombine.low %v1044_v61, %v1060_v12  ;;  %v9696_v32 = vcombine.high %v1013_v4, %v1029_v36  ;;  %v1876_v21 = vrot.slane %v11124_v60, %v10895_v29 }
 0x4b4   :  { %v1572_v18 = vld [vmem:[#allocation10 + $0x18d8] sm:$0xff]  ;;  %v1880_v2 = vrot.slane %v11124_v60, %v10898_v31  ;;  %v9631_v12 = vcombine.low %v949_v40, %v965_v42 }
 0x4b5   :  { %8012 = vmatpush2.bf16.msra.mxu1 %v9885_v22  ;;  %v10238_v6 = vcombine.high %v1556_v17, %v1572_v18  ;;  %v10237_v9 = vcombine.low %v1556_v17, %v1572_v18  ;;  %v9695_v22 = vcombine.low %v1013_v4, %v1029_v36  ;;  %v901_v4 = vld [vmem:[#allocation10 + $0x3e0] sm:$0xff] }
 0x4b6   :  { %8053 = vmatpush2.bf16.msra.mxu0 %v10397_v23  ;;  %8013 = vmatprep.subr.bf16.mxu1 %v9854_v53  ;;  %v1493_v23 = vld [vmem:[#allocation10 + $0x1660] sm:$0xff] }
 0x4b7   :  { %8054 = vmatprep.subr.bf16.mxu0 %v10366_v38  ;;  %v1509_v53 = vld [vmem:[#allocation10 + $0x16e0] sm:$0xff]  ;;  %v10207_v38 = vcombine.low %v1525_v24, %v1541_v25  ;;  %v9599_v25 = vcombine.low %v917_v8, %v933_v28 }
 0x4b8   :  { %v1397_v36 = vld [vmem:[#allocation10 + $0x1360] sm:$0xff] }
 0x4b9   :  { %8014 = vmatpush2.bf16.msra.mxu1 %v9853_v27  ;;  %v1413_v24 = vld [vmem:[#allocation10 + $0x13e0] sm:$0xff] }
 0x4ba   :  { %8055 = vmatpush2.bf16.msra.mxu0 %v10365_v30  ;;  %8015 = vmatprep.subr.bf16.mxu1 %v9822_v43  ;;  %v10176_v30 = vcombine.high %v1493_v23, %v1509_v53  ;;  %v1461_v43 = vld [vmem:[#allocation10 + $0x1560] sm:$0xff] }
 0x4bb   :  { %8056 = vmatprep.subr.bf16.mxu0 %v10334_v44  ;;  %v1477_v44 = vld [vmem:[#allocation10 + $0x15e0] sm:$0xff] }
 0x4bc   :  { %v10144_v7 = vcombine.high %v1461_v43, %v1477_v44  ;;  %v10143_v18 = vcombine.low %v1461_v43, %v1477_v44 }
 0x4bd   :  { %8016 = vmatpush2.bf16.msra.mxu1 %v9821_v63  ;;  %v10175_v63 = vcombine.low %v1493_v23, %v1509_v53  ;;  %v10079_v23 = vcombine.low %v1397_v36, %v1413_v24 }
 0x4be   :  { %8057 = vmatpush2.bf16.msra.mxu0 %v10333_v0  ;;  %8017 = vmatprep.subr.bf16.mxu1 %v9790_v1  ;;  %v9632_v0 = vcombine.high %v949_v40, %v965_v42  ;;  %v1333_v40 = vld [vmem:[#allocation10 + $0x1160] sm:$0xff] }
 0x4bf   :  { %8058 = vmatprep.subr.bf16.mxu0 %v10302_v49  ;;  %v1349_v42 = vld [vmem:[#allocation10 + $0x11e0] sm:$0xff] }
 0x4c0   :  { %v10016_v44 = vcombine.high %v1333_v40, %v1349_v42 }
 0x4c1   :  { %8018 = vmatpush2.bf16.msra.mxu1 %v9789_v51 }
 0x4c2   :  { %8059 = vmatpush2.bf16.msra.mxu0 %v10301_v62  ;;  %8019 = vmatprep.subr.bf16.mxu1 %v9758_v10  ;;  %v1429_v62 = vld [vmem:[#allocation10 + $0x1460] sm:$0xff] }
 0x4c3   :  { %8060 = vmatprep.subr.bf16.mxu0 %v10270_v41  ;;  %v1445_v10 = vld [vmem:[#allocation10 + $0x14e0] sm:$0xff] }
 0x4c5   :  { %8020 = vmatpush2.bf16.msra.mxu1 %v9757_v3  ;;  %v9600_v3 = vcombine.high %v917_v8, %v933_v28  ;;  %v1285_v8 = vld [vmem:[#allocation10 + $0xfe0] sm:$0xff] }
 0x4c6   :  { %8061 = vmatpush2.bf16.msra.mxu0 %v10269_v19  ;;  %8021 = vmatprep.subr.bf16.mxu1 %v9726_v20  ;;  %v10112_v20 = vcombine.high %v1429_v62, %v1445_v10  ;;  %v1781_v28 = vld [vmem:[#allocation10 + $0x1f60] sm:$0xff] }
 0x4c7   :  { %8062 = vmatprep.subr.bf16.mxu0 %v10238_v6  ;;  %v885_v6 = vld [vmem:[#allocation10 + $0x360] sm:$0xff] }
 0x4c9   :  { %8022 = vmatpush2.bf16.msra.mxu1 %v9725_v26  ;;  %v10111_v26 = vcombine.low %v1429_v62, %v1445_v10 }
 0x4ca   :  { %8063 = vmatpush2.bf16.msra.mxu0 %v10237_v9  ;;  %8073 = vmatprep.subr.bf16.mxu1 %v9696_v32  ;;  %v9568_v9 = vcombine.high %v885_v6, %v901_v4  ;;  %v10080_v32 = vcombine.high %v1397_v36, %v1413_v24  ;;  %v1205_v24 = vld [vmem:[#allocation10 + $0xd60] sm:$0xff] }
 0x4cb   :  { %8114 = vmatprep.subr.bf16.mxu0 %v10208_v33  ;;  %v853_v33 = vld [vmem:[#allocation10 + $0x260] sm:$0xff] }
 0x4cc   :  { %v7779_v27 = vpop.f32.mrf.mxu1  ;;  %8024 = vmatmul.mubr.bf16.vlgmr.msra.gmra.mxu1 %v10916_v15  ;;  %v9536_v53 = vcombine.high %v853_v33, %v869_v45 }
 0x4cd   :  { %v7780_v47 = vadd.f32 %v7779_v27, %v1876_v21  ;;  %v7820_v57 = vpop.f32.mrf.mxu0  ;;  %8065 = vmatmul.mubr.bf16.vlgmr.msra.gmra.mxu0 %v10918_v16  ;;  %8074 = vmatpush1.bf16.msra.mxu1 %v9695_v22  ;;  %v1381_v21 = vld [vmem:[#allocation10 + $0x12e0] sm:$0xff]  ;;  %v9567_v22 = vcombine.low %v885_v6, %v901_v4  ;;  %v9535_v27 = vcombine.low %v853_v33, %v869_v45 }
 0x4ce   :  { %8105 = vmatprep.mubr.bf16.mxu1 %v10912_v13  ;;  %8115 = vmatpush1.bf16.msra.mxu0 %v10207_v38  ;;  %v7781_v59 = vpop.f32.mrf.mxu1  ;;  %v10048_v38 = vcombine.high %v1365_v37, %v1381_v21 }
 0x4cf   :  { %v11133_v1 = vadd.f32 %v7820_v57, %v7780_v47  ;;  %8146 = vmatprep.mubr.bf16.mxu0 %v10914_v14  ;;  %v7782_v49 = vadd.f32 %v7781_v59, %v1880_v2  ;;  %v7822_v56 = vpop.f32.mrf.mxu0  ;;  %8075 = vmatprep.subr.bf16.mxu1 %v9664_v39  ;;  %v821_v2 = vld [vmem:[#allocation10 + $0x160] sm:$0xff] }
 0x4d0   :  { %v7783_v51 = vpop.f32.mrf.mxu1  ;;  %8116 = vmatprep.subr.bf16.mxu0 %v10176_v30  ;;  %v837_v39 = vld [vmem:[#allocation10 + $0x1e0] sm:$0xff]  ;;  %v10047_v30 = vcombine.low %v1365_v37, %v1381_v21 }
 0x4d1   :  { %v11136_v41 = vadd.f32 %v7822_v56, %v7782_v49  ;;  %v7824_v61 = vpop.f32.mrf.mxu0  ;;  %8076 = vmatpush1.bf16.msra.mxu1 %v9663_v58  ;;  %v9504_v43 = vcombine.high %v821_v2, %v837_v39  ;;  %v789_v47 = vld [vmem:[#allocation10 + $0x60] sm:$0xff] }
 0x4d2   :  { %8117 = vmatpush1.bf16.msra.mxu0 %v10175_v63  ;;  %v7784_v17 = vpop.f32.mrf.mxu1  ;;  %8077 = vmatprep.subr.bf16.mxu1 %v9632_v0  ;;  %v805_v57 = vld [vmem:[#allocation10 + $0xe0] sm:$0xff]  ;;  %v9503_v63 = vcombine.low %v821_v2, %v837_v39  ;;  %v10015_v0 = vcombine.low %v1333_v40, %v1349_v42 }
 0x4d3   :  { %v7825_v19 = vpop.f32.mrf.mxu0  ;;  %8118 = vmatprep.subr.bf16.mxu0 %v10144_v7  ;;  %v1301_v58 = vld [vmem:[#allocation10 + $0x1060] sm:$0xff]  ;;  %v9472_v49 = vcombine.high %v789_v47, %v805_v57  ;;  %v9471_v62 = vcombine.low %v789_v47, %v805_v57 }
 0x4d4   :  { %v1317_v59 = vld [vmem:[#allocation10 + $0x10e0] sm:$0xff] }
 0x4d5   :  { %8078 = vmatpush1.bf16.msra.mxu1 %v9631_v12  ;;  %v9984_v56 = vcombine.high %v1301_v58, %v1317_v59  ;;  %v1269_v7 = vld [vmem:[#allocation10 + $0xf60] sm:$0xff]  ;;  %v9983_v10 = vcombine.low %v1301_v58, %v1317_v59 }
 0x4d6   :  { %8119 = vmatpush1.bf16.msra.mxu0 %v10143_v18  ;;  %8079 = vmatprep.subr.bf16.mxu1 %v9600_v3  ;;  %v1797_v51 = vld [vmem:[#allocation10 + $0x1fe0] sm:$0xff]  ;;  %v9952_v61 = vcombine.high %v1269_v7, %v1285_v8 }
 0x4d7   :  { %8120 = vmatprep.subr.bf16.mxu0 %v10112_v20  ;;  %v10464_v12 = vcombine.high %v1781_v28, %v1797_v51  ;;  %v1237_v17 = vld [vmem:[#allocation10 + $0xe60] sm:$0xff]  ;;  %v9951_v20 = vcombine.low %v1269_v7, %v1285_v8  ;;  %v10463_v6 = vcombine.low %v1781_v28, %v1797_v51 }
 0x4d8   :  { %v1253_v18 = vld [vmem:[#allocation10 + $0xee0] sm:$0xff] }
 0x4d9   :  { %8080 = vmatpush1.bf16.msra.mxu1 %v9599_v25  ;;  %v1749_v3 = vld [vmem:[#allocation10 + $0x1e60] sm:$0xff]  ;;  %v9920_v4 = vcombine.high %v1237_v17, %v1253_v18 }
 0x4da   :  { %8121 = vmatpush1.bf16.msra.mxu0 %v10111_v26  ;;  %8081 = vmatprep.subr.bf16.mxu1 %v9568_v9  ;;  %v1765_v19 = vld [vmem:[#allocation10 + $0x1ee0] sm:$0xff] }
 0x4db   :  { %8122 = vmatprep.subr.bf16.mxu0 %v10080_v32  ;;  %v10432_v36 = vcombine.high %v1749_v3, %v1765_v19  ;;  %v1221_v25 = vld [vmem:[#allocation10 + $0xde0] sm:$0xff]  ;;  %v9919_v32 = vcombine.low %v1237_v17, %v1253_v18  ;;  %v10431_v33 = vcombine.low %v1749_v3, %v1765_v19 }
 0x4dc   :  { %v1717_v26 = vld [vmem:[#allocation10 + $0x1d60] sm:$0xff]  ;;  %v9888_v45 = vcombine.high %v1205_v24, %v1221_v25 }
 0x4dd   :  { %8082 = vmatpush1.bf16.msra.mxu1 %v9567_v22  ;;  %v1733_v9 = vld [vmem:[#allocation10 + $0x1de0] sm:$0xff] }
 0x4de   :  { %8123 = vmatpush1.bf16.msra.mxu0 %v10079_v23  ;;  %8083 = vmatprep.subr.bf16.mxu1 %v9536_v53  ;;  %v10400_v37 = vcombine.high %v1717_v26, %v1733_v9  ;;  %v1173_v21 = vld [vmem:[#allocation10 + $0xc60] sm:$0xff]  ;;  %v10399_v2 = vcombine.low %v1717_v26, %v1733_v9  ;;  %v1014_v9 = vld [vmem:[#allocation10 + $0x768] sm:$0xff] }
 0x4df   :  { %8124 = vmatprep.subr.bf16.mxu0 %v10048_v38  ;;  %v1189_v22 = vld [vmem:[#allocation10 + $0xce0] sm:$0xff]  ;;  %v9887_v38 = vcombine.low %v1205_v24, %v1221_v25 }
 0x4e0   :  { %v1685_v23 = vld [vmem:[#allocation10 + $0x1c60] sm:$0xff]  ;;  %v9856_v39 = vcombine.high %v1173_v21, %v1189_v22 }
 0x4e1   :  { %8084 = vmatpush1.bf16.msra.mxu1 %v9535_v27  ;;  %v1701_v53 = vld [vmem:[#allocation10 + $0x1ce0] sm:$0xff] }
 0x4e2   :  { %8125 = vmatpush1.bf16.msra.mxu0 %v10047_v30  ;;  %8085 = vmatprep.subr.bf16.mxu1 %v9504_v43  ;;  %v10368_v40 = vcombine.high %v1685_v23, %v1701_v53  ;;  %v1141_v42 = vld [vmem:[#allocation10 + $0xb60] sm:$0xff]  ;;  %v10367_v47 = vcombine.low %v1685_v23, %v1701_v53  ;;  %v982_v53 = vld [vmem:[#allocation10 + $0x668] sm:$0xff] }
 0x4e3   :  { %8126 = vmatprep.subr.bf16.mxu0 %v10016_v44  ;;  %v1157_v27 = vld [vmem:[#allocation10 + $0xbe0] sm:$0xff]  ;;  %v9855_v44 = vcombine.low %v1173_v21, %v1189_v22 }
 0x4e4   :  { %v1653_v30 = vld [vmem:[#allocation10 + $0x1b60] sm:$0xff]  ;;  %v9824_v57 = vcombine.high %v1141_v42, %v1157_v27 }
 0x4e5   :  { %8086 = vmatpush1.bf16.msra.mxu1 %v9503_v63  ;;  %v1669_v43 = vld [vmem:[#allocation10 + $0x1be0] sm:$0xff] }
 0x4e6   :  { %8127 = vmatpush1.bf16.msra.mxu0 %v10015_v0  ;;  %8087 = vmatprep.subr.bf16.mxu1 %v9472_v49  ;;  %v10336_v58 = vcombine.high %v1653_v30, %v1669_v43  ;;  %v1109_v59 = vld [vmem:[#allocation10 + $0xa60] sm:$0xff]  ;;  %v10335_v7 = vcombine.low %v1653_v30, %v1669_v43  ;;  %v1888_v30 = vrot.slane %v11124_v60, %v10906_v52 }
 0x4e7   :  { %8128 = vmatprep.subr.bf16.mxu0 %v9984_v56  ;;  %v1125_v63 = vld [vmem:[#allocation10 + $0xae0] sm:$0xff]  ;;  %v9823_v56 = vcombine.low %v1141_v42, %v1157_v27  ;;  %v1510_v42 = vld [vmem:[#allocation10 + $0x16e8] sm:$0xff] }
 0x4e8   :  { %v1621_v0 = vld [vmem:[#allocation10 + $0x1a60] sm:$0xff]  ;;  %v9792_v8 = vcombine.high %v1109_v59, %v1125_v63 }
 0x4e9   :  { %8088 = vmatpush1.bf16.msra.mxu1 %v9471_v62  ;;  %v1637_v49 = vld [vmem:[#allocation10 + $0x1ae0] sm:$0xff] }
 0x4ea   :  { %8129 = vmatpush1.bf16.msra.mxu0 %v9983_v10  ;;  %8089 = vmatprep.subr.bf16.mxu1 %v9952_v61  ;;  %v10304_v28 = vcombine.high %v1621_v0, %v1637_v49  ;;  %v1077_v51 = vld [vmem:[#allocation10 + $0x960] sm:$0xff]  ;;  %v10303_v17 = vcombine.low %v1621_v0, %v1637_v49  ;;  %v8417_v0 = vmax.f32 %v11133_v1, 0.0 }
 0x4eb   :  { %8130 = vmatprep.subr.bf16.mxu0 %v10464_v12  ;;  %v1093_v62 = vld [vmem:[#allocation10 + $0x9e0] sm:$0xff]  ;;  %v9791_v12 = vcombine.low %v1109_v59, %v1125_v63  ;;  %v1462_v59 = vld [vmem:[#allocation10 + $0x1568] sm:$0xff] }
 0x4ec   :  { %v1589_v10 = vld [vmem:[#allocation10 + $0x1960] sm:$0xff]  ;;  %v9760_v18 = vcombine.high %v1077_v51, %v1093_v62  ;;  %v1478_v63 = vld [vmem:[#allocation10 + $0x15e8] sm:$0xff] }
 0x4ed   :  { %8090 = vmatpush2.bf16.msra.mxu1 %v9951_v20  ;;  %v1605_v61 = vld [vmem:[#allocation10 + $0x19e0] sm:$0xff] }
 0x4ee   :  { %8131 = vmatpush2.bf16.msra.mxu0 %v10463_v6  ;;  %8091 = vmatprep.subr.bf16.mxu1 %v9920_v4  ;;  %v10272_v3 = vcombine.high %v1589_v10, %v1605_v61  ;;  %v1045_v19 = vld [vmem:[#allocation10 + $0x860] sm:$0xff]  ;;  %v10271_v24 = vcombine.low %v1589_v10, %v1605_v61  ;;  %v8418_v10 = vmax.f32 %v11136_v41, 0.0 }
 0x4ef   :  { %8132 = vmatprep.subr.bf16.mxu0 %v10432_v36  ;;  %v1061_v20 = vld [vmem:[#allocation10 + $0x8e0] sm:$0xff]  ;;  %v9759_v36 = vcombine.low %v1077_v51, %v1093_v62  ;;  %v918_v62 = vld [vmem:[#allocation10 + $0x468] sm:$0xff] }
 0x4f0   :  { %v1557_v6 = vld [vmem:[#allocation10 + $0x1860] sm:$0xff]  ;;  %v9728_v25 = vcombine.high %v1045_v19, %v1061_v20 }
 0x4f1   :  { %8092 = vmatpush2.bf16.msra.mxu1 %v9919_v32  ;;  %v1573_v4 = vld [vmem:[#allocation10 + $0x18e0] sm:$0xff]  ;;  %v1030_v32 = vld [vmem:[#allocation10 + $0x7e8] sm:$0xff] }
 0x4f2   :  { %8133 = vmatpush2.bf16.msra.mxu0 %v10431_v33  ;;  %8093 = vmatprep.subr.bf16.mxu1 %v9888_v45  ;;  %v10240_v26 = vcombine.high %v1557_v6, %v1573_v4  ;;  %v1526_v33 = vld [vmem:[#allocation10 + $0x1768] sm:$0xff]  ;;  %v10239_v21 = vcombine.low %v1557_v6, %v1573_v4  ;;  %v9698_v22 = vcombine.high %v1014_v9, %v1030_v32  ;;  %v8975_v6 = vrot.slane %v8417_v0, 1 }
 0x4f3   :  { %8134 = vmatprep.subr.bf16.mxu0 %v10400_v37  ;;  %v1542_v45 = vld [vmem:[#allocation10 + $0x17e8] sm:$0xff]  ;;  %v9727_v37 = vcombine.low %v1045_v19, %v1061_v20 }
 0x4f4   :  { %v10210_v23 = vcombine.high %v1526_v33, %v1542_v45  ;;  %v10209_v27 = vcombine.low %v1526_v33, %v1542_v45  ;;  %v1446_v19 = vld [vmem:[#allocation10 + $0x14e8] sm:$0xff]  ;;  %v8976_v33 = vrot.slane %v8418_v10, 1 }
 0x4f5   :  { %8094 = vmatpush2.bf16.msra.mxu1 %v9887_v38  ;;  %v998_v38 = vld [vmem:[#allocation10 + $0x6e8] sm:$0xff] }
 0x4f6   :  { %8135 = vmatpush2.bf16.msra.mxu0 %v10399_v2  ;;  %8095 = vmatprep.subr.bf16.mxu1 %v9856_v39  ;;  %v1884_v2 = vrot.slane %v11124_v60, %v10903_v50  ;;  %v9697_v39 = vcombine.low %v1014_v9, %v1030_v32  ;;  %v9666_v43 = vcombine.high %v982_v53, %v998_v38 }
 0x4f7   :  { %8136 = vmatprep.subr.bf16.mxu0 %v10368_v40  ;;  %v1494_v40 = vld [vmem:[#allocation10 + $0x1668] sm:$0xff] }
 0x4f9   :  { %8096 = vmatpush2.bf16.msra.mxu1 %v9855_v44  ;;  %v950_v44 = vld [vmem:[#allocation10 + $0x568] sm:$0xff] }
 0x4fa   :  { %8137 = vmatpush2.bf16.msra.mxu0 %v10367_v47  ;;  %8097 = vmatprep.subr.bf16.mxu1 %v9824_v57  ;;  %v966_v47 = vld [vmem:[#allocation10 + $0x5e8] sm:$0xff] }
 0x4fb   :  { %8138 = vmatprep.subr.bf16.mxu0 %v10336_v58  ;;  %v10178_v58 = vcombine.high %v1494_v40, %v1510_v42  ;;  %v9634_v51 = vcombine.high %v950_v44, %v966_v47 }
 0x4fd   :  { %8098 = vmatpush2.bf16.msra.mxu1 %v9823_v56 }
 0x4fe   :  { %8139 = vmatpush2.bf16.msra.mxu0 %v10335_v7  ;;  %8099 = vmatprep.subr.bf16.mxu1 %v9792_v8  ;;  %v9665_v7 = vcombine.low %v982_v53, %v998_v38  ;;  %v902_v53 = vld [vmem:[#allocation10 + $0x3e8] sm:$0xff] }
 0x4ff   :  { %8140 = vmatprep.subr.bf16.mxu0 %v10304_v28  ;;  %v10177_v28 = vcombine.low %v1494_v40, %v1510_v42  ;;  %v1398_v38 = vld [vmem:[#allocation10 + $0x1368] sm:$0xff] }
 0x501   :  { %8100 = vmatpush2.bf16.msra.mxu1 %v9791_v12 }
 0x502   :  { %8141 = vmatpush2.bf16.msra.mxu0 %v10303_v17  ;;  %8101 = vmatprep.subr.bf16.mxu1 %v9760_v18  ;;  %v10146_v17 = vcombine.high %v1462_v59, %v1478_v63  ;;  %v934_v18 = vld [vmem:[#allocation10 + $0x4e8] sm:$0xff] }
 0x503   :  { %8142 = vmatprep.subr.bf16.mxu0 %v10272_v3  ;;  %v1430_v3 = vld [vmem:[#allocation10 + $0x1468] sm:$0xff]  ;;  %v9602_v9 = vcombine.high %v918_v62, %v934_v18 }
 0x504   :  { %v10114_v32 = vcombine.high %v1430_v3, %v1446_v19 }
 0x505   :  { %8102 = vmatpush2.bf16.msra.mxu1 %v9759_v36 }
 0x506   :  { %8143 = vmatpush2.bf16.msra.mxu0 %v10271_v24  ;;  %8103 = vmatprep.subr.bf16.mxu1 %v9728_v25  ;;  %v9633_v25 = vcombine.low %v950_v44, %v966_v47 }
 0x507   :  { %8144 = vmatprep.subr.bf16.mxu0 %v10240_v26  ;;  %v10145_v26 = vcombine.low %v1462_v59, %v1478_v63  ;;  %v1366_v59 = vld [vmem:[#allocation10 + $0x1268] sm:$0xff] }
 0x508   :  { %v1382_v63 = vld [vmem:[#allocation10 + $0x12e8] sm:$0xff] }
 0x509   :  { %8104 = vmatpush2.bf16.msra.mxu1 %v9727_v37 }
 0x50a   :  { %8145 = vmatpush2.bf16.msra.mxu0 %v10239_v21  ;;  %8155 = vmatprep.subr.bf16.mxu1 %v9698_v22 }
 0x50b   :  { %8196 = vmatprep.subr.bf16.mxu0 %v10210_v23  ;;  %v886_v23 = vld [vmem:[#allocation10 + $0x368] sm:$0xff] }
 0x50c   :  { %v7861_v57 = vpop.f32.mrf.mxu1  ;;  %8106 = vmatmul.mubr.bf16.vlgmr.msra.gmra.mxu1 %v10916_v15 }
 0x50d   :  { %v7862_v49 = vadd.f32 %v7861_v57, %v1884_v2  ;;  %v7902_v56 = vpop.f32.mrf.mxu0  ;;  %8147 = vmatmul.mubr.bf16.vlgmr.msra.gmra.mxu0 %v10918_v16  ;;  %8156 = vmatpush1.bf16.msra.mxu1 %v9697_v39  ;;  %v1414_v2 = vld [vmem:[#allocation10 + $0x13e8] sm:$0xff] }
 0x50e   :  { %8187 = vmatprep.mubr.bf16.mxu1 %v10912_v13  ;;  %8197 = vmatpush1.bf16.msra.mxu0 %v10209_v27  ;;  %v7863_v8 = vpop.f32.mrf.mxu1  ;;  %v9601_v27 = vcombine.low %v918_v62, %v934_v18  ;;  %v10082_v47 = vcombine.high %v1398_v38, %v1414_v2  ;;  %v854_v57 = vld [vmem:[#allocation10 + $0x268] sm:$0xff] }
 0x50f   :  { %v7903_v61 = vadd.f32 %v7902_v56, %v7862_v49  ;;  %8228 = vmatprep.mubr.bf16.mxu0 %v10914_v14  ;;  %v7864_v12 = vadd.f32 %v7863_v8, %v1888_v30  ;;  %v7904_v1 = vpop.f32.mrf.mxu0  ;;  %8157 = vmatprep.subr.bf16.mxu1 %v9666_v43  ;;  %v10113_v30 = vcombine.low %v1430_v3, %v1446_v19  ;;  %v822_v8 = vld [vmem:[#allocation10 + $0x168] sm:$0xff] }
 0x510   :  { %v7865_v20 = vpop.f32.mrf.mxu1  ;;  %8198 = vmatprep.subr.bf16.mxu0 %v10178_v58  ;;  %v9570_v43 = vcombine.high %v886_v23, %v902_v53  ;;  %v870_v58 = vld [vmem:[#allocation10 + $0x2e8] sm:$0xff]  ;;  %v10081_v49 = vcombine.low %v1398_v38, %v1414_v2 }
 0x511   :  { %v8419_v4 = vmax.f32 %v7903_v61, 0.0  ;;  %v7905_v36 = vadd.f32 %v7904_v1, %v7864_v12  ;;  %v7906_v24 = vpop.f32.mrf.mxu0  ;;  %8158 = vmatpush1.bf16.msra.mxu1 %v9665_v7  ;;  %v9538_v56 = vcombine.high %v854_v57, %v870_v58  ;;  %v10050_v7 = vcombine.high %v1366_v59, %v1382_v63  ;;  %v1350_v62 = vld [vmem:[#allocation10 + $0x11e8] sm:$0xff] }
 0x512   :  { %8199 = vmatpush1.bf16.msra.mxu0 %v10177_v28  ;;  %v7866_v41 = vpop.f32.mrf.mxu1  ;;  %8159 = vmatprep.subr.bf16.mxu1 %v9634_v51  ;;  %v838_v28 = vld [vmem:[#allocation10 + $0x1e8] sm:$0xff]  ;;  %v10049_v61 = vcombine.low %v1366_v59, %v1382_v63 }
 0x513   :  { %v8487_v45 = vrot.slane %v8419_v4, 7  ;;  %v11149_v37 = vsel %vm8527_vm0, %v8975_v6, %v8419_v4  ;;  %v8420_v21 = vmax.f32 %v7905_v36, 0.0  ;;  %v7907_v22 = vpop.f32.mrf.mxu0  ;;  %8200 = vmatprep.subr.bf16.mxu0 %v10146_v17  ;;  %v1334_v51 = vld [vmem:[#allocation10 + $0x1168] sm:$0xff]  ;;  %v9506_v12 = vcombine.high %v822_v8, %v838_v28 }
 0x514   :  { %v10018_v1 = vcombine.high %v1334_v51, %v1350_v62  ;;  %v790_v17 = vld [vmem:[#allocation10 + $0x68] sm:$0xff]  ;;  %v9505_v20 = vcombine.low %v822_v8, %v838_v28  ;;  %v10017_v6 = vcombine.low %v1334_v51, %v1350_v62 }
 0x515   :  { %v11152_v39 = vsel %vm8527_vm0, %v8417_v0, %v8487_v45  ;;  %v8488_v40 = vrot.slane %v8420_v21, 7  ;;  %v11155_v42 = vsel %vm8527_vm0, %v8976_v33, %v8420_v21  ;;  %8160 = vmatpush1.bf16.msra.mxu1 %v9633_v25  ;;  %v9569_v0 = vcombine.low %v886_v23, %v902_v53  ;;  %v806_v18 = vld [vmem:[#allocation10 + $0xe8] sm:$0xff] }
 0x516   :  { %8201 = vmatpush1.bf16.msra.mxu0 %v10145_v26  ;;  %8161 = vmatprep.subr.bf16.mxu1 %v9602_v9  ;;  %v1302_v3 = vld [vmem:[#allocation10 + $0x1068] sm:$0xff]  ;;  %v9474_v4 = vcombine.high %v790_v17, %v806_v18  ;;  %v9473_v9 = vcombine.low %v790_v17, %v806_v18 }
 0x517   :  { %v11158_v44 = vsel %vm8527_vm0, %v8418_v10, %v8488_v40  ;;  %8202 = vmatprep.subr.bf16.mxu0 %v10114_v32  ;;  %v9537_v10 = vcombine.low %v854_v57, %v870_v58  ;;  %v1318_v19 = vld [vmem:[#allocation10 + $0x10e8] sm:$0xff] }
 0x518   :  { %v9986_v36 = vcombine.high %v1302_v3, %v1318_v19  ;;  %v1270_v24 = vld [vmem:[#allocation10 + $0xf68] sm:$0xff]  ;;  %v9985_v32 = vcombine.low %v1302_v3, %v1318_v19 }
 0x519   :  { %8162 = vmatpush1.bf16.msra.mxu1 %v9601_v27  ;;  %v1286_v25 = vld [vmem:[#allocation10 + $0xfe8] sm:$0xff] }
 0x51a   :  { %8203 = vmatpush1.bf16.msra.mxu0 %v10113_v30  ;;  %8163 = vmatprep.subr.bf16.mxu1 %v9570_v43  ;;  %v1782_v41 = vld [vmem:[#allocation10 + $0x1f68] sm:$0xff]  ;;  %v9954_v33 = vcombine.high %v1270_v24, %v1286_v25  ;;  %v9953_v38 = vcombine.low %v1270_v24, %v1286_v25 }
 0x51b   :  { %8204 = vmatprep.subr.bf16.mxu0 %v10082_v47  ;;  %v1798_v26 = vld [vmem:[#allocation10 + $0x1fe8] sm:$0xff] }
 0x51c   :  { %v10466_v45 = vcombine.high %v1782_v41, %v1798_v26  ;;  %v1238_v21 = vld [vmem:[#allocation10 + $0xe68] sm:$0xff]  ;;  %v10465_v2 = vcombine.low %v1782_v41, %v1798_v26 }
 0x51d   :  { %8164 = vmatpush1.bf16.msra.mxu1 %v9569_v0  ;;  %v1254_v22 = vld [vmem:[#allocation10 + $0xee8] sm:$0xff] }
 0x51e   :  { %8205 = vmatpush1.bf16.msra.mxu0 %v10081_v49  ;;  %8165 = vmatprep.subr.bf16.mxu1 %v9538_v56  ;;  %v1750_v23 = vld [vmem:[#allocation10 + $0x1e68] sm:$0xff]  ;;  %v9922_v40 = vcombine.high %v1238_v21, %v1254_v22  ;;  %v9921_v58 = vcombine.low %v1238_v21, %v1254_v22 }
 0x51f   :  { %8206 = vmatprep.subr.bf16.mxu0 %v10050_v7  ;;  %v1766_v53 = vld [vmem:[#allocation10 + $0x1ee8] sm:$0xff] }
 0x520   :  { %v10434_v27 = vcombine.high %v1750_v23, %v1766_v53  ;;  %v1206_v30 = vld [vmem:[#allocation10 + $0xd68] sm:$0xff]  ;;  %v10433_v59 = vcombine.low %v1750_v23, %v1766_v53 }
 0x521   :  { %8166 = vmatpush1.bf16.msra.mxu1 %v9537_v10  ;;  %v1222_v43 = vld [vmem:[#allocation10 + $0xde8] sm:$0xff] }
 0x522   :  { %8207 = vmatpush1.bf16.msra.mxu0 %v10049_v61  ;;  %8167 = vmatprep.subr.bf16.mxu1 %v9506_v12  ;;  %v1718_v47 = vld [vmem:[#allocation10 + $0x1d68] sm:$0xff]  ;;  %v9890_v63 = vcombine.high %v1206_v30, %v1222_v43  ;;  %v9889_v28 = vcombine.low %v1206_v30, %v1222_v43 }
 0x523   :  { %8208 = vmatprep.subr.bf16.mxu0 %v10018_v1  ;;  %v1734_v57 = vld [vmem:[#allocation10 + $0x1de8] sm:$0xff] }
 0x524   :  { %v10402_v0 = vcombine.high %v1718_v47, %v1734_v57  ;;  %v1174_v49 = vld [vmem:[#allocation10 + $0xc68] sm:$0xff]  ;;  %v10401_v51 = vcombine.low %v1718_v47, %v1734_v57 }
 0x525   :  { %8168 = vmatpush1.bf16.msra.mxu1 %v9505_v20  ;;  %v1190_v56 = vld [vmem:[#allocation10 + $0xce8] sm:$0xff] }
 0x526   :  { %8209 = vmatpush1.bf16.msra.mxu0 %v10017_v6  ;;  %8169 = vmatprep.subr.bf16.mxu1 %v9474_v4  ;;  %v1686_v7 = vld [vmem:[#allocation10 + $0x1c68] sm:$0xff]  ;;  %v9858_v62 = vcombine.high %v1174_v49, %v1190_v56  ;;  %v9857_v18 = vcombine.low %v1174_v49, %v1190_v56  ;;  %v1543_v49 = vld [vmem:[#allocation10 + $0x17f0] sm:$0xff] }
 0x527   :  { %8210 = vmatprep.subr.bf16.mxu0 %v9986_v36  ;;  %v1702_v8 = vld [vmem:[#allocation10 + $0x1ce8] sm:$0xff] }
 0x528   :  { %v10370_v10 = vcombine.high %v1686_v7, %v1702_v8  ;;  %v1142_v61 = vld [vmem:[#allocation10 + $0xb68] sm:$0xff]  ;;  %v10369_v3 = vcombine.low %v1686_v7, %v1702_v8 }
 0x529   :  { %8170 = vmatpush1.bf16.msra.mxu1 %v9473_v9  ;;  %v1158_v12 = vld [vmem:[#allocation10 + $0xbe8] sm:$0xff] }
 0x52a   :  { %8211 = vmatpush1.bf16.msra.mxu0 %v9985_v32  ;;  %8171 = vmatprep.subr.bf16.mxu1 %v9954_v33  ;;  %v1654_v1 = vld [vmem:[#allocation10 + $0x1b68] sm:$0xff]  ;;  %v9826_v19 = vcombine.high %v1142_v61, %v1158_v12  ;;  %v9825_v25 = vcombine.low %v1142_v61, %v1158_v12  ;;  %v1495_v12 = vld [vmem:[#allocation10 + $0x1670] sm:$0xff] }
 0x52b   :  { %8212 = vmatprep.subr.bf16.mxu0 %v10466_v45  ;;  %v1670_v17 = vld [vmem:[#allocation10 + $0x1be8] sm:$0xff] }
 0x52c   :  { %v10338_v20 = vcombine.high %v1654_v1, %v1670_v17  ;;  %v1110_v6 = vld [vmem:[#allocation10 + $0xa68] sm:$0xff]  ;;  %v10337_v41 = vcombine.low %v1654_v1, %v1670_v17  ;;  %v1511_v1 = vld [vmem:[#allocation10 + $0x16f0] sm:$0xff] }
 0x52d   :  { %8172 = vmatpush2.bf16.msra.mxu1 %v9953_v38  ;;  %v1126_v4 = vld [vmem:[#allocation10 + $0xae8] sm:$0xff] }
 0x52e   :  { %8213 = vmatpush2.bf16.msra.mxu0 %v10465_v2  ;;  %8173 = vmatprep.subr.bf16.mxu1 %v9922_v40  ;;  %v1622_v36 = vld [vmem:[#allocation10 + $0x1a68] sm:$0xff]  ;;  %v9794_v26 = vcombine.high %v1110_v6, %v1126_v4  ;;  %v9793_v22 = vcombine.low %v1110_v6, %v1126_v4  ;;  %v10180_v4 = vcombine.high %v1495_v12, %v1511_v1 }
 0x52f   :  { %8214 = vmatprep.subr.bf16.mxu0 %v10434_v27  ;;  %v1638_v24 = vld [vmem:[#allocation10 + $0x1ae8] sm:$0xff] }
 0x530   :  { %v10306_v9 = vcombine.high %v1622_v36, %v1638_v24  ;;  %v1078_v32 = vld [vmem:[#allocation10 + $0x968] sm:$0xff]  ;;  %v10305_v23 = vcombine.low %v1622_v36, %v1638_v24  ;;  %v1463_v36 = vld [vmem:[#allocation10 + $0x1570] sm:$0xff] }
 0x531   :  { %8174 = vmatpush2.bf16.msra.mxu1 %v9921_v58  ;;  %v1094_v33 = vld [vmem:[#allocation10 + $0x9e8] sm:$0xff]  ;;  %v1479_v24 = vld [vmem:[#allocation10 + $0x15f0] sm:$0xff] }
 0x532   :  { %8215 = vmatpush2.bf16.msra.mxu0 %v10433_v59  ;;  %8175 = vmatprep.subr.bf16.mxu1 %v9890_v63  ;;  %v1590_v45 = vld [vmem:[#allocation10 + $0x1968] sm:$0xff]  ;;  %v9762_v53 = vcombine.high %v1078_v32, %v1094_v33  ;;  %v9761_v43 = vcombine.low %v1078_v32, %v1094_v33  ;;  %v1015_v59 = vld [vmem:[#allocation10 + $0x770] sm:$0xff] }
 0x533   :  { %8216 = vmatprep.subr.bf16.mxu0 %v10402_v0  ;;  %v1606_v21 = vld [vmem:[#allocation10 + $0x19e8] sm:$0xff]  ;;  %v1031_v63 = vld [vmem:[#allocation10 + $0x7f0] sm:$0xff] }
 0x534   :  { %v10274_v38 = vcombine.high %v1590_v45, %v1606_v21  ;;  %v1046_v2 = vld [vmem:[#allocation10 + $0x868] sm:$0xff]  ;;  %v10273_v47 = vcombine.low %v1590_v45, %v1606_v21  ;;  %v1527_v0 = vld [vmem:[#allocation10 + $0x1770] sm:$0xff]  ;;  %v9700_v8 = vcombine.high %v1015_v59, %v1031_v63  ;;  %v9699_v61 = vcombine.low %v1015_v59, %v1031_v63 }
 0x535   :  { %8176 = vmatpush2.bf16.msra.mxu1 %v9889_v28  ;;  %v1062_v40 = vld [vmem:[#allocation10 + $0x8e8] sm:$0xff]  ;;  %v10212_v28 = vcombine.high %v1527_v0, %v1543_v49  ;;  %v10211_v17 = vcombine.low %v1527_v0, %v1543_v49 }
 0x536   :  { %8217 = vmatpush2.bf16.msra.mxu0 %v10401_v51  ;;  %8177 = vmatprep.subr.bf16.mxu1 %v9858_v62  ;;  %v1558_v27 = vld [vmem:[#allocation10 + $0x1868] sm:$0xff]  ;;  %v9730_v57 = vcombine.high %v1046_v2, %v1062_v40  ;;  %v9729_v56 = vcombine.low %v1046_v2, %v1062_v40  ;;  %v983_v51 = vld [vmem:[#allocation10 + $0x670] sm:$0xff] }
 0x537   :  { %8218 = vmatprep.subr.bf16.mxu0 %v10370_v10  ;;  %v1574_v30 = vld [vmem:[#allocation10 + $0x18e8] sm:$0xff]  ;;  %v999_v62 = vld [vmem:[#allocation10 + $0x6f0] sm:$0xff]  ;;  %v1892_v10 = vrot.slane %v11124_v60, %v10971_v46 }
 0x538   :  { %v10242_v58 = vcombine.high %v1558_v27, %v1574_v30  ;;  %v10241_v7 = vcombine.low %v1558_v27, %v1574_v30  ;;  %v1431_v2 = vld [vmem:[#allocation10 + $0x1470] sm:$0xff] }
 0x539   :  { %8178 = vmatpush2.bf16.msra.mxu1 %v9857_v18  ;;  %v1896_v18 = vrot.slane %v11124_v60, %v10974_v54  ;;  %v10179_v60 = vcombine.low %v1495_v12, %v1511_v1  ;;  %v1447_v40 = vld [vmem:[#allocation10 + $0x14f0] sm:$0xff] }
 0x53a   :  { %8219 = vmatpush2.bf16.msra.mxu0 %v10369_v3  ;;  %8179 = vmatprep.subr.bf16.mxu1 %v9826_v19  ;;  %v9668_v3 = vcombine.high %v983_v51, %v999_v62  ;;  %v951_v19 = vld [vmem:[#allocation10 + $0x570] sm:$0xff] }
 0x53b   :  { %8220 = vmatprep.subr.bf16.mxu0 %v10338_v20  ;;  %v967_v20 = vld [vmem:[#allocation10 + $0x5f0] sm:$0xff] }
 0x53c   :  { %v9636_v32 = vcombine.high %v951_v19, %v967_v20 }
 0x53d   :  { %8180 = vmatpush2.bf16.msra.mxu1 %v9825_v25 }
 0x53e   :  { %8221 = vmatpush2.bf16.msra.mxu0 %v10337_v41  ;;  %8181 = vmatprep.subr.bf16.mxu1 %v9794_v26  ;;  %v9667_v26 = vcombine.low %v983_v51, %v999_v62  ;;  %v1399_v62 = vld [vmem:[#allocation10 + $0x1370] sm:$0xff] }
 0x53f   :  { %8222 = vmatprep.subr.bf16.mxu0 %v10306_v9 }
 0x541   :  { %8182 = vmatpush2.bf16.msra.mxu1 %v9793_v22  ;;  %v10148_v22 = vcombine.high %v1463_v36, %v1479_v24 }
 0x542   :  { %8223 = vmatpush2.bf16.msra.mxu0 %v10305_v23  ;;  %8183 = vmatprep.subr.bf16.mxu1 %v9762_v53  ;;  %v919_v23 = vld [vmem:[#allocation10 + $0x470] sm:$0xff] }
 0x543   :  { %8224 = vmatprep.subr.bf16.mxu0 %v10274_v38  ;;  %v935_v53 = vld [vmem:[#allocation10 + $0x4f0] sm:$0xff] }
 0x544   :  { %v9604_v59 = vcombine.high %v919_v23, %v935_v53  ;;  %v9603_v51 = vcombine.low %v919_v23, %v935_v53  ;;  %v807_v23 = vld [vmem:[#allocation10 + $0xf0] sm:$0xff] }
 0x545   :  { %8184 = vmatpush2.bf16.msra.mxu1 %v9761_v43  ;;  %v1303_v53 = vld [vmem:[#allocation10 + $0x1070] sm:$0xff] }
 0x546   :  { %8225 = vmatpush2.bf16.msra.mxu0 %v10273_v47  ;;  %8185 = vmatprep.subr.bf16.mxu1 %v9730_v57  ;;  %v9635_v47 = vcombine.low %v951_v19, %v967_v20 }
 0x547   :  { %8226 = vmatprep.subr.bf16.mxu0 %v10242_v58  ;;  %v10147_v58 = vcombine.low %v1463_v36, %v1479_v24  ;;  %v1383_v36 = vld [vmem:[#allocation10 + $0x12f0] sm:$0xff] }
 0x549   :  { %8186 = vmatpush2.bf16.msra.mxu1 %v9729_v56 }
 0x54a   :  { %8227 = vmatpush2.bf16.msra.mxu0 %v10241_v7  ;;  %8237 = vmatprep.subr.bf16.mxu1 %v9700_v8  ;;  %v10116_v7 = vcombine.high %v1431_v2, %v1447_v40  ;;  %v887_v8 = vld [vmem:[#allocation10 + $0x370] sm:$0xff] }
 0x54b   :  { %8278 = vmatprep.subr.bf16.mxu0 %v10212_v28  ;;  %v903_v28 = vld [vmem:[#allocation10 + $0x3f0] sm:$0xff] }
 0x54c   :  { %v7943_v6 = vpop.f32.mrf.mxu1  ;;  %8188 = vmatmul.mubr.bf16.vlgmr.msra.gmra.mxu1 %v10916_v15  ;;  %v9571_v24 = vcombine.low %v887_v8, %v903_v28 }
 0x54d   :  { %v7944_v25 = vadd.f32 %v7943_v6, %v1892_v10  ;;  %v7984_v41 = vpop.f32.mrf.mxu0  ;;  %8229 = vmatmul.mubr.bf16.vlgmr.msra.gmra.mxu0 %v10918_v16  ;;  %8238 = vmatpush1.bf16.msra.mxu1 %v9699_v61  ;;  %v1415_v10 = vld [vmem:[#allocation10 + $0x13f0] sm:$0xff] }
 0x54e   :  { %8269 = vmatprep.mubr.bf16.mxu1 %v10912_v13  ;;  %8279 = vmatpush1.bf16.msra.mxu0 %v10211_v17  ;;  %v7945_v9 = vpop.f32.mrf.mxu1  ;;  %v855_v6 = vld [vmem:[#allocation10 + $0x270] sm:$0xff] }
 0x54f   :  { %v7985_v33 = vadd.f32 %v7984_v41, %v7944_v25  ;;  %8310 = vmatprep.mubr.bf16.mxu0 %v10914_v14  ;;  %v7946_v45 = vadd.f32 %v7945_v9, %v1896_v18  ;;  %v7986_v21 = vpop.f32.mrf.mxu0  ;;  %8239 = vmatprep.subr.bf16.mxu1 %v9668_v3  ;;  %v10115_v18 = vcombine.low %v1431_v2, %v1447_v40  ;;  %v839_v9 = vld [vmem:[#allocation10 + $0x1f0] sm:$0xff] }
 0x550   :  { %v7947_v38 = vpop.f32.mrf.mxu1  ;;  %8280 = vmatprep.subr.bf16.mxu0 %v10180_v4  ;;  %v9572_v3 = vcombine.high %v887_v8, %v903_v28  ;;  %v1367_v4 = vld [vmem:[#allocation10 + $0x1270] sm:$0xff]  ;;  %v10083_v25 = vcombine.low %v1399_v62, %v1415_v10 }
 0x551   :  { %v8421_v27 = vmax.f32 %v7985_v33, 0.0  ;;  %v7987_v30 = vadd.f32 %v7986_v21, %v7946_v45  ;;  %v7988_v43 = vpop.f32.mrf.mxu0  ;;  %8240 = vmatpush1.bf16.msra.mxu1 %v9667_v26  ;;  %v10052_v26 = vcombine.high %v1367_v4, %v1383_v36  ;;  %v10051_v33 = vcombine.low %v1367_v4, %v1383_v36  ;;  %v1319_v38 = vld [vmem:[#allocation10 + $0x10f0] sm:$0xff] }
 0x552   :  { %8281 = vmatpush1.bf16.msra.mxu0 %v10179_v60  ;;  %v7948_v57 = vpop.f32.mrf.mxu1  ;;  %8241 = vmatprep.subr.bf16.mxu1 %v9636_v32  ;;  %v1335_v60 = vld [vmem:[#allocation10 + $0x1170] sm:$0xff] }
 0x553   :  { %v8493_v63 = vrot.slane %v8421_v27, 6  ;;  %v8979_v0 = vrot.slane %v8421_v27, 7  ;;  %v8422_v49 = vmax.f32 %v7987_v30, 0.0  ;;  %v7989_v56 = vpop.f32.mrf.mxu0  ;;  %8282 = vmatprep.subr.bf16.mxu0 %v10148_v22  ;;  %v1351_v32 = vld [vmem:[#allocation10 + $0x11f0] sm:$0xff]  ;;  %v9988_v30 = vcombine.high %v1303_v53, %v1319_v38 }
 0x554   :  { %v10020_v21 = vcombine.high %v1335_v60, %v1351_v32  ;;  %v791_v22 = vld [vmem:[#allocation10 + $0x70] sm:$0xff]  ;;  %v10019_v40 = vcombine.low %v1335_v60, %v1351_v32 }
 0x555   :  { %v11170_v61 = vsel %vm8530_vm1, %v11152_v39, %v8493_v63  ;;  %v11174_v12 = vsel %vm8530_vm1, %v11149_v37, %v8979_v0  ;;  %v8494_v1 = vrot.slane %v8422_v49, 6  ;;  %v8980_v17 = vrot.slane %v8422_v49, 7  ;;  %8242 = vmatpush1.bf16.msra.mxu1 %v9635_v47  ;;  %v871_v37 = vld [vmem:[#allocation10 + $0x2f0] sm:$0xff] }
 0x556   :  { %8283 = vmatpush1.bf16.msra.mxu0 %v10147_v58  ;;  %8243 = vmatprep.subr.bf16.mxu1 %v9604_v59  ;;  %v10084_v39 = vcombine.high %v1399_v62, %v1415_v10  ;;  %v9540_v41 = vcombine.high %v855_v6, %v871_v37  ;;  %v9476_v27 = vcombine.high %v791_v22, %v807_v23  ;;  %v1271_v43 = vld [vmem:[#allocation10 + $0xf70] sm:$0xff] }
 0x557   :  { %v11178_v19 = vsel %vm8530_vm1, %v11158_v44, %v8494_v1  ;;  %v11182_v20 = vsel %vm8530_vm1, %v11155_v42, %v8980_v17  ;;  %8284 = vmatprep.subr.bf16.mxu0 %v10116_v7  ;;  %v823_v44 = vld [vmem:[#allocation10 + $0x170] sm:$0xff]  ;;  %v9539_v42 = vcombine.low %v855_v6, %v871_v37  ;;  %v9475_v59 = vcombine.low %v791_v22, %v807_v23 }
 0x558   :  { %v9508_v45 = vcombine.high %v823_v44, %v839_v9  ;;  %v9507_v2 = vcombine.low %v823_v44, %v839_v9  ;;  %v1287_v47 = vld [vmem:[#allocation10 + $0xff0] sm:$0xff]  ;;  %v9987_v63 = vcombine.low %v1303_v53, %v1319_v38 }
 0x559   :  { %8244 = vmatpush1.bf16.msra.mxu1 %v9603_v51  ;;  %v1783_v57 = vld [vmem:[#allocation10 + $0x1f70] sm:$0xff]  ;;  %v9956_v0 = vcombine.high %v1271_v43, %v1287_v47  ;;  %v9955_v51 = vcombine.low %v1271_v43, %v1287_v47 }
 0x55a   :  { %8285 = vmatpush1.bf16.msra.mxu0 %v10115_v18  ;;  %8245 = vmatprep.subr.bf16.mxu1 %v9572_v3  ;;  %v1799_v58 = vld [vmem:[#allocation10 + $0x1ff0] sm:$0xff] }
 0x55b   :  { %8286 = vmatprep.subr.bf16.mxu0 %v10084_v39  ;;  %v10468_v49 = vcombine.high %v1783_v57, %v1799_v58  ;;  %v1239_v56 = vld [vmem:[#allocation10 + $0xe70] sm:$0xff]  ;;  %v10467_v62 = vcombine.low %v1783_v57, %v1799_v58 }
 0x55c   :  { %v1255_v7 = vld [vmem:[#allocation10 + $0xef0] sm:$0xff] }
 0x55d   :  { %8246 = vmatpush1.bf16.msra.mxu1 %v9571_v24  ;;  %v1751_v8 = vld [vmem:[#allocation10 + $0x1e70] sm:$0xff]  ;;  %v9924_v10 = vcombine.high %v1239_v56, %v1255_v7  ;;  %v9923_v6 = vcombine.low %v1239_v56, %v1255_v7 }
 0x55e   :  { %8287 = vmatpush1.bf16.msra.mxu0 %v10083_v25  ;;  %8247 = vmatprep.subr.bf16.mxu1 %v9540_v41  ;;  %v1767_v28 = vld [vmem:[#allocation10 + $0x1ef0] sm:$0xff] }
 0x55f   :  { %8288 = vmatprep.subr.bf16.mxu0 %v10052_v26  ;;  %v10436_v1 = vcombine.high %v1751_v8, %v1767_v28  ;;  %v1207_v17 = vld [vmem:[#allocation10 + $0xd70] sm:$0xff]  ;;  %v10435_v37 = vcombine.low %v1751_v8, %v1767_v28 }
 0x560   :  { %v1223_v18 = vld [vmem:[#allocation10 + $0xdf0] sm:$0xff] }
 0x561   :  { %8248 = vmatpush1.bf16.msra.mxu1 %v9539_v42  ;;  %v1719_v3 = vld [vmem:[#allocation10 + $0x1d70] sm:$0xff]  ;;  %v9892_v4 = vcombine.high %v1207_v17, %v1223_v18  ;;  %v9891_v44 = vcombine.low %v1207_v17, %v1223_v18 }
 0x562   :  { %8289 = vmatpush1.bf16.msra.mxu0 %v10051_v33  ;;  %8249 = vmatprep.subr.bf16.mxu1 %v9508_v45  ;;  %v1735_v39 = vld [vmem:[#allocation10 + $0x1df0] sm:$0xff] }
 0x563   :  { %8290 = vmatprep.subr.bf16.mxu0 %v10020_v21  ;;  %v10404_v36 = vcombine.high %v1719_v3, %v1735_v39  ;;  %v1175_v24 = vld [vmem:[#allocation10 + $0xc70] sm:$0xff]  ;;  %v10403_v9 = vcombine.low %v1719_v3, %v1735_v39 }
 0x564   :  { %v1191_v25 = vld [vmem:[#allocation10 + $0xcf0] sm:$0xff] }
 0x565   :  { %8250 = vmatpush1.bf16.msra.mxu1 %v9507_v2  ;;  %v1687_v41 = vld [vmem:[#allocation10 + $0x1c70] sm:$0xff]  ;;  %v9860_v60 = vcombine.high %v1175_v24, %v1191_v25  ;;  %v9859_v22 = vcombine.low %v1175_v24, %v1191_v25 }
 0x566   :  { %8291 = vmatpush1.bf16.msra.mxu0 %v10019_v40  ;;  %8251 = vmatprep.subr.bf16.mxu1 %v9476_v27  ;;  %v1703_v26 = vld [vmem:[#allocation10 + $0x1cf0] sm:$0xff] }
 0x567   :  { %8292 = vmatprep.subr.bf16.mxu0 %v9988_v30  ;;  %v10372_v32 = vcombine.high %v1687_v41, %v1703_v26  ;;  %v1143_v42 = vld [vmem:[#allocation10 + $0xb70] sm:$0xff]  ;;  %v10371_v23 = vcombine.low %v1687_v41, %v1703_v26 }
 0x568   :  { %v1159_v33 = vld [vmem:[#allocation10 + $0xbf0] sm:$0xff] }
 0x569   :  { %8252 = vmatpush1.bf16.msra.mxu1 %v9475_v59  ;;  %v1655_v45 = vld [vmem:[#allocation10 + $0x1b70] sm:$0xff]  ;;  %v9828_v53 = vcombine.high %v1143_v42, %v1159_v33  ;;  %v9827_v43 = vcombine.low %v1143_v42, %v1159_v33  ;;  %v1496_v33 = vld [vmem:[#allocation10 + $0x1678] sm:$0xff] }
 0x56a   :  { %8293 = vmatpush1.bf16.msra.mxu0 %v9987_v63  ;;  %8253 = vmatprep.subr.bf16.mxu1 %v9956_v0  ;;  %v1671_v21 = vld [vmem:[#allocation10 + $0x1bf0] sm:$0xff] }
 0x56b   :  { %8294 = vmatprep.subr.bf16.mxu0 %v10468_v49  ;;  %v10340_v38 = vcombine.high %v1655_v45, %v1671_v21  ;;  %v1111_v2 = vld [vmem:[#allocation10 + $0xa70] sm:$0xff]  ;;  %v10339_v47 = vcombine.low %v1655_v45, %v1671_v21  ;;  %v1512_v45 = vld [vmem:[#allocation10 + $0x16f8] sm:$0xff] }
 0x56c   :  { %v1127_v40 = vld [vmem:[#allocation10 + $0xaf0] sm:$0xff] }
 0x56d   :  { %8254 = vmatpush2.bf16.msra.mxu1 %v9955_v51  ;;  %v1623_v27 = vld [vmem:[#allocation10 + $0x1a70] sm:$0xff]  ;;  %v9796_v57 = vcombine.high %v1111_v2, %v1127_v40  ;;  %v9795_v56 = vcombine.low %v1111_v2, %v1127_v40  ;;  %v10182_v40 = vcombine.high %v1496_v33, %v1512_v45 }
 0x56e   :  { %8295 = vmatpush2.bf16.msra.mxu0 %v10467_v62  ;;  %8255 = vmatprep.subr.bf16.mxu1 %v9924_v10  ;;  %v1639_v30 = vld [vmem:[#allocation10 + $0x1af0] sm:$0xff] }
 0x56f   :  { %8296 = vmatprep.subr.bf16.mxu0 %v10436_v1  ;;  %v10308_v58 = vcombine.high %v1623_v27, %v1639_v30  ;;  %v1079_v59 = vld [vmem:[#allocation10 + $0x970] sm:$0xff]  ;;  %v10307_v7 = vcombine.low %v1623_v27, %v1639_v30  ;;  %v1464_v27 = vld [vmem:[#allocation10 + $0x1578] sm:$0xff] }
 0x570   :  { %v1095_v63 = vld [vmem:[#allocation10 + $0x9f0] sm:$0xff]  ;;  %v1480_v30 = vld [vmem:[#allocation10 + $0x15f8] sm:$0xff] }
 0x571   :  { %8256 = vmatpush2.bf16.msra.mxu1 %v9923_v6  ;;  %v1591_v0 = vld [vmem:[#allocation10 + $0x1970] sm:$0xff]  ;;  %v9764_v8 = vcombine.high %v1079_v59, %v1095_v63  ;;  %v9763_v17 = vcombine.low %v1079_v59, %v1095_v63  ;;  %v1016_v6 = vld [vmem:[#allocation10 + $0x778] sm:$0xff]  ;;  %v10181_v59 = vcombine.low %v1496_v33, %v1512_v45 }
 0x572   :  { %8297 = vmatpush2.bf16.msra.mxu0 %v10435_v37  ;;  %8257 = vmatprep.subr.bf16.mxu1 %v9892_v4  ;;  %v1607_v49 = vld [vmem:[#allocation10 + $0x19f0] sm:$0xff]  ;;  %v1032_v37 = vld [vmem:[#allocation10 + $0x7f8] sm:$0xff] }
 0x573   :  { %8298 = vmatprep.subr.bf16.mxu0 %v10404_v36  ;;  %v10276_v28 = vcombine.high %v1591_v0, %v1607_v49  ;;  %v1047_v51 = vld [vmem:[#allocation10 + $0x870] sm:$0xff]  ;;  %v10275_v18 = vcombine.low %v1591_v0, %v1607_v49  ;;  %v1528_v4 = vld [vmem:[#allocation10 + $0x1778] sm:$0xff]  ;;  %v9702_v41 = vcombine.high %v1016_v6, %v1032_v37  ;;  %v9701_v42 = vcombine.low %v1016_v6, %v1032_v37 }
 0x574   :  { %v1063_v62 = vld [vmem:[#allocation10 + $0x8f0] sm:$0xff]  ;;  %v1544_v36 = vld [vmem:[#allocation10 + $0x17f8] sm:$0xff] }
 0x575   :  { %8258 = vmatpush2.bf16.msra.mxu1 %v9891_v44  ;;  %v1559_v10 = vld [vmem:[#allocation10 + $0x1870] sm:$0xff]  ;;  %v9732_v3 = vcombine.high %v1047_v51, %v1063_v62  ;;  %v9731_v24 = vcombine.low %v1047_v51, %v1063_v62  ;;  %v10214_v26 = vcombine.high %v1528_v4, %v1544_v36  ;;  %v984_v44 = vld [vmem:[#allocation10 + $0x678] sm:$0xff]  ;;  %v10213_v21 = vcombine.low %v1528_v4, %v1544_v36 }
 0x576   :  { %8299 = vmatpush2.bf16.msra.mxu0 %v10403_v9  ;;  %8259 = vmatprep.subr.bf16.mxu1 %v9860_v60  ;;  %v1575_v1 = vld [vmem:[#allocation10 + $0x18f0] sm:$0xff]  ;;  %v1000_v9 = vld [vmem:[#allocation10 + $0x6f8] sm:$0xff] }
 0x577   :  { %8300 = vmatprep.subr.bf16.mxu0 %v10372_v32  ;;  %v10244_v39 = vcombine.high %v1559_v10, %v1575_v1  ;;  %v10243_v25 = vcombine.low %v1559_v10, %v1575_v1  ;;  %v10642_v60 = vld [vmem:[#allocation12 + $0x10] sm:$0xff]  ;;  %v1432_v62 = vld [vmem:[#allocation10 + $0x1478] sm:$0xff] }
 0x578   :  { %v1900_v32 = vrot.slane %v10642_v60, %v11001_v55  ;;  %v1448_v10 = vld [vmem:[#allocation10 + $0x14f8] sm:$0xff] }
 0x579   :  { %8260 = vmatpush2.bf16.msra.mxu1 %v9859_v22  ;;  %v1904_v22 = vrot.slane %v10642_v60, %v11004_v48  ;;  %v10117_v45 = vcombine.low %v1432_v62, %v1448_v10 }
 0x57a   :  { %8301 = vmatpush2.bf16.msra.mxu0 %v10371_v23  ;;  %8261 = vmatprep.subr.bf16.mxu1 %v9828_v53  ;;  %v9670_v23 = vcombine.high %v984_v44, %v1000_v9  ;;  %v952_v53 = vld [vmem:[#allocation10 + $0x578] sm:$0xff] }
 0x57b   :  { %8302 = vmatprep.subr.bf16.mxu0 %v10340_v38  ;;  %v968_v38 = vld [vmem:[#allocation10 + $0x5f8] sm:$0xff] }
 0x57c   :  { %v9638_v63 = vcombine.high %v952_v53, %v968_v38 }
 0x57d   :  { %8262 = vmatpush2.bf16.msra.mxu1 %v9827_v43 }
 0x57e   :  { %8303 = vmatpush2.bf16.msra.mxu0 %v10339_v47  ;;  %8263 = vmatprep.subr.bf16.mxu1 %v9796_v57  ;;  %v9669_v57 = vcombine.low %v984_v44, %v1000_v9  ;;  %v1400_v44 = vld [vmem:[#allocation10 + $0x1378] sm:$0xff] }
 0x57f   :  { %8304 = vmatprep.subr.bf16.mxu0 %v10308_v58  ;;  %v1416_v9 = vld [vmem:[#allocation10 + $0x13f8] sm:$0xff] }
 0x581   :  { %8264 = vmatpush2.bf16.msra.mxu1 %v9795_v56 }
 0x582   :  { %8305 = vmatpush2.bf16.msra.mxu0 %v10307_v7  ;;  %8265 = vmatprep.subr.bf16.mxu1 %v9764_v8  ;;  %v10150_v7 = vcombine.high %v1464_v27, %v1480_v30  ;;  %v920_v8 = vld [vmem:[#allocation10 + $0x478] sm:$0xff] }
 0x583   :  { %8306 = vmatprep.subr.bf16.mxu0 %v10276_v28  ;;  %v936_v28 = vld [vmem:[#allocation10 + $0x4f8] sm:$0xff] }
 0x585   :  { %8266 = vmatpush2.bf16.msra.mxu1 %v9763_v17 }
 0x586   :  { %8307 = vmatpush2.bf16.msra.mxu0 %v10275_v18  ;;  %8267 = vmatprep.subr.bf16.mxu1 %v9732_v3  ;;  %v9637_v18 = vcombine.low %v952_v53, %v968_v38  ;;  %v856_v53 = vld [vmem:[#allocation10 + $0x278] sm:$0xff] }
 0x587   :  { %8308 = vmatprep.subr.bf16.mxu0 %v10244_v39  ;;  %v10149_v39 = vcombine.low %v1464_v27, %v1480_v30  ;;  %v1368_v38 = vld [vmem:[#allocation10 + $0x1278] sm:$0xff]  ;;  %v10085_v27 = vcombine.low %v1400_v44, %v1416_v9 }
 0x589   :  { %8268 = vmatpush2.bf16.msra.mxu1 %v9731_v24  ;;  %v10118_v24 = vcombine.high %v1432_v62, %v1448_v10 }
 0x58a   :  { %8309 = vmatpush2.bf16.msra.mxu0 %v10243_v25  ;;  %8319 = vmatprep.subr.bf16.mxu1 %v9702_v41  ;;  %v888_v25 = vld [vmem:[#allocation10 + $0x378] sm:$0xff] }
 0x58b   :  { %8360 = vmatprep.subr.bf16.mxu0 %v10214_v26  ;;  %v904_v41 = vld [vmem:[#allocation10 + $0x3f8] sm:$0xff]  ;;  %v9605_v26 = vcombine.low %v920_v8, %v936_v28 }
 0x58c   :  { %v8025_v2 = vpop.f32.mrf.mxu1  ;;  %8270 = vmatmul.mubr.bf16.vlgmr.msra.gmra.mxu1 %v10916_v15 }
 0x58d   :  { %v8026_v43 = vadd.f32 %v8025_v2, %v1900_v32  ;;  %v8066_v47 = vpop.f32.mrf.mxu0  ;;  %8311 = vmatmul.mubr.bf16.vlgmr.msra.gmra.mxu0 %v10918_v16  ;;  %8320 = vmatpush1.bf16.msra.mxu1 %v9701_v42  ;;  %v1384_v2 = vld [vmem:[#allocation10 + $0x12f8] sm:$0xff] }
 0x58e   :  { %8351 = vmatprep.mubr.bf16.mxu1 %v10912_v13  ;;  %8361 = vmatpush1.bf16.msra.mxu0 %v10213_v21  ;;  %v8027_v58 = vpop.f32.mrf.mxu1  ;;  %v9574_v21 = vcombine.high %v888_v25, %v904_v41 }
 0x58f   :  { %v8067_v0 = vadd.f32 %v8066_v47, %v8026_v43  ;;  %8392 = vmatprep.mubr.bf16.mxu0 %v10914_v14  ;;  %v8028_v49 = vadd.f32 %v8027_v58, %v1904_v22  ;;  %v8068_v56 = vpop.f32.mrf.mxu0  ;;  %8321 = vmatprep.subr.bf16.mxu1 %v9670_v23  ;;  %v9606_v14 = vcombine.high %v920_v8, %v936_v28  ;;  %v840_v47 = vld [vmem:[#allocation10 + $0x1f8] sm:$0xff] }
 0x590   :  { %v8029_v51 = vpop.f32.mrf.mxu1  ;;  %8362 = vmatprep.subr.bf16.mxu0 %v10182_v40  ;;  %v9573_v40 = vcombine.low %v888_v25, %v904_v41  ;;  %v10054_v43 = vcombine.high %v1368_v38, %v1384_v2  ;;  %v1352_v58 = vld [vmem:[#allocation10 + $0x11f8] sm:$0xff] }
 0x591   :  { %v8423_v1 = vmax.f32 %v8067_v0, 0.0  ;;  %v8069_v17 = vadd.f32 %v8068_v56, %v8028_v49  ;;  %v8070_v13 = vpop.f32.mrf.mxu0  ;;  %8322 = vmatpush1.bf16.msra.mxu1 %v9669_v57  ;;  %v1336_v57 = vld [vmem:[#allocation10 + $0x1178] sm:$0xff] }
 0x592   :  { %8363 = vmatpush1.bf16.msra.mxu0 %v10181_v59  ;;  %v8030_v3 = vpop.f32.mrf.mxu1  ;;  %8323 = vmatprep.subr.bf16.mxu1 %v9638_v63  ;;  %v10053_v59 = vcombine.low %v1368_v38, %v1384_v2  ;;  %v10022_v0 = vcombine.high %v1336_v57, %v1352_v58  ;;  %v792_v49 = vld [vmem:[#allocation10 + $0x78] sm:$0xff]  ;;  %v10021_v51 = vcombine.low %v1336_v57, %v1352_v58 }
 0x593   :  { %v8499_v6 = vrot.slane %v8423_v1, 5  ;;  %v8983_v37 = vrot.slane %v8423_v1, 6  ;;  %v8424_v4 = vmax.f32 %v8069_v17, 0.0  ;;  %v8071_v36 = vpop.f32.mrf.mxu0  ;;  %8364 = vmatprep.subr.bf16.mxu0 %v10150_v7  ;;  %v808_v56 = vld [vmem:[#allocation10 + $0xf8] sm:$0xff] }
 0x594   :  { %v1304_v7 = vld [vmem:[#allocation10 + $0x1078] sm:$0xff]  ;;  %v9478_v62 = vcombine.high %v792_v49, %v808_v56  ;;  %v9477_v3 = vcombine.low %v792_v49, %v808_v56 }
 0x595   :  { %v11192_v60 = vsel %vm8533_vm2, %v11170_v61, %v8499_v6  ;;  %v11196_v32 = vsel %vm8533_vm2, %v11174_v12, %v8983_v37  ;;  %v8500_v42 = vrot.slane %v8424_v4, 5  ;;  %v8984_v33 = vrot.slane %v8424_v4, 6  ;;  %8324 = vmatpush1.bf16.msra.mxu1 %v9637_v18  ;;  %v872_v12 = vld [vmem:[#allocation10 + $0x2f8] sm:$0xff] }
 0x596   :  { %8365 = vmatpush1.bf16.msra.mxu0 %v10149_v39  ;;  %8325 = vmatprep.subr.bf16.mxu1 %v9606_v14  ;;  %v10086_v61 = vcombine.high %v1400_v44, %v1416_v9  ;;  %v9542_v30 = vcombine.high %v856_v53, %v872_v12  ;;  %v1320_v8 = vld [vmem:[#allocation10 + $0x10f8] sm:$0xff] }
 0x597   :  { %v11200_v22 = vsel %vm8533_vm2, %v11178_v19, %v8500_v42  ;;  %v11204_v23 = vsel %vm8533_vm2, %v11182_v20, %v8984_v33  ;;  %8366 = vmatprep.subr.bf16.mxu0 %v10118_v24  ;;  %v824_v19 = vld [vmem:[#allocation10 + $0x178] sm:$0xff]  ;;  %v9541_v20 = vcombine.low %v856_v53, %v872_v12  ;;  %v9990_v10 = vcombine.high %v1304_v7, %v1320_v8 }
 0x598   :  { %v9510_v63 = vcombine.high %v824_v19, %v840_v47  ;;  %v9509_v28 = vcombine.low %v824_v19, %v840_v47  ;;  %v1272_v1 = vld [vmem:[#allocation10 + $0xf78] sm:$0xff]  ;;  %v9989_v39 = vcombine.low %v1304_v7, %v1320_v8 }
 0x599   :  { %8326 = vmatpush1.bf16.msra.mxu1 %v9605_v26  ;;  %v1288_v17 = vld [vmem:[#allocation10 + $0xff8] sm:$0xff] }
 0x59a   :  { %8367 = vmatpush1.bf16.msra.mxu0 %v10117_v45  ;;  %8327 = vmatprep.subr.bf16.mxu1 %v9574_v21  ;;  %v1784_v13 = vld [vmem:[#allocation10 + $0x1f78] sm:$0xff]  ;;  %v9958_v14 = vcombine.high %v1272_v1, %v1288_v17  ;;  %v9957_v25 = vcombine.low %v1272_v1, %v1288_v17 }
 0x59b   :  { %8368 = vmatprep.subr.bf16.mxu0 %v10086_v61  ;;  %v1800_v18 = vld [vmem:[#allocation10 + $0x1ff8] sm:$0xff] }
 0x59c   :  { %v10470_v6 = vcombine.high %v1784_v13, %v1800_v18  ;;  %v1240_v37 = vld [vmem:[#allocation10 + $0xe78] sm:$0xff]  ;;  %v10469_v41 = vcombine.low %v1784_v13, %v1800_v18 }
 0x59d   :  { %8328 = vmatpush1.bf16.msra.mxu1 %v9573_v40  ;;  %v1256_v4 = vld [vmem:[#allocation10 + $0xef8] sm:$0xff] }
 0x59e   :  { %8369 = vmatpush1.bf16.msra.mxu0 %v10085_v27  ;;  %8329 = vmatprep.subr.bf16.mxu1 %v9542_v30  ;;  %v1752_v36 = vld [vmem:[#allocation10 + $0x1e78] sm:$0xff]  ;;  %v9926_v26 = vcombine.high %v1240_v37, %v1256_v4  ;;  %v9925_v21 = vcombine.low %v1240_v37, %v1256_v4 }
 0x59f   :  { %8370 = vmatprep.subr.bf16.mxu0 %v10054_v43  ;;  %v1768_v24 = vld [vmem:[#allocation10 + $0x1ef8] sm:$0xff] }
 0x5a0   :  { %v10438_v44 = vcombine.high %v1752_v36, %v1768_v24  ;;  %v1208_v9 = vld [vmem:[#allocation10 + $0xd78] sm:$0xff]  ;;  %v10437_v61 = vcombine.low %v1752_v36, %v1768_v24 }
 0x5a1   :  { %8330 = vmatpush1.bf16.msra.mxu1 %v9541_v20  ;;  %v1224_v42 = vld [vmem:[#allocation10 + $0xdf8] sm:$0xff] }
 0x5a2   :  { %8371 = vmatpush1.bf16.msra.mxu0 %v10053_v59  ;;  %8331 = vmatprep.subr.bf16.mxu1 %v9510_v63  ;;  %v1720_v33 = vld [vmem:[#allocation10 + $0x1d78] sm:$0xff]  ;;  %v9894_v53 = vcombine.high %v1208_v9, %v1224_v42  ;;  %v9893_v30 = vcombine.low %v1208_v9, %v1224_v42 }
 0x5a3   :  { %8372 = vmatprep.subr.bf16.mxu0 %v10022_v0  ;;  %v1736_v45 = vld [vmem:[#allocation10 + $0x1df8] sm:$0xff] }
 0x5a4   :  { %v10406_v12 = vcombine.high %v1720_v33, %v1736_v45  ;;  %v1176_v38 = vld [vmem:[#allocation10 + $0xc78] sm:$0xff]  ;;  %v10405_v43 = vcombine.low %v1720_v33, %v1736_v45 }
 0x5a5   :  { %8332 = vmatpush1.bf16.msra.mxu1 %v9509_v28  ;;  %v1192_v2 = vld [vmem:[#allocation10 + $0xcf8] sm:$0xff] }
 0x5a6   :  { %8373 = vmatpush1.bf16.msra.mxu0 %v10021_v51  ;;  %8333 = vmatprep.subr.bf16.mxu1 %v9478_v62  ;;  %v1688_v40 = vld [vmem:[#allocation10 + $0x1c78] sm:$0xff]  ;;  %v9862_v19 = vcombine.high %v1176_v38, %v1192_v2  ;;  %v9861_v63 = vcombine.low %v1176_v38, %v1192_v2 }
 0x5a7   :  { %8374 = vmatprep.subr.bf16.mxu0 %v9990_v10  ;;  %v1704_v27 = vld [vmem:[#allocation10 + $0x1cf8] sm:$0xff] }
 0x5a8   :  { %v10374_v47 = vcombine.high %v1688_v40, %v1704_v27  ;;  %v1144_v57 = vld [vmem:[#allocation10 + $0xb78] sm:$0xff]  ;;  %v10373_v0 = vcombine.low %v1688_v40, %v1704_v27 }
 0x5a9   :  { %8334 = vmatpush1.bf16.msra.mxu1 %v9477_v3  ;;  %v1160_v58 = vld [vmem:[#allocation10 + $0xbf8] sm:$0xff] }
 0x5aa   :  { %8375 = vmatpush1.bf16.msra.mxu0 %v9989_v39  ;;  %8335 = vmatprep.subr.bf16.mxu1 %v9958_v14  ;;  %v1656_v20 = vld [vmem:[#allocation10 + $0x1b78] sm:$0xff]  ;;  %v9830_v49 = vcombine.high %v1144_v57, %v1160_v58  ;;  %v9829_v62 = vcombine.low %v1144_v57, %v1160_v58 }
 0x5ab   :  { %8376 = vmatprep.subr.bf16.mxu0 %v10470_v6  ;;  %v1672_v59 = vld [vmem:[#allocation10 + $0x1bf8] sm:$0xff] }
 0x5ac   :  { %v10342_v56 = vcombine.high %v1656_v20, %v1672_v59  ;;  %v1112_v7 = vld [vmem:[#allocation10 + $0xa78] sm:$0xff]  ;;  %v10341_v10 = vcombine.low %v1656_v20, %v1672_v59 }
 0x5ad   :  { %8336 = vmatpush2.bf16.msra.mxu1 %v9957_v25  ;;  %v1128_v8 = vld [vmem:[#allocation10 + $0xaf8] sm:$0xff] }
 0x5ae   :  { %8377 = vmatpush2.bf16.msra.mxu0 %v10469_v41  ;;  %8337 = vmatprep.subr.bf16.mxu1 %v9926_v26  ;;  %v1624_v28 = vld [vmem:[#allocation10 + $0x1a78] sm:$0xff]  ;;  %v9798_v1 = vcombine.high %v1112_v7, %v1128_v8  ;;  %v9797_v14 = vcombine.low %v1112_v7, %v1128_v8 }
 0x5af   :  { %8378 = vmatprep.subr.bf16.mxu0 %v10438_v44  ;;  %v1640_v51 = vld [vmem:[#allocation10 + $0x1af8] sm:$0xff] }
 0x5b0   :  { %v10310_v17 = vcombine.high %v1624_v28, %v1640_v51  ;;  %v1080_v13 = vld [vmem:[#allocation10 + $0x978] sm:$0xff]  ;;  %v10309_v6 = vcombine.low %v1624_v28, %v1640_v51 }
 0x5b1   :  { %8338 = vmatpush2.bf16.msra.mxu1 %v9925_v21  ;;  %v1096_v18 = vld [vmem:[#allocation10 + $0x9f8] sm:$0xff] }
 0x5b2   :  { %8379 = vmatpush2.bf16.msra.mxu0 %v10437_v61  ;;  %8339 = vmatprep.subr.bf16.mxu1 %v9894_v53  ;;  %v1592_v3 = vld [vmem:[#allocation10 + $0x1978] sm:$0xff]  ;;  %v9766_v37 = vcombine.high %v1080_v13, %v1096_v18  ;;  %v9765_v26 = vcombine.low %v1080_v13, %v1096_v18 }
 0x5b3   :  { %8380 = vmatprep.subr.bf16.mxu0 %v10406_v12  ;;  %v1608_v39 = vld [vmem:[#allocation10 + $0x19f8] sm:$0xff] }
 0x5b4   :  { %v10278_v4 = vcombine.high %v1592_v3, %v1608_v39  ;;  %v1048_v36 = vld [vmem:[#allocation10 + $0x878] sm:$0xff]  ;;  %v10277_v44 = vcombine.low %v1592_v3, %v1608_v39 }
 0x5b5   :  { %8340 = vmatpush2.bf16.msra.mxu1 %v9893_v30  ;;  %v1064_v24 = vld [vmem:[#allocation10 + $0x8f8] sm:$0xff] }
 0x5b6   :  { %8381 = vmatpush2.bf16.msra.mxu0 %v10405_v43  ;;  %8341 = vmatprep.subr.bf16.mxu1 %v9862_v19  ;;  %v1560_v25 = vld [vmem:[#allocation10 + $0x1878] sm:$0xff]  ;;  %v9734_v9 = vcombine.high %v1048_v36, %v1064_v24  ;;  %v9733_v33 = vcombine.low %v1048_v36, %v1064_v24 }
 0x5b7   :  { %8382 = vmatprep.subr.bf16.mxu0 %v10374_v47  ;;  %v1576_v41 = vld [vmem:[#allocation10 + $0x18f8] sm:$0xff] }
 0x5b8   :  { %v10246_v42 = vcombine.high %v1560_v25, %v1576_v41  ;;  %v10245_v45 = vcombine.low %v1560_v25, %v1576_v41  ;;  %v11206_v21 = vld [vmem:[#allocation12 + $0x18] sm:$0xff]  ;;  %v10804_v41 = vmov 0.0  }
 0x5b9   :  { %8342 = vmatpush2.bf16.msra.mxu1 %v9861_v63  ;;  %v1908_v61 = vrot.slane %v11206_v21, %v10895_v29  ;;  %v1912_v53 = vrot.slane %v11206_v21, %v10898_v31  ;;  %v1916_v8 = vrot.slane %v11206_v21, %v10903_v50  ;;  %v1920_v28 = vrot.slane %v11206_v21, %v10906_v52 }
 0x5ba   :  { %8383 = vmatpush2.bf16.msra.mxu0 %v10373_v0  ;;  %8343 = vmatprep.subr.bf16.mxu1 %v9830_v49 }
 0x5bb   :  { %8384 = vmatprep.subr.bf16.mxu0 %v10342_v56 }
 0x5bd   :  { %8344 = vmatpush2.bf16.msra.mxu1 %v9829_v62 }
 0x5be   :  { %8385 = vmatpush2.bf16.msra.mxu0 %v10341_v10  ;;  %8345 = vmatprep.subr.bf16.mxu1 %v9798_v1 }
 0x5bf   :  { %8386 = vmatprep.subr.bf16.mxu0 %v10310_v17 }
 0x5c1   :  { %8346 = vmatpush2.bf16.msra.mxu1 %v9797_v14 }
 0x5c2   :  { %8387 = vmatpush2.bf16.msra.mxu0 %v10309_v6  ;;  %8347 = vmatprep.subr.bf16.mxu1 %v9766_v37 }
 0x5c3   :  { %8388 = vmatprep.subr.bf16.mxu0 %v10278_v4 }
 0x5c5   :  { %8348 = vmatpush2.bf16.msra.mxu1 %v9765_v26  ;;  %v1924_v26 = vrot.slane %v11206_v21, %v10971_v46 }
 0x5c6   :  { %8389 = vmatpush2.bf16.msra.mxu0 %v10277_v44  ;;  %8349 = vmatprep.subr.bf16.mxu1 %v9734_v9  ;;  %v1928_v44 = vrot.slane %v11206_v21, %v10974_v54 }
 0x5c7   :  { %8390 = vmatprep.subr.bf16.mxu0 %v10246_v42 }
 0x5c9   :  { %8350 = vmatpush2.bf16.msra.mxu1 %v9733_v33 }
 0x5ca   :  { %8391 = vmatpush2.bf16.msra.mxu0 %v10245_v45 }
 0x5cc   :  { %v8107_v12 = vpop.f32.mrf.mxu1  ;;  %8352 = vmatmul.mubr.bf16.vlgmr.msra.gmra.mxu1 %v10916_v15 }
 0x5cd   :  { %v8108_v38 = vadd.f32 %v8107_v12, %v1908_v61  ;;  %v8148_v2 = vpop.f32.mrf.mxu0  ;;  %8393 = vmatmul.mubr.bf16.vlgmr.msra.gmra.mxu0 %v10918_v16  ;;  %8639 = vmatprep.mubr.f32.mxu1 %v10804_v41 }
 0x5ce   :  { %v8109_v40 = vpop.f32.mrf.mxu1  ;;  %9095 = vmatprep.mubr.f32.mxu0 %v10804_v41 }
 0x5cf   :  { %v8149_v27 = vadd.f32 %v8148_v2, %v8108_v38  ;;  %v8110_v30 = vadd.f32 %v8109_v40, %v1912_v53  ;;  %v8150_v43 = vpop.f32.mrf.mxu0 }
 0x5d0   :  { %v8111_v19 = vpop.f32.mrf.mxu1 }
 0x5d1   :  { %v8425_v47 = vmax.f32 %v8149_v27, 0.0  ;;  %v8151_v57 = vadd.f32 %v8150_v43, %v8110_v30  ;;  %v8152_v58 = vpop.f32.mrf.mxu0 }
 0x5d2   :  { %v8112_v29 = vpop.f32.mrf.mxu1 }
 0x5d3   :  { %v8505_v20 = vrot.slane %v8425_v47, 4  ;;  %v8987_v59 = vrot.slane %v8425_v47, 5  ;;  %v8426_v63 = vmax.f32 %v8151_v57, 0.0  ;;  %v8153_v31 = vpop.f32.mrf.mxu0 }
 0x5d4   :  { %v1936_v31 = vrot.slane %v11206_v21, %v11004_v48 }
 0x5d5   :  { %v8554_v15 = vsel %vm8536_vm3, %v11192_v60, %v8505_v20  ;;  %v9023_v0 = vsel %vm8536_vm3, %v11196_v32, %v8987_v59  ;;  %v8506_v16 = vrot.slane %v8426_v63, 4  ;;  %v8988_v49 = vrot.slane %v8426_v63, 5 }
 0x5d6   :  { %v1932_v63 = vrot.slane %v11206_v21, %v11001_v55 }
 0x5d7   :  { %v8555_v56 = vsel %vm8536_vm3, %v11200_v22, %v8506_v16  ;;  %v9024_v7 = vsel %vm8536_vm3, %v11204_v23, %v8988_v49  ;;  %vm8905_vm3 = vcmask 1045508  }
 0x5d8   :  { %vm11404_vm2 = vmor %vm8530_vm1, %vm8905_vm3 }
 0x60c   :  { %v8189_v51 = vpop.f32.mrf.mxu1 }
 0x60d   :  { %v8190_v62 = vadd.f32 %v8189_v51, %v1916_v8  ;;  %v8230_v60 = vpop.f32.mrf.mxu0 }
 0x60e   :  { %v8191_v10 = vpop.f32.mrf.mxu1 }
 0x60f   :  { %v8231_v1 = vadd.f32 %v8230_v60, %v8190_v62  ;;  %v8192_v32 = vadd.f32 %v8191_v10, %v1920_v28  ;;  %v8232_v17 = vpop.f32.mrf.mxu0 }
 0x610   :  { %v8193_v13 = vpop.f32.mrf.mxu1 }
 0x611   :  { %v8427_v18 = vmax.f32 %v8231_v1, 0.0  ;;  %v8233_v3 = vadd.f32 %v8232_v17, %v8192_v32  ;;  %v8234_v22 = vpop.f32.mrf.mxu0 }
 0x612   :  { %v8194_v39 = vpop.f32.mrf.mxu1 }
 0x613   :  { %v8511_v14 = vrot.slane %v8427_v18, 3  ;;  %v8991_v23 = vrot.slane %v8427_v18, 4  ;;  %v8428_v6 = vmax.f32 %v8233_v3, 0.0  ;;  %v8235_v37 = vpop.f32.mrf.mxu0  ;;  %v8433_v39 = vld [vmem:[%s11501_s7] sm:$0xff] }
 0x615   :  { %v8556_v50 = vsel %vm8539_vm4, %v8554_v15, %v8511_v14  ;;  %v9025_v52 = vsel %vm8539_vm4, %v9023_v0, %v8991_v23  ;;  %v8512_v4 = vrot.slane %v8428_v6, 3  ;;  %v8992_v36 = vrot.slane %v8428_v6, 4  ;;  %v8434_v14 = vld [vmem:[%s11501_s7 + $0x8] sm:$0xff] }
 0x617   :  { %v8557_v24 = vsel %vm8539_vm4, %v8555_v56, %v8512_v4  ;;  %v9026_v25 = vsel %vm8539_vm4, %v9024_v7, %v8992_v36  ;;  %v8437_v36 = vld [vmem:[%s11502_s8] sm:$0xff]  ;;  %vm11398_vm4 = vmor %vm8527_vm0, %vm8882_vm14 }
 0x64c   :  { %v8271_v9 = vpop.f32.mrf.mxu1 }
 0x64d   :  { %v8272_v42 = vadd.f32 %v8271_v9, %v1924_v26  ;;  %v8312_v33 = vpop.f32.mrf.mxu0 }
 0x64e   :  { %v8273_v45 = vpop.f32.mrf.mxu1 }
 0x64f   :  { %v8313_v61 = vadd.f32 %v8312_v33, %v8272_v42  ;;  %v8274_v53 = vadd.f32 %v8273_v45, %v1928_v44  ;;  %v8314_v12 = vpop.f32.mrf.mxu0  ;;  %v8442_v45 = vld [vmem:[%s11504_s10] sm:$0x7] }
 0x650   :  { %v8275_v38 = vpop.f32.mrf.mxu1 }
 0x651   :  { %v8429_v2 = vmax.f32 %v8313_v61, 0.0  ;;  %v8315_v40 = vadd.f32 %v8314_v12, %v8274_v53  ;;  %v8316_v27 = vpop.f32.mrf.mxu0 }
 0x652   :  { %v8276_v30 = vpop.f32.mrf.mxu1 }
 0x653   :  { %v8517_v43 = vrot.slane %v8429_v2, 2  ;;  %v8995_v19 = vrot.slane %v8429_v2, 3  ;;  %v8430_v47 = vmax.f32 %v8315_v40, 0.0  ;;  %v8317_v57 = vpop.f32.mrf.mxu0 }
 0x655   :  { %v8518_v46 = vrot.slane %v8430_v47, 2  ;;  %v8996_v58 = vrot.slane %v8430_v47, 3  ;;  %v8558_v54 = vsel %vm8542_vm5, %v8556_v50, %v8517_v43  ;;  %v9027_v29 = vsel %vm8542_vm5, %v9025_v52, %v8995_v19 }
 0x657   :  { %v8559_v20 = vsel %vm8542_vm5, %v8557_v24, %v8518_v46  ;;  %v9028_v59 = vsel %vm8542_vm5, %v9026_v25, %v8996_v58 }
 0x68c   :  { %v8353_v15 = vpop.f32.mrf.mxu1 }
 0x68d   :  { %v8354_v0 = vadd.f32 %v8353_v15, %v1932_v63  ;;  %v8394_v16 = vpop.f32.mrf.mxu0 }
 0x68e   :  { %v8355_v49 = vpop.f32.mrf.mxu1 }
 0x68f   :  { %v8395_v56 = vadd.f32 %v8394_v16, %v8354_v0  ;;  %v8356_v7 = vadd.f32 %v8355_v49, %v1936_v31  ;;  %v8396_v8 = vpop.f32.mrf.mxu0 }
 0x690   :  { %v8357_v28 = vpop.f32.mrf.mxu1 }
 0x691   :  { %v8431_v51 = vmax.f32 %v8395_v56, 0.0  ;;  %v8397_v62 = vadd.f32 %v8396_v8, %v8356_v7  ;;  %v8398_v60 = vpop.f32.mrf.mxu0  ;;  %v8438_v8 = vld [vmem:[%s11503_s9] sm:$0xff] }
 0x692   :  { %v8358_v10 = vpop.f32.mrf.mxu1 }
 0x693   :  { %v8432_v1 = vmax.f32 %v8397_v62, 0.0  ;;  %v8399_v32 = vpop.f32.mrf.mxu0  ;;  %v8523_v17 = vrot.slane %v8431_v51, 1  ;;  %v8999_v13 = vrot.slane %v8431_v51, 2 }
 0x695   :  { %v8524_v55 = vrot.slane %v8432_v1, 1  ;;  %v9000_v18 = vrot.slane %v8432_v1, 2  ;;  %v8560_v3 = vsel %vm8545_vm6, %v8558_v54, %v8523_v17  ;;  %v9029_v22 = vsel %vm8545_vm6, %v9027_v29, %v8999_v13  ;;  %v8439_v13 = vld [vmem:[%s11503_s9 + $0x8] sm:$0xff] }
 0x697   :  { %v8561_v48 = vsel %vm8545_vm6, %v8559_v20, %v8524_v55  ;;  %v9030_v21 = vsel %vm8545_vm6, %v9028_v59, %v9000_v18 }
 0x698   :  { %8603 = vmatprep.subr.mxu1 %v8561_v48  ;;  %9059 = vmatprep.subr.mxu0 %v9030_v21 }
 0x699   :  { %8604 = vmatpush1.msra.mxu1 %v8560_v3  ;;  %9060 = vmatpush1.msra.mxu0 %v9029_v22 }
 0x69a   :  { %8605 = vmatprep.subr.mxu1 %v11118_v34  ;;  %9061 = vmatprep.subr.mxu0 %v11122_v35 }
 0x69b   :  { %8606 = vmatpush1.msra.mxu1 %v11110_v11  ;;  %9062 = vmatpush1.msra.mxu0 %v11114_v5  ;;  %v8435_v11 = vld [vmem:[%s11501_s7 + $0x10] sm:$0xff]  ;;  %v8436_v5 = vld [vmem:[%s11501_s7 + $0x18] sm:$0xff]  ;;  %s10806_s7 = smov 2  }
 0x69c   :  { %10471 = vmatmul.mubr.msk.f32.vlgmr.msra.gmra.mxu1 %vm8562_vm7, %v8433_v39  ;;  %10486 = vmatmul.mubr.msk.f32.vlgmr.msra.gmra.mxu0 %vm8562_vm7, %v8433_v39 }
 0x69d   :  { %8645 = vmatprep.mubr.f32.mxu1 %v10804_v41  ;;  %9101 = vmatprep.mubr.f32.mxu0 %v10804_v41 }
 0x6a0   :  { %10472 = vmatmul.mubr.msk.f32.gmra.mxu1 %vm8562_vm7, %v8434_v14  ;;  %10487 = vmatmul.mubr.msk.f32.gmra.mxu0 %vm8562_vm7, %v8434_v14 }
 0x6a1   :  { %8651 = vmatprep.mubr.f32.mxu1 %v10804_v41  ;;  %9107 = vmatprep.mubr.f32.mxu0 %v10804_v41 }
 0x6a4   :  { %10473 = vmatmul.mubr.msk.f32.gmra.mxu1 %vm8562_vm7, %v8435_v11  ;;  %10488 = vmatmul.mubr.msk.f32.gmra.mxu0 %vm8562_vm7, %v8435_v11  ;;  %v8440_v11 = vld [vmem:[%s11503_s9 + $0x10] sm:$0xff] }
 0x6a5   :  { %8657 = vmatprep.mubr.f32.mxu1 %v10804_v41  ;;  %9113 = vmatprep.mubr.f32.mxu0 %v10804_v41 }
 0x6a8   :  { %10474 = vmatmul.mubr.msk.f32.gmra.mxu1 %vm8562_vm7, %v8436_v5  ;;  %10489 = vmatmul.mubr.msk.f32.gmra.mxu0 %vm8562_vm7, %v8436_v5 }
 0x6a9   :  { %8789 = vmatprep.mubr.f32.mxu1 %v10804_v41 }
 0x75c   :  { %v8641_v34 = vpop.f32.mrf.mxu1  ;;  %v11279_v35 = vpop.f32.mrf.mxu0 }
 0x75e   :  { %v8643_v23 = vpop.f32.mrf.mxu1  ;;  %v11281_v6 = vpop.f32.mrf.mxu0 }
 0x760   :  { %v8647_v37 = vpop.f32.mrf.mxu1  ;;  %v9103_v52 = vpop.f32.mrf.mxu0 }
 0x761   :  { %8666 = vrot.lane.b32.xlu0 %v8647_v37, %s10805_s3 }
 0x762   :  { %v8649_v50 = vpop.f32.mrf.mxu1  ;;  %v9105_v24 = vpop.f32.mrf.mxu0 }
 0x764   :  { %v8653_v4 = vpop.f32.mrf.mxu1  ;;  %v9109_v26 = vpop.f32.mrf.mxu0 }
 0x765   :  { %8668 = vrot.lane.b32.xlu0 %v8649_v50, %s10805_s3  ;;  %8679 = vrot.lane.b32.xlu1 %v8653_v4, %s10806_s7 }
 0x766   :  { %v8655_v25 = vpop.f32.mrf.mxu1  ;;  %v9111_v9 = vpop.f32.mrf.mxu0 }
 0x768   :  { %v8659_v44 = vpop.f32.mrf.mxu1  ;;  %v9115_v33 = vpop.f32.mrf.mxu0 }
 0x769   :  { %8705 = vperm.xlu0 %10519, %v8437_v36   ;;  %8681 = vrot.lane.b32.xlu1 %v8655_v25, %s10806_s7 }
 0x76a   :  { %v8661_v42 = vpop.f32.mrf.mxu1  ;;  %v9117_v61 = vpop.f32.mrf.mxu0 }
 0x76d   :  { %9122 = vrot.lane.b32.xlu0 %v9103_v52, %s10805_s3  ;;  %8692 = vrot.lane.b32.xlu1 %v8659_v44, %s10807_s22 }
 0x771   :  { %9134 = vrot.lane.b32.xlu0 %v9109_v26, %s10806_s7  ;;  %8694 = vrot.lane.b32.xlu1 %v8661_v42, %s10807_s22 }
 0x775   :  { %9146 = vrot.lane.b32.xlu0 %v9115_v33, %s10807_s22  ;;  %9124 = vrot.lane.b32.xlu1 %v9105_v24, %s10805_s3 }
 0x779   :  { %8858 = vperm.xlu0 %10519, %v8442_v45   ;;  %9136 = vrot.lane.b32.xlu1 %v9111_v9, %s10806_s7 }
 0x77d   :  { %9148 = vrot.lane.b32.xlu1 %v9117_v61, %s10807_s22 }
 0x7d3   :  { %v8667_v53 = vpop.permute.xlu0 %8666 }
 0x7d4   :  { %v8674_v40 = vsel %vm8670_vm8, 0.0, %v8667_v53 }
 0x7d5   :  { %v8675_v19 = vadd.f32 %v8674_v40, %v8641_v34 }
 0x7d7   :  { %v8680_v12 = vpop.permute.xlu1 %8679  ;;  %v8669_v38 = vpop.permute.xlu0 %8668 }
 0x7d8   :  { %v8671_v27 = vsel %vm8670_vm8, %v8667_v53, %v8669_v38  ;;  %v8687_v30 = vsel %vm8683_vm9, 0.0, %v8680_v12 }
 0x7d9   :  { %v8676_v57 = vadd.f32 %v8671_v27, %v8643_v23  ;;  %v8688_v58 = vadd.f32 %v8687_v30, %v8675_v19 }
 0x7db   :  { %v8682_v2 = vpop.permute.xlu1 %8681 }
 0x7dc   :  { %v8684_v47 = vsel %vm8683_vm9, %v8680_v12, %v8682_v2 }
 0x7dd   :  { %v8689_v54 = vadd.f32 %v8684_v47, %v8676_v57 }
 0x7df   :  { %v8693_v43 = vpop.permute.xlu1 %8692 }
 0x7e0   :  { %v8700_v46 = vsel %vm8696_vm10, 0.0, %v8693_v43 }
 0x7e1   :  { %v8701_v20 = vadd.f32 %v8700_v46, %v8688_v58 }
 0x7e3   :  { %v8695_v29 = vpop.permute.xlu1 %8694 }
 0x7e4   :  { %v8697_v59 = vsel %vm8696_vm10, %v8693_v43, %v8695_v29  ;;  %v8706_v63 = vpop.permute.xlu0 %8705 }
 0x7e5   :  { %v8702_v31 = vadd.f32 %v8697_v59, %v8689_v54  ;;  %v8708_v15 = vadd.f32 %v8706_v63, %v8701_v20 }
 0x7e7   :  { %v9125_v0 = vpop.permute.xlu1 %9124  ;;  %v8709_v16 = vadd.f32 %v8706_v63, %v8702_v31  ;;  %v8710_v7 = vmax.f32 %v8708_v15, 0.0 }
 0x7e8   :  { %v9123_v49 = vpop.permute.xlu0 %9122 }
 0x7e9   :  { %v8711_v56 = vmax.f32 %v8709_v16, 0.0  ;;  %v9129_v28 = vsel %vm8670_vm8, 0.0, %v9123_v49  ;;  %v9126_v51 = vsel %vm8670_vm8, %v9123_v49, %v9125_v0 }
 0x7ea   :  { %v9130_v32 = vadd.f32 %v9129_v28, %v11279_v35  ;;  %v9131_v17 = vadd.f32 %v9126_v51, %v11281_v6  ;;  %v8441_v6 = vld [vmem:[%s11503_s9 + $0x18] sm:$0x3f] }
 0x7eb   :  { %8755 = vmatprep.subr.mxu1 %v8711_v56  ;;  %v9137_v62 = vpop.permute.xlu1 %9136 }
 0x7ec   :  { %v9135_v60 = vpop.permute.xlu0 %9134  ;;  %8756 = vmatpush1.msra.mxu1 %v8710_v7 }
 0x7ed   :  { %v9141_v10 = vsel %vm8683_vm9, 0.0, %v9135_v60  ;;  %v9138_v1 = vsel %vm8683_vm9, %v9135_v60, %v9137_v62  ;;  %10475 = vmatmul.mubr.msk.f32.vlgmr.msra.gmra.mxu1 %vm8712_vm11, %v8438_v8 }
 0x7ee   :  { %8795 = vmatprep.mubr.f32.mxu1 %v10804_v41  ;;  %v9142_v18 = vadd.f32 %v9141_v10, %v9130_v32  ;;  %v9143_v48 = vadd.f32 %v9138_v1, %v9131_v17 }
 0x7ef   :  { %v9149_v55 = vpop.permute.xlu1 %9148 }
 0x7f0   :  { %v9147_v21 = vpop.permute.xlu0 %9146 }
 0x7f1   :  { %v9153_v3 = vsel %vm8696_vm10, 0.0, %v9147_v21  ;;  %v9150_v22 = vsel %vm8696_vm10, %v9147_v21, %v9149_v55  ;;  %10476 = vmatmul.mubr.msk.f32.gmra.mxu1 %vm8712_vm11, %v8439_v13 }
 0x7f2   :  { %v9154_v39 = vadd.f32 %v9153_v3, %v9142_v18  ;;  %v9155_v14 = vadd.f32 %v9150_v22, %v9143_v48  ;;  %8801 = vmatprep.mubr.f32.mxu1 %v10804_v41 }
 0x7f4   :  { %v9156_v5 = vadd.f32 %v9154_v39, %v8706_v63  ;;  %v9157_v34 = vadd.f32 %v9155_v14, %v8706_v63  ;;  %v11359_v12 = vpop.permute.xlu0 %8858 }
 0x7f5   :  { %10477 = vmatmul.mubr.msk.f32.gmra.mxu1 %vm8712_vm11, %v8440_v11  ;;  %v11365_v19 = vrot.slane %v11359_v12, 2  ;;  %v11368_v58 = vrot.slane %v11359_v12, 5  ;;  %v11372_v29 = vrot.slane %v11359_v12, 7 }
 0x7f6   :  { %v9158_v35 = vmax.f32 %v9156_v5, 0.0  ;;  %8807 = vmatprep.mubr.f32.mxu1 %v10804_v41  ;;  %v9159_v23 = vmax.f32 %v9157_v34, 0.0 }
 0x7f8   :  { %9190 = vmatprep.subr.mxu1 %v9159_v23 }
 0x7f9   :  { %10478 = vmatmul.mubr.msk.f32.gmra.mxu1 %vm8712_vm11, %v8441_v6 }
 0x7fa   :  { %9191 = vmatpush1.msra.mxu1 %v9158_v35  ;;  %9224 = vmatprep.mubr.f32.mxu1 %v10804_v41 }
 0x7fd   :  { %10490 = vmatmul.mubr.msk.f32.vlgmr.msra.gmra.mxu1 %vm8712_vm11, %v8438_v8 }
 0x7fe   :  { %9230 = vmatprep.mubr.f32.mxu1 %v10804_v41 }
 0x801   :  { %10491 = vmatmul.mubr.msk.f32.gmra.mxu1 %vm8712_vm11, %v8439_v13 }
 0x802   :  { %9236 = vmatprep.mubr.f32.mxu1 %v10804_v41 }
 0x805   :  { %10492 = vmatmul.mubr.msk.f32.gmra.mxu1 %vm8712_vm11, %v8440_v11 }
 0x806   :  { %9242 = vmatprep.mubr.f32.mxu1 %v10804_v41 }
 0x809   :  { %10493 = vmatmul.mubr.msk.f32.gmra.mxu1 %vm8712_vm11, %v8441_v6 }
 0x8ad   :  { %v8791_v37 = vpop.f32.mrf.mxu1 }
 0x8af   :  { %v8793_v50 = vpop.f32.mrf.mxu1 }
 0x8b0   :  { %v8815_v49 = vsel %vm8814_vm12, %v8793_v50, 0.0 }
 0x8b1   :  { %v11334_v52 = vpop.f32.mrf.mxu1 }
 0x8b2   :  { %8823 = vrot.lane.b32.xlu1 %v11334_v52, %s10805_s3 }
 0x8b3   :  { %v8799_v4 = vpop.f32.mrf.mxu1 }
 0x8b4   :  { %8825 = vrot.lane.b32.xlu0 %v8799_v4, %s10805_s3  ;;  %v8816_v56 = vsel %vm8814_vm12, %v8799_v4, 0.0 }
 0x8b5   :  { %v8803_v36 = vpop.f32.mrf.mxu1 }
 0x8b6   :  { %8827 = vrot.lane.b32.xlu1 %v8803_v36, %s10805_s3 }
 0x8b7   :  { %v8805_v24 = vpop.f32.mrf.mxu1 }
 0x8b8   :  { %8829 = vrot.lane.b32.xlu0 %v8805_v24, %s10805_s3 }
 0x8b9   :  { %v8809_v25 = vpop.f32.mrf.mxu1 }
 0x8ba   :  { %8831 = vrot.lane.b32.xlu1 %v8809_v25, %s10805_s3 }
 0x8bb   :  { %v8811_v41 = vpop.f32.mrf.mxu1 }
 0x8bc   :  { %8833 = vrot.lane.b32.xlu0 %v8811_v41, %s10805_s3 }
 0x8bd   :  { %v11343_v26 = vpop.f32.mrf.mxu1 }
 0x8bf   :  { %v11345_v44 = vpop.f32.mrf.mxu1 }
 0x8c1   :  { %v11347_v9 = vpop.f32.mrf.mxu1 }
 0x8c3   :  { %v11349_v42 = vpop.f32.mrf.mxu1 }
 0x8c5   :  { %v9238_v33 = vpop.f32.mrf.mxu1 }
 0x8c6   :  { %9261 = vrot.lane.b32.xlu1 %v9238_v33, %s10805_s3 }
 0x8c7   :  { %v9240_v45 = vpop.f32.mrf.mxu1 }
 0x8c8   :  { %9263 = vrot.lane.b32.xlu0 %v9240_v45, %s10805_s3 }
 0x8c9   :  { %v9244_v61 = vpop.f32.mrf.mxu1 }
 0x8ca   :  { %9265 = vrot.lane.b32.xlu1 %v9244_v61, %s10805_s3 }
 0x8cb   :  { %v9246_v53 = vpop.f32.mrf.mxu1 }
 0x8cc   :  { %9267 = vrot.lane.b32.xlu0 %v9246_v53, %s10805_s3 }
 0x8ce   :  { %9257 = vrot.lane.b32.xlu1 %v11347_v9, %s10805_s3 }
 0x8d0   :  { %9259 = vrot.lane.b32.xlu0 %v11349_v42, %s10805_s3 }
 0x924   :  { %v8824_v38 = vpop.permute.xlu1 %8823 }
 0x925   :  { %v8841_v40 = vsel %vm8670_vm8, 0.0, %v8824_v38 }
 0x926   :  { %v8826_v2 = vpop.permute.xlu0 %8825  ;;  %v8846_v47 = vrot.slane %v8841_v40, 7 }
 0x927   :  { %v8835_v30 = vsel %vm8670_vm8, %v8824_v38, %v8826_v2 }
 0x928   :  { %v8828_v27 = vpop.permute.xlu1 %8827  ;;  %v8849_v20 = vrot.slane %v8835_v30, 7 }
 0x929   :  { %v8842_v43 = vsel %vm8670_vm8, 0.0, %v8828_v27 }
 0x92a   :  { %v8847_v57 = vrot.slane %v8842_v43, 7  ;;  %v8830_v46 = vpop.permute.xlu0 %8829 }
 0x92b   :  { %v8836_v54 = vsel %vm8670_vm8, %v8828_v27, %v8830_v46 }
 0x92c   :  { %v8848_v59 = vsel %vm8527_vm0, %v8846_v47, %v8847_v57  ;;  %v8872_v63 = vadd.f32 %v8847_v57, %v8791_v37  ;;  %v8850_v31 = vrot.slane %v8836_v54, 7  ;;  %v8832_v15 = vpop.permute.xlu1 %8831  ;;  %v8891_v7 = vadd.f32 %v8847_v57, %v11334_v52 }
 0x92d   :  { %v8854_v0 = vadd.f32 %v8848_v59, %v8791_v37  ;;  %v8843_v16 = vsel %vm8670_vm8, 0.0, %v8832_v15  ;;  %v8933_v37 = vrot.slane %v11359_v12, 4 }
 0x92e   :  { %v8851_v8 = vsel %vm8527_vm0, %v8849_v20, %v8850_v31  ;;  %v8834_v28 = vpop.permute.xlu0 %8833  ;;  %v8876_v51 = vadd.f32 %v11368_v58, %v8872_v63  ;;  %v8873_v60 = vadd.f32 %v8850_v31, %v8815_v49  ;;  %v8892_v10 = vadd.f32 %v8850_v31, %v8816_v56 }
 0x92f   :  { %v8855_v62 = vadd.f32 %v8851_v8, %v8815_v49  ;;  %v8861_v1 = vadd.f32 %v11359_v12, %v8854_v0  ;;  %v8895_v32 = vadd.f32 %v11365_v19, %v8872_v63  ;;  %v8915_v17 = vrot.slane %v8843_v16, 7 }
 0x930   :  { %v8837_v13 = vsel %vm8670_vm8, %v8832_v15, %v8834_v28  ;;  %v8877_v18 = vadd.f32 %v11368_v58, %v8873_v60  ;;  %v8896_v48 = vadd.f32 %v11365_v19, %v8873_v60  ;;  %v8898_v21 = vadd.f32 %v11365_v19, %v8892_v10 }
 0x931   :  { %v8862_v55 = vadd.f32 %v11359_v12, %v8855_v62  ;;  %v8897_v3 = vadd.f32 %v11365_v19, %v8891_v7  ;;  %v8919_v39 = vadd.f32 %v8915_v17, %v11334_v52  ;;  %v8916_v14 = vrot.slane %v8837_v13, 7 }
 0x932   :  { %v8880_v5 = vcombine.low %v8876_v51, %v8877_v18  ;;  %v8881_v34 = vcombine.high %v8876_v51, %v8877_v18  ;;  %v8903_v35 = vcombine.high %v8895_v32, %v8896_v48  ;;  %v9249_v63 = vsel %vm8814_vm12, %v11345_v44, 0.0 }
 0x933   :  { %v8865_v11 = vcombine.low %v8861_v1, %v8862_v55  ;;  %v8904_v6 = vcombine.low %v8897_v3, %v8898_v21  ;;  %v8920_v50 = vadd.f32 %v8916_v14, %v8816_v56  ;;  %v8923_v25 = vadd.f32 %v11372_v29, %v8919_v39 }
 0x934   :  { %v10479_v52 = vrot.slane %v8880_v5, 11  ;;  %v8886_v36 = vrot.slane %v8881_v34, 7  ;;  %v10481_v24 = vrot.slane %v8903_v35, 10  ;;  %v8935_v33 = vadd.f32 %v8933_v37, %v8919_v39 }
 0x935   :  { %8869 = vst.msk [vmem:[%s11505_s11] sm:$0x77] %vm11391_vm15, %v8865_v11  ;;  %v8909_v41 = vrot.slane %v8904_v6, 6  ;;  %v8924_v45 = vadd.f32 %v11372_v29, %v8920_v50  ;;  %v8936_v61 = vadd.f32 %v8933_v37, %v8920_v50  ;;  %v9250_v0 = vsel %vm8814_vm12, %v11349_v42, 0.0 }
 0x936   :  { %v8887_v53 = vsel %vm11398_vm4, %v10479_v52, %v8886_v36 }
 0x937   :  { %10480 = vst.msk [vmem:[%s11505_s11 + $0x8] sm:$0x77] %vm11391_vm15, %v8887_v53  ;;  %v8910_v38 = vsel %vm11404_vm2, %v10481_v24, %v8909_v41  ;;  %v8927_v2 = vcombine.low %v8923_v25, %v8924_v45  ;;  %v8939_v40 = vcombine.high %v8935_v33, %v8936_v61 }
 0x938   :  { %v9262_v27 = vpop.permute.xlu1 %9261  ;;  %10482 = vst.msk [vmem:[%s11505_s11 + $0x10] sm:$0x77] %vm11391_vm15, %v8910_v38 }
 0x939   :  { %v9276_v30 = vsel %vm8670_vm8, 0.0, %v9262_v27  ;;  %v10483_v43 = vrot.slane %v8927_v2, 9  ;;  %10485 = vst.msk [vmem:[%s11505_s11 + $0x20] sm:$0x77] %vm11391_vm15, %v8939_v40 }
 0x93a   :  { %v9281_v47 = vrot.slane %v9276_v30, 7  ;;  %v9264_v57 = vpop.permute.xlu0 %9263 }
 0x93b   :  { %v9270_v46 = vsel %vm8670_vm8, %v9262_v27, %v9264_v57  ;;  %10484 = vst.msk [vmem:[%s11505_s11 + $0x18] sm:$0x77] %vm11391_vm15, %v10483_v43 }
 0x93c   :  { %v9300_v54 = vadd.f32 %v9281_v47, %v11343_v26  ;;  %v9284_v20 = vrot.slane %v9270_v46, 7  ;;  %v9266_v59 = vpop.permute.xlu1 %9265  ;;  %v9315_v31 = vadd.f32 %v9281_v47, %v11347_v9 }
 0x93d   :  { %v9277_v15 = vsel %vm8670_vm8, 0.0, %v9266_v59 }
 0x93e   :  { %v9301_v16 = vadd.f32 %v9284_v20, %v9249_v63  ;;  %v9268_v49 = vpop.permute.xlu0 %9267  ;;  %v9302_v56 = vadd.f32 %v9300_v54, %v11368_v58  ;;  %v9316_v7 = vadd.f32 %v9284_v20, %v9250_v0  ;;  %v9335_v8 = vrot.slane %v9277_v15, 7 }
 0x93f   :  { %v9271_v28 = vsel %vm8670_vm8, %v9266_v59, %v9268_v49  ;;  %v9317_v51 = vadd.f32 %v9300_v54, %v11365_v19  ;;  %v9319_v1 = vadd.f32 %v9315_v31, %v11365_v19 }
 0x940   :  { %v9303_v62 = vadd.f32 %v9301_v16, %v11368_v58  ;;  %v9318_v44 = vadd.f32 %v9301_v16, %v11365_v19  ;;  %v9336_v60 = vrot.slane %v9271_v28, 7  ;;  %v9258_v10 = vpop.permute.xlu1 %9257  ;;  %v9320_v42 = vadd.f32 %v9316_v7, %v11365_v19 }
 0x941   :  { %v9339_v32 = vadd.f32 %v9335_v8, %v11347_v9  ;;  %v9275_v17 = vsel %vm8670_vm8, 0.0, %v9258_v10 }
 0x942   :  { %v9306_v13 = vcombine.low %v9302_v56, %v9303_v62  ;;  %v9307_v55 = vcombine.high %v9302_v56, %v9303_v62  ;;  %v9325_v18 = vcombine.high %v9317_v51, %v9318_v44  ;;  %v9340_v48 = vadd.f32 %v9336_v60, %v9250_v0  ;;  %v9260_v21 = vpop.permute.xlu0 %9259 }
 0x943   :  { %v9326_v3 = vcombine.low %v9319_v1, %v9320_v42  ;;  %v9341_v58 = vadd.f32 %v9339_v32, %v11372_v29  ;;  %v9351_v39 = vadd.f32 %v9339_v32, %v8933_v37  ;;  %v9280_v14 = vrot.slane %v9275_v17, 7 }
 0x944   :  { %v10495_v11 = vrot.slane %v9306_v13, 11  ;;  %v9310_v5 = vrot.slane %v9307_v55, 7  ;;  %v10497_v34 = vrot.slane %v9325_v18, 10  ;;  %v9342_v35 = vadd.f32 %v9340_v48, %v11372_v29 }
 0x945   :  { %v9329_v19 = vrot.slane %v9326_v3, 6  ;;  %v9352_v6 = vadd.f32 %v9340_v48, %v8933_v37  ;;  %v9282_v9 = vsel %vm8527_vm0, %v9280_v14, %v9281_v47  ;;  %v9269_v50 = vsel %vm8670_vm8, %v9258_v10, %v9260_v21 }
 0x946   :  { %v9311_v52 = vsel %vm11398_vm4, %v10495_v11, %v9310_v5  ;;  %v9345_v36 = vcombine.low %v9341_v58, %v9342_v35  ;;  %v9283_v24 = vrot.slane %v9269_v50, 7  ;;  %v9288_v37 = vadd.f32 %v9282_v9, %v11343_v26 }
 0x947   :  { %10496 = vst.msk [vmem:[%s11505_s11 + $0x30] sm:$0x77] %vm11391_vm15, %v9311_v52  ;;  %v9330_v29 = vsel %vm11404_vm2, %v10497_v34, %v9329_v19  ;;  %v9355_v25 = vcombine.high %v9351_v39, %v9352_v6 }
 0x948   :  { %10498 = vst.msk [vmem:[%s11505_s11 + $0x38] sm:$0x77] %vm11391_vm15, %v9330_v29  ;;  %v10499_v23 = vrot.slane %v9345_v36, 9  ;;  %v9285_v41 = vsel %vm8527_vm0, %v9283_v24, %v9284_v20  ;;  %v9290_v26 = vadd.f32 %v9288_v37, %v11359_v12 }
 0x949   :  { %10501 = vst.msk [vmem:[%s11505_s11 + $0x48] sm:$0x77] %vm11391_vm15, %v9355_v25  ;;  %v9289_v4 = vadd.f32 %v9285_v41, %v9249_v63 }
 0x94a   :  { %10500 = vst.msk [vmem:[%s11505_s11 + $0x40] sm:$0x77] %vm11391_vm15, %v10499_v23 }
 0x94b   :  { %v9291_v33 = vadd.f32 %v9289_v4, %v11359_v12 }
 0x94d   :  { %v9294_v45 = vcombine.low %v9290_v26, %v9291_v33 }
 0x94f   :  { %10494 = vst.msk [vmem:[%s11505_s11 + $0x28] sm:$0x77] %vm11391_vm15, %v9294_v45 }
 0x950   :  { %9363 = vsyncpa [#allocation3], 1 }
 0x951   :  { %9364 = vsyncpa [#allocation5], 1 }
 0x952   :  { %9365 = vsyncpa [#allocation8], 1 }
 0x953   :  { %9366 = vsyncpa [#allocation11], 1 }

</bundles_post_ra>
